<compile_context>
chip_gen: v5e
topology: v5e:2x2
jax: 0.10.0
libtpu: 0.0.40
codegen_flags: <defaults>
</compile_context>

<pallas_src>
import jax
import jax.numpy as jnp
from jax.experimental import pallas as pl
from jax.experimental.pallas import tpu as pltpu

_VMEM = pl.BlockSpec(memory_space=pltpu.MemorySpace.VMEM)


def _round_up(x, m):
    return (x + m - 1) // m * m


# ----------------------------- Pallas kernels -----------------------------


def conv_blend_bn_relu_kernel(s_ref, a_ref, wb_ref, we_ref,
                              sb_ref, se_ref, bb_ref, be_ref,
                              o_ref, acc_ref):
    """One (TM, TN) tile of relu((cols @ blend(Wb, We)) * blend(scale) + blend(bias)).

    blend(p1, p2) = p1 + s * (p2 - p1) with s = sigmoid(w_block) computed once
    in the wrapper (scalar, passed as a (1,1) f32).  The weight blend is VPU
    filler work that hides under the MXU matmul.  K is the grid's 'arbitrary'
    reduction axis; acc_ref is the resident f32 accumulator.
    """
    k = pl.program_id(2)

    @pl.when(k == 0)
    def _init():
        acc_ref[...] = jnp.zeros_like(acc_ref)

    s = s_ref[...]                                       # (1, 1) f32, broadcasts
    wb = wb_ref[...].astype(jnp.float32)
    we = we_ref[...].astype(jnp.float32)
    w = (wb + s * (we - wb)).astype(jnp.bfloat16)        # lerp blend, bf16 for MXU
    acc_ref[...] += jnp.dot(a_ref[...], w, preferred_element_type=jnp.float32)

    @pl.when(k == pl.num_programs(2) - 1)
    def _finalize():
        scale = sb_ref[...] + s * (se_ref[...] - sb_ref[...])   # (1, TN)
        bias = bb_ref[...] + s * (be_ref[...] - bb_ref[...])    # (1, TN)
        o_ref[...] = jnp.maximum(acc_ref[...] * scale + bias, 0.0).astype(o_ref.dtype)


def head_kernel(f_ref, w_ref, b_ref, o_ref):
    # ClassificationHead: global average pool over spatial + linear.
    # class dim pre-padded to 128 lanes so the store is lane-dense / unmasked.
    pooled = jnp.mean(f_ref[...].astype(jnp.float32), axis=1)           # (B, C)
    o_ref[...] = (jnp.dot(pooled, w_ref[...], preferred_element_type=jnp.float32)
                  + b_ref[...])


# ----------------------------- wrappers -----------------------------


def im2col(x, kh, kw, stride, pad):
    # x: (B, H, W, C) NHWC (bf16) -> (B*OH*OW, kh*kw*C), K-order = (ki, kj, cin)
    xp = jnp.pad(x, ((0, 0), (pad, pad), (pad, pad), (0, 0)))
    B, H, W, C = xp.shape
    oh = (H - kh) // stride + 1
    ow = (W - kw) // stride + 1
    cols = []
    for i in range(kh):
        for j in range(kw):
            cols.append(xp[:, i:i + stride * oh:stride, j:j + stride * ow:stride, :])
    cols = jnp.concatenate(cols, axis=-1)
    return cols.reshape(B * oh * ow, kh * kw * C), oh, ow


def fused_conv_bn_relu(x_nhwc, s, w_base, w_enc, sc_base, sc_enc, bi_base, bi_enc,
                       *, stride, pad=1, kh=3, kw=3):
    """Conv-as-matmul with in-kernel parameter blending + folded BN + ReLU.

    x_nhwc: (B,H,W,Cin) bf16.  w_base/w_enc: (kh*kw*Cin, Cout) bf16.
    sc_*/bi_*: (Cout,) f32 folded BN scale/bias for base and enc parameters.
    s: (1,1) f32 = sigmoid(middle_w[block]).
    """
    B = x_nhwc.shape[0]
    cols, oh, ow = im2col(x_nhwc, kh, kw, stride, pad)          # (M, K) bf16
    M, K = cols.shape
    N = w_base.shape[1]

    # Tile sizes: largest block <= 256x512x(K<=1024); per-step VMEM use (bf16
    # operands, double-buffered) stays ~2-4 MiB -> safe on v5e (16 MiB scoped
    # default) and v7x (64 MiB physical).
    TM = min(256, _round_up(M, 8))
    TN = N if N <= 512 else 512
    TK = K if K <= 1024 else 512
    Mp, Np, Kp = _round_up(M, TM), _round_up(N, TN), _round_up(K, TK)

    cols_p = jnp.pad(cols, ((0, Mp - M), (0, Kp - K)))
    wb_p = jnp.pad(w_base, ((0, Kp - K), (0, Np - N)))
    we_p = jnp.pad(w_enc, ((0, Kp - K), (0, Np - N)))
    sb_p = jnp.pad(sc_base.reshape(1, N), ((0, 0), (0, Np - N)))
    se_p = jnp.pad(sc_enc.reshape(1, N), ((0, 0), (0, Np - N)))
    bb_p = jnp.pad(bi_base.reshape(1, N), ((0, 0), (0, Np - N)))
    be_p = jnp.pad(bi_enc.reshape(1, N), ((0, 0), (0, Np - N)))

    grid = (Mp // TM, Np // TN, Kp // TK)

    out = pl.pallas_call(
        conv_blend_bn_relu_kernel,
        out_shape=jax.ShapeDtypeStruct((Mp, Np), jnp.bfloat16),
        grid_spec=pltpu.PrefetchScalarGridSpec(
            num_scalar_prefetch=0,
            grid=grid,
            in_specs=[
                pl.BlockSpec((1, 1), lambda i, j, k: (0, 0)),       # s (sigmoid)
                pl.BlockSpec((TM, TK), lambda i, j, k: (i, k)),     # cols
                pl.BlockSpec((TK, TN), lambda i, j, k: (k, j)),     # w_base
                pl.BlockSpec((TK, TN), lambda i, j, k: (k, j)),     # w_enc
                pl.BlockSpec((1, TN), lambda i, j, k: (0, j)),      # scale_base
                pl.BlockSpec((1, TN), lambda i, j, k: (0, j)),      # scale_enc
                pl.BlockSpec((1, TN), lambda i, j, k: (0, j)),      # bias_base
                pl.BlockSpec((1, TN), lambda i, j, k: (0, j)),      # bias_enc
            ],
            out_specs=pl.BlockSpec((TM, TN), lambda i, j, k: (i, j)),
            scratch_shapes=[pltpu.VMEM((TM, TN), jnp.float32)],
        ),
        compiler_params=pltpu.CompilerParams(
            dimension_semantics=("parallel", "parallel", "arbitrary"),
            vmem_limit_bytes=32 * 1024 * 1024,
        ),
    )(s, cols_p, wb_p, we_p, sb_p, se_p, bb_p, be_p)

    return out[:M, :N].reshape(B, oh, ow, N)


def classification_head(feat_nhwc, head_w, head_b):
    B, H, W, C = feat_nhwc.shape
    classes = head_w.shape[1]
    f = feat_nhwc.reshape(B, H * W, C)                       # bf16 features
    n_pad = _round_up(max(classes, 1), 128)                  # lane-dense output
    w = jnp.pad(head_w.astype(jnp.float32), ((0, 0), (0, n_pad - classes)))
    b = jnp.pad(head_b.astype(jnp.float32).reshape(1, classes),
                ((0, 0), (0, n_pad - classes)))
    out = pl.pallas_call(
        head_kernel,
        out_shape=jax.ShapeDtypeStruct((B, n_pad), jnp.float32),
        in_specs=[_VMEM, _VMEM, _VMEM],
        out_specs=_VMEM,
    )(f, w, b)
    return out[:, :classes]


# ----------------------------- model definition -----------------------------

# 5 parameter blocks, matching the non-LAYER_WISE grouping of CombinedModel:
#   block0: conv0/norm0, block1-3: denseblock{1,2,3}+transition, block4: denseblock4+norm5
ENC_CHANNELS = (8, 16, 32, 64, 1024)   # final feature channels = 1024 (head expects 1024)
ENC_STRIDES = (2, 2, 2, 2, 1)
BN_EPS = 1e-5


def init_encoder_params(key, in_channels=3):
    """One (conv_weight[K, Cout], bn_gamma[Cout], bn_beta[Cout]) triple per block."""
    params = []
    cin = in_channels
    for cout in ENC_CHANNELS:
        key, k1, k2, k3 = jax.random.split(key, 4)
        fan_in = cin * 9
        w = jax.random.normal(k1, (fan_in, cout), jnp.float32) * jnp.sqrt(2.0 / fan_in)
        gamma = 1.0 + 0.1 * jax.random.normal(k2, (cout,), jnp.float32)
        beta = 0.1 * jax.random.normal(k3, (cout,), jnp.float32)
        params.append((w, gamma, beta))
        cin = cout
    return params


def init_empty_bn_buffers():
    # Fresh ("empty") encoder BatchNorm buffers. The PyTorch forward copies only
    # named_parameters into the empty encoder, so its BN running stats keep the
    # defaults running_mean=0, running_var=1.  The fold below is the general
    # formula, so non-default stats would also be handled correctly.
    return [(jnp.zeros((c,), jnp.float32), jnp.ones((c,), jnp.float32))
            for c in ENC_CHANNELS]


def combined_model_forward(x_nchw, params_base, params_enc, bn_buffers,
                           middle_w, head_w, head_b):
    # NCHW -> NHWC once at the boundary; activations stay bf16 throughout.
    x = jnp.transpose(x_nchw, (0, 2, 3, 1)).astype(jnp.bfloat16)

    for i, ((w1, g1, b1), (w2, g2, b2), (mean, var), stride) in enumerate(
            zip(params_base, params_enc, bn_buffers, ENC_STRIDES)):
        assert w1.shape == w2.shape and g1.shape == g2.shape and b1.shape == b2.shape
        # sigmoid(w_i) hoisted: computed ONCE per block in the wrapper.
        s = jax.nn.sigmoid(middle_w[i]).astype(jnp.float32).reshape(1, 1)
        # eval-mode BN fold with the empty encoder's running stats:
        #   scale = gamma / sqrt(var + eps),  bias = beta - mean * scale
        # (the sigmoid blend of gamma/beta commutes with this fold because
        #  mean/var are shared buffers, so we pre-fold base/enc separately and
        #  blend scale/bias in-kernel with the same scalar s).
        inv_std = 1.0 / jnp.sqrt(var + BN_EPS)
        sc1, sc2 = g1 * inv_std, g2 * inv_std
        bi1, bi2 = b1 - mean * sc1, b2 - mean * sc2
        x = fused_conv_bn_relu(
            x, s,
            w1.astype(jnp.bfloat16), w2.astype(jnp.bfloat16),
            sc1, sc2, bi1, bi2,
            stride=stride, pad=1)

    # dropout is identity in eval mode
    return classification_head(x, head_w, head_b)


# ----------------------------- main -----------------------------

if __name__ == "__main__":
    key = jax.random.PRNGKey(0)
    k_in, k_base, k_enc, k_mid, k_head = jax.random.split(key, 5)

    B, C, H, W = 2, 3, 16, 16           # (batch, in_channels, height, width), NCHW
    classes = 1
    x = jax.random.normal(k_in, (B, C, H, W), jnp.float32)

    params_base = init_encoder_params(k_base, in_channels=C)   # self.encoder_base
    params_enc = init_encoder_params(k_enc, in_channels=C)     # self.encoder
    bn_buffers = init_empty_bn_buffers()                       # empty encoder BN buffers
    middle_w = jax.random.normal(k_mid, (len(ENC_CHANNELS),), jnp.float32)  # w0..w4

    # ClassificationHead(in_channels=1024, classes=1): xavier_uniform weight, zero bias
    limit = jnp.sqrt(6.0 / (ENC_CHANNELS[-1] + classes))
    head_w = jax.random.uniform(
        k_head, (ENC_CHANNELS[-1], classes), jnp.float32, -limit, limit
    )
    head_b = jnp.zeros((classes,), jnp.float32)

    fwd = jax.jit(combined_model_forward)
    out = fwd(x, params_base, params_enc, bn_buffers, middle_w, head_w, head_b)
    jax.block_until_ready(out)
    assert out.shape == (B, classes) and out.dtype == jnp.float32
    print("KERNEL_OK")
</pallas_src>

<mosaic_0001>
module attributes {stable_mosaic.version = 11 : i64} {
  func.func @conv_blend_bn_relu_kernel(%arg0: i32, %arg1: i32, %arg2: i32, %arg3: memref<1x1xf32, #tpu.memory_space<vmem>>, %arg4: memref<128x27xbf16, #tpu.memory_space<vmem>>, %arg5: memref<27x8xbf16, #tpu.memory_space<vmem>>, %arg6: memref<27x8xbf16, #tpu.memory_space<vmem>>, %arg7: memref<1x8xf32, #tpu.memory_space<vmem>>, %arg8: memref<1x8xf32, #tpu.memory_space<vmem>>, %arg9: memref<1x8xf32, #tpu.memory_space<vmem>>, %arg10: memref<1x8xf32, #tpu.memory_space<vmem>>, %arg11: memref<128x8xbf16, #tpu.memory_space<vmem>>, %arg12: memref<128x8xf32, #tpu.memory_space<vmem>>) attributes {dimension_semantics = [#tpu.dimension_semantics<parallel>, #tpu.dimension_semantics<parallel>, #tpu.dimension_semantics<arbitrary>], iteration_bounds = array<i64: 1, 1, 1>, scalar_prefetch = 0 : i64, scratch_operands = 1 : i64, tpu.core_type = #tpu.core_type<tc>, window_params = [{pipeline_mode = #tpu.pipeline_mode<synchronous>, transform_indices = @transform_0, window_bounds = array<i64: 1, 1>}, {transform_indices = @transform_1, window_bounds = array<i64: 128, 27>}, {transform_indices = @transform_2, window_bounds = array<i64: 27, 8>}, {transform_indices = @transform_3, window_bounds = array<i64: 27, 8>}, {transform_indices = @transform_4, window_bounds = array<i64: 1, 8>}, {transform_indices = @transform_5, window_bounds = array<i64: 1, 8>}, {transform_indices = @transform_6, window_bounds = array<i64: 1, 8>}, {transform_indices = @transform_7, window_bounds = array<i64: 1, 8>}, {transform_indices = @transform_8, window_bounds = array<i64: 128, 8>}]} {
    %c0_i32 = arith.constant 0 : i32
    %0 = arith.cmpi eq, %arg2, %c0_i32 : i32
    %1 = arith.extui %0 : i1 to i32
    %c0_i32_0 = arith.constant 0 : i32
    %2 = arith.cmpi ne, %1, %c0_i32_0 : i32
    scf.if %2 {
      %cst_14 = arith.constant 0.000000e+00 : f32
      %21 = vector.broadcast %cst_14 : f32 to vector<128x8xf32>
      %c0_15 = arith.constant 0 : index
      %c0_16 = arith.constant 0 : index
      %22 = vector.load %arg12[%c0_15, %c0_16] : memref<128x8xf32, #tpu.memory_space<vmem>>, vector<128x8xf32>
      tpu.vector_store %arg12[%c0_15, %c0_16], %21 {strides = array<i32>} : memref<128x8xf32, #tpu.memory_space<vmem>>, vector<128x8xf32>,
    } else {
    }
    %c0 = arith.constant 0 : index
    %c0_1 = arith.constant 0 : index
    %3 = vector.load %arg3[%c0, %c0_1] : memref<1x1xf32, #tpu.memory_space<vmem>>, vector<1x1xf32>
    %c0_2 = arith.constant 0 : index
    %c0_3 = arith.constant 0 : index
    %4 = vector.load %arg5[%c0_2, %c0_3] : memref<27x8xbf16, #tpu.memory_space<vmem>>, vector<27x8xbf16>
    %5 = arith.extf %4 : vector<27x8xbf16> to vector<27x8xf32>
    %c0_4 = arith.constant 0 : index
    %c0_5 = arith.constant 0 : index
    %6 = vector.load %arg6[%c0_4, %c0_5] : memref<27x8xbf16, #tpu.memory_space<vmem>>, vector<27x8xbf16>
    %7 = arith.extf %6 : vector<27x8xbf16> to vector<27x8xf32>
    %8 = arith.subf %7, %5 : vector<27x8xf32>
    %9 = vector.broadcast %3 : vector<1x1xf32> to vector<27x8xf32>
    %10 = arith.mulf %9, %8 : vector<27x8xf32>
    %11 = arith.addf %5, %10 : vector<27x8xf32>
    %12 = arith.truncf %11 : vector<27x8xf32> to vector<27x8xbf16>
    %c0_6 = arith.constant 0 : index
    %c0_7 = arith.constant 0 : index
    %13 = vector.load %arg12[%c0_6, %c0_7] : memref<128x8xf32, #tpu.memory_space<vmem>>, vector<128x8xf32>
    %c0_8 = arith.constant 0 : index
    %c0_9 = arith.constant 0 : index
    %14 = vector.load %arg4[%c0_8, %c0_9] : memref<128x27xbf16, #tpu.memory_space<vmem>>, vector<128x27xbf16>
    %cst = arith.constant dense<0.000000e+00> : vector<128x8xf32>
    %15 = tpu.matmul %14, %12, %cst {dimension_numbers = #tpu.dot_dimension_numbers<[1], [0], [0], [1], [0, 0, 1, 1], [], []>} : vector<128x27xbf16>, vector<27x8xbf16>, vector<128x8xf32> -> vector<128x8xf32>
    %16 = arith.addf %13, %15 : vector<128x8xf32>
    %c0_10 = arith.constant 0 : index
    %c0_11 = arith.constant 0 : index
    %17 = vector.load %arg12[%c0_10, %c0_11] : memref<128x8xf32, #tpu.memory_space<vmem>>, vector<128x8xf32>
    tpu.vector_store %arg12[%c0_10, %c0_11], %16 {strides = array<i32>} : memref<128x8xf32, #tpu.memory_space<vmem>>, vector<128x8xf32>,
    %c0_i32_12 = arith.constant 0 : i32
    %18 = arith.cmpi eq, %arg2, %c0_i32_12 : i32
    %19 = arith.extui %18 : i1 to i32
    %c0_i32_13 = arith.constant 0 : i32
    %20 = arith.cmpi ne, %19, %c0_i32_13 : i32
    scf.if %20 {
      %c0_14 = arith.constant 0 : index
      %c0_15 = arith.constant 0 : index
      %21 = vector.load %arg7[%c0_14, %c0_15] : memref<1x8xf32, #tpu.memory_space<vmem>>, vector<1x8xf32>
      %c0_16 = arith.constant 0 : index
      %c0_17 = arith.constant 0 : index
      %22 = vector.load %arg8[%c0_16, %c0_17] : memref<1x8xf32, #tpu.memory_space<vmem>>, vector<1x8xf32>
      %c0_18 = arith.constant 0 : index
      %c0_19 = arith.constant 0 : index
      %23 = vector.load %arg7[%c0_18, %c0_19] : memref<1x8xf32, #tpu.memory_space<vmem>>, vector<1x8xf32>
      %24 = arith.subf %22, %23 : vector<1x8xf32>
      %25 = vector.broadcast %3 : vector<1x1xf32> to vector<1x8xf32>
      %26 = arith.mulf %25, %24 : vector<1x8xf32>
      %27 = arith.addf %21, %26 : vector<1x8xf32>
      %c0_20 = arith.constant 0 : index
      %c0_21 = arith.constant 0 : index
      %28 = vector.load %arg9[%c0_20, %c0_21] : memref<1x8xf32, #tpu.memory_space<vmem>>, vector<1x8xf32>
      %c0_22 = arith.constant 0 : index
      %c0_23 = arith.constant 0 : index
      %29 = vector.load %arg10[%c0_22, %c0_23] : memref<1x8xf32, #tpu.memory_space<vmem>>, vector<1x8xf32>
      %c0_24 = arith.constant 0 : index
      %c0_25 = arith.constant 0 : index
      %30 = vector.load %arg9[%c0_24, %c0_25] : memref<1x8xf32, #tpu.memory_space<vmem>>, vector<1x8xf32>
      %31 = arith.subf %29, %30 : vector<1x8xf32>
      %32 = vector.broadcast %3 : vector<1x1xf32> to vector<1x8xf32>
      %33 = arith.mulf %32, %31 : vector<1x8xf32>
      %34 = arith.addf %28, %33 : vector<1x8xf32>
      %c0_26 = arith.constant 0 : index
      %c0_27 = arith.constant 0 : index
      %35 = vector.load %arg12[%c0_26, %c0_27] : memref<128x8xf32, #tpu.memory_space<vmem>>, vector<128x8xf32>
      %36 = vector.broadcast %27 : vector<1x8xf32> to vector<128x8xf32>
      %37 = arith.mulf %35, %36 : vector<128x8xf32>
      %38 = vector.broadcast %34 : vector<1x8xf32> to vector<128x8xf32>
      %39 = arith.addf %37, %38 : vector<128x8xf32>
      %cst_28 = arith.constant 0.000000e+00 : f32
      %40 = vector.broadcast %cst_28 : f32 to vector<128x8xf32>
      %41 = arith.maximumf %39, %40 : vector<128x8xf32>
      %42 = arith.truncf %41 : vector<128x8xf32> to vector<128x8xbf16>
      %c0_29 = arith.constant 0 : index
      %c0_30 = arith.constant 0 : index
      %43 = vector.load %arg11[%c0_29, %c0_30] : memref<128x8xbf16, #tpu.memory_space<vmem>>, vector<128x8xbf16>
      tpu.vector_store %arg11[%c0_29, %c0_30], %42 {strides = array<i32>} : memref<128x8xbf16, #tpu.memory_space<vmem>>, vector<128x8xbf16>,
    } else {
    }
    return
  }
  func.func @transform_0(%arg0: i32, %arg1: i32, %arg2: i32) -> (i32, i32) {
    %c0_i32 = arith.constant 0 : i32
    %c0_i32_0 = arith.constant 0 : i32
    %c0_i32_1 = arith.constant 0 : i32
    return %c0_i32, %c0_i32_0 : i32, i32
  }
  func.func @transform_1(%arg0: i32, %arg1: i32, %arg2: i32) -> (i32, i32) {
    %c0_i32 = arith.constant 0 : i32
    return %arg0, %arg2 : i32, i32
  }
  func.func @transform_2(%arg0: i32, %arg1: i32, %arg2: i32) -> (i32, i32) {
    %c0_i32 = arith.constant 0 : i32
    return %arg2, %arg1 : i32, i32
  }
  func.func @transform_3(%arg0: i32, %arg1: i32, %arg2: i32) -> (i32, i32) {
    %c0_i32 = arith.constant 0 : i32
    return %arg2, %arg1 : i32, i32
  }
  func.func @transform_4(%arg0: i32, %arg1: i32, %arg2: i32) -> (i32, i32) {
    %c0_i32 = arith.constant 0 : i32
    %c0_i32_0 = arith.constant 0 : i32
    return %c0_i32, %arg1 : i32, i32
  }
  func.func @transform_5(%arg0: i32, %arg1: i32, %arg2: i32) -> (i32, i32) {
    %c0_i32 = arith.constant 0 : i32
    %c0_i32_0 = arith.constant 0 : i32
    return %c0_i32, %arg1 : i32, i32
  }
  func.func @transform_6(%arg0: i32, %arg1: i32, %arg2: i32) -> (i32, i32) {
    %c0_i32 = arith.constant 0 : i32
    %c0_i32_0 = arith.constant 0 : i32
    return %c0_i32, %arg1 : i32, i32
  }
  func.func @transform_7(%arg0: i32, %arg1: i32, %arg2: i32) -> (i32, i32) {
    %c0_i32 = arith.constant 0 : i32
    %c0_i32_0 = arith.constant 0 : i32
    return %c0_i32, %arg1 : i32, i32
  }
  func.func @transform_8(%arg0: i32, %arg1: i32, %arg2: i32) -> (i32, i32) {
    %c0_i32 = arith.constant 0 : i32
    return %arg0, %arg1 : i32, i32
  }
}

module attributes {stable_mosaic.version = 11 : i64} {
  func.func @conv_blend_bn_relu_kernel(%arg0: i32, %arg1: i32, %arg2: i32, %arg3: memref<1x1xf32, #tpu.memory_space<vmem>>, %arg4: memref<32x72xbf16, #tpu.memory_space<vmem>>, %arg5: memref<72x16xbf16, #tpu.memory_space<vmem>>, %arg6: memref<72x16xbf16, #tpu.memory_space<vmem>>, %arg7: memref<1x16xf32, #tpu.memory_space<vmem>>, %arg8: memref<1x16xf32, #tpu.memory_space<vmem>>, %arg9: memref<1x16xf32, #tpu.memory_space<vmem>>, %arg10: memref<1x16xf32, #tpu.memory_space<vmem>>, %arg11: memref<32x16xbf16, #tpu.memory_space<vmem>>, %arg12: memref<32x16xf32, #tpu.memory_space<vmem>>) attributes {dimension_semantics = [#tpu.dimension_semantics<parallel>, #tpu.dimension_semantics<parallel>, #tpu.dimension_semantics<arbitrary>], iteration_bounds = array<i64: 1, 1, 1>, scalar_prefetch = 0 : i64, scratch_operands = 1 : i64, tpu.core_type = #tpu.core_type<tc>, window_params = [{pipeline_mode = #tpu.pipeline_mode<synchronous>, transform_indices = @transform_0, window_bounds = array<i64: 1, 1>}, {transform_indices = @transform_1, window_bounds = array<i64: 32, 72>}, {transform_indices = @transform_2, window_bounds = array<i64: 72, 16>}, {transform_indices = @transform_3, window_bounds = array<i64: 72, 16>}, {transform_indices = @transform_4, window_bounds = array<i64: 1, 16>}, {transform_indices = @transform_5, window_bounds = array<i64: 1, 16>}, {transform_indices = @transform_6, window_bounds = array<i64: 1, 16>}, {transform_indices = @transform_7, window_bounds = array<i64: 1, 16>}, {transform_indices = @transform_8, window_bounds = array<i64: 32, 16>}]} {
    %c0_i32 = arith.constant 0 : i32
    %0 = arith.cmpi eq, %arg2, %c0_i32 : i32
    %1 = arith.extui %0 : i1 to i32
    %c0_i32_0 = arith.constant 0 : i32
    %2 = arith.cmpi ne, %1, %c0_i32_0 : i32
    scf.if %2 {
      %cst_14 = arith.constant 0.000000e+00 : f32
      %21 = vector.broadcast %cst_14 : f32 to vector<32x16xf32>
      %c0_15 = arith.constant 0 : index
      %c0_16 = arith.constant 0 : index
      %22 = vector.load %arg12[%c0_15, %c0_16] : memref<32x16xf32, #tpu.memory_space<vmem>>, vector<32x16xf32>
      tpu.vector_store %arg12[%c0_15, %c0_16], %21 {strides = array<i32>} : memref<32x16xf32, #tpu.memory_space<vmem>>, vector<32x16xf32>,
    } else {
    }
    %c0 = arith.constant 0 : index
    %c0_1 = arith.constant 0 : index
    %3 = vector.load %arg3[%c0, %c0_1] : memref<1x1xf32, #tpu.memory_space<vmem>>, vector<1x1xf32>
    %c0_2 = arith.constant 0 : index
    %c0_3 = arith.constant 0 : index
    %4 = vector.load %arg5[%c0_2, %c0_3] : memref<72x16xbf16, #tpu.memory_space<vmem>>, vector<72x16xbf16>
    %5 = arith.extf %4 : vector<72x16xbf16> to vector<72x16xf32>
    %c0_4 = arith.constant 0 : index
    %c0_5 = arith.constant 0 : index
    %6 = vector.load %arg6[%c0_4, %c0_5] : memref<72x16xbf16, #tpu.memory_space<vmem>>, vector<72x16xbf16>
    %7 = arith.extf %6 : vector<72x16xbf16> to vector<72x16xf32>
    %8 = arith.subf %7, %5 : vector<72x16xf32>
    %9 = vector.broadcast %3 : vector<1x1xf32> to vector<72x16xf32>
    %10 = arith.mulf %9, %8 : vector<72x16xf32>
    %11 = arith.addf %5, %10 : vector<72x16xf32>
    %12 = arith.truncf %11 : vector<72x16xf32> to vector<72x16xbf16>
    %c0_6 = arith.constant 0 : index
    %c0_7 = arith.constant 0 : index
    %13 = vector.load %arg12[%c0_6, %c0_7] : memref<32x16xf32, #tpu.memory_space<vmem>>, vector<32x16xf32>
    %c0_8 = arith.constant 0 : index
    %c0_9 = arith.constant 0 : index
    %14 = vector.load %arg4[%c0_8, %c0_9] : memref<32x72xbf16, #tpu.memory_space<vmem>>, vector<32x72xbf16>
    %cst = arith.constant dense<0.000000e+00> : vector<32x16xf32>
    %15 = tpu.matmul %14, %12, %cst {dimension_numbers = #tpu.dot_dimension_numbers<[1], [0], [0], [1], [0, 0, 1, 1], [], []>} : vector<32x72xbf16>, vector<72x16xbf16>, vector<32x16xf32> -> vector<32x16xf32>
    %16 = arith.addf %13, %15 : vector<32x16xf32>
    %c0_10 = arith.constant 0 : index
    %c0_11 = arith.constant 0 : index
    %17 = vector.load %arg12[%c0_10, %c0_11] : memref<32x16xf32, #tpu.memory_space<vmem>>, vector<32x16xf32>
    tpu.vector_store %arg12[%c0_10, %c0_11], %16 {strides = array<i32>} : memref<32x16xf32, #tpu.memory_space<vmem>>, vector<32x16xf32>,
    %c0_i32_12 = arith.constant 0 : i32
    %18 = arith.cmpi eq, %arg2, %c0_i32_12 : i32
    %19 = arith.extui %18 : i1 to i32
    %c0_i32_13 = arith.constant 0 : i32
    %20 = arith.cmpi ne, %19, %c0_i32_13 : i32
    scf.if %20 {
      %c0_14 = arith.constant 0 : index
      %c0_15 = arith.constant 0 : index
      %21 = vector.load %arg7[%c0_14, %c0_15] : memref<1x16xf32, #tpu.memory_space<vmem>>, vector<1x16xf32>
      %c0_16 = arith.constant 0 : index
      %c0_17 = arith.constant 0 : index
      %22 = vector.load %arg8[%c0_16, %c0_17] : memref<1x16xf32, #tpu.memory_space<vmem>>, vector<1x16xf32>
      %c0_18 = arith.constant 0 : index
      %c0_19 = arith.constant 0 : index
      %23 = vector.load %arg7[%c0_18, %c0_19] : memref<1x16xf32, #tpu.memory_space<vmem>>, vector<1x16xf32>
      %24 = arith.subf %22, %23 : vector<1x16xf32>
      %25 = vector.broadcast %3 : vector<1x1xf32> to vector<1x16xf32>
      %26 = arith.mulf %25, %24 : vector<1x16xf32>
      %27 = arith.addf %21, %26 : vector<1x16xf32>
      %c0_20 = arith.constant 0 : index
      %c0_21 = arith.constant 0 : index
      %28 = vector.load %arg9[%c0_20, %c0_21] : memref<1x16xf32, #tpu.memory_space<vmem>>, vector<1x16xf32>
      %c0_22 = arith.constant 0 : index
      %c0_23 = arith.constant 0 : index
      %29 = vector.load %arg10[%c0_22, %c0_23] : memref<1x16xf32, #tpu.memory_space<vmem>>, vector<1x16xf32>
      %c0_24 = arith.constant 0 : index
      %c0_25 = arith.constant 0 : index
      %30 = vector.load %arg9[%c0_24, %c0_25] : memref<1x16xf32, #tpu.memory_space<vmem>>, vector<1x16xf32>
      %31 = arith.subf %29, %30 : vector<1x16xf32>
      %32 = vector.broadcast %3 : vector<1x1xf32> to vector<1x16xf32>
      %33 = arith.mulf %32, %31 : vector<1x16xf32>
      %34 = arith.addf %28, %33 : vector<1x16xf32>
      %c0_26 = arith.constant 0 : index
      %c0_27 = arith.constant 0 : index
      %35 = vector.load %arg12[%c0_26, %c0_27] : memref<32x16xf32, #tpu.memory_space<vmem>>, vector<32x16xf32>
      %36 = vector.broadcast %27 : vector<1x16xf32> to vector<32x16xf32>
      %37 = arith.mulf %35, %36 : vector<32x16xf32>
      %38 = vector.broadcast %34 : vector<1x16xf32> to vector<32x16xf32>
      %39 = arith.addf %37, %38 : vector<32x16xf32>
      %cst_28 = arith.constant 0.000000e+00 : f32
      %40 = vector.broadcast %cst_28 : f32 to vector<32x16xf32>
      %41 = arith.maximumf %39, %40 : vector<32x16xf32>
      %42 = arith.truncf %41 : vector<32x16xf32> to vector<32x16xbf16>
      %c0_29 = arith.constant 0 : index
      %c0_30 = arith.constant 0 : index
      %43 = vector.load %arg11[%c0_29, %c0_30] : memref<32x16xbf16, #tpu.memory_space<vmem>>, vector<32x16xbf16>
      tpu.vector_store %arg11[%c0_29, %c0_30], %42 {strides = array<i32>} : memref<32x16xbf16, #tpu.memory_space<vmem>>, vector<32x16xbf16>,
    } else {
    }
    return
  }
  func.func @transform_0(%arg0: i32, %arg1: i32, %arg2: i32) -> (i32, i32) {
    %c0_i32 = arith.constant 0 : i32
    %c0_i32_0 = arith.constant 0 : i32
    %c0_i32_1 = arith.constant 0 : i32
    return %c0_i32, %c0_i32_0 : i32, i32
  }
  func.func @transform_1(%arg0: i32, %arg1: i32, %arg2: i32) -> (i32, i32) {
    %c0_i32 = arith.constant 0 : i32
    return %arg0, %arg2 : i32, i32
  }
  func.func @transform_2(%arg0: i32, %arg1: i32, %arg2: i32) -> (i32, i32) {
    %c0_i32 = arith.constant 0 : i32
    return %arg2, %arg1 : i32, i32
  }
  func.func @transform_3(%arg0: i32, %arg1: i32, %arg2: i32) -> (i32, i32) {
    %c0_i32 = arith.constant 0 : i32
    return %arg2, %arg1 : i32, i32
  }
  func.func @transform_4(%arg0: i32, %arg1: i32, %arg2: i32) -> (i32, i32) {
    %c0_i32 = arith.constant 0 : i32
    %c0_i32_0 = arith.constant 0 : i32
    return %c0_i32, %arg1 : i32, i32
  }
  func.func @transform_5(%arg0: i32, %arg1: i32, %arg2: i32) -> (i32, i32) {
    %c0_i32 = arith.constant 0 : i32
    %c0_i32_0 = arith.constant 0 : i32
    return %c0_i32, %arg1 : i32, i32
  }
  func.func @transform_6(%arg0: i32, %arg1: i32, %arg2: i32) -> (i32, i32) {
    %c0_i32 = arith.constant 0 : i32
    %c0_i32_0 = arith.constant 0 : i32
    return %c0_i32, %arg1 : i32, i32
  }
  func.func @transform_7(%arg0: i32, %arg1: i32, %arg2: i32) -> (i32, i32) {
    %c0_i32 = arith.constant 0 : i32
    %c0_i32_0 = arith.constant 0 : i32
    return %c0_i32, %arg1 : i32, i32
  }
  func.func @transform_8(%arg0: i32, %arg1: i32, %arg2: i32) -> (i32, i32) {
    %c0_i32 = arith.constant 0 : i32
    return %arg0, %arg1 : i32, i32
  }
}

module attributes {stable_mosaic.version = 11 : i64} {
  func.func @conv_blend_bn_relu_kernel(%arg0: i32, %arg1: i32, %arg2: i32, %arg3: memref<1x1xf32, #tpu.memory_space<vmem>>, %arg4: memref<8x288xbf16, #tpu.memory_space<vmem>>, %arg5: memref<288x64xbf16, #tpu.memory_space<vmem>>, %arg6: memref<288x64xbf16, #tpu.memory_space<vmem>>, %arg7: memref<1x64xf32, #tpu.memory_space<vmem>>, %arg8: memref<1x64xf32, #tpu.memory_space<vmem>>, %arg9: memref<1x64xf32, #tpu.memory_space<vmem>>, %arg10: memref<1x64xf32, #tpu.memory_space<vmem>>, %arg11: memref<8x64xbf16, #tpu.memory_space<vmem>>, %arg12: memref<8x64xf32, #tpu.memory_space<vmem>>) attributes {dimension_semantics = [#tpu.dimension_semantics<parallel>, #tpu.dimension_semantics<parallel>, #tpu.dimension_semantics<arbitrary>], iteration_bounds = array<i64: 1, 1, 1>, scalar_prefetch = 0 : i64, scratch_operands = 1 : i64, tpu.core_type = #tpu.core_type<tc>, window_params = [{pipeline_mode = #tpu.pipeline_mode<synchronous>, transform_indices = @transform_0, window_bounds = array<i64: 1, 1>}, {transform_indices = @transform_1, window_bounds = array<i64: 8, 288>}, {transform_indices = @transform_2, window_bounds = array<i64: 288, 64>}, {transform_indices = @transform_3, window_bounds = array<i64: 288, 64>}, {transform_indices = @transform_4, window_bounds = array<i64: 1, 64>}, {transform_indices = @transform_5, window_bounds = array<i64: 1, 64>}, {transform_indices = @transform_6, window_bounds = array<i64: 1, 64>}, {transform_indices = @transform_7, window_bounds = array<i64: 1, 64>}, {transform_indices = @transform_8, window_bounds = array<i64: 8, 64>}]} {
    %c0_i32 = arith.constant 0 : i32
    %0 = arith.cmpi eq, %arg2, %c0_i32 : i32
    %1 = arith.extui %0 : i1 to i32
    %c0_i32_0 = arith.constant 0 : i32
    %2 = arith.cmpi ne, %1, %c0_i32_0 : i32
    scf.if %2 {
      %cst_14 = arith.constant 0.000000e+00 : f32
      %21 = vector.broadcast %cst_14 : f32 to vector<8x64xf32>
      %c0_15 = arith.constant 0 : index
      %c0_16 = arith.constant 0 : index
      %22 = vector.load %arg12[%c0_15, %c0_16] : memref<8x64xf32, #tpu.memory_space<vmem>>, vector<8x64xf32>
      tpu.vector_store %arg12[%c0_15, %c0_16], %21 {strides = array<i32>} : memref<8x64xf32, #tpu.memory_space<vmem>>, vector<8x64xf32>,
    } else {
    }
    %c0 = arith.constant 0 : index
    %c0_1 = arith.constant 0 : index
    %3 = vector.load %arg3[%c0, %c0_1] : memref<1x1xf32, #tpu.memory_space<vmem>>, vector<1x1xf32>
    %c0_2 = arith.constant 0 : index
    %c0_3 = arith.constant 0 : index
    %4 = vector.load %arg5[%c0_2, %c0_3] : memref<288x64xbf16, #tpu.memory_space<vmem>>, vector<288x64xbf16>
    %5 = arith.extf %4 : vector<288x64xbf16> to vector<288x64xf32>
    %c0_4 = arith.constant 0 : index
    %c0_5 = arith.constant 0 : index
    %6 = vector.load %arg6[%c0_4, %c0_5] : memref<288x64xbf16, #tpu.memory_space<vmem>>, vector<288x64xbf16>
    %7 = arith.extf %6 : vector<288x64xbf16> to vector<288x64xf32>
    %8 = arith.subf %7, %5 : vector<288x64xf32>
    %9 = vector.broadcast %3 : vector<1x1xf32> to vector<288x64xf32>
    %10 = arith.mulf %9, %8 : vector<288x64xf32>
    %11 = arith.addf %5, %10 : vector<288x64xf32>
    %12 = arith.truncf %11 : vector<288x64xf32> to vector<288x64xbf16>
    %c0_6 = arith.constant 0 : index
    %c0_7 = arith.constant 0 : index
    %13 = vector.load %arg12[%c0_6, %c0_7] : memref<8x64xf32, #tpu.memory_space<vmem>>, vector<8x64xf32>
    %c0_8 = arith.constant 0 : index
    %c0_9 = arith.constant 0 : index
    %14 = vector.load %arg4[%c0_8, %c0_9] : memref<8x288xbf16, #tpu.memory_space<vmem>>, vector<8x288xbf16>
    %cst = arith.constant dense<0.000000e+00> : vector<8x64xf32>
    %15 = tpu.matmul %14, %12, %cst {dimension_numbers = #tpu.dot_dimension_numbers<[1], [0], [0], [1], [0, 0, 1, 1], [], []>} : vector<8x288xbf16>, vector<288x64xbf16>, vector<8x64xf32> -> vector<8x64xf32>
    %16 = arith.addf %13, %15 : vector<8x64xf32>
    %c0_10 = arith.constant 0 : index
    %c0_11 = arith.constant 0 : index
    %17 = vector.load %arg12[%c0_10, %c0_11] : memref<8x64xf32, #tpu.memory_space<vmem>>, vector<8x64xf32>
    tpu.vector_store %arg12[%c0_10, %c0_11], %16 {strides = array<i32>} : memref<8x64xf32, #tpu.memory_space<vmem>>, vector<8x64xf32>,
    %c0_i32_12 = arith.constant 0 : i32
    %18 = arith.cmpi eq, %arg2, %c0_i32_12 : i32
    %19 = arith.extui %18 : i1 to i32
    %c0_i32_13 = arith.constant 0 : i32
    %20 = arith.cmpi ne, %19, %c0_i32_13 : i32
    scf.if %20 {
      %c0_14 = arith.constant 0 : index
      %c0_15 = arith.constant 0 : index
      %21 = vector.load %arg7[%c0_14, %c0_15] : memref<1x64xf32, #tpu.memory_space<vmem>>, vector<1x64xf32>
      %c0_16 = arith.constant 0 : index
      %c0_17 = arith.constant 0 : index
      %22 = vector.load %arg8[%c0_16, %c0_17] : memref<1x64xf32, #tpu.memory_space<vmem>>, vector<1x64xf32>
      %c0_18 = arith.constant 0 : index
      %c0_19 = arith.constant 0 : index
      %23 = vector.load %arg7[%c0_18, %c0_19] : memref<1x64xf32, #tpu.memory_space<vmem>>, vector<1x64xf32>
      %24 = arith.subf %22, %23 : vector<1x64xf32>
      %25 = vector.broadcast %3 : vector<1x1xf32> to vector<1x64xf32>
      %26 = arith.mulf %25, %24 : vector<1x64xf32>
      %27 = arith.addf %21, %26 : vector<1x64xf32>
      %c0_20 = arith.constant 0 : index
      %c0_21 = arith.constant 0 : index
      %28 = vector.load %arg9[%c0_20, %c0_21] : memref<1x64xf32, #tpu.memory_space<vmem>>, vector<1x64xf32>
      %c0_22 = arith.constant 0 : index
      %c0_23 = arith.constant 0 : index
      %29 = vector.load %arg10[%c0_22, %c0_23] : memref<1x64xf32, #tpu.memory_space<vmem>>, vector<1x64xf32>
      %c0_24 = arith.constant 0 : index
      %c0_25 = arith.constant 0 : index
      %30 = vector.load %arg9[%c0_24, %c0_25] : memref<1x64xf32, #tpu.memory_space<vmem>>, vector<1x64xf32>
      %31 = arith.subf %29, %30 : vector<1x64xf32>
      %32 = vector.broadcast %3 : vector<1x1xf32> to vector<1x64xf32>
      %33 = arith.mulf %32, %31 : vector<1x64xf32>
      %34 = arith.addf %28, %33 : vector<1x64xf32>
      %c0_26 = arith.constant 0 : index
      %c0_27 = arith.constant 0 : index
      %35 = vector.load %arg12[%c0_26, %c0_27] : memref<8x64xf32, #tpu.memory_space<vmem>>, vector<8x64xf32>
      %36 = vector.broadcast %27 : vector<1x64xf32> to vector<8x64xf32>
      %37 = arith.mulf %35, %36 : vector<8x64xf32>
      %38 = vector.broadcast %34 : vector<1x64xf32> to vector<8x64xf32>
      %39 = arith.addf %37, %38 : vector<8x64xf32>
      %cst_28 = arith.constant 0.000000e+00 : f32
      %40 = vector.broadcast %cst_28 : f32 to vector<8x64xf32>
      %41 = arith.maximumf %39, %40 : vector<8x64xf32>
      %42 = arith.truncf %41 : vector<8x64xf32> to vector<8x64xbf16>
      %c0_29 = arith.constant 0 : index
      %c0_30 = arith.constant 0 : index
      %43 = vector.load %arg11[%c0_29, %c0_30] : memref<8x64xbf16, #tpu.memory_space<vmem>>, vector<8x64xbf16>
      tpu.vector_store %arg11[%c0_29, %c0_30], %42 {strides = array<i32>} : memref<8x64xbf16, #tpu.memory_space<vmem>>, vector<8x64xbf16>,
    } else {
    }
    return
  }
  func.func @transform_0(%arg0: i32, %arg1: i32, %arg2: i32) -> (i32, i32) {
    %c0_i32 = arith.constant 0 : i32
    %c0_i32_0 = arith.constant 0 : i32
    %c0_i32_1 = arith.constant 0 : i32
    return %c0_i32, %c0_i32_0 : i32, i32
  }
  func.func @transform_1(%arg0: i32, %arg1: i32, %arg2: i32) -> (i32, i32) {
    %c0_i32 = arith.constant 0 : i32
    return %arg0, %arg2 : i32, i32
  }
  func.func @transform_2(%arg0: i32, %arg1: i32, %arg2: i32) -> (i32, i32) {
    %c0_i32 = arith.constant 0 : i32
    return %arg2, %arg1 : i32, i32
  }
  func.func @transform_3(%arg0: i32, %arg1: i32, %arg2: i32) -> (i32, i32) {
    %c0_i32 = arith.constant 0 : i32
    return %arg2, %arg1 : i32, i32
  }
  func.func @transform_4(%arg0: i32, %arg1: i32, %arg2: i32) -> (i32, i32) {
    %c0_i32 = arith.constant 0 : i32
    %c0_i32_0 = arith.constant 0 : i32
    return %c0_i32, %arg1 : i32, i32
  }
  func.func @transform_5(%arg0: i32, %arg1: i32, %arg2: i32) -> (i32, i32) {
    %c0_i32 = arith.constant 0 : i32
    %c0_i32_0 = arith.constant 0 : i32
    return %c0_i32, %arg1 : i32, i32
  }
  func.func @transform_6(%arg0: i32, %arg1: i32, %arg2: i32) -> (i32, i32) {
    %c0_i32 = arith.constant 0 : i32
    %c0_i32_0 = arith.constant 0 : i32
    return %c0_i32, %arg1 : i32, i32
  }
  func.func @transform_7(%arg0: i32, %arg1: i32, %arg2: i32) -> (i32, i32) {
    %c0_i32 = arith.constant 0 : i32
    %c0_i32_0 = arith.constant 0 : i32
    return %c0_i32, %arg1 : i32, i32
  }
  func.func @transform_8(%arg0: i32, %arg1: i32, %arg2: i32) -> (i32, i32) {
    %c0_i32 = arith.constant 0 : i32
    return %arg0, %arg1 : i32, i32
  }
}

module attributes {stable_mosaic.version = 11 : i64} {
  func.func @conv_blend_bn_relu_kernel(%arg0: i32, %arg1: i32, %arg2: i32, %arg3: memref<1x1xf32, #tpu.memory_space<vmem>>, %arg4: memref<8x144xbf16, #tpu.memory_space<vmem>>, %arg5: memref<144x32xbf16, #tpu.memory_space<vmem>>, %arg6: memref<144x32xbf16, #tpu.memory_space<vmem>>, %arg7: memref<1x32xf32, #tpu.memory_space<vmem>>, %arg8: memref<1x32xf32, #tpu.memory_space<vmem>>, %arg9: memref<1x32xf32, #tpu.memory_space<vmem>>, %arg10: memref<1x32xf32, #tpu.memory_space<vmem>>, %arg11: memref<8x32xbf16, #tpu.memory_space<vmem>>, %arg12: memref<8x32xf32, #tpu.memory_space<vmem>>) attributes {dimension_semantics = [#tpu.dimension_semantics<parallel>, #tpu.dimension_semantics<parallel>, #tpu.dimension_semantics<arbitrary>], iteration_bounds = array<i64: 1, 1, 1>, scalar_prefetch = 0 : i64, scratch_operands = 1 : i64, tpu.core_type = #tpu.core_type<tc>, window_params = [{pipeline_mode = #tpu.pipeline_mode<synchronous>, transform_indices = @transform_0, window_bounds = array<i64: 1, 1>}, {transform_indices = @transform_1, window_bounds = array<i64: 8, 144>}, {transform_indices = @transform_2, window_bounds = array<i64: 144, 32>}, {transform_indices = @transform_3, window_bounds = array<i64: 144, 32>}, {transform_indices = @transform_4, window_bounds = array<i64: 1, 32>}, {transform_indices = @transform_5, window_bounds = array<i64: 1, 32>}, {transform_indices = @transform_6, window_bounds = array<i64: 1, 32>}, {transform_indices = @transform_7, window_bounds = array<i64: 1, 32>}, {transform_indices = @transform_8, window_bounds = array<i64: 8, 32>}]} {
    %c0_i32 = arith.constant 0 : i32
    %0 = arith.cmpi eq, %arg2, %c0_i32 : i32
    %1 = arith.extui %0 : i1 to i32
    %c0_i32_0 = arith.constant 0 : i32
    %2 = arith.cmpi ne, %1, %c0_i32_0 : i32
    scf.if %2 {
      %cst_14 = arith.constant 0.000000e+00 : f32
      %21 = vector.broadcast %cst_14 : f32 to vector<8x32xf32>
      %c0_15 = arith.constant 0 : index
      %c0_16 = arith.constant 0 : index
      %22 = vector.load %arg12[%c0_15, %c0_16] : memref<8x32xf32, #tpu.memory_space<vmem>>, vector<8x32xf32>
      tpu.vector_store %arg12[%c0_15, %c0_16], %21 {strides = array<i32>} : memref<8x32xf32, #tpu.memory_space<vmem>>, vector<8x32xf32>,
    } else {
    }
    %c0 = arith.constant 0 : index
    %c0_1 = arith.constant 0 : index
    %3 = vector.load %arg3[%c0, %c0_1] : memref<1x1xf32, #tpu.memory_space<vmem>>, vector<1x1xf32>
    %c0_2 = arith.constant 0 : index
    %c0_3 = arith.constant 0 : index
    %4 = vector.load %arg5[%c0_2, %c0_3] : memref<144x32xbf16, #tpu.memory_space<vmem>>, vector<144x32xbf16>
    %5 = arith.extf %4 : vector<144x32xbf16> to vector<144x32xf32>
    %c0_4 = arith.constant 0 : index
    %c0_5 = arith.constant 0 : index
    %6 = vector.load %arg6[%c0_4, %c0_5] : memref<144x32xbf16, #tpu.memory_space<vmem>>, vector<144x32xbf16>
    %7 = arith.extf %6 : vector<144x32xbf16> to vector<144x32xf32>
    %8 = arith.subf %7, %5 : vector<144x32xf32>
    %9 = vector.broadcast %3 : vector<1x1xf32> to vector<144x32xf32>
    %10 = arith.mulf %9, %8 : vector<144x32xf32>
    %11 = arith.addf %5, %10 : vector<144x32xf32>
    %12 = arith.truncf %11 : vector<144x32xf32> to vector<144x32xbf16>
    %c0_6 = arith.constant 0 : index
    %c0_7 = arith.constant 0 : index
    %13 = vector.load %arg12[%c0_6, %c0_7] : memref<8x32xf32, #tpu.memory_space<vmem>>, vector<8x32xf32>
    %c0_8 = arith.constant 0 : index
    %c0_9 = arith.constant 0 : index
    %14 = vector.load %arg4[%c0_8, %c0_9] : memref<8x144xbf16, #tpu.memory_space<vmem>>, vector<8x144xbf16>
    %cst = arith.constant dense<0.000000e+00> : vector<8x32xf32>
    %15 = tpu.matmul %14, %12, %cst {dimension_numbers = #tpu.dot_dimension_numbers<[1], [0], [0], [1], [0, 0, 1, 1], [], []>} : vector<8x144xbf16>, vector<144x32xbf16>, vector<8x32xf32> -> vector<8x32xf32>
    %16 = arith.addf %13, %15 : vector<8x32xf32>
    %c0_10 = arith.constant 0 : index
    %c0_11 = arith.constant 0 : index
    %17 = vector.load %arg12[%c0_10, %c0_11] : memref<8x32xf32, #tpu.memory_space<vmem>>, vector<8x32xf32>
    tpu.vector_store %arg12[%c0_10, %c0_11], %16 {strides = array<i32>} : memref<8x32xf32, #tpu.memory_space<vmem>>, vector<8x32xf32>,
    %c0_i32_12 = arith.constant 0 : i32
    %18 = arith.cmpi eq, %arg2, %c0_i32_12 : i32
    %19 = arith.extui %18 : i1 to i32
    %c0_i32_13 = arith.constant 0 : i32
    %20 = arith.cmpi ne, %19, %c0_i32_13 : i32
    scf.if %20 {
      %c0_14 = arith.constant 0 : index
      %c0_15 = arith.constant 0 : index
      %21 = vector.load %arg7[%c0_14, %c0_15] : memref<1x32xf32, #tpu.memory_space<vmem>>, vector<1x32xf32>
      %c0_16 = arith.constant 0 : index
      %c0_17 = arith.constant 0 : index
      %22 = vector.load %arg8[%c0_16, %c0_17] : memref<1x32xf32, #tpu.memory_space<vmem>>, vector<1x32xf32>
      %c0_18 = arith.constant 0 : index
      %c0_19 = arith.constant 0 : index
      %23 = vector.load %arg7[%c0_18, %c0_19] : memref<1x32xf32, #tpu.memory_space<vmem>>, vector<1x32xf32>
      %24 = arith.subf %22, %23 : vector<1x32xf32>
      %25 = vector.broadcast %3 : vector<1x1xf32> to vector<1x32xf32>
      %26 = arith.mulf %25, %24 : vector<1x32xf32>
      %27 = arith.addf %21, %26 : vector<1x32xf32>
      %c0_20 = arith.constant 0 : index
      %c0_21 = arith.constant 0 : index
      %28 = vector.load %arg9[%c0_20, %c0_21] : memref<1x32xf32, #tpu.memory_space<vmem>>, vector<1x32xf32>
      %c0_22 = arith.constant 0 : index
      %c0_23 = arith.constant 0 : index
      %29 = vector.load %arg10[%c0_22, %c0_23] : memref<1x32xf32, #tpu.memory_space<vmem>>, vector<1x32xf32>
      %c0_24 = arith.constant 0 : index
      %c0_25 = arith.constant 0 : index
      %30 = vector.load %arg9[%c0_24, %c0_25] : memref<1x32xf32, #tpu.memory_space<vmem>>, vector<1x32xf32>
      %31 = arith.subf %29, %30 : vector<1x32xf32>
      %32 = vector.broadcast %3 : vector<1x1xf32> to vector<1x32xf32>
      %33 = arith.mulf %32, %31 : vector<1x32xf32>
      %34 = arith.addf %28, %33 : vector<1x32xf32>
      %c0_26 = arith.constant 0 : index
      %c0_27 = arith.constant 0 : index
      %35 = vector.load %arg12[%c0_26, %c0_27] : memref<8x32xf32, #tpu.memory_space<vmem>>, vector<8x32xf32>
      %36 = vector.broadcast %27 : vector<1x32xf32> to vector<8x32xf32>
      %37 = arith.mulf %35, %36 : vector<8x32xf32>
      %38 = vector.broadcast %34 : vector<1x32xf32> to vector<8x32xf32>
      %39 = arith.addf %37, %38 : vector<8x32xf32>
      %cst_28 = arith.constant 0.000000e+00 : f32
      %40 = vector.broadcast %cst_28 : f32 to vector<8x32xf32>
      %41 = arith.maximumf %39, %40 : vector<8x32xf32>
      %42 = arith.truncf %41 : vector<8x32xf32> to vector<8x32xbf16>
      %c0_29 = arith.constant 0 : index
      %c0_30 = arith.constant 0 : index
      %43 = vector.load %arg11[%c0_29, %c0_30] : memref<8x32xbf16, #tpu.memory_space<vmem>>, vector<8x32xbf16>
      tpu.vector_store %arg11[%c0_29, %c0_30], %42 {strides = array<i32>} : memref<8x32xbf16, #tpu.memory_space<vmem>>, vector<8x32xbf16>,
    } else {
    }
    return
  }
  func.func @transform_0(%arg0: i32, %arg1: i32, %arg2: i32) -> (i32, i32) {
    %c0_i32 = arith.constant 0 : i32
    %c0_i32_0 = arith.constant 0 : i32
    %c0_i32_1 = arith.constant 0 : i32
    return %c0_i32, %c0_i32_0 : i32, i32
  }
  func.func @transform_1(%arg0: i32, %arg1: i32, %arg2: i32) -> (i32, i32) {
    %c0_i32 = arith.constant 0 : i32
    return %arg0, %arg2 : i32, i32
  }
  func.func @transform_2(%arg0: i32, %arg1: i32, %arg2: i32) -> (i32, i32) {
    %c0_i32 = arith.constant 0 : i32
    return %arg2, %arg1 : i32, i32
  }
  func.func @transform_3(%arg0: i32, %arg1: i32, %arg2: i32) -> (i32, i32) {
    %c0_i32 = arith.constant 0 : i32
    return %arg2, %arg1 : i32, i32
  }
  func.func @transform_4(%arg0: i32, %arg1: i32, %arg2: i32) -> (i32, i32) {
    %c0_i32 = arith.constant 0 : i32
    %c0_i32_0 = arith.constant 0 : i32
    return %c0_i32, %arg1 : i32, i32
  }
  func.func @transform_5(%arg0: i32, %arg1: i32, %arg2: i32) -> (i32, i32) {
    %c0_i32 = arith.constant 0 : i32
    %c0_i32_0 = arith.constant 0 : i32
    return %c0_i32, %arg1 : i32, i32
  }
  func.func @transform_6(%arg0: i32, %arg1: i32, %arg2: i32) -> (i32, i32) {
    %c0_i32 = arith.constant 0 : i32
    %c0_i32_0 = arith.constant 0 : i32
    return %c0_i32, %arg1 : i32, i32
  }
  func.func @transform_7(%arg0: i32, %arg1: i32, %arg2: i32) -> (i32, i32) {
    %c0_i32 = arith.constant 0 : i32
    %c0_i32_0 = arith.constant 0 : i32
    return %c0_i32, %arg1 : i32, i32
  }
  func.func @transform_8(%arg0: i32, %arg1: i32, %arg2: i32) -> (i32, i32) {
    %c0_i32 = arith.constant 0 : i32
    return %arg0, %arg1 : i32, i32
  }
}

module attributes {stable_mosaic.version = 11 : i64} {
  func.func @conv_blend_bn_relu_kernel(%arg0: i32, %arg1: i32, %arg2: i32, %arg3: memref<1x1xf32, #tpu.memory_space<vmem>>, %arg4: memref<8x576xbf16, #tpu.memory_space<vmem>>, %arg5: memref<576x512xbf16, #tpu.memory_space<vmem>>, %arg6: memref<576x512xbf16, #tpu.memory_space<vmem>>, %arg7: memref<1x512xf32, #tpu.memory_space<vmem>>, %arg8: memref<1x512xf32, #tpu.memory_space<vmem>>, %arg9: memref<1x512xf32, #tpu.memory_space<vmem>>, %arg10: memref<1x512xf32, #tpu.memory_space<vmem>>, %arg11: memref<8x512xbf16, #tpu.memory_space<vmem>>, %arg12: memref<8x512xf32, #tpu.memory_space<vmem>>) attributes {dimension_semantics = [#tpu.dimension_semantics<parallel>, #tpu.dimension_semantics<parallel>, #tpu.dimension_semantics<arbitrary>], iteration_bounds = array<i64: 1, 2, 1>, scalar_prefetch = 0 : i64, scratch_operands = 1 : i64, tpu.core_type = #tpu.core_type<tc>, window_params = [{pipeline_mode = #tpu.pipeline_mode<synchronous>, transform_indices = @transform_0, window_bounds = array<i64: 1, 1>}, {transform_indices = @transform_1, window_bounds = array<i64: 8, 576>}, {transform_indices = @transform_2, window_bounds = array<i64: 576, 512>}, {transform_indices = @transform_3, window_bounds = array<i64: 576, 512>}, {transform_indices = @transform_4, window_bounds = array<i64: 1, 512>}, {transform_indices = @transform_5, window_bounds = array<i64: 1, 512>}, {transform_indices = @transform_6, window_bounds = array<i64: 1, 512>}, {transform_indices = @transform_7, window_bounds = array<i64: 1, 512>}, {transform_indices = @transform_8, window_bounds = array<i64: 8, 512>}]} {
    %c0_i32 = arith.constant 0 : i32
    %0 = arith.cmpi eq, %arg2, %c0_i32 : i32
    %1 = arith.extui %0 : i1 to i32
    %c0_i32_0 = arith.constant 0 : i32
    %2 = arith.cmpi ne, %1, %c0_i32_0 : i32
    scf.if %2 {
      %cst_14 = arith.constant 0.000000e+00 : f32
      %21 = vector.broadcast %cst_14 : f32 to vector<8x512xf32>
      %c0_15 = arith.constant 0 : index
      %c0_16 = arith.constant 0 : index
      %22 = vector.load %arg12[%c0_15, %c0_16] : memref<8x512xf32, #tpu.memory_space<vmem>>, vector<8x512xf32>
      tpu.vector_store %arg12[%c0_15, %c0_16], %21 {strides = array<i32>} : memref<8x512xf32, #tpu.memory_space<vmem>>, vector<8x512xf32>,
    } else {
    }
    %c0 = arith.constant 0 : index
    %c0_1 = arith.constant 0 : index
    %3 = vector.load %arg3[%c0, %c0_1] : memref<1x1xf32, #tpu.memory_space<vmem>>, vector<1x1xf32>
    %c0_2 = arith.constant 0 : index
    %c0_3 = arith.constant 0 : index
    %4 = vector.load %arg5[%c0_2, %c0_3] : memref<576x512xbf16, #tpu.memory_space<vmem>>, vector<576x512xbf16>
    %5 = arith.extf %4 : vector<576x512xbf16> to vector<576x512xf32>
    %c0_4 = arith.constant 0 : index
    %c0_5 = arith.constant 0 : index
    %6 = vector.load %arg6[%c0_4, %c0_5] : memref<576x512xbf16, #tpu.memory_space<vmem>>, vector<576x512xbf16>
    %7 = arith.extf %6 : vector<576x512xbf16> to vector<576x512xf32>
    %8 = arith.subf %7, %5 : vector<576x512xf32>
    %9 = vector.broadcast %3 : vector<1x1xf32> to vector<576x512xf32>
    %10 = arith.mulf %9, %8 : vector<576x512xf32>
    %11 = arith.addf %5, %10 : vector<576x512xf32>
    %12 = arith.truncf %11 : vector<576x512xf32> to vector<576x512xbf16>
    %c0_6 = arith.constant 0 : index
    %c0_7 = arith.constant 0 : index
    %13 = vector.load %arg12[%c0_6, %c0_7] : memref<8x512xf32, #tpu.memory_space<vmem>>, vector<8x512xf32>
    %c0_8 = arith.constant 0 : index
    %c0_9 = arith.constant 0 : index
    %14 = vector.load %arg4[%c0_8, %c0_9] : memref<8x576xbf16, #tpu.memory_space<vmem>>, vector<8x576xbf16>
    %cst = arith.constant dense<0.000000e+00> : vector<8x512xf32>
    %15 = tpu.matmul %14, %12, %cst {dimension_numbers = #tpu.dot_dimension_numbers<[1], [0], [0], [1], [0, 0, 1, 1], [], []>} : vector<8x576xbf16>, vector<576x512xbf16>, vector<8x512xf32> -> vector<8x512xf32>
    %16 = arith.addf %13, %15 : vector<8x512xf32>
    %c0_10 = arith.constant 0 : index
    %c0_11 = arith.constant 0 : index
    %17 = vector.load %arg12[%c0_10, %c0_11] : memref<8x512xf32, #tpu.memory_space<vmem>>, vector<8x512xf32>
    tpu.vector_store %arg12[%c0_10, %c0_11], %16 {strides = array<i32>} : memref<8x512xf32, #tpu.memory_space<vmem>>, vector<8x512xf32>,
    %c0_i32_12 = arith.constant 0 : i32
    %18 = arith.cmpi eq, %arg2, %c0_i32_12 : i32
    %19 = arith.extui %18 : i1 to i32
    %c0_i32_13 = arith.constant 0 : i32
    %20 = arith.cmpi ne, %19, %c0_i32_13 : i32
    scf.if %20 {
      %c0_14 = arith.constant 0 : index
      %c0_15 = arith.constant 0 : index
      %21 = vector.load %arg7[%c0_14, %c0_15] : memref<1x512xf32, #tpu.memory_space<vmem>>, vector<1x512xf32>
      %c0_16 = arith.constant 0 : index
      %c0_17 = arith.constant 0 : index
      %22 = vector.load %arg8[%c0_16, %c0_17] : memref<1x512xf32, #tpu.memory_space<vmem>>, vector<1x512xf32>
      %c0_18 = arith.constant 0 : index
      %c0_19 = arith.constant 0 : index
      %23 = vector.load %arg7[%c0_18, %c0_19] : memref<1x512xf32, #tpu.memory_space<vmem>>, vector<1x512xf32>
      %24 = arith.subf %22, %23 : vector<1x512xf32>
      %25 = vector.broadcast %3 : vector<1x1xf32> to vector<1x512xf32>
      %26 = arith.mulf %25, %24 : vector<1x512xf32>
      %27 = arith.addf %21, %26 : vector<1x512xf32>
      %c0_20 = arith.constant 0 : index
      %c0_21 = arith.constant 0 : index
      %28 = vector.load %arg9[%c0_20, %c0_21] : memref<1x512xf32, #tpu.memory_space<vmem>>, vector<1x512xf32>
      %c0_22 = arith.constant 0 : index
      %c0_23 = arith.constant 0 : index
      %29 = vector.load %arg10[%c0_22, %c0_23] : memref<1x512xf32, #tpu.memory_space<vmem>>, vector<1x512xf32>
      %c0_24 = arith.constant 0 : index
      %c0_25 = arith.constant 0 : index
      %30 = vector.load %arg9[%c0_24, %c0_25] : memref<1x512xf32, #tpu.memory_space<vmem>>, vector<1x512xf32>
      %31 = arith.subf %29, %30 : vector<1x512xf32>
      %32 = vector.broadcast %3 : vector<1x1xf32> to vector<1x512xf32>
      %33 = arith.mulf %32, %31 : vector<1x512xf32>
      %34 = arith.addf %28, %33 : vector<1x512xf32>
      %c0_26 = arith.constant 0 : index
      %c0_27 = arith.constant 0 : index
      %35 = vector.load %arg12[%c0_26, %c0_27] : memref<8x512xf32, #tpu.memory_space<vmem>>, vector<8x512xf32>
      %36 = vector.broadcast %27 : vector<1x512xf32> to vector<8x512xf32>
      %37 = arith.mulf %35, %36 : vector<8x512xf32>
      %38 = vector.broadcast %34 : vector<1x512xf32> to vector<8x512xf32>
      %39 = arith.addf %37, %38 : vector<8x512xf32>
      %cst_28 = arith.constant 0.000000e+00 : f32
      %40 = vector.broadcast %cst_28 : f32 to vector<8x512xf32>
      %41 = arith.maximumf %39, %40 : vector<8x512xf32>
      %42 = arith.truncf %41 : vector<8x512xf32> to vector<8x512xbf16>
      %c0_29 = arith.constant 0 : index
      %c0_30 = arith.constant 0 : index
      %43 = vector.load %arg11[%c0_29, %c0_30] : memref<8x512xbf16, #tpu.memory_space<vmem>>, vector<8x512xbf16>
      tpu.vector_store %arg11[%c0_29, %c0_30], %42 {strides = array<i32>} : memref<8x512xbf16, #tpu.memory_space<vmem>>, vector<8x512xbf16>,
    } else {
    }
    return
  }
  func.func @transform_0(%arg0: i32, %arg1: i32, %arg2: i32) -> (i32, i32) {
    %c0_i32 = arith.constant 0 : i32
    %c0_i32_0 = arith.constant 0 : i32
    %c0_i32_1 = arith.constant 0 : i32
    return %c0_i32, %c0_i32_0 : i32, i32
  }
  func.func @transform_1(%arg0: i32, %arg1: i32, %arg2: i32) -> (i32, i32) {
    %c0_i32 = arith.constant 0 : i32
    return %arg0, %arg2 : i32, i32
  }
  func.func @transform_2(%arg0: i32, %arg1: i32, %arg2: i32) -> (i32, i32) {
    %c0_i32 = arith.constant 0 : i32
    return %arg2, %arg1 : i32, i32
  }
  func.func @transform_3(%arg0: i32, %arg1: i32, %arg2: i32) -> (i32, i32) {
    %c0_i32 = arith.constant 0 : i32
    return %arg2, %arg1 : i32, i32
  }
  func.func @transform_4(%arg0: i32, %arg1: i32, %arg2: i32) -> (i32, i32) {
    %c0_i32 = arith.constant 0 : i32
    %c0_i32_0 = arith.constant 0 : i32
    return %c0_i32, %arg1 : i32, i32
  }
  func.func @transform_5(%arg0: i32, %arg1: i32, %arg2: i32) -> (i32, i32) {
    %c0_i32 = arith.constant 0 : i32
    %c0_i32_0 = arith.constant 0 : i32
    return %c0_i32, %arg1 : i32, i32
  }
  func.func @transform_6(%arg0: i32, %arg1: i32, %arg2: i32) -> (i32, i32) {
    %c0_i32 = arith.constant 0 : i32
    %c0_i32_0 = arith.constant 0 : i32
    return %c0_i32, %arg1 : i32, i32
  }
  func.func @transform_7(%arg0: i32, %arg1: i32, %arg2: i32) -> (i32, i32) {
    %c0_i32 = arith.constant 0 : i32
    %c0_i32_0 = arith.constant 0 : i32
    return %c0_i32, %arg1 : i32, i32
  }
  func.func @transform_8(%arg0: i32, %arg1: i32, %arg2: i32) -> (i32, i32) {
    %c0_i32 = arith.constant 0 : i32
    return %arg0, %arg1 : i32, i32
  }
}

module attributes {stable_mosaic.version = 11 : i64} {
  func.func @head_kernel(%arg0: memref<2x1x1024xbf16, #tpu.memory_space<vmem>>, %arg1: memref<1024x128xf32, #tpu.memory_space<vmem>>, %arg2: memref<1x128xf32, #tpu.memory_space<vmem>>, %arg3: memref<2x128xf32, #tpu.memory_space<vmem>>) attributes {dimension_semantics = [], scalar_prefetch = 0 : i64, scratch_operands = 0 : i64, tpu.core_type = #tpu.core_type<tc>} {
    %c0 = arith.constant 0 : index
    %c0_0 = arith.constant 0 : index
    %c0_1 = arith.constant 0 : index
    %0 = vector.load %arg0[%c0, %c0_0, %c0_1] : memref<2x1x1024xbf16, #tpu.memory_space<vmem>>, vector<2x1x1024xbf16>
    %1 = arith.extf %0 : vector<2x1x1024xbf16> to vector<2x1x1024xf32>
    %cst = arith.constant dense<0.000000e+00> : vector<2x1024xf32>
    %2 = vector.multi_reduction <add>, %1, %cst [1] : vector<2x1x1024xf32> to vector<2x1024xf32>
    %cst_2 = arith.constant 1.000000e+00 : f32
    %3 = vector.broadcast %cst_2 : f32 to vector<2x1024xf32>
    %4 = arith.divf %2, %3 : vector<2x1024xf32>
    %c0_3 = arith.constant 0 : index
    %c0_4 = arith.constant 0 : index
    %5 = vector.load %arg1[%c0_3, %c0_4] : memref<1024x128xf32, #tpu.memory_space<vmem>>, vector<1024x128xf32>
    %cst_5 = arith.constant dense<0.000000e+00> : vector<2x128xf32>
    %6 = tpu.matmul %4, %5, %cst_5 {dimension_numbers = #tpu.dot_dimension_numbers<[1], [0], [0], [1], [0, 0, 1, 1], [], []>} : vector<2x1024xf32>, vector<1024x128xf32>, vector<2x128xf32> -> vector<2x128xf32>
    %c0_6 = arith.constant 0 : index
    %c0_7 = arith.constant 0 : index
    %7 = vector.load %arg2[%c0_6, %c0_7] : memref<1x128xf32, #tpu.memory_space<vmem>>, vector<1x128xf32>
    %8 = vector.broadcast %7 : vector<1x128xf32> to vector<2x128xf32>
    %9 = arith.addf %6, %8 : vector<2x128xf32>
    %c0_8 = arith.constant 0 : index
    %c0_9 = arith.constant 0 : index
    %10 = vector.load %arg3[%c0_8, %c0_9] : memref<2x128xf32, #tpu.memory_space<vmem>>, vector<2x128xf32>
    tpu.vector_store %arg3[%c0_8, %c0_9], %9 {strides = array<i32>} : memref<2x128xf32, #tpu.memory_space<vmem>>, vector<2x128xf32>,
    return
  }
}

</mosaic_0001>

<bundles_post_ra>
// kernel: combined_model_forward.6
= control target key start
LH: loop header
LB: loop body
LE: loop exit
PB: predicated region body
PF: predicated region fallthrough
CT: control target
= control target key end

     0   :  { %v468_v0 = vmov 0   ;;  %vm187_vm0 = vcmask 1044480   ;;  %vm188_vm1 = vcmask 1045504   ;;  %v469_v25 = vmov 65535   ;;  %s713_s0 = inlined_call_operand.<no memory space> [shape: f32[1,1], index: 0, kind: input, shape index: {}]   ;;  %s714_s2 = inlined_call_operand.vmem [shape: bf16[27,8], index: 2, kind: input, shape index: {}]   ;;  %s715_s3 = inlined_call_operand.vmem [shape: bf16[27,8], index: 3, kind: input, shape index: {}]   ;;  %s716_s1 = inlined_call_operand.vmem [shape: bf16[128,27], index: 1, kind: input, shape index: {}]   ;;  %s717_s4 = inlined_call_operand.vmem [shape: f32[1,8], index: 4, kind: input, shape index: {}]   ;;  %s718_s5 = inlined_call_operand.vmem [shape: f32[1,8], index: 5, kind: input, shape index: {}]   ;;  %s719_s6 = inlined_call_operand.vmem [shape: f32[1,8], index: 6, kind: input, shape index: {}]   ;;  %s720_s7 = inlined_call_operand.vmem [shape: f32[1,8], index: 7, kind: input, shape index: {}]   ;;  %s721_s8 = inlined_call_operand.vmem [shape: bf16[128,8], index: 8, kind: output, shape index: {}]  }
   0x1   :  { %466 = vset.pattern.permute.xlu0 %v468_v0  ;;  %v13_v1 = vstv %s713_s0  ;;  %v56_v4 = vld [vmem:[%s714_s2 + $0x8] sm:$0xf]  ;;  %v57_v5 = vld [vmem:[%s714_s2 + $0xc] sm:$0x3]  ;;  %v450_v8 = vld [vmem:[%s714_s2] sm:$0xff]   ;;  %v189_v26 = vsel %vm187_vm0, 4294967295, %v469_v25 }
   0x2   :  { %14 = vst [vmem:[#allocation3] sm:$0x1] %v13_v1  ;;  %v64_v6 = vld [vmem:[%s715_s3 + $0x8] sm:$0xf]  ;;  %v65_v7 = vld [vmem:[%s715_s3 + $0xc] sm:$0x3]  ;;  %v60_v10 = vunpack.c.l.bf16 %v56_v4  ;;  %v61_v11 = vunpack.c.l.bf16 %v57_v5  ;;  %v451_v14 = vunpack.c.l.bf16 %v450_v8  ;;  %v452_v15 = vunpack.c.h.bf16 %v450_v8 }
   0x3   :  { %v454_v9 = vld [vmem:[%s715_s3] sm:$0xff]   ;;  %v68_v12 = vunpack.c.l.bf16 %v64_v6  ;;  %v69_v13 = vunpack.c.l.bf16 %v65_v7  ;;  %vm36_vm2 = vcmask 64512   ;;  %v470_v31 = vmov 0.0   ;;  %v443_v39 = vld [vmem:[%s716_s1 + $0x10] sm:$0xff]  ;;  %v442_v42 = vld [vmem:[%s716_s1 + $0x8] sm:$0xff] }
   0x4   :  { %v455_v16 = vunpack.c.l.bf16 %v454_v9  ;;  %v456_v17 = vunpack.c.h.bf16 %v454_v9  ;;  %37 = vst.msk [vmem:[#allocation2] sm:$0xff] %vm36_vm2, %v470_v31  ;;  %v190_v32 = vsel %vm188_vm1, %v189_v26, 0  ;;  %v441_v38 = vld [vmem:[%s716_s1] sm:$0xff]  ;;  %vm162_vm3 = vcmask 220160   ;;  %v447_v41 = vld [vmem:[%s716_s1 + $0x30] sm:$0xff]  ;;  %v444_v43 = vld [vmem:[%s716_s1 + $0x18] sm:$0xff] }
   0x5   :  { %v72_v18 = vsub.f32 %v68_v12, %v60_v10  ;;  %v73_v19 = vsub.f32 %v69_v13, %v61_v11  ;;  %38 = vst.msk [vmem:[#allocation2 + $0x8] sm:$0xff] %vm36_vm2, %v470_v31  ;;  %v445_v40 = vld [vmem:[%s716_s1 + $0x20] sm:$0xff]  ;;  %v446_v44 = vld [vmem:[%s716_s1 + $0x28] sm:$0xff]  ;;  %v448_v45 = vld [vmem:[%s716_s1 + $0x38] sm:$0xff]  ;;  %vm380_vm4 = vcmask 60416  }
   0x6   :  { %v70_v20 = vsub.f32 %v455_v16, %v451_v14  ;;  %v71_v21 = vsub.f32 %v456_v17, %v452_v15  ;;  %39 = vst.msk [vmem:[#allocation2 + $0x10] sm:$0xff] %vm36_vm2, %v470_v31  ;;  %v279_v46 = vld [vmem:[%s717_s4] sm:$0x1] }
   0x7   :  { %40 = vst.msk [vmem:[#allocation2 + $0x18] sm:$0xff] %vm36_vm2, %v470_v31  ;;  %v280_v47 = vld [vmem:[%s718_s5] sm:$0x1] }
   0x8   :  { %41 = vst.msk [vmem:[#allocation2 + $0x20] sm:$0xff] %vm36_vm2, %v470_v31  ;;  %v289_v49 = vld [vmem:[%s719_s6] sm:$0x1]  ;;  %v281_v51 = vsub.f32 %v280_v47, %v279_v46 }
   0x9   :  { %v467_v2 = vld [vmem:[#allocation3] ss:$0 sm:$0xff]  ;;  %42 = vst.msk [vmem:[#allocation2 + $0x28] sm:$0xff] %vm36_vm2, %v470_v31 }
   0xa   :  { %77 = vperm.xlu0 %466, %v467_v2   ;;  %v53_v3 = vld [vmem:[#allocation3] sm:$0x1]  ;;  %43 = vst.msk [vmem:[#allocation2 + $0x30] sm:$0xff] %vm36_vm2, %v470_v31 }
   0xb   :  { %44 = vst.msk [vmem:[#allocation2 + $0x38] sm:$0xff] %vm36_vm2, %v470_v31  ;;  %v290_v50 = vld [vmem:[%s720_s7] sm:$0x1] }
   0xc   :  { %45 = vst.msk [vmem:[#allocation2 + $0x40] sm:$0xff] %vm36_vm2, %v470_v31  ;;  %v90_v53 = vld [vmem:[#allocation2] sm:$0xff]  ;;  %v291_v55 = vsub.f32 %v290_v50, %v289_v49  ;;  %v91_v1 = vld [vmem:[#allocation2 + $0x8] sm:$0xff] }
   0xd   :  { %46 = vst.msk [vmem:[#allocation2 + $0x48] sm:$0xff] %vm36_vm2, %v470_v31  ;;  %v92_v25 = vld [vmem:[#allocation2 + $0x10] sm:$0xff] }
   0xe   :  { %47 = vst.msk [vmem:[#allocation2 + $0x50] sm:$0xff] %vm36_vm2, %v470_v31 }
   0xf   :  { %48 = vst.msk [vmem:[#allocation2 + $0x58] sm:$0xff] %vm36_vm2, %v470_v31  ;;  %v94_v54 = vld [vmem:[#allocation2 + $0x20] sm:$0xff] }
  0x10   :  { %49 = vst.msk [vmem:[#allocation2 + $0x60] sm:$0xff] %vm36_vm2, %v470_v31  ;;  %v95_v2 = vld [vmem:[#allocation2 + $0x28] sm:$0xff] }
  0x11   :  { %50 = vst.msk [vmem:[#allocation2 + $0x68] sm:$0xff] %vm36_vm2, %v470_v31 }
  0x12   :  { %283 = vperm.xlu0 %466, %v53_v3   ;;  %51 = vst.msk [vmem:[#allocation2 + $0x70] sm:$0xff] %vm36_vm2, %v470_v31 }
  0x13   :  { %52 = vst.msk [vmem:[#allocation2 + $0x78] sm:$0xff] %vm36_vm2, %v470_v31  ;;  %v98_v63 = vld [vmem:[#allocation2 + $0x40] sm:$0xff] }
  0x15   :  { %v100_v50 = vld [vmem:[#allocation2 + $0x50] sm:$0xff] }
  0x17   :  { %v102_v0 = vld [vmem:[#allocation2 + $0x60] sm:$0xff] }
  0x7c   :  { %v78_v22 = vpop.permute.xlu0 %77 }
  0x7d   :  { %v82_v23 = vmul.f32 %v78_v22, %v72_v18  ;;  %v83_v24 = vmul.f32 %v78_v22, %v73_v19  ;;  %v80_v27 = vmul.f32 %v78_v22, %v70_v20  ;;  %v81_v28 = vmul.f32 %v78_v22, %v71_v21  ;;  %v99_v19 = vld [vmem:[#allocation2 + $0x48] sm:$0xff] }
  0x7e   :  { %v103_v21 = vld [vmem:[#allocation2 + $0x68] sm:$0xff] }
  0x7f   :  { %v86_v29 = vadd.f32 %v82_v23, %v60_v10  ;;  %v87_v30 = vadd.f32 %v83_v24, %v61_v11  ;;  %v84_v34 = vadd.f32 %v451_v14, %v80_v27  ;;  %v85_v35 = vadd.f32 %v452_v15, %v81_v28 }
  0x81   :  { %v89_v33 = vpack.c.bf16 %v87_v30, %v86_v29  ;;  %v88_v37 = vpack.c.bf16 %v85_v35, %v84_v34  ;;  %v96_v29 = vld [vmem:[#allocation2 + $0x30] sm:$0xff] }
  0x83   :  { %v192_v36 = vand.u32 %v190_v32, %v89_v33 }
  0x84   :  { %v284_v48 = vpop.permute.xlu0 %283 }
  0x85   :  { %200 = vmatpush.bf16.msra.mxu0 %v192_v36  ;;  %457 = vmatpush.bf16.msra.mxu1 %v192_v36  ;;  %v286_v52 = vperm.slane %v284_v48, 0 }
  0x86   :  { %458 = vmatpush.bf16.msra.mxu2 %v192_v36  ;;  %459 = vmatpush.bf16.msra.mxu3 %v192_v36 }
  0x87   :  { %v287_v58 = vmul.f32 %v286_v52, %v281_v51  ;;  %v292_v61 = vmul.f32 %v291_v55, %v286_v52  ;;  %v104_v55 = vld [vmem:[#allocation2 + $0x70] sm:$0xff] }
  0x89   :  { %201 = vmatpush.bf16.msra.mxu0 %v88_v37  ;;  %460 = vmatpush.bf16.msra.mxu1 %v88_v37  ;;  %v288_v62 = vadd.f32 %v287_v58, %v279_v46  ;;  %v293_v3 = vadd.f32 %v292_v61, %v289_v49 }
  0x8a   :  { %461 = vmatpush.bf16.msra.mxu2 %v88_v37  ;;  %462 = vmatpush.bf16.msra.mxu3 %v88_v37 }
  0x8b   :  { %v599_v10 = vperm.slane %v288_v62, 0  ;;  %v602_v14 = vperm.slane %v293_v3, 0 }
  0x8c   :  { %433 = vmatmul.msk.bf16.vlgmr.msra.gmra.mxu0 %vm162_vm3, %v441_v38  ;;  %435 = vmatmul.msk.bf16.vlgmr.msra.gmra.mxu1 %vm162_vm3, %v443_v39 }
  0x8d   :  { %437 = vmatmul.msk.bf16.vlgmr.msra.gmra.mxu2 %vm162_vm3, %v445_v40  ;;  %439 = vmatmul.msk.bf16.vlgmr.msra.gmra.mxu3 %vm162_vm3, %v447_v41 }
  0x9c   :  { %434 = vmatmul.msk.bf16.gmra.mxu0 %vm162_vm3, %v442_v42  ;;  %436 = vmatmul.msk.bf16.gmra.mxu1 %vm162_vm3, %v444_v43 }
  0x9d   :  { %438 = vmatmul.msk.bf16.gmra.mxu2 %vm162_vm3, %v446_v44  ;;  %440 = vmatmul.msk.bf16.gmra.mxu3 %vm162_vm3, %v448_v45 }
 0x109   :  { %v203_v56 = vpop.f32.mrf.mxu0  ;;  %v213_v57 = vpop.f32.mrf.mxu1 }
 0x10a   :  { %v243_v59 = vadd.f32 %v203_v56, %v90_v53  ;;  %v247_v60 = vadd.f32 %v213_v57, %v94_v54 }
 0x10c   :  { %260 = vst.msk [vmem:[#allocation2] sm:$0xff] %vm36_vm2, %v243_v59  ;;  %v93_v59 = vld [vmem:[#allocation2 + $0x18] sm:$0xff] }
 0x10d   :  { %264 = vst.msk [vmem:[#allocation2 + $0x20] sm:$0xff] %vm36_vm2, %v247_v60 }
 0x110   :  { %v223_v4 = vpop.f32.mrf.mxu2  ;;  %v233_v5 = vpop.f32.mrf.mxu3 }
 0x111   :  { %v251_v6 = vadd.f32 %v223_v4, %v98_v63  ;;  %v255_v7 = vadd.f32 %v233_v5, %v102_v0  ;;  %v205_v8 = vpop.f32.mrf.mxu0  ;;  %v215_v9 = vpop.f32.mrf.mxu1  ;;  %v97_v0 = vld [vmem:[#allocation2 + $0x38] sm:$0xff] }
 0x112   :  { %v244_v11 = vadd.f32 %v205_v8, %v91_v1  ;;  %v248_v12 = vadd.f32 %v215_v9, %v95_v2 }
 0x113   :  { %v294_v13 = vld [vmem:[#allocation2] sm:$0xff]  ;;  %268 = vst.msk [vmem:[#allocation2 + $0x40] sm:$0xff] %vm36_vm2, %v251_v6 }
 0x114   :  { %v313_v15 = vmul.f32 %v599_v10, %v294_v13  ;;  %v298_v16 = vld [vmem:[#allocation2 + $0x20] sm:$0xff]  ;;  %272 = vst.msk [vmem:[#allocation2 + $0x60] sm:$0xff] %vm36_vm2, %v255_v7 }
 0x115   :  { %v317_v17 = vmul.f32 %v599_v10, %v298_v16  ;;  %261 = vst.msk [vmem:[#allocation2 + $0x8] sm:$0xff] %vm36_vm2, %v244_v11  ;;  %v101_v11 = vld [vmem:[#allocation2 + $0x58] sm:$0xff] }
 0x116   :  { %v332_v18 = vadd.f32 %v602_v14, %v313_v15  ;;  %265 = vst.msk [vmem:[#allocation2 + $0x28] sm:$0xff] %vm36_vm2, %v248_v12  ;;  %v105_v12 = vld [vmem:[#allocation2 + $0x78] sm:$0xff] }
 0x117   :  { %v336_v20 = vadd.f32 %v602_v14, %v317_v17 }
 0x118   :  { %v348_v22 = vmax.f32 %v332_v18, 0.0  ;;  %v225_v23 = vpop.f32.mrf.mxu2  ;;  %v235_v24 = vpop.f32.mrf.mxu3 }
 0x119   :  { %v352_v26 = vmax.f32 %v336_v20, 0.0  ;;  %v252_v27 = vadd.f32 %v225_v23, %v99_v19  ;;  %v208_v28 = vpop.f32.mrf.mxu0  ;;  %v218_v30 = vpop.f32.mrf.mxu1  ;;  %v256_v33 = vadd.f32 %v235_v24, %v103_v21 }
 0x11a   :  { %v364_v31 = vpack.c.bf16 %v348_v22, %v348_v22  ;;  %v302_v32 = vld [vmem:[#allocation2 + $0x40] sm:$0xff]  ;;  %v245_v37 = vadd.f32 %v208_v28, %v92_v25  ;;  %v249_v40 = vadd.f32 %v218_v30, %v96_v29 }
 0x11b   :  { %v368_v34 = vpack.c.bf16 %v352_v26, %v352_v26  ;;  %v321_v35 = vmul.f32 %v599_v10, %v302_v32  ;;  %v306_v36 = vld [vmem:[#allocation2 + $0x60] sm:$0xff]  ;;  %269 = vst.msk [vmem:[#allocation2 + $0x48] sm:$0xff] %vm36_vm2, %v252_v27 }
 0x11c   :  { %381 = vst.msk [vmem:[%s721_s8] sm:$0xf] %vm380_vm4, %v364_v31  ;;  %v325_v38 = vmul.f32 %v599_v10, %v306_v36  ;;  %v295_v39 = vld [vmem:[#allocation2 + $0x8] sm:$0xff] }
 0x11d   :  { %385 = vst.msk [vmem:[%s721_s8 + $0x10] sm:$0xf] %vm380_vm4, %v368_v34  ;;  %v340_v41 = vadd.f32 %v602_v14, %v321_v35  ;;  %v314_v42 = vmul.f32 %v599_v10, %v295_v39  ;;  %v299_v43 = vld [vmem:[#allocation2 + $0x28] sm:$0xff] }
 0x11e   :  { %v344_v44 = vadd.f32 %v602_v14, %v325_v38  ;;  %v318_v45 = vmul.f32 %v599_v10, %v299_v43  ;;  %273 = vst.msk [vmem:[#allocation2 + $0x68] sm:$0xff] %vm36_vm2, %v256_v33 }
 0x11f   :  { %v356_v46 = vmax.f32 %v340_v41, 0.0  ;;  %v333_v47 = vadd.f32 %v602_v14, %v314_v42  ;;  %262 = vst.msk [vmem:[#allocation2 + $0x10] sm:$0xff] %vm36_vm2, %v245_v37 }
 0x120   :  { %v360_v48 = vmax.f32 %v344_v44, 0.0  ;;  %v337_v49 = vadd.f32 %v602_v14, %v318_v45  ;;  %266 = vst.msk [vmem:[#allocation2 + $0x30] sm:$0xff] %vm36_vm2, %v249_v40  ;;  %v228_v51 = vpop.f32.mrf.mxu2  ;;  %v238_v52 = vpop.f32.mrf.mxu3 }
 0x121   :  { %v372_v53 = vpack.c.bf16 %v356_v46, %v356_v46  ;;  %v349_v54 = vmax.f32 %v333_v47, 0.0  ;;  %v210_v60 = vpop.f32.mrf.mxu0  ;;  %v253_v63 = vadd.f32 %v228_v51, %v100_v50  ;;  %v220_v1 = vpop.f32.mrf.mxu1  ;;  %v257_v3 = vadd.f32 %v238_v52, %v104_v55 }
 0x122   :  { %v376_v56 = vpack.c.bf16 %v360_v48, %v360_v48  ;;  %v353_v57 = vmax.f32 %v337_v49, 0.0  ;;  %v303_v58 = vld [vmem:[#allocation2 + $0x48] sm:$0xff]  ;;  %v246_v6 = vadd.f32 %v210_v60, %v93_v59  ;;  %v250_v9 = vadd.f32 %v220_v1, %v97_v0 }
 0x123   :  { %389 = vst.msk [vmem:[%s721_s8 + $0x20] sm:$0xf] %vm380_vm4, %v372_v53  ;;  %v365_v61 = vpack.c.bf16 %v349_v54, %v349_v54  ;;  %v322_v62 = vmul.f32 %v599_v10, %v303_v58 }
 0x124   :  { %393 = vst.msk [vmem:[%s721_s8 + $0x30] sm:$0xf] %vm380_vm4, %v376_v56  ;;  %v369_v2 = vpack.c.bf16 %v353_v57, %v353_v57 }
 0x125   :  { %382 = vst.msk [vmem:[%s721_s8 + $0x4] sm:$0xf] %vm380_vm4, %v365_v61  ;;  %v341_v4 = vadd.f32 %v602_v14, %v322_v62  ;;  %v307_v5 = vld [vmem:[#allocation2 + $0x68] sm:$0xff] }
 0x126   :  { %386 = vst.msk [vmem:[%s721_s8 + $0x14] sm:$0xf] %vm380_vm4, %v369_v2  ;;  %v326_v7 = vmul.f32 %v599_v10, %v307_v5  ;;  %v296_v8 = vld [vmem:[#allocation2 + $0x10] sm:$0xff] }
 0x127   :  { %v357_v13 = vmax.f32 %v341_v4, 0.0  ;;  %v315_v15 = vmul.f32 %v599_v10, %v296_v8  ;;  %v300_v16 = vld [vmem:[#allocation2 + $0x30] sm:$0xff]  ;;  %270 = vst.msk [vmem:[#allocation2 + $0x50] sm:$0xff] %vm36_vm2, %v253_v63 }
 0x128   :  { %v345_v17 = vadd.f32 %v602_v14, %v326_v7  ;;  %v319_v18 = vmul.f32 %v599_v10, %v300_v16  ;;  %274 = vst.msk [vmem:[#allocation2 + $0x70] sm:$0xff] %vm36_vm2, %v257_v3  ;;  %v230_v19 = vpop.f32.mrf.mxu2  ;;  %v240_v20 = vpop.f32.mrf.mxu3 }
 0x129   :  { %v373_v21 = vpack.c.bf16 %v357_v13, %v357_v13  ;;  %v334_v22 = vadd.f32 %v602_v14, %v315_v15  ;;  %263 = vst.msk [vmem:[#allocation2 + $0x18] sm:$0xff] %vm36_vm2, %v246_v6  ;;  %v254_v23 = vadd.f32 %v230_v19, %v101_v11  ;;  %v258_v24 = vadd.f32 %v240_v20, %v105_v12 }
 0x12a   :  { %v361_v25 = vmax.f32 %v345_v17, 0.0  ;;  %v338_v26 = vadd.f32 %v602_v14, %v319_v18  ;;  %267 = vst.msk [vmem:[#allocation2 + $0x38] sm:$0xff] %vm36_vm2, %v250_v9 }
 0x12b   :  { %390 = vst.msk [vmem:[%s721_s8 + $0x24] sm:$0xf] %vm380_vm4, %v373_v21  ;;  %v350_v27 = vmax.f32 %v334_v22, 0.0 }
 0x12c   :  { %v377_v28 = vpack.c.bf16 %v361_v25, %v361_v25  ;;  %v354_v29 = vmax.f32 %v338_v26, 0.0  ;;  %271 = vst.msk [vmem:[#allocation2 + $0x58] sm:$0xff] %vm36_vm2, %v254_v23 }
 0x12d   :  { %v366_v30 = vpack.c.bf16 %v350_v27, %v350_v27  ;;  %275 = vst.msk [vmem:[#allocation2 + $0x78] sm:$0xff] %vm36_vm2, %v258_v24 }
 0x12e   :  { %394 = vst.msk [vmem:[%s721_s8 + $0x34] sm:$0xf] %vm380_vm4, %v377_v28  ;;  %v370_v31 = vpack.c.bf16 %v354_v29, %v354_v29  ;;  %v304_v32 = vld [vmem:[#allocation2 + $0x50] sm:$0xff] }
 0x12f   :  { %383 = vst.msk [vmem:[%s721_s8 + $0x8] sm:$0xf] %vm380_vm4, %v366_v30  ;;  %v323_v33 = vmul.f32 %v599_v10, %v304_v32  ;;  %v308_v34 = vld [vmem:[#allocation2 + $0x70] sm:$0xff] }
 0x130   :  { %387 = vst.msk [vmem:[%s721_s8 + $0x18] sm:$0xf] %vm380_vm4, %v370_v31  ;;  %v327_v35 = vmul.f32 %v599_v10, %v308_v34  ;;  %v297_v36 = vld [vmem:[#allocation2 + $0x18] sm:$0xff] }
 0x131   :  { %v342_v37 = vadd.f32 %v602_v14, %v323_v33  ;;  %v316_v38 = vmul.f32 %v599_v10, %v297_v36  ;;  %v301_v39 = vld [vmem:[#allocation2 + $0x38] sm:$0xff] }
 0x132   :  { %v346_v40 = vadd.f32 %v602_v14, %v327_v35  ;;  %v320_v41 = vmul.f32 %v599_v10, %v301_v39 }
 0x133   :  { %v358_v42 = vmax.f32 %v342_v37, 0.0  ;;  %v335_v43 = vadd.f32 %v602_v14, %v316_v38  ;;  %v305_v44 = vld [vmem:[#allocation2 + $0x58] sm:$0xff] }
 0x134   :  { %v362_v45 = vmax.f32 %v346_v40, 0.0  ;;  %v339_v46 = vadd.f32 %v602_v14, %v320_v41  ;;  %v324_v47 = vmul.f32 %v599_v10, %v305_v44  ;;  %v309_v48 = vld [vmem:[#allocation2 + $0x78] sm:$0xff] }
 0x135   :  { %v374_v49 = vpack.c.bf16 %v358_v42, %v358_v42  ;;  %v351_v50 = vmax.f32 %v335_v43, 0.0  ;;  %v328_v51 = vmul.f32 %v599_v10, %v309_v48 }
 0x136   :  { %v378_v52 = vpack.c.bf16 %v362_v45, %v362_v45  ;;  %v355_v53 = vmax.f32 %v339_v46, 0.0  ;;  %v343_v54 = vadd.f32 %v602_v14, %v324_v47 }
 0x137   :  { %391 = vst.msk [vmem:[%s721_s8 + $0x28] sm:$0xf] %vm380_vm4, %v374_v49  ;;  %v367_v55 = vpack.c.bf16 %v351_v50, %v351_v50  ;;  %v347_v56 = vadd.f32 %v602_v14, %v328_v51 }
 0x138   :  { %395 = vst.msk [vmem:[%s721_s8 + $0x38] sm:$0xf] %vm380_vm4, %v378_v52  ;;  %v371_v57 = vpack.c.bf16 %v355_v53, %v355_v53  ;;  %v359_v58 = vmax.f32 %v343_v54, 0.0 }
 0x139   :  { %384 = vst.msk [vmem:[%s721_s8 + $0xc] sm:$0xf] %vm380_vm4, %v367_v55  ;;  %v363_v10 = vmax.f32 %v347_v56, 0.0 }
 0x13a   :  { %388 = vst.msk [vmem:[%s721_s8 + $0x1c] sm:$0xf] %vm380_vm4, %v371_v57  ;;  %v375_v59 = vpack.c.bf16 %v359_v58, %v359_v58 }
 0x13b   :  { %v379_v14 = vpack.c.bf16 %v363_v10, %v363_v10 }
 0x13c   :  { %392 = vst.msk [vmem:[%s721_s8 + $0x2c] sm:$0xf] %vm380_vm4, %v375_v59 }
 0x13d   :  { %396 = vst.msk [vmem:[%s721_s8 + $0x3c] sm:$0xf] %vm380_vm4, %v379_v14 }

// kernel: combined_model_forward.7
= control target key start
LH: loop header
LB: loop body
LE: loop exit
PB: predicated region body
PF: predicated region fallthrough
CT: control target
= control target key end

     0   :  { %v285_v0 = vmov 0   ;;  %vm36_vm0 = vcmask 130048   ;;  %v286_v16 = vmov 0.0   ;;  %vm141_vm1 = vcmask 1043456   ;;  %s407_s0 = inlined_call_operand.<no memory space> [shape: f32[1,1], index: 0, kind: input, shape index: {}]   ;;  %s408_s2 = inlined_call_operand.vmem [shape: bf16[72,16], index: 2, kind: input, shape index: {}]   ;;  %s409_s3 = inlined_call_operand.vmem [shape: bf16[72,16], index: 3, kind: input, shape index: {}]   ;;  %s410_s1 = inlined_call_operand.vmem [shape: bf16[32,72], index: 1, kind: input, shape index: {}]   ;;  %s411_s4 = inlined_call_operand.vmem [shape: f32[1,16], index: 4, kind: input, shape index: {}]   ;;  %s412_s5 = inlined_call_operand.vmem [shape: f32[1,16], index: 5, kind: input, shape index: {}]   ;;  %s413_s6 = inlined_call_operand.vmem [shape: f32[1,16], index: 6, kind: input, shape index: {}]   ;;  %s414_s7 = inlined_call_operand.vmem [shape: f32[1,16], index: 7, kind: input, shape index: {}]   ;;  %s415_s8 = inlined_call_operand.vmem [shape: bf16[32,16], index: 8, kind: output, shape index: {}]  }
   0x1   :  { %283 = vset.pattern.permute.xlu0 %v285_v0  ;;  %v13_v1 = vstv %s407_s0  ;;  %v50_v4 = vld [vmem:[%s408_s2 + $0x20] sm:$0xf]  ;;  %v272_v6 = vld [vmem:[%s408_s2 + $0x18] sm:$0xff]   ;;  %v271_v14 = vld [vmem:[%s408_s2 + $0x10] sm:$0xff]   ;;  %37 = vst.msk [vmem:[#allocation2] sm:$0xff] %vm36_vm0, %v286_v16  ;;  %vm134_vm2 = vcmask 588800  }
   0x2   :  { %14 = vst [vmem:[#allocation3] sm:$0x1] %v13_v1  ;;  %v68_v5 = vld [vmem:[%s409_s3 + $0x20] sm:$0xf]  ;;  %v275_v7 = vld [vmem:[%s409_s3 + $0x18] sm:$0xff]   ;;  %v59_v8 = vunpack.c.l.bf16 %v50_v4  ;;  %v252_v10 = vunpack.c.l.bf16 %v272_v6  ;;  %v253_v11 = vunpack.c.h.bf16 %v272_v6  ;;  %v274_v15 = vld [vmem:[%s409_s3 + $0x10] sm:$0xff]   ;;  %v248_v18 = vunpack.c.l.bf16 %v271_v14 }
   0x3   :  { %v77_v9 = vunpack.c.l.bf16 %v68_v5  ;;  %v268_v12 = vunpack.c.l.bf16 %v275_v7  ;;  %v269_v13 = vunpack.c.h.bf16 %v275_v7  ;;  %v249_v19 = vunpack.c.h.bf16 %v271_v14  ;;  %v270_v20 = vld [vmem:[%s408_s2 + $0x8] sm:$0xff]   ;;  %38 = vst.msk [vmem:[#allocation2 + $0x8] sm:$0xff] %vm36_vm0, %v286_v16  ;;  %v239_v32 = vld [vmem:[%s408_s2] sm:$0xff]  }
   0x4   :  { %v273_v21 = vld [vmem:[%s409_s3 + $0x8] sm:$0xff]   ;;  %v264_v24 = vunpack.c.l.bf16 %v274_v15  ;;  %v265_v25 = vunpack.c.h.bf16 %v274_v15  ;;  %39 = vst.msk [vmem:[#allocation2 + $0x10] sm:$0xff] %vm36_vm0, %v286_v16  ;;  %v244_v27 = vunpack.c.l.bf16 %v270_v20  ;;  %v245_v30 = vunpack.c.h.bf16 %v270_v20  ;;  %v255_v37 = vld [vmem:[%s409_s3] sm:$0xff]  }
   0x5   :  { %v86_v17 = vsub.f32 %v77_v9, %v59_v8  ;;  %v84_v22 = vsub.f32 %v268_v12, %v252_v10  ;;  %v85_v23 = vsub.f32 %v269_v13, %v253_v11  ;;  %40 = vst.msk [vmem:[#allocation2 + $0x18] sm:$0xff] %vm36_vm0, %v286_v16  ;;  %v260_v28 = vunpack.c.l.bf16 %v273_v21  ;;  %v237_v4 = vld [vmem:[%s410_s1 + $0x8] sm:$0xff]  ;;  %v176_v5 = vld [vmem:[%s411_s4] sm:$0x1] }
   0x6   :  { %v261_v31 = vunpack.c.h.bf16 %v273_v21  ;;  %v82_v35 = vsub.f32 %v264_v24, %v248_v18  ;;  %v83_v36 = vsub.f32 %v265_v25, %v249_v19  ;;  %v240_v40 = vunpack.c.l.bf16 %v239_v32  ;;  %v177_v6 = vld [vmem:[%s412_s5] sm:$0x1] }
   0x7   :  { %v80_v39 = vsub.f32 %v260_v28, %v244_v27  ;;  %v241_v41 = vunpack.c.h.bf16 %v239_v32  ;;  %v256_v44 = vunpack.c.l.bf16 %v255_v37  ;;  %v257_v45 = vunpack.c.h.bf16 %v255_v37  ;;  %v187_v9 = vld [vmem:[%s414_s7] sm:$0x1] }
   0x8   :  { %v81_v43 = vsub.f32 %v261_v31, %v245_v30  ;;  %v116_v12 = vld [vmem:[#allocation2] sm:$0xff]  ;;  %vm217_vm3 = vcmask 125952  }
   0x9   :  { %v284_v2 = vld [vmem:[#allocation3] ss:$0 sm:$0xff]  ;;  %v78_v52 = vsub.f32 %v256_v44, %v240_v40  ;;  %v79_v53 = vsub.f32 %v257_v45, %v241_v41 }
   0xa   :  { %90 = vperm.xlu0 %283, %v284_v2   ;;  %v41_v3 = vld [vmem:[#allocation3] sm:$0x1] }
   0xb   :  { %v118_v13 = vld [vmem:[#allocation2 + $0x10] sm:$0xff] }
  0x12   :  { %180 = vperm.xlu0 %283, %v41_v3   ;;  %v236_v3 = vld [vmem:[%s410_s1] sm:$0xff] }
  0x7c   :  { %v91_v26 = vpop.permute.xlu0 %90 }
  0x7d   :  { %v101_v29 = vmul.f32 %v91_v26, %v86_v17  ;;  %v99_v33 = vmul.f32 %v91_v26, %v84_v22  ;;  %v100_v34 = vmul.f32 %v91_v26, %v85_v23  ;;  %v97_v48 = vmul.f32 %v91_v26, %v82_v35  ;;  %v117_v22 = vld [vmem:[#allocation2 + $0x8] sm:$0xff]  ;;  %v119_v23 = vld [vmem:[#allocation2 + $0x18] sm:$0xff] }
  0x7e   :  { %v98_v49 = vmul.f32 %v91_v26, %v83_v36  ;;  %v95_v51 = vmul.f32 %v91_v26, %v80_v39  ;;  %v96_v57 = vmul.f32 %v91_v26, %v81_v43  ;;  %v93_v58 = vmul.f32 %v91_v26, %v78_v52 }
  0x7f   :  { %v110_v38 = vadd.f32 %v101_v29, %v59_v8  ;;  %v108_v46 = vadd.f32 %v252_v10, %v99_v33  ;;  %v109_v47 = vadd.f32 %v253_v11, %v100_v34  ;;  %v106_v55 = vadd.f32 %v248_v18, %v97_v48  ;;  %v186_v8 = vld [vmem:[%s413_s6] sm:$0x1] }
  0x80   :  { %v107_v56 = vadd.f32 %v249_v19, %v98_v49  ;;  %v104_v60 = vadd.f32 %v244_v27, %v95_v51  ;;  %v105_v61 = vadd.f32 %v245_v30, %v96_v57  ;;  %v94_v62 = vmul.f32 %v91_v26, %v79_v53 }
  0x81   :  { %v115_v42 = vpack.c.bf16 %v110_v38, %v110_v38  ;;  %v114_v54 = vpack.c.bf16 %v109_v47, %v108_v46  ;;  %v102_v0 = vadd.f32 %v240_v40, %v93_v58  ;;  %v178_v10 = vsub.f32 %v177_v6, %v176_v5 }
  0x82   :  { %v113_v59 = vpack.c.bf16 %v107_v56, %v106_v55  ;;  %v112_v63 = vpack.c.bf16 %v105_v61, %v104_v60  ;;  %v103_v1 = vadd.f32 %v241_v41, %v94_v62  ;;  %v188_v14 = vsub.f32 %v187_v9, %v186_v8 }
  0x83   :  { %v143_v50 = vsel %vm141_vm1, %v115_v42, 0 }
  0x84   :  { %148 = vmatpush.bf16.msra.mxu0 %v143_v50  ;;  %276 = vmatpush.bf16.msra.mxu1 %v143_v50  ;;  %v111_v2 = vpack.c.bf16 %v103_v1, %v102_v0  ;;  %v181_v7 = vpop.permute.xlu0 %180 }
  0x85   :  { %v183_v11 = vperm.slane %v181_v7, 0 }
  0x87   :  { %v184_v17 = vmul.f32 %v183_v11, %v178_v10  ;;  %v189_v20 = vmul.f32 %v188_v14, %v183_v11 }
  0x88   :  { %149 = vmatpush.bf16.msra.mxu0 %v114_v54  ;;  %277 = vmatpush.bf16.msra.mxu1 %v114_v54 }
  0x89   :  { %v185_v21 = vadd.f32 %v184_v17, %v176_v5  ;;  %v190_v24 = vadd.f32 %v189_v20, %v186_v8 }
  0x8b   :  { %v196_v27 = vperm.slane %v185_v21, 0  ;;  %v203_v31 = vperm.slane %v190_v24, 0 }
  0x8c   :  { %150 = vmatpush.bf16.msra.mxu0 %v113_v59  ;;  %278 = vmatpush.bf16.msra.mxu1 %v113_v59 }
  0x90   :  { %151 = vmatpush.bf16.msra.mxu0 %v112_v63  ;;  %279 = vmatpush.bf16.msra.mxu1 %v112_v63 }
  0x94   :  { %152 = vmatpush.bf16.msra.mxu0 %v111_v2  ;;  %280 = vmatpush.bf16.msra.mxu1 %v111_v2 }
  0x97   :  { %234 = vmatmul.msk.bf16.vlgmr.msra.gmra.mxu0 %vm134_vm2, %v236_v3  ;;  %235 = vmatmul.msk.bf16.vlgmr.msra.gmra.mxu1 %vm134_vm2, %v237_v4 }
 0x114   :  { %v154_v15 = vpop.f32.mrf.mxu0  ;;  %v159_v16 = vpop.f32.mrf.mxu1 }
 0x115   :  { %v164_v18 = vadd.f32 %v154_v15, %v116_v12  ;;  %v166_v19 = vadd.f32 %v159_v16, %v118_v13 }
 0x117   :  { %169 = vst.msk [vmem:[#allocation2] sm:$0xff] %vm36_vm0, %v164_v18 }
 0x118   :  { %171 = vst.msk [vmem:[#allocation2 + $0x10] sm:$0xff] %vm36_vm0, %v166_v19 }
 0x11c   :  { %v156_v25 = vpop.f32.mrf.mxu0  ;;  %v161_v26 = vpop.f32.mrf.mxu1 }
 0x11d   :  { %v165_v28 = vadd.f32 %v156_v25, %v117_v22  ;;  %v167_v29 = vadd.f32 %v161_v26, %v119_v23 }
 0x11e   :  { %v191_v30 = vld [vmem:[#allocation2] sm:$0xff] }
 0x11f   :  { %v198_v32 = vmul.f32 %v196_v27, %v191_v30  ;;  %v193_v33 = vld [vmem:[#allocation2 + $0x10] sm:$0xff]  ;;  %170 = vst.msk [vmem:[#allocation2 + $0x8] sm:$0xff] %vm36_vm0, %v165_v28 }
 0x120   :  { %v200_v34 = vmul.f32 %v196_v27, %v193_v33  ;;  %172 = vst.msk [vmem:[#allocation2 + $0x18] sm:$0xff] %vm36_vm0, %v167_v29 }
 0x121   :  { %v205_v35 = vadd.f32 %v203_v31, %v198_v32 }
 0x122   :  { %v207_v36 = vadd.f32 %v203_v31, %v200_v34 }
 0x123   :  { %v209_v37 = vmax.f32 %v205_v35, 0.0 }
 0x124   :  { %v211_v38 = vmax.f32 %v207_v36, 0.0 }
 0x125   :  { %v213_v39 = vpack.c.bf16 %v209_v37, %v209_v37 }
 0x126   :  { %v215_v40 = vpack.c.bf16 %v211_v38, %v211_v38  ;;  %v192_v41 = vld [vmem:[#allocation2 + $0x8] sm:$0xff] }
 0x127   :  { %218 = vst.msk [vmem:[%s415_s8] sm:$0xf] %vm217_vm3, %v213_v39  ;;  %v199_v42 = vmul.f32 %v196_v27, %v192_v41  ;;  %v194_v43 = vld [vmem:[#allocation2 + $0x18] sm:$0xff] }
 0x128   :  { %220 = vst.msk [vmem:[%s415_s8 + $0x8] sm:$0xf] %vm217_vm3, %v215_v40  ;;  %v201_v44 = vmul.f32 %v196_v27, %v194_v43 }
 0x129   :  { %v206_v45 = vadd.f32 %v203_v31, %v199_v42 }
 0x12a   :  { %v208_v46 = vadd.f32 %v203_v31, %v201_v44 }
 0x12b   :  { %v210_v47 = vmax.f32 %v206_v45, 0.0 }
 0x12c   :  { %v212_v48 = vmax.f32 %v208_v46, 0.0 }
 0x12d   :  { %v214_v49 = vpack.c.bf16 %v210_v47, %v210_v47 }
 0x12e   :  { %v216_v50 = vpack.c.bf16 %v212_v48, %v212_v48 }
 0x12f   :  { %219 = vst.msk [vmem:[%s415_s8 + $0x4] sm:$0xf] %vm217_vm3, %v214_v49 }
 0x130   :  { %221 = vst.msk [vmem:[%s415_s8 + $0xc] sm:$0xf] %vm217_vm3, %v216_v50 }

// kernel: combined_model_forward.8
= control target key start
LH: loop header
LB: loop body
LE: loop exit
PB: predicated region body
PF: predicated region fallthrough
CT: control target
= control target key end

     0   :  { %v349_v0 = vmov 0   ;;  %vm188_vm0 = vcmask 130048   ;;  %vm36_vm1 = vcmask 261120   ;;  %vm250_vm2 = vcmask 257024   ;;  %s521_s0 = inlined_call_operand.<no memory space> [shape: f32[1,1], index: 0, kind: input, shape index: {}]   ;;  %s522_s2 = inlined_call_operand.vmem [shape: bf16[144,32], index: 2, kind: input, shape index: {}]   ;;  %s523_s3 = inlined_call_operand.vmem [shape: bf16[144,32], index: 3, kind: input, shape index: {}]   ;;  %s524_s1 = inlined_call_operand.vmem [shape: bf16[8,144], index: 1, kind: input, shape index: {}]   ;;  %s525_s4 = inlined_call_operand.vmem [shape: f32[1,32], index: 4, kind: input, shape index: {}]   ;;  %s526_s5 = inlined_call_operand.vmem [shape: f32[1,32], index: 5, kind: input, shape index: {}]   ;;  %s527_s6 = inlined_call_operand.vmem [shape: f32[1,32], index: 6, kind: input, shape index: {}]   ;;  %s528_s7 = inlined_call_operand.vmem [shape: f32[1,32], index: 7, kind: input, shape index: {}]   ;;  %s529_s8 = inlined_call_operand.vmem [shape: bf16[8,32], index: 8, kind: output, shape index: {}]  }
   0x1   :  { %347 = vset.pattern.permute.xlu0 %v349_v0  ;;  %v13_v1 = vstv %s521_s0  ;;  %v335_v4 = vld [vmem:[%s522_s2 + $0x38] sm:$0xff]   ;;  %v336_v6 = vld [vmem:[%s522_s2 + $0x40] sm:$0xff]   ;;  %v414_v8 = vld [vmem:[%s522_s2 + $0x30] sm:$0xff]  }
   0x2   :  { %14 = vst [vmem:[#allocation3] sm:$0x1] %v13_v1  ;;  %v343_v5 = vld [vmem:[%s523_s3 + $0x38] sm:$0xff]   ;;  %v344_v7 = vld [vmem:[%s523_s3 + $0x40] sm:$0xff]   ;;  %v342_v9 = vld [vmem:[%s523_s3 + $0x30] sm:$0xff]   ;;  %v287_v10 = vunpack.c.l.bf16 %v335_v4  ;;  %v288_v11 = vunpack.c.h.bf16 %v335_v4  ;;  %v291_v16 = vunpack.c.l.bf16 %v336_v6  ;;  %v292_v17 = vunpack.c.h.bf16 %v336_v6 }
   0x3   :  { %v323_v12 = vunpack.c.l.bf16 %v343_v5  ;;  %v324_v13 = vunpack.c.h.bf16 %v343_v5  ;;  %v422_v14 = vld [vmem:[%s522_s2 + $0x28] sm:$0xff]   ;;  %v327_v18 = vunpack.c.l.bf16 %v344_v7  ;;  %v328_v19 = vunpack.c.h.bf16 %v344_v7  ;;  %v434_v28 = vld [vmem:[%s522_s2 + $0x20] sm:$0xff]   ;;  %v442_v34 = vld [vmem:[%s522_s2 + $0x18] sm:$0xff]  }
   0x4   :  { %v341_v15 = vld [vmem:[%s523_s3 + $0x28] sm:$0xff]   ;;  %v283_v20 = vunpack.c.l.bf16 %v414_v8  ;;  %v284_v21 = vunpack.c.h.bf16 %v414_v8  ;;  %v319_v22 = vunpack.c.l.bf16 %v342_v9  ;;  %v320_v23 = vunpack.c.h.bf16 %v342_v9  ;;  %v340_v29 = vld [vmem:[%s523_s3 + $0x20] sm:$0xff]   ;;  %v339_v35 = vld [vmem:[%s523_s3 + $0x18] sm:$0xff]  }
   0x5   :  { %v279_v24 = vunpack.c.l.bf16 %v422_v14  ;;  %v280_v25 = vunpack.c.h.bf16 %v422_v14  ;;  %v315_v26 = vunpack.c.l.bf16 %v341_v15  ;;  %v316_v27 = vunpack.c.h.bf16 %v341_v15  ;;  %v452_v43 = vld [vmem:[%s524_s1] sm:$0xff]  ;;  %v330_v1 = vld [vmem:[%s522_s2 + $0x10] sm:$0xff]   ;;  %v329_v15 = vld [vmem:[%s522_s2 + $0x8] sm:$0xff]  }
   0x6   :  { %v125_v30 = vsub.f32 %v323_v12, %v287_v10  ;;  %v126_v31 = vsub.f32 %v324_v13, %v288_v11  ;;  %v127_v32 = vsub.f32 %v327_v18, %v291_v16  ;;  %v128_v33 = vsub.f32 %v328_v19, %v292_v17  ;;  %v338_v6 = vld [vmem:[%s523_s3 + $0x10] sm:$0xff]  }
   0x7   :  { %v123_v36 = vsub.f32 %v319_v22, %v283_v20  ;;  %v124_v37 = vsub.f32 %v320_v23, %v284_v21  ;;  %v275_v38 = vunpack.c.l.bf16 %v434_v28  ;;  %v121_v39 = vsub.f32 %v315_v26, %v279_v24 }
   0x8   :  { %v122_v40 = vsub.f32 %v316_v27, %v280_v25  ;;  %v276_v41 = vunpack.c.h.bf16 %v434_v28  ;;  %v311_v42 = vunpack.c.l.bf16 %v340_v29  ;;  %v312_v45 = vunpack.c.h.bf16 %v340_v29  ;;  %v258_v28 = vld [vmem:[%s522_s2] sm:$0xff]  }
   0x9   :  { %v348_v2 = vld [vmem:[#allocation3] ss:$0 sm:$0xff]  ;;  %v271_v46 = vunpack.c.l.bf16 %v442_v34  ;;  %v272_v47 = vunpack.c.h.bf16 %v442_v34  ;;  %v307_v48 = vunpack.c.l.bf16 %v339_v35  ;;  %v308_v55 = vunpack.c.h.bf16 %v339_v35 }
   0xa   :  { %132 = vperm.xlu0 %347, %v348_v2   ;;  %v38_v3 = vld [vmem:[#allocation3] sm:$0x1]  ;;  %v184_v56 = vunpack.c.h.b16 %v452_v43  ;;  %v119_v63 = vsub.f32 %v311_v42, %v275_v38  ;;  %v120_v0 = vsub.f32 %v312_v45, %v276_v41  ;;  %v267_v9 = vunpack.c.l.bf16 %v330_v1 }
   0xb   :  { %v117_v8 = vsub.f32 %v307_v48, %v271_v46  ;;  %v303_v13 = vunpack.c.l.bf16 %v338_v6  ;;  %v304_v14 = vunpack.c.h.bf16 %v338_v6  ;;  %v264_v22 = vunpack.c.h.bf16 %v329_v15  ;;  %v235_v6 = vld [vmem:[%s528_s7] sm:$0x1] }
   0xc   :  { %v186_v7 = vpack.c.b16 %v184_v56, %v184_v56 }
   0xd   :  { %v115_v26 = vsub.f32 %v303_v13, %v267_v9 }
  0x12   :  { %228 = vperm.xlu0 %347, %v38_v3  }
  0x7c   :  { %v454_v44 = vpop.permute.xlu0 %132 }
  0x7d   :  { %v149_v49 = vmul.f32 %v454_v44, %v125_v30  ;;  %v150_v50 = vmul.f32 %v454_v44, %v126_v31  ;;  %v151_v51 = vmul.f32 %v454_v44, %v127_v32  ;;  %v152_v52 = vmul.f32 %v454_v44, %v128_v33  ;;  %v294_v33 = vld [vmem:[%s523_s3] sm:$0xff]  }
  0x7e   :  { %v147_v53 = vmul.f32 %v454_v44, %v123_v36  ;;  %v148_v54 = vmul.f32 %v454_v44, %v124_v37  ;;  %v145_v61 = vmul.f32 %v454_v44, %v121_v39  ;;  %v146_v62 = vmul.f32 %v454_v44, %v122_v40 }
  0x7f   :  { %v167_v57 = vadd.f32 %v287_v10, %v149_v49  ;;  %v168_v58 = vadd.f32 %v288_v11, %v150_v50  ;;  %v169_v59 = vadd.f32 %v291_v16, %v151_v51  ;;  %v170_v60 = vadd.f32 %v292_v17, %v152_v52  ;;  %v337_v16 = vld [vmem:[%s523_s3 + $0x8] sm:$0xff]  }
  0x80   :  { %v165_v4 = vadd.f32 %v283_v20, %v147_v53  ;;  %v166_v5 = vadd.f32 %v284_v21, %v148_v54  ;;  %v268_v10 = vunpack.c.h.bf16 %v330_v1  ;;  %v163_v11 = vadd.f32 %v279_v24, %v145_v61 }
  0x81   :  { %v178_v2 = vpack.c.bf16 %v168_v58, %v167_v57  ;;  %v179_v3 = vpack.c.bf16 %v170_v60, %v169_v59  ;;  %v164_v12 = vadd.f32 %v280_v25, %v146_v62  ;;  %v143_v18 = vmul.f32 %v454_v44, %v119_v63 }
  0x82   :  { %v177_v17 = vpack.c.bf16 %v166_v5, %v165_v4  ;;  %v144_v19 = vmul.f32 %v454_v44, %v120_v0  ;;  %v118_v20 = vsub.f32 %v308_v55, %v272_v47  ;;  %v263_v21 = vunpack.c.l.bf16 %v329_v15  ;;  %v225_v4 = vld [vmem:[%s526_s5] sm:$0x1] }
  0x83   :  { %192 = vmatpush.bf16.msra.mxu0 %v178_v2  ;;  %212 = vmatpush.bf16.msra.mxu1 %v179_v3  ;;  %v299_v23 = vunpack.c.l.bf16 %v337_v16  ;;  %v300_v24 = vunpack.c.h.bf16 %v337_v16  ;;  %v176_v25 = vpack.c.bf16 %v164_v12, %v163_v11  ;;  %v116_v27 = vsub.f32 %v304_v14, %v268_v10  ;;  %v234_v5 = vld [vmem:[%s527_s6] sm:$0x1] }
  0x84   :  { %v161_v29 = vadd.f32 %v275_v38, %v143_v18  ;;  %v162_v30 = vadd.f32 %v276_v41, %v144_v19  ;;  %v141_v31 = vmul.f32 %v454_v44, %v117_v8  ;;  %v142_v32 = vmul.f32 %v454_v44, %v118_v20 }
  0x85   :  { %v113_v35 = vsub.f32 %v299_v23, %v263_v21  ;;  %v114_v36 = vsub.f32 %v300_v24, %v264_v22  ;;  %v259_v37 = vunpack.c.l.bf16 %v258_v28  ;;  %v139_v39 = vmul.f32 %v454_v44, %v115_v26 }
  0x86   :  { %256 = vmatmul.msk.bf16.vlgmr.msra.gmra.mxu1 %vm188_vm0, %v186_v7  ;;  %v260_v40 = vunpack.c.h.bf16 %v258_v28  ;;  %v295_v42 = vunpack.c.l.bf16 %v294_v33  ;;  %v296_v45 = vunpack.c.h.bf16 %v294_v33  ;;  %v175_v48 = vpack.c.bf16 %v162_v30, %v161_v29 }
  0x87   :  { %193 = vmatpush.bf16.msra.mxu0 %v177_v17  ;;  %v159_v38 = vadd.f32 %v271_v46, %v141_v31  ;;  %v160_v41 = vadd.f32 %v272_v47, %v142_v32  ;;  %v140_v49 = vmul.f32 %v454_v44, %v116_v27  ;;  %v137_v50 = vmul.f32 %v454_v44, %v113_v35 }
  0x88   :  { %v111_v51 = vsub.f32 %v295_v42, %v259_v37  ;;  %v112_v52 = vsub.f32 %v296_v45, %v260_v40  ;;  %v157_v54 = vadd.f32 %v267_v9, %v139_v39  ;;  %v138_v56 = vmul.f32 %v454_v44, %v114_v36 }
  0x89   :  { %v174_v53 = vpack.c.bf16 %v160_v41, %v159_v38  ;;  %v158_v55 = vadd.f32 %v268_v10, %v140_v49  ;;  %v155_v57 = vadd.f32 %v263_v21, %v137_v50  ;;  %v183_v62 = vunpack.c.l.b16 %v452_v43  ;;  %v229_v43 = vpop.permute.xlu0 %228 }
  0x8a   :  { %v156_v59 = vadd.f32 %v264_v22, %v138_v56  ;;  %v135_v46 = vmul.f32 %v454_v44, %v111_v51  ;;  %v136_v34 = vmul.f32 %v454_v44, %v112_v52  ;;  %v350_v1 = vmov 0.0   ;;  %v224_v44 = vld [vmem:[%s525_s4] sm:$0x1] }
  0x8b   :  { %194 = vmatpush.bf16.msra.mxu0 %v176_v25  ;;  %v173_v58 = vpack.c.bf16 %v158_v55, %v157_v54  ;;  %v185_v0 = vpack.c.b16 %v183_v62, %v183_v62  ;;  %37 = vst.msk [vmem:[#allocation2] sm:$0xff] %vm36_vm1, %v350_v1  ;;  %v226_v7 = vsub.f32 %v225_v4, %v224_v44  ;;  %v231_v8 = vperm.slane %v229_v43, 0 }
  0x8c   :  { %v172_v47 = vpack.c.bf16 %v156_v59, %v155_v57  ;;  %v153_v60 = vadd.f32 %v259_v37, %v135_v46  ;;  %v154_v61 = vadd.f32 %v260_v40, %v136_v34  ;;  %v236_v11 = vsub.f32 %v235_v6, %v234_v5 }
  0x8d   :  { %v232_v13 = vmul.f32 %v231_v8, %v226_v7 }
  0x8e   :  { %v171_v63 = vpack.c.bf16 %v154_v61, %v153_v60  ;;  %v237_v15 = vmul.f32 %v236_v11, %v231_v8 }
  0x8f   :  { %195 = vmatpush.bf16.msra.mxu0 %v175_v48  ;;  %v233_v16 = vadd.f32 %v232_v13, %v224_v44 }
  0x90   :  { %v238_v18 = vadd.f32 %v237_v15, %v234_v5 }
  0x91   :  { %v241_v19 = vperm.slane %v233_v16, 0 }
  0x92   :  { %v180_v9 = vld [vmem:[#allocation2] sm:$0xff]  ;;  %v245_v21 = vperm.slane %v238_v18, 0 }
  0x93   :  { %196 = vmatpush.bf16.msra.mxu0 %v174_v53 }
  0x97   :  { %197 = vmatpush.bf16.msra.mxu0 %v173_v58 }
  0x9b   :  { %198 = vmatpush.bf16.msra.mxu0 %v172_v47 }
  0x9f   :  { %199 = vmatpush.bf16.msra.mxu0 %v171_v63 }
  0xa2   :  { %200 = vmatmul.bf16.vlgmr.msra.gmra.mxu0 %v185_v0 }
 0x103   :  { %v214_v2 = vpop.f32.mrf.mxu1 }
 0x10b   :  { %v216_v3 = vpop.f32.mrf.mxu1 }
 0x11f   :  { %v201_v10 = vpop.f32.mrf.mxu0 }
 0x120   :  { %v215_v12 = vadd.f32 %v214_v2, %v201_v10 }
 0x122   :  { %v218_v14 = vadd.f32 %v215_v12, %v180_v9 }
 0x124   :  { %220 = vst.msk [vmem:[#allocation2] sm:$0xff] %vm36_vm1, %v218_v14 }
 0x127   :  { %v203_v17 = vpop.f32.mrf.mxu0 }
 0x12b   :  { %v239_v20 = vld [vmem:[#allocation2] sm:$0xff] }
 0x12c   :  { %v243_v22 = vmul.f32 %v241_v19, %v239_v20 }
 0x12e   :  { %v247_v23 = vadd.f32 %v245_v21, %v243_v22 }
 0x130   :  { %v248_v24 = vmax.f32 %v247_v23, 0.0 }
 0x132   :  { %v249_v25 = vpack.c.bf16 %v248_v24, %v248_v24 }
 0x134   :  { %251 = vst.msk [vmem:[%s529_s8] sm:$0xf] %vm250_vm2, %v249_v25 }

// kernel: combined_model_forward.9
= control target key start
LH: loop header
LB: loop body
LE: loop exit
PB: predicated region body
PF: predicated region fallthrough
CT: control target
= control target key end

     0   :  { %v592_v0 = vmov 0   ;;  %vm328_vm0 = vcmask 261120   ;;  %vm36_vm1 = vcmask 523264   ;;  %vm403_vm2 = vcmask 519168   ;;  %s1130_s0 = inlined_call_operand.<no memory space> [shape: f32[1,1], index: 0, kind: input, shape index: {}]   ;;  %s1131_s2 = inlined_call_operand.vmem [shape: bf16[288,64], index: 2, kind: input, shape index: {}]   ;;  %s1132_s3 = inlined_call_operand.vmem [shape: bf16[288,64], index: 3, kind: input, shape index: {}]   ;;  %s1133_s1 = inlined_call_operand.vmem [shape: bf16[8,288], index: 1, kind: input, shape index: {}]   ;;  %s1134_s4 = inlined_call_operand.vmem [shape: f32[1,64], index: 4, kind: input, shape index: {}]   ;;  %s1135_s5 = inlined_call_operand.vmem [shape: f32[1,64], index: 5, kind: input, shape index: {}]   ;;  %s1136_s6 = inlined_call_operand.vmem [shape: f32[1,64], index: 6, kind: input, shape index: {}]   ;;  %s1137_s7 = inlined_call_operand.vmem [shape: f32[1,64], index: 7, kind: input, shape index: {}]   ;;  %s1138_s8 = inlined_call_operand.vmem [shape: bf16[8,64], index: 8, kind: output, shape index: {}]  }
   0x1   :  { %590 = vset.pattern.permute.xlu0 %v592_v0  ;;  %v13_v1 = vstv %s1130_s0  ;;  %v645_v4 = vld [vmem:[%s1131_s2 + $0x38] sm:$0xff]   ;;  %v661_v8 = vld [vmem:[%s1131_s2 + $0x88] sm:$0xff]   ;;  %v671_v14 = vld [vmem:[%s1131_s2 + $0x30] sm:$0xff]  }
   0x2   :  { %14 = vst [vmem:[#allocation3] sm:$0x1] %v13_v1  ;;  %v577_v5 = vld [vmem:[%s1132_s3 + $0x38] sm:$0xff]   ;;  %v587_v9 = vld [vmem:[%s1132_s3 + $0x88] sm:$0xff]   ;;  %v1158_v10 = vunpack.c.l.bf16 %v645_v4  ;;  %v1157_v11 = vunpack.c.h.bf16 %v645_v4  ;;  %v576_v15 = vld [vmem:[%s1132_s3 + $0x30] sm:$0xff]   ;;  %v1154_v20 = vunpack.c.l.bf16 %v661_v8  ;;  %v1153_v21 = vunpack.c.h.bf16 %v661_v8 }
   0x3   :  { %v653_v6 = vld [vmem:[%s1131_s2 + $0x78] sm:$0xff]   ;;  %v512_v12 = vunpack.c.l.bf16 %v577_v5  ;;  %v513_v13 = vunpack.c.h.bf16 %v577_v5  ;;  %v552_v22 = vunpack.c.l.bf16 %v587_v9  ;;  %v553_v23 = vunpack.c.h.bf16 %v587_v9  ;;  %v685_v28 = vld [vmem:[%s1131_s2 + $0x70] sm:$0xff]   ;;  %v709_v34 = vld [vmem:[%s1131_s2 + $0x80] sm:$0xff]  }
   0x4   :  { %v585_v7 = vld [vmem:[%s1132_s3 + $0x78] sm:$0xff]   ;;  %v1156_v16 = vunpack.c.l.bf16 %v653_v6  ;;  %v1155_v17 = vunpack.c.h.bf16 %v653_v6  ;;  %v1152_v24 = vunpack.c.l.bf16 %v671_v14  ;;  %v1151_v25 = vunpack.c.h.bf16 %v671_v14  ;;  %v584_v29 = vld [vmem:[%s1132_s3 + $0x70] sm:$0xff]   ;;  %v586_v35 = vld [vmem:[%s1132_s3 + $0x80] sm:$0xff]  }
   0x5   :  { %v544_v18 = vunpack.c.l.bf16 %v585_v7  ;;  %v545_v19 = vunpack.c.h.bf16 %v585_v7  ;;  %v508_v26 = vunpack.c.l.bf16 %v576_v15  ;;  %v509_v27 = vunpack.c.h.bf16 %v576_v15  ;;  %v727_v40 = vld [vmem:[%s1131_s2 + $0x28] sm:$0xff]   ;;  %v753_v52 = vld [vmem:[%s1131_s2 + $0x20] sm:$0xff]  }
   0x6   :  { %v692_v30 = vsub.f32 %v512_v12, %v1158_v10  ;;  %v696_v31 = vsub.f32 %v513_v13, %v1157_v11  ;;  %v716_v36 = vsub.f32 %v552_v22, %v1154_v20  ;;  %v720_v37 = vsub.f32 %v553_v23, %v1153_v21  ;;  %v575_v41 = vld [vmem:[%s1132_s3 + $0x28] sm:$0xff]   ;;  %v574_v53 = vld [vmem:[%s1132_s3 + $0x20] sm:$0xff]   ;;  %v777_v13 = vld [vmem:[%s1131_s2 + $0x18] sm:$0xff]  }
   0x7   :  { %v700_v32 = vsub.f32 %v544_v18, %v1156_v16  ;;  %v704_v33 = vsub.f32 %v545_v19, %v1155_v17  ;;  %v1150_v38 = vunpack.c.l.bf16 %v685_v28  ;;  %v1149_v39 = vunpack.c.h.bf16 %v685_v28  ;;  %v743_v46 = vld [vmem:[%s1131_s2 + $0x68] sm:$0xff]   ;;  %v763_v58 = vld [vmem:[%s1131_s2 + $0x60] sm:$0xff]   ;;  %v573_v23 = vld [vmem:[%s1132_s3 + $0x18] sm:$0xff]  }
   0x8   :  { %v734_v42 = vsub.f32 %v508_v26, %v1152_v24  ;;  %v738_v43 = vsub.f32 %v509_v27, %v1151_v25  ;;  %v540_v44 = vunpack.c.l.bf16 %v584_v29  ;;  %v541_v45 = vunpack.c.h.bf16 %v584_v29  ;;  %v583_v47 = vld [vmem:[%s1132_s3 + $0x68] sm:$0xff]   ;;  %v582_v59 = vld [vmem:[%s1132_s3 + $0x60] sm:$0xff]  }
   0x9   :  { %v591_v2 = vld [vmem:[#allocation3] ss:$0 sm:$0xff]  ;;  %v1148_v48 = vunpack.c.l.bf16 %v709_v34  ;;  %v1147_v49 = vunpack.c.h.bf16 %v709_v34  ;;  %v548_v50 = vunpack.c.l.bf16 %v586_v35  ;;  %v549_v51 = vunpack.c.h.bf16 %v586_v35  ;;  %v885_v10 = vld [vmem:[%s1131_s2] sm:$0xff]  }
   0xa   :  { %222 = vperm.xlu0 %590, %v591_v2   ;;  %v38_v3 = vld [vmem:[#allocation3] sm:$0x1]  ;;  %v1146_v54 = vunpack.c.l.bf16 %v727_v40  ;;  %v1145_v55 = vunpack.c.h.bf16 %v727_v40  ;;  %v504_v56 = vunpack.c.l.bf16 %v575_v41  ;;  %v505_v57 = vunpack.c.h.bf16 %v575_v41  ;;  %v817_v41 = vld [vmem:[%s1131_s2 + $0x58] sm:$0xff]   ;;  %v906_v17 = vld [vmem:[%s1132_s3] sm:$0xff]  }
   0xb   :  { %v1144_v60 = vunpack.c.l.bf16 %v743_v46  ;;  %v1143_v61 = vunpack.c.h.bf16 %v743_v46  ;;  %v536_v62 = vunpack.c.l.bf16 %v583_v47  ;;  %v537_v63 = vunpack.c.h.bf16 %v583_v47 }
   0xc   :  { %v1141_v0 = vunpack.c.l.bf16 %v753_v52  ;;  %v1139_v1 = vunpack.c.h.bf16 %v753_v52  ;;  %v500_v2 = vunpack.c.l.bf16 %v574_v53  ;;  %v1140_v5 = vunpack.c.l.bf16 %v763_v58 }
   0xd   :  { %v1142_v7 = vunpack.c.h.bf16 %v763_v58  ;;  %v532_v9 = vunpack.c.l.bf16 %v582_v59  ;;  %v533_v12 = vunpack.c.h.bf16 %v582_v59  ;;  %v781_v15 = vsub.f32 %v540_v44, %v1150_v38  ;;  %v581_v44 = vld [vmem:[%s1132_s3 + $0x58] sm:$0xff]  }
   0xe   :  { %v785_v18 = vsub.f32 %v541_v45, %v1149_v39  ;;  %v789_v19 = vsub.f32 %v548_v50, %v1148_v48  ;;  %v793_v22 = vsub.f32 %v549_v51, %v1147_v49  ;;  %v800_v26 = vsub.f32 %v504_v56, %v1146_v54  ;;  %v572_v56 = vld [vmem:[%s1132_s3 + $0x10] sm:$0xff]   ;;  %v871_v54 = vld [vmem:[%s1131_s2 + $0x48] sm:$0xff]  }
   0xf   :  { %v804_v27 = vsub.f32 %v505_v57, %v1145_v55  ;;  %v808_v29 = vsub.f32 %v536_v62, %v1144_v60  ;;  %v812_v35 = vsub.f32 %v537_v63, %v1143_v61  ;;  %v824_v45 = vsub.f32 %v500_v2, %v1141_v0  ;;  %v851_v2 = vld [vmem:[%s1131_s2 + $0x50] sm:$0xff]  }
  0x10   :  { %v1168_v50 = vunpack.c.l.bf16 %v777_v13  ;;  %v1167_v51 = vunpack.c.h.bf16 %v777_v13  ;;  %v842_v57 = vsub.f32 %v532_v9, %v1140_v5  ;;  %v846_v59 = vsub.f32 %v533_v12, %v1142_v7  ;;  %v861_v12 = vld [vmem:[%s1131_s2 + $0x8] sm:$0xff]  }
  0x11   :  { %v496_v62 = vunpack.c.l.bf16 %v573_v23  ;;  %v497_v63 = vunpack.c.h.bf16 %v573_v23  ;;  %v1159_v9 = vunpack.c.h.bf16 %v817_v41  ;;  %v528_v5 = vunpack.c.l.bf16 %v581_v44  ;;  %v571_v23 = vld [vmem:[%s1132_s3 + $0x8] sm:$0xff]  }
  0x12   :  { %381 = vperm.xlu0 %590, %v38_v3   ;;  %v501_v3 = vunpack.c.h.bf16 %v574_v53  ;;  %v835_v53 = vld [vmem:[%s1131_s2 + $0x10] sm:$0xff]   ;;  %v529_v0 = vunpack.c.h.bf16 %v581_v44  ;;  %v492_v60 = vunpack.c.l.bf16 %v572_v56  ;;  %v493_v55 = vunpack.c.h.bf16 %v572_v56  ;;  %v579_v44 = vld [vmem:[%s1132_s3 + $0x48] sm:$0xff]  }
  0x13   :  { %v1161_v7 = vunpack.c.l.bf16 %v835_v53  ;;  %v1162_v61 = vunpack.c.h.bf16 %v835_v53  ;;  %v1165_v49 = vunpack.c.l.bf16 %v851_v2  ;;  %v1163_v48 = vunpack.c.h.bf16 %v851_v2 }
  0x14   :  { %v828_v47 = vsub.f32 %v501_v3, %v1139_v1  ;;  %v580_v3 = vld [vmem:[%s1132_s3 + $0x50] sm:$0xff]   ;;  %v1160_v1 = vunpack.c.l.bf16 %v817_v41  ;;  %v1164_v25 = vunpack.c.l.bf16 %v861_v12  ;;  %v488_v56 = vunpack.c.l.bf16 %v571_v23 }
  0x15   :  { %v524_v39 = vunpack.c.l.bf16 %v580_v3  ;;  %v525_v38 = vunpack.c.h.bf16 %v580_v3  ;;  %v489_v21 = vunpack.c.h.bf16 %v571_v23  ;;  %v1166_v20 = vunpack.c.l.bf16 %v871_v54 }
  0x16   :  { %v520_v16 = vunpack.c.l.bf16 %v579_v44  ;;  %v521_v11 = vunpack.c.h.bf16 %v579_v44  ;;  %v889_v3 = vsub.f32 %v496_v62, %v1168_v50  ;;  %v893_v24 = vsub.f32 %v497_v63, %v1167_v51 }
  0x17   :  { %v897_v23 = vsub.f32 %v528_v5, %v1160_v1  ;;  %v901_v44 = vsub.f32 %v529_v0, %v1159_v9  ;;  %v910_v62 = vsub.f32 %v492_v60, %v1161_v7  ;;  %v914_v63 = vsub.f32 %v493_v55, %v1162_v61 }
  0x18   :  { %v918_v5 = vsub.f32 %v524_v39, %v1165_v49  ;;  %v922_v0 = vsub.f32 %v525_v38, %v1163_v48  ;;  %v926_v9 = vsub.f32 %v488_v56, %v1164_v25  ;;  %v1169_v1 = vunpack.c.h.bf16 %v861_v12 }
  0x19   :  { %v938_v39 = vsub.f32 %v520_v16, %v1166_v20  ;;  %v1170_v38 = vunpack.c.h.bf16 %v871_v54  ;;  %v484_v56 = vunpack.c.l.bf16 %v906_v17  ;;  %v1176_v7 = vunpack.c.h.bf16 %v661_v8 }
  0x1a   :  { %v930_v60 = vsub.f32 %v489_v21, %v1169_v1 }
  0x1b   :  { %v942_v48 = vsub.f32 %v521_v11, %v1170_v38 }
  0x7c   :  { %v934_v61 = vpop.permute.xlu0 %222 }
  0x7d   :  { %v239_v21 = vmul.f32 %v934_v61, %v692_v30  ;;  %v240_v1 = vmul.f32 %v934_v61, %v696_v31  ;;  %v255_v49 = vmul.f32 %v934_v61, %v700_v32  ;;  %v256_v16 = vmul.f32 %v934_v61, %v704_v33 }
  0x7e   :  { %v259_v11 = vmul.f32 %v934_v61, %v716_v36  ;;  %v260_v38 = vmul.f32 %v934_v61, %v720_v37  ;;  %v237_v20 = vmul.f32 %v934_v61, %v734_v42  ;;  %v238_v30 = vmul.f32 %v934_v61, %v738_v43  ;;  %v973_v37 = vld [vmem:[%s1131_s2 + $0x40] sm:$0xff]  }
  0x7f   :  { %v1171_v31 = vunpack.c.l.bf16 %v645_v4  ;;  %v1172_v32 = vunpack.c.h.bf16 %v645_v4  ;;  %v1173_v33 = vunpack.c.l.bf16 %v653_v6  ;;  %v1174_v36 = vunpack.c.h.bf16 %v653_v6  ;;  %v317_v6 = vld [vmem:[%s1133_s1 + $0x8] sm:$0xf] }
  0x80   :  { %v1175_v42 = vunpack.c.l.bf16 %v661_v8  ;;  %v1177_v4 = vunpack.c.l.bf16 %v671_v14 }
  0x81   :  { %v275_v51 = vadd.f32 %v1171_v31, %v239_v21  ;;  %v276_v50 = vadd.f32 %v1172_v32, %v240_v1  ;;  %v291_v25 = vadd.f32 %v1173_v33, %v255_v49  ;;  %v292_v55 = vadd.f32 %v1174_v36, %v256_v16 }
  0x82   :  { %v295_v43 = vadd.f32 %v1175_v42, %v259_v11  ;;  %v296_v21 = vadd.f32 %v1176_v7, %v260_v38  ;;  %v273_v1 = vadd.f32 %v1177_v4, %v237_v20  ;;  %v1178_v31 = vunpack.c.h.bf16 %v671_v14 }
  0x83   :  { %v304_v16 = vpack.c.bf16 %v276_v50, %v275_v51  ;;  %v312_v32 = vpack.c.bf16 %v292_v55, %v291_v25  ;;  %v253_v33 = vmul.f32 %v934_v61, %v781_v15  ;;  %v254_v11 = vmul.f32 %v934_v61, %v785_v18 }
  0x84   :  { %v274_v49 = vadd.f32 %v1178_v31, %v238_v30  ;;  %v314_v8 = vpack.c.bf16 %v296_v21, %v295_v43  ;;  %v257_v7 = vmul.f32 %v934_v61, %v789_v19  ;;  %v258_v14 = vmul.f32 %v934_v61, %v793_v22 }
  0x85   :  { %v444_v20 = vunpack.c.l.bf16 %v973_v37  ;;  %332 = vmatpush.bf16.msra.mxu0 %v304_v16  ;;  %345 = vmatpush.bf16.msra.mxu1 %v312_v32  ;;  %v1179_v50 = vunpack.c.l.bf16 %v685_v28  ;;  %v1180_v51 = vunpack.c.h.bf16 %v685_v28  ;;  %v235_v18 = vmul.f32 %v934_v61, %v800_v26 }
  0x86   :  { %v322_v55 = vunpack.c.l.b16 %v317_v6  ;;  %364 = vmatpush.bf16.msra.mxu2 %v314_v8  ;;  %v1181_v19 = vunpack.c.l.bf16 %v709_v34  ;;  %v1182_v22 = vunpack.c.h.bf16 %v709_v34  ;;  %v236_v36 = vmul.f32 %v934_v61, %v804_v27 }
  0x87   :  { %v289_v25 = vadd.f32 %v1179_v50, %v253_v33  ;;  %v290_v15 = vadd.f32 %v1180_v51, %v254_v11  ;;  %v251_v42 = vmul.f32 %v934_v61, %v808_v29  ;;  %v303_v43 = vpack.c.bf16 %v274_v49, %v273_v1  ;;  %v578_v29 = vld [vmem:[%s1132_s3 + $0x40] sm:$0xff]  }
  0x88   :  { %v293_v38 = vadd.f32 %v1181_v19, %v257_v7  ;;  %v294_v30 = vadd.f32 %v1182_v22, %v258_v14  ;;  %v1183_v21 = vunpack.c.l.bf16 %v727_v40  ;;  %v252_v26 = vmul.f32 %v934_v61, %v812_v35 }
  0x89   :  { %v311_v28 = vpack.c.bf16 %v290_v15, %v289_v25  ;;  %v1184_v6 = vunpack.c.h.bf16 %v727_v40  ;;  %v1185_v34 = vunpack.c.l.bf16 %v743_v46  ;;  %v233_v27 = vmul.f32 %v934_v61, %v824_v45  ;;  %333 = vmatpush.bf16.msra.mxu0 %v303_v43 }
  0x8a   :  { %v271_v4 = vadd.f32 %v1183_v21, %v235_v18  ;;  %v313_v31 = vpack.c.bf16 %v294_v30, %v293_v38  ;;  %v1186_v1 = vunpack.c.h.bf16 %v743_v46  ;;  %v1187_v35 = vunpack.c.l.bf16 %v885_v10 }
  0x8b   :  { %v272_v16 = vadd.f32 %v1184_v6, %v236_v36  ;;  %v287_v32 = vadd.f32 %v1185_v34, %v251_v42  ;;  %346 = vmatpush.bf16.msra.mxu1 %v311_v28  ;;  %v445_v33 = vunpack.c.h.bf16 %v973_v37  ;;  %v234_v11 = vmul.f32 %v934_v61, %v828_v47  ;;  %v377_v37 = vld [vmem:[%s1134_s4] sm:$0x1] }
  0x8c   :  { %v288_v49 = vadd.f32 %v1186_v1, %v252_v26  ;;  %v183_v40 = vsub.f32 %v484_v56, %v1187_v35  ;;  %365 = vmatpush.bf16.msra.mxu2 %v313_v31  ;;  %v1188_v45 = vunpack.c.l.bf16 %v753_v52  ;;  %v249_v7 = vmul.f32 %v934_v61, %v842_v57 }
  0x8d   :  { %v325_v14 = vpack.c.b16 %v322_v55, %v322_v55  ;;  %v302_v50 = vpack.c.bf16 %v272_v16, %v271_v4  ;;  %v250_v25 = vmul.f32 %v934_v61, %v846_v59  ;;  %v516_v51 = vunpack.c.l.bf16 %v578_v29 }
  0x8e   :  { %v269_v8 = vadd.f32 %v1188_v45, %v233_v27  ;;  %v310_v46 = vpack.c.bf16 %v288_v49, %v287_v32  ;;  %v1189_v56 = vunpack.c.h.bf16 %v753_v52  ;;  %v1190_v18 = vunpack.c.l.bf16 %v763_v58 }
  0x8f   :  { %v231_v47 = vmul.f32 %v934_v61, %v889_v3  ;;  %v232_v38 = vmul.f32 %v934_v61, %v893_v24  ;;  %334 = vmatpush.bf16.msra.mxu0 %v302_v50  ;;  %v1191_v57 = vunpack.c.h.bf16 %v763_v58  ;;  %v247_v59 = vmul.f32 %v934_v61, %v897_v23  ;;  %409 = vmatmul.msk.bf16.vlgmr.msra.gmra.mxu2 %vm328_vm0, %v325_v14 }
  0x90   :  { %v270_v15 = vadd.f32 %v1189_v56, %v234_v11  ;;  %v285_v19 = vadd.f32 %v1190_v18, %v249_v7  ;;  %347 = vmatpush.bf16.msra.mxu1 %v310_v46  ;;  %v1192_v52 = vunpack.c.h.bf16 %v885_v10  ;;  %v1193_v22 = vunpack.c.h.bf16 %v906_v17 }
  0x91   :  { %v286_v55 = vadd.f32 %v1191_v57, %v250_v25  ;;  %v517_v36 = vunpack.c.h.bf16 %v578_v29  ;;  %v1194_v3 = vunpack.c.l.bf16 %v777_v13  ;;  %v1195_v24 = vunpack.c.h.bf16 %v777_v13 }
  0x92   :  { %v184_v30 = vsub.f32 %v1193_v22, %v1192_v52  ;;  %v301_v42 = vpack.c.bf16 %v270_v15, %v269_v8  ;;  %v248_v58 = vmul.f32 %v934_v61, %v901_v44  ;;  %v1196_v23 = vunpack.c.l.bf16 %v817_v41 }
  0x93   :  { %v267_v43 = vadd.f32 %v1194_v3, %v231_v47  ;;  %v268_v28 = vadd.f32 %v1195_v24, %v232_v38  ;;  %v309_v21 = vpack.c.bf16 %v286_v55, %v285_v19  ;;  %v229_v17 = vmul.f32 %v934_v61, %v910_v62  ;;  %v382_v3 = vpop.permute.xlu0 %381  ;;  %v388_v24 = vld [vmem:[%s1137_s7] sm:$0x1] }
  0x94   :  { %v283_v4 = vadd.f32 %v1196_v23, %v247_v59  ;;  %v230_v26 = vmul.f32 %v934_v61, %v914_v63  ;;  %v1197_v31 = vunpack.c.h.bf16 %v817_v41  ;;  %v245_v13 = vmul.f32 %v934_v61, %v918_v5  ;;  %335 = vmatpush.bf16.msra.mxu0 %v301_v42 }
  0x95   :  { %v246_v44 = vmul.f32 %v934_v61, %v922_v0  ;;  %v199_v16 = vsub.f32 %v516_v51, %v444_v20  ;;  %348 = vmatpush.bf16.msra.mxu1 %v309_v21  ;;  %v1198_v34 = vunpack.c.l.bf16 %v835_v53  ;;  %v1199_v32 = vunpack.c.h.bf16 %v835_v53 }
  0x96   :  { %v284_v6 = vadd.f32 %v1197_v31, %v248_v58  ;;  %v227_v41 = vmul.f32 %v934_v61, %v926_v9  ;;  %v1200_v27 = vunpack.c.l.bf16 %v851_v2  ;;  %v1201_v29 = vunpack.c.h.bf16 %v851_v2 }
  0x97   :  { %v265_v62 = vadd.f32 %v1198_v34, %v229_v17  ;;  %v266_v63 = vadd.f32 %v1199_v32, %v230_v26  ;;  %v228_v1 = vmul.f32 %v934_v61, %v930_v60  ;;  %v200_v49 = vsub.f32 %v517_v36, %v445_v33 }
  0x98   :  { %v281_v5 = vadd.f32 %v1200_v27, %v245_v13  ;;  %v282_v0 = vadd.f32 %v1201_v29, %v246_v44  ;;  %v300_v35 = vpack.c.bf16 %v268_v28, %v267_v43  ;;  %v308_v11 = vpack.c.bf16 %v284_v6, %v283_v4  ;;  %v387_v43 = vld [vmem:[%s1136_s6] sm:$0x1] }
  0x99   :  { %v243_v53 = vmul.f32 %v934_v61, %v938_v39  ;;  %v244_v9 = vmul.f32 %v934_v61, %v942_v48  ;;  %v299_v45 = vpack.c.bf16 %v266_v63, %v265_v62  ;;  %v1202_v2 = vunpack.c.l.bf16 %v861_v12 }
  0x9a   :  { %336 = vmatpush.bf16.msra.mxu0 %v300_v35  ;;  %349 = vmatpush.bf16.msra.mxu1 %v308_v11  ;;  %v307_v7 = vpack.c.bf16 %v282_v0, %v281_v5  ;;  %v1203_v60 = vunpack.c.h.bf16 %v861_v12  ;;  %v225_v50 = vmul.f32 %v934_v61, %v183_v40  ;;  %v226_v46 = vmul.f32 %v934_v61, %v184_v30  ;;  %v316_v12 = vld [vmem:[%s1133_s1] sm:$0xff] }
  0x9b   :  { %v263_v8 = vadd.f32 %v1202_v2, %v227_v41  ;;  %v1204_v25 = vunpack.c.l.bf16 %v871_v54  ;;  %v1205_v51 = vunpack.c.h.bf16 %v871_v54  ;;  %v241_v56 = vmul.f32 %v934_v61, %v199_v16 }
  0x9c   :  { %v264_v14 = vadd.f32 %v1203_v60, %v228_v1  ;;  %v242_v15 = vmul.f32 %v934_v61, %v200_v49  ;;  %v1206_v40 = vunpack.c.l.bf16 %v885_v10  ;;  %v1207_v38 = vmov %v1192_v52 }
  0x9d   :  { %v279_v39 = vadd.f32 %v1204_v25, %v243_v53  ;;  %v280_v48 = vadd.f32 %v1205_v51, %v244_v9  ;;  %v262_v57 = vadd.f32 %v1207_v38, %v226_v46  ;;  %v277_v54 = vadd.f32 %v444_v20, %v241_v56 }
  0x9e   :  { %337 = vmatpush.bf16.msra.mxu0 %v299_v45  ;;  %350 = vmatpush.bf16.msra.mxu1 %v307_v7  ;;  %v298_v18 = vpack.c.bf16 %v264_v14, %v263_v8  ;;  %v261_v19 = vadd.f32 %v1206_v40, %v225_v50  ;;  %v278_v61 = vadd.f32 %v445_v33, %v242_v15  ;;  %v320_v55 = vunpack.c.l.b16 %v316_v12  ;;  %v378_v33 = vld [vmem:[%s1135_s5] sm:$0x1] }
  0x9f   :  { %v306_v47 = vpack.c.bf16 %v280_v48, %v279_v39  ;;  %v321_v59 = vunpack.c.h.b16 %v316_v12  ;;  %v593_v10 = vmov 0.0   ;;  %v379_v21 = vsub.f32 %v378_v33, %v377_v37 }
  0xa0   :  { %v297_v52 = vpack.c.bf16 %v262_v57, %v261_v19  ;;  %v305_v22 = vpack.c.bf16 %v278_v61, %v277_v54  ;;  %v323_v30 = vpack.c.b16 %v320_v55, %v320_v55  ;;  %37 = vst.msk [vmem:[#allocation2] sm:$0xff] %vm36_vm1, %v593_v10  ;;  %v384_v23 = vperm.slane %v382_v3, 0 }
  0xa1   :  { %v324_v36 = vpack.c.b16 %v321_v59, %v321_v59  ;;  %v389_v26 = vsub.f32 %v388_v24, %v387_v43 }
  0xa2   :  { %338 = vmatpush.bf16.msra.mxu0 %v298_v18  ;;  %351 = vmatpush.bf16.msra.mxu1 %v306_v47  ;;  %v385_v6 = vmul.f32 %v384_v23, %v379_v21 }
  0xa3   :  { %v390_v44 = vmul.f32 %v389_v26, %v384_v23 }
  0xa4   :  { %v386_v62 = vadd.f32 %v385_v6, %v377_v37 }
  0xa5   :  { %v391_v32 = vadd.f32 %v390_v44, %v387_v43 }
  0xa6   :  { %339 = vmatpush.bf16.msra.mxu0 %v297_v52  ;;  %352 = vmatpush.bf16.msra.mxu1 %v305_v22  ;;  %v394_v63 = vperm.slane %v386_v62, 0 }
  0xa7   :  { %v315_v17 = vld [vmem:[#allocation2] sm:$0xff]  ;;  %v398_v27 = vperm.slane %v391_v32, 0 }
  0xa9   :  { %340 = vmatmul.bf16.vlgmr.msra.gmra.mxu0 %v323_v30  ;;  %353 = vmatmul.bf16.vlgmr.msra.gmra.mxu1 %v324_v36 }
 0x112   :  { %v367_v20 = vpop.f32.mrf.mxu2 }
 0x11a   :  { %v369_v42 = vpop.f32.mrf.mxu2 }
 0x126   :  { %v341_v28 = vpop.f32.mrf.mxu0  ;;  %v354_v58 = vpop.f32.mrf.mxu1 }
 0x127   :  { %v355_v4 = vadd.f32 %v354_v58, %v341_v28 }
 0x129   :  { %v368_v31 = vadd.f32 %v367_v20, %v355_v4 }
 0x12b   :  { %v371_v13 = vadd.f32 %v368_v31, %v315_v17 }
 0x12d   :  { %373 = vst.msk [vmem:[#allocation2] sm:$0xff] %vm36_vm1, %v371_v13 }
 0x12e   :  { %v343_v16 = vpop.f32.mrf.mxu0  ;;  %v356_v34 = vpop.f32.mrf.mxu1 }
 0x134   :  { %v392_v41 = vld [vmem:[#allocation2] sm:$0xff] }
 0x135   :  { %v396_v5 = vmul.f32 %v394_v63, %v392_v41 }
 0x137   :  { %v400_v29 = vadd.f32 %v398_v27, %v396_v5 }
 0x139   :  { %v401_v0 = vmax.f32 %v400_v29, 0.0 }
 0x13b   :  { %v402_v1 = vpack.c.bf16 %v401_v0, %v401_v0 }
 0x13d   :  { %404 = vst.msk [vmem:[%s1138_s8] sm:$0xf] %vm403_vm2, %v402_v1 }

// kernel: combined_model_forward.11
= control target key start
LH: loop header
LB: loop body
LE: loop exit
PB: predicated region body
PF: predicated region fallthrough
CT: control target
= control target key end

     0   :  { %vm176_vm0 = vcmask 1041409   ;;  %s803_s1 = inlined_call_operand.vmem [shape: f32[1024,128], index: 1, kind: input, shape index: {}]   ;;  %s804_s0 = inlined_call_operand.vmem [shape: bf16[2,1,1024], index: 0, kind: input, shape index: {}]   ;;  %s805_s2 = inlined_call_operand.vmem [shape: f32[1,128], index: 2, kind: input, shape index: {}]   ;;  %s806_s3 = inlined_call_operand.vmem [shape: f32[2,128], index: 3, kind: output, shape index: {}]  }
   0x1   :  { %v71_v0 = vld [vmem:[%s803_s1 + $0x178] sm:$0xff]  ;;  %v70_v2 = vld [vmem:[%s803_s1 + $0x170] sm:$0xff]  ;;  %v69_v6 = vld [vmem:[%s803_s1 + $0x168] sm:$0xff] }
   0x2   :  { %v39_v1 = vld [vmem:[%s803_s1 + $0x78] sm:$0xff]  ;;  %233 = vmatpush.msra.mxu2 %v71_v0  ;;  %v38_v4 = vld [vmem:[%s803_s1 + $0x70] sm:$0xff]  ;;  %v37_v8 = vld [vmem:[%s803_s1 + $0x68] sm:$0xff] }
   0x3   :  { %193 = vmatpush.msra.mxu0 %v39_v1  ;;  %v87_v3 = vld [vmem:[%s803_s1 + $0x1f8] sm:$0xff]  ;;  %v86_v7 = vld [vmem:[%s803_s1 + $0x1f0] sm:$0xff]  ;;  %v85_v10 = vld [vmem:[%s803_s1 + $0x1e8] sm:$0xff] }
   0x4   :  { %v55_v5 = vld [vmem:[%s803_s1 + $0xf8] sm:$0xff]  ;;  %253 = vmatpush.msra.mxu3 %v87_v3  ;;  %234 = vmatpush.msra.mxu2 %v70_v2  ;;  %v54_v9 = vld [vmem:[%s803_s1 + $0xf0] sm:$0xff]  ;;  %v68_v11 = vld [vmem:[%s803_s1 + $0x160] sm:$0xff] }
   0x5   :  { %213 = vmatpush.msra.mxu1 %v55_v5  ;;  %194 = vmatpush.msra.mxu0 %v38_v4  ;;  %v36_v12 = vld [vmem:[%s803_s1 + $0x60] sm:$0xff]  ;;  %v53_v13 = vld [vmem:[%s803_s1 + $0xe8] sm:$0xff]  ;;  %v67_v16 = vld [vmem:[%s803_s1 + $0x158] sm:$0xff] }
   0x6   :  { %254 = vmatpush.msra.mxu3 %v86_v7  ;;  %235 = vmatpush.msra.mxu2 %v69_v6  ;;  %v84_v14 = vld [vmem:[%s803_s1 + $0x1e0] sm:$0xff]  ;;  %v35_v17 = vld [vmem:[%s803_s1 + $0x58] sm:$0xff]  ;;  %v66_v20 = vld [vmem:[%s803_s1 + $0x150] sm:$0xff] }
   0x7   :  { %214 = vmatpush.msra.mxu1 %v54_v9  ;;  %195 = vmatpush.msra.mxu0 %v37_v8  ;;  %v52_v15 = vld [vmem:[%s803_s1 + $0xe0] sm:$0xff]  ;;  %v83_v18 = vld [vmem:[%s803_s1 + $0x1d8] sm:$0xff]  ;;  %v34_v21 = vld [vmem:[%s803_s1 + $0x50] sm:$0xff] }
   0x8   :  { %255 = vmatpush.msra.mxu3 %v85_v10  ;;  %236 = vmatpush.msra.mxu2 %v68_v11  ;;  %v51_v19 = vld [vmem:[%s803_s1 + $0xd8] sm:$0xff]  ;;  %v82_v22 = vld [vmem:[%s803_s1 + $0x1d0] sm:$0xff]  ;;  %v65_v24 = vld [vmem:[%s803_s1 + $0x148] sm:$0xff] }
   0x9   :  { %215 = vmatpush.msra.mxu1 %v53_v13  ;;  %196 = vmatpush.msra.mxu0 %v36_v12  ;;  %v50_v23 = vld [vmem:[%s803_s1 + $0xd0] sm:$0xff]  ;;  %v33_v25 = vld [vmem:[%s803_s1 + $0x48] sm:$0xff]  ;;  %v64_v28 = vld [vmem:[%s803_s1 + $0x140] sm:$0xff] }
   0xa   :  { %256 = vmatpush.msra.mxu3 %v84_v14  ;;  %237 = vmatpush.msra.mxu2 %v67_v16  ;;  %v81_v26 = vld [vmem:[%s803_s1 + $0x1c8] sm:$0xff]  ;;  %v32_v29 = vld [vmem:[%s803_s1 + $0x40] sm:$0xff]  ;;  %v63_v32 = vld [vmem:[%s803_s1 + $0x138] sm:$0xff] }
   0xb   :  { %216 = vmatpush.msra.mxu1 %v52_v15  ;;  %197 = vmatpush.msra.mxu0 %v35_v17  ;;  %v49_v27 = vld [vmem:[%s803_s1 + $0xc8] sm:$0xff]  ;;  %v80_v30 = vld [vmem:[%s803_s1 + $0x1c0] sm:$0xff]  ;;  %v31_v33 = vld [vmem:[%s803_s1 + $0x38] sm:$0xff] }
   0xc   :  { %257 = vmatpush.msra.mxu3 %v83_v18  ;;  %238 = vmatpush.msra.mxu2 %v66_v20  ;;  %v48_v31 = vld [vmem:[%s803_s1 + $0xc0] sm:$0xff]  ;;  %v79_v34 = vld [vmem:[%s803_s1 + $0x1b8] sm:$0xff]  ;;  %v62_v36 = vld [vmem:[%s803_s1 + $0x130] sm:$0xff] }
   0xd   :  { %217 = vmatpush.msra.mxu1 %v51_v19  ;;  %198 = vmatpush.msra.mxu0 %v34_v21  ;;  %v47_v35 = vld [vmem:[%s803_s1 + $0xb8] sm:$0xff]  ;;  %v30_v37 = vld [vmem:[%s803_s1 + $0x30] sm:$0xff]  ;;  %v61_v40 = vld [vmem:[%s803_s1 + $0x128] sm:$0xff] }
   0xe   :  { %258 = vmatpush.msra.mxu3 %v82_v22  ;;  %239 = vmatpush.msra.mxu2 %v65_v24  ;;  %v78_v38 = vld [vmem:[%s803_s1 + $0x1b0] sm:$0xff]  ;;  %v29_v41 = vld [vmem:[%s803_s1 + $0x28] sm:$0xff]  ;;  %v60_v44 = vld [vmem:[%s803_s1 + $0x120] sm:$0xff] }
   0xf   :  { %218 = vmatpush.msra.mxu1 %v50_v23  ;;  %199 = vmatpush.msra.mxu0 %v33_v25  ;;  %v46_v39 = vld [vmem:[%s803_s1 + $0xb0] sm:$0xff]  ;;  %v77_v42 = vld [vmem:[%s803_s1 + $0x1a8] sm:$0xff]  ;;  %v28_v45 = vld [vmem:[%s803_s1 + $0x20] sm:$0xff] }
  0x10   :  { %259 = vmatpush.msra.mxu3 %v81_v26  ;;  %240 = vmatpush.msra.mxu2 %v64_v28  ;;  %v45_v43 = vld [vmem:[%s803_s1 + $0xa8] sm:$0xff]  ;;  %v76_v46 = vld [vmem:[%s803_s1 + $0x1a0] sm:$0xff]  ;;  %v59_v48 = vld [vmem:[%s803_s1 + $0x118] sm:$0xff] }
  0x11   :  { %219 = vmatpush.msra.mxu1 %v49_v27  ;;  %200 = vmatpush.msra.mxu0 %v32_v29  ;;  %v44_v47 = vld [vmem:[%s803_s1 + $0xa0] sm:$0xff]  ;;  %v27_v49 = vld [vmem:[%s803_s1 + $0x18] sm:$0xff]  ;;  %v58_v52 = vld [vmem:[%s803_s1 + $0x110] sm:$0xff] }
  0x12   :  { %260 = vmatpush.msra.mxu3 %v80_v30  ;;  %241 = vmatpush.msra.mxu2 %v63_v32  ;;  %v75_v50 = vld [vmem:[%s803_s1 + $0x198] sm:$0xff]  ;;  %v26_v53 = vld [vmem:[%s803_s1 + $0x10] sm:$0xff]  ;;  %v57_v56 = vld [vmem:[%s803_s1 + $0x108] sm:$0xff] }
  0x13   :  { %220 = vmatpush.msra.mxu1 %v48_v31  ;;  %201 = vmatpush.msra.mxu0 %v31_v33  ;;  %v43_v51 = vld [vmem:[%s803_s1 + $0x98] sm:$0xff]  ;;  %v74_v54 = vld [vmem:[%s803_s1 + $0x190] sm:$0xff]  ;;  %v25_v57 = vld [vmem:[%s803_s1 + $0x8] sm:$0xff] }
  0x14   :  { %261 = vmatpush.msra.mxu3 %v79_v34  ;;  %242 = vmatpush.msra.mxu2 %v62_v36  ;;  %v42_v55 = vld [vmem:[%s803_s1 + $0x90] sm:$0xff]  ;;  %v73_v58 = vld [vmem:[%s803_s1 + $0x188] sm:$0xff]  ;;  %v56_v60 = vld [vmem:[%s803_s1 + $0x100] sm:$0xff] }
  0x15   :  { %221 = vmatpush.msra.mxu1 %v47_v35  ;;  %202 = vmatpush.msra.mxu0 %v30_v37  ;;  %v41_v59 = vld [vmem:[%s803_s1 + $0x88] sm:$0xff]  ;;  %v24_v61 = vld [vmem:[%s803_s1] sm:$0xff]  ;;  %v135_v62 = vld [vmem:[%s803_s1 + $0x378] sm:$0xff] }
  0x16   :  { %262 = vmatpush.msra.mxu3 %v78_v38  ;;  %243 = vmatpush.msra.mxu2 %v61_v40  ;;  %v72_v63 = vld [vmem:[%s803_s1 + $0x180] sm:$0xff]  ;;  %v103_v0 = vld [vmem:[%s803_s1 + $0x278] sm:$0xff]  ;;  %v134_v2 = vld [vmem:[%s803_s1 + $0x370] sm:$0xff] }
  0x17   :  { %222 = vmatpush.msra.mxu1 %v46_v39  ;;  %203 = vmatpush.msra.mxu0 %v29_v41  ;;  %v151_v1 = vld [vmem:[%s803_s1 + $0x3f8] sm:$0xff]  ;;  %v40_v3 = vld [vmem:[%s803_s1 + $0x80] sm:$0xff]  ;;  %v102_v4 = vld [vmem:[%s803_s1 + $0x270] sm:$0xff] }
  0x18   :  { %263 = vmatpush.msra.mxu3 %v77_v42  ;;  %244 = vmatpush.msra.mxu2 %v60_v44  ;;  %v119_v5 = vld [vmem:[%s803_s1 + $0x2f8] sm:$0xff]  ;;  %v133_v6 = vld [vmem:[%s803_s1 + $0x368] sm:$0xff]  ;;  %v150_v7 = vld [vmem:[%s803_s1 + $0x3f0] sm:$0xff] }
  0x19   :  { %223 = vmatpush.msra.mxu1 %v45_v43  ;;  %204 = vmatpush.msra.mxu0 %v28_v45  ;;  %v101_v8 = vld [vmem:[%s803_s1 + $0x268] sm:$0xff]  ;;  %v118_v9 = vld [vmem:[%s803_s1 + $0x2f0] sm:$0xff]  ;;  %v132_v10 = vld [vmem:[%s803_s1 + $0x360] sm:$0xff] }
  0x1a   :  { %264 = vmatpush.msra.mxu3 %v76_v46  ;;  %245 = vmatpush.msra.mxu2 %v59_v48  ;;  %v149_v11 = vld [vmem:[%s803_s1 + $0x3e8] sm:$0xff]  ;;  %v100_v12 = vld [vmem:[%s803_s1 + $0x260] sm:$0xff]  ;;  %v131_v14 = vld [vmem:[%s803_s1 + $0x358] sm:$0xff] }
  0x1b   :  { %224 = vmatpush.msra.mxu1 %v44_v47  ;;  %205 = vmatpush.msra.mxu0 %v27_v49  ;;  %v117_v13 = vld [vmem:[%s803_s1 + $0x2e8] sm:$0xff]  ;;  %v148_v15 = vld [vmem:[%s803_s1 + $0x3e0] sm:$0xff]  ;;  %v99_v16 = vld [vmem:[%s803_s1 + $0x258] sm:$0xff] }
  0x1c   :  { %265 = vmatpush.msra.mxu3 %v75_v50  ;;  %246 = vmatpush.msra.mxu2 %v58_v52  ;;  %v116_v17 = vld [vmem:[%s803_s1 + $0x2e0] sm:$0xff]  ;;  %v130_v18 = vld [vmem:[%s803_s1 + $0x350] sm:$0xff]  ;;  %v147_v19 = vld [vmem:[%s803_s1 + $0x3d8] sm:$0xff] }
  0x1d   :  { %225 = vmatpush.msra.mxu1 %v43_v51  ;;  %206 = vmatpush.msra.mxu0 %v26_v53  ;;  %v98_v20 = vld [vmem:[%s803_s1 + $0x250] sm:$0xff]  ;;  %v115_v21 = vld [vmem:[%s803_s1 + $0x2d8] sm:$0xff]  ;;  %v129_v22 = vld [vmem:[%s803_s1 + $0x348] sm:$0xff] }
  0x1e   :  { %266 = vmatpush.msra.mxu3 %v74_v54  ;;  %247 = vmatpush.msra.mxu2 %v57_v56  ;;  %v146_v23 = vld [vmem:[%s803_s1 + $0x3d0] sm:$0xff]  ;;  %v646_v24 = vld [vmem:[%s804_s0] sm:$0xff]  ;;  %v651_v25 = vld [vmem:[%s804_s0 + $0x8] sm:$0xff] }
  0x1f   :  { %226 = vmatpush.msra.mxu1 %v42_v55  ;;  %207 = vmatpush.msra.mxu0 %v25_v57  ;;  %v97_v26 = vld [vmem:[%s803_s1 + $0x248] sm:$0xff]  ;;  %v114_v27 = vld [vmem:[%s803_s1 + $0x2d0] sm:$0xff]  ;;  %v128_v28 = vld [vmem:[%s803_s1 + $0x340] sm:$0xff]  ;;  %v672_v32 = vunpack.c.l.bf16 %v646_v24  ;;  %v675_v33 = vunpack.c.l.bf16 %v651_v25 }
  0x20   :  { %267 = vmatpush.msra.mxu3 %v73_v58  ;;  %248 = vmatpush.msra.mxu2 %v56_v60  ;;  %v145_v29 = vld [vmem:[%s803_s1 + $0x3c8] sm:$0xff]  ;;  %v96_v30 = vld [vmem:[%s803_s1 + $0x240] sm:$0xff]  ;;  %v127_v34 = vld [vmem:[%s803_s1 + $0x338] sm:$0xff] }
  0x21   :  { %227 = vmatpush.msra.mxu1 %v41_v59  ;;  %208 = vmatpush.msra.mxu0 %v24_v61  ;;  %v113_v31 = vld [vmem:[%s803_s1 + $0x2c8] sm:$0xff]  ;;  %v144_v35 = vld [vmem:[%s803_s1 + $0x3c0] sm:$0xff]  ;;  %v95_v36 = vld [vmem:[%s803_s1 + $0x238] sm:$0xff]  ;;  %v162_v42 = vperm.slane %v672_v32, 4  ;;  %v170_v43 = vperm.slane %v675_v33, 4  ;;  %v160_v48 = vperm.slane %v672_v32, 0 }
  0x22   :  { %313 = vmatpush.msrb.mxu2 %v135_v62  ;;  %268 = vmatpush.msra.mxu3 %v72_v63  ;;  %v112_v37 = vld [vmem:[%s803_s1 + $0x2c0] sm:$0xff]  ;;  %v126_v38 = vld [vmem:[%s803_s1 + $0x330] sm:$0xff]  ;;  %v143_v39 = vld [vmem:[%s803_s1 + $0x3b8] sm:$0xff]  ;;  %v168_v49 = vperm.slane %v675_v33, 0  ;;  %v163_v52 = vperm.slane %v672_v32, 6  ;;  %v171_v53 = vperm.slane %v675_v33, 6  ;;  %v17_v62 = vunpack.c.h.bf16 %v646_v24 }
  0x23   :  { %273 = vmatpush.msrb.mxu0 %v103_v0  ;;  %228 = vmatpush.msra.mxu1 %v40_v3  ;;  %v94_v40 = vld [vmem:[%s803_s1 + $0x230] sm:$0xff]  ;;  %v111_v41 = vld [vmem:[%s803_s1 + $0x2b8] sm:$0xff]  ;;  %v125_v44 = vld [vmem:[%s803_s1 + $0x328] sm:$0xff]  ;;  %v179_v54 = vsel %vm176_vm0, %v170_v43, %v162_v42  ;;  %v161_v58 = vperm.slane %v672_v32, 2  ;;  %v169_v59 = vperm.slane %v675_v33, 2  ;;  %v19_v63 = vunpack.c.h.bf16 %v651_v25 }
  0x24   :  { %333 = vmatpush.msrb.mxu3 %v151_v1  ;;  %314 = vmatpush.msrb.mxu2 %v134_v2  ;;  %v142_v45 = vld [vmem:[%s803_s1 + $0x3b0] sm:$0xff]  ;;  %v93_v46 = vld [vmem:[%s803_s1 + $0x228] sm:$0xff]  ;;  %v124_v50 = vld [vmem:[%s803_s1 + $0x320] sm:$0xff]  ;;  %v177_v61 = vsel %vm176_vm0, %v168_v49, %v160_v48  ;;  %v180_v0 = vsel %vm176_vm0, %v171_v53, %v163_v52 }
  0x25   :  { %274 = vmatpush.msrb.mxu0 %v102_v4  ;;  %293 = vmatpush.msrb.mxu1 %v119_v5  ;;  %v110_v47 = vld [vmem:[%s803_s1 + $0x2b0] sm:$0xff]  ;;  %v141_v51 = vld [vmem:[%s803_s1 + $0x3a8] sm:$0xff]  ;;  %v92_v55 = vld [vmem:[%s803_s1 + $0x220] sm:$0xff]  ;;  %v178_v5 = vsel %vm176_vm0, %v169_v59, %v161_v58 }
  0x26   :  { %315 = vmatpush.msrb.mxu2 %v133_v6  ;;  %334 = vmatpush.msrb.mxu3 %v150_v7  ;;  %v109_v56 = vld [vmem:[%s803_s1 + $0x2a8] sm:$0xff]  ;;  %v123_v57 = vld [vmem:[%s803_s1 + $0x318] sm:$0xff]  ;;  %v140_v60 = vld [vmem:[%s803_s1 + $0x3a0] sm:$0xff] }
  0x27   :  { %275 = vmatpush.msrb.mxu0 %v101_v8  ;;  %294 = vmatpush.msrb.mxu1 %v118_v9  ;;  %v91_v1 = vld [vmem:[%s803_s1 + $0x218] sm:$0xff]  ;;  %v108_v2 = vld [vmem:[%s803_s1 + $0x2a0] sm:$0xff]  ;;  %v122_v3 = vld [vmem:[%s803_s1 + $0x310] sm:$0xff]  ;;  %v166_v8 = vperm.slane %v17_v62, 4  ;;  %v174_v9 = vperm.slane %v19_v63, 4 }
  0x28   :  { %316 = vmatpush.msrb.mxu2 %v132_v10  ;;  %335 = vmatpush.msrb.mxu3 %v149_v11  ;;  %v139_v4 = vld [vmem:[%s803_s1 + $0x398] sm:$0xff]  ;;  %v90_v6 = vld [vmem:[%s803_s1 + $0x210] sm:$0xff]  ;;  %v121_v10 = vld [vmem:[%s803_s1 + $0x308] sm:$0xff] }
  0x29   :  { %276 = vmatpush.msrb.mxu0 %v100_v12  ;;  %295 = vmatpush.msrb.mxu1 %v117_v13  ;;  %v107_v7 = vld [vmem:[%s803_s1 + $0x298] sm:$0xff]  ;;  %v138_v11 = vld [vmem:[%s803_s1 + $0x390] sm:$0xff]  ;;  %v89_v12 = vld [vmem:[%s803_s1 + $0x208] sm:$0xff] }
  0x2a   :  { %317 = vmatpush.msrb.mxu2 %v131_v14  ;;  %336 = vmatpush.msrb.mxu3 %v148_v15  ;;  %v106_v13 = vld [vmem:[%s803_s1 + $0x290] sm:$0xff]  ;;  %v164_v14 = vperm.slane %v17_v62, 0  ;;  %v172_v15 = vperm.slane %v19_v63, 0  ;;  %v105_v24 = vld [vmem:[%s803_s1 + $0x288] sm:$0xff]  ;;  %v136_v25 = vld [vmem:[%s803_s1 + $0x380] sm:$0xff] }
  0x2b   :  { %277 = vmatpush.msrb.mxu0 %v99_v16  ;;  %296 = vmatpush.msrb.mxu1 %v116_v17  ;;  %v167_v16 = vperm.slane %v17_v62, 6  ;;  %v175_v17 = vperm.slane %v19_v63, 6 }
  0x2c   :  { %318 = vmatpush.msrb.mxu2 %v130_v18  ;;  %337 = vmatpush.msrb.mxu3 %v147_v19  ;;  %v120_v18 = vld [vmem:[%s803_s1 + $0x300] sm:$0xff]  ;;  %v137_v19 = vld [vmem:[%s803_s1 + $0x388] sm:$0xff] }
  0x2d   :  { %278 = vmatpush.msrb.mxu0 %v98_v20  ;;  %297 = vmatpush.msrb.mxu1 %v115_v21  ;;  %v183_v20 = vsel %vm176_vm0, %v174_v9, %v166_v8  ;;  %v88_v21 = vld [vmem:[%s803_s1 + $0x200] sm:$0xff] }
  0x2e   :  { %319 = vmatpush.msrb.mxu2 %v129_v22  ;;  %338 = vmatpush.msrb.mxu3 %v146_v23  ;;  %v165_v22 = vperm.slane %v17_v62, 2  ;;  %v173_v23 = vperm.slane %v19_v63, 2 }
  0x2f   :  { %279 = vmatpush.msrb.mxu0 %v97_v26  ;;  %298 = vmatpush.msrb.mxu1 %v114_v27  ;;  %v181_v26 = vsel %vm176_vm0, %v172_v15, %v164_v14  ;;  %v184_v27 = vsel %vm176_vm0, %v175_v17, %v167_v16 }
  0x30   :  { %320 = vmatpush.msrb.mxu2 %v128_v28  ;;  %339 = vmatpush.msrb.mxu3 %v145_v29  ;;  %v104_v28 = vld [vmem:[%s803_s1 + $0x280] sm:$0xff]  ;;  %v182_v29 = vsel %vm176_vm0, %v173_v23, %v165_v22 }
  0x31   :  { %280 = vmatpush.msrb.mxu0 %v96_v30  ;;  %299 = vmatpush.msrb.mxu1 %v113_v31  ;;  %v358_v30 = vld [vmem:[%s805_s2] ss:$0 sm:$0xff] }
  0x32   :  { %321 = vmatpush.msrb.mxu2 %v127_v34  ;;  %340 = vmatpush.msrb.mxu3 %v144_v35 }
  0x33   :  { %281 = vmatpush.msrb.mxu0 %v95_v36  ;;  %300 = vmatpush.msrb.mxu1 %v112_v37 }
  0x34   :  { %322 = vmatpush.msrb.mxu2 %v126_v38  ;;  %341 = vmatpush.msrb.mxu3 %v143_v39 }
  0x35   :  { %282 = vmatpush.msrb.mxu0 %v94_v40  ;;  %301 = vmatpush.msrb.mxu1 %v111_v41 }
  0x36   :  { %323 = vmatpush.msrb.mxu2 %v125_v44  ;;  %342 = vmatpush.msrb.mxu3 %v142_v45 }
  0x37   :  { %283 = vmatpush.msrb.mxu0 %v93_v46  ;;  %302 = vmatpush.msrb.mxu1 %v110_v47 }
  0x38   :  { %324 = vmatpush.msrb.mxu2 %v124_v50  ;;  %343 = vmatpush.msrb.mxu3 %v141_v51 }
  0x39   :  { %249 = vmatmul.f32.vlgmr.msra.gmra.mxu2 %v179_v54  ;;  %284 = vmatpush.msrb.mxu0 %v92_v55 }
  0x3a   :  { %303 = vmatpush.msrb.mxu1 %v109_v56  ;;  %325 = vmatpush.msrb.mxu2 %v123_v57 }
  0x3b   :  { %344 = vmatpush.msrb.mxu3 %v140_v60  ;;  %209 = vmatmul.f32.vlgmr.msra.gmra.mxu0 %v177_v61 }
  0x3c   :  { %269 = vmatmul.f32.vlgmr.msra.gmra.mxu3 %v180_v0  ;;  %285 = vmatpush.msrb.mxu0 %v91_v1 }
  0x3d   :  { %304 = vmatpush.msrb.mxu1 %v108_v2  ;;  %326 = vmatpush.msrb.mxu2 %v122_v3 }
  0x3e   :  { %345 = vmatpush.msrb.mxu3 %v139_v4  ;;  %229 = vmatmul.f32.vlgmr.msra.gmra.mxu1 %v178_v5 }
  0x3f   :  { %286 = vmatpush.msrb.mxu0 %v90_v6  ;;  %305 = vmatpush.msrb.mxu1 %v107_v7 }
  0x40   :  { %327 = vmatpush.msrb.mxu2 %v121_v10  ;;  %346 = vmatpush.msrb.mxu3 %v138_v11 }
  0x41   :  { %287 = vmatpush.msrb.mxu0 %v89_v12  ;;  %306 = vmatpush.msrb.mxu1 %v106_v13 }
  0x42   :  { %328 = vmatpush.msrb.mxu2 %v120_v18  ;;  %347 = vmatpush.msrb.mxu3 %v137_v19 }
  0x43   :  { %329 = vmatmul.f32.vlgmr.msrb.gmra.mxu2 %v183_v20  ;;  %288 = vmatpush.msrb.mxu0 %v88_v21 }
  0x44   :  { %307 = vmatpush.msrb.mxu1 %v105_v24  ;;  %348 = vmatpush.msrb.mxu3 %v136_v25 }
  0x45   :  { %289 = vmatmul.f32.vlgmr.msrb.gmra.mxu0 %v181_v26  ;;  %349 = vmatmul.f32.vlgmr.msrb.gmra.mxu3 %v184_v27 }
  0x46   :  { %308 = vmatpush.msrb.mxu1 %v104_v28 }
  0x47   :  { %309 = vmatmul.f32.vlgmr.msrb.gmra.mxu1 %v182_v29 }
  0xb8   :  { %v210_v31 = vpop.f32.mrf.mxu0 }
  0xb9   :  { %v211_v32 = vadd.f32 %v358_v30, %v210_v31 }
  0xbb   :  { %v230_v33 = vpop.f32.mrf.mxu1 }
  0xbc   :  { %v231_v34 = vadd.f32 %v230_v33, %v211_v32  ;;  %v250_v35 = vpop.f32.mrf.mxu2 }
  0xbe   :  { %v251_v36 = vadd.f32 %v250_v35, %v231_v34 }
  0xbf   :  { %v270_v37 = vpop.f32.mrf.mxu3 }
  0xc0   :  { %v271_v38 = vadd.f32 %v270_v37, %v251_v36 }
  0xc2   :  { %v290_v39 = vpop.f32.mrf.mxu0 }
  0xc3   :  { %v291_v40 = vadd.f32 %v290_v39, %v271_v38 }
  0xc4   :  { %v310_v41 = vpop.f32.mrf.mxu1 }
  0xc5   :  { %v311_v42 = vadd.f32 %v310_v41, %v291_v40 }
  0xc6   :  { %v330_v43 = vpop.f32.mrf.mxu2 }
  0xc7   :  { %v331_v44 = vadd.f32 %v330_v43, %v311_v42 }
  0xc8   :  { %v350_v45 = vpop.f32.mrf.mxu3 }
  0xc9   :  { %v351_v46 = vadd.f32 %v350_v45, %v331_v44 }
  0xcb   :  { %353 = vst [vmem:[%s806_s3] sm:$0x3] %v351_v46 }

// kernel: combined_model_forward.10
= control target key start
LH: loop header
LB: loop body
LE: loop exit
PB: predicated region body
PF: predicated region fallthrough
CT: control target
= control target key end

     0   :  { %s6414_s0 = inlined_call_operand.<no memory space> [shape: f32[1,1], index: 0, kind: input, shape index: {}]   ;;  %s6415_s1 = inlined_call_operand.vmem [shape: bf16[8,576], index: 1, kind: input, shape index: {}]   ;;  %s6416_s2 = inlined_call_operand.vmem [shape: bf16[576,1024], index: 2, kind: input, shape index: {}]   ;;  %s6417_s3 = inlined_call_operand.vmem [shape: bf16[576,1024], index: 3, kind: input, shape index: {}]   ;;  %s6418_s4 = inlined_call_operand.vmem [shape: f32[1,1024], index: 4, kind: input, shape index: {}]   ;;  %s6419_s5 = inlined_call_operand.vmem [shape: f32[1,1024], index: 5, kind: input, shape index: {}]   ;;  %s6420_s6 = inlined_call_operand.vmem [shape: f32[1,1024], index: 6, kind: input, shape index: {}]   ;;  %s6421_s7 = inlined_call_operand.vmem [shape: f32[1,1024], index: 7, kind: input, shape index: {}]   ;;  %s6422_s8 = inlined_call_operand.vmem [shape: bf16[8,1024], index: 8, kind: output, shape index: {}]  }
   0x1   :  { %v13_v0 = vstv %s6414_s0 }
   0x2   :  { %14 = vst [vmem:[#allocation3] sm:$0x1] %v13_v0 }
   0x3   :  { %s3784_s29 = smov 0   ;;  %s3786_s30 = smov 0  }
   0x4   :  { %s3788_s9 = smov 0   ;;  %s3790_s10 = smov 0  }
   0x5   :  { %s3792_s11 = smov 0  }
   0x6 LB: > { %s35_s0 = sadd.s32 1, %s3729_s10  ;;  %p104_p1 = scmp.ne.s32.totalorder %s3721_s30, %s3717_s29  ;;  %s3733_s11 = sphi %s3792_s11, %s20_s11   ;;  %s3729_s10 = sphi %s3790_s10, %s6927_s10   ;;  %s3725_s9 = sphi %s3788_s9, %s6926_s9   ;;  %s3721_s30 = sphi %s3786_s30, %s6925_s30   ;;  %s3717_s29 = sphi %s3784_s29, %s6924_s29  }
   0x7   : > { %p37_p0 = scmp.ge.s32.totalorder %s35_s0, 2  ;;  %p105_p2 = scmp.eq.s32.totalorder %s3733_s11, 0 }
   0x8   : > { %s97_s14 = sadd.s32 1, %s3721_s30  ;;  %p3511_p5 = scmp.ge.s32.totalorder %s3733_s11, 2 }
   0x9   : > { %s6929_s0 = smov (%p37_p0, %s35_s0), 0  ;;  %p3815_p3 = por %p105_p2, %p104_p1 }
   0xa   : > { %s93_s13 = ssub.s32 %s3729_s10, %s6929_s0  ;;  %306 = sbr.rel (%p3511_p5) target bundleno = 311 (0x137), region = 24 }
   0xb   : > { %p95_p4 = scmp.eq.s32.totalorder %s93_s13, 0 }
   0xd   : > { %s3823_s15 = scalar_select %p95_p4, %s3721_s30, %s97_s14  }
   0xf   : > { %309 = sbr.rel (!%p3815_p3) target bundleno = 163 (0xa3), region = 28  ;;  %s311_s16 = sand.u32 (%p3815_p3), 1, %s3721_s30  }
  0x10   : > { %s3529_s17 = sshll.u32 (%p3815_p3), %s3729_s10, 4  ;;  %s3531_s18 = smul.u32 (%p3815_p3), 1152, %s311_s16 }
  0x11   : > { %s3833_s21 = scalar_lea.vmem (%p3815_p3), %s6416_s2, %s3529_s17 }
  0x12   : > { %v332_v1 = vld [vmem:[%s3833_s21] sm:$0xff] (%p3815_p3)  ;;  %v334_v2 = vld [vmem:[%s3833_s21 + $0x8] sm:$0xff] (%p3815_p3)  ;;  %s3838_s22 = scalar_lea.vmem (%p3815_p3), [#allocation4], %s3531_s18 }
  0x13   : > { %v336_v3 = vld [vmem:[%s3833_s21 + $0x20] sm:$0xff] (%p3815_p3)  ;;  %333 = vst [vmem:[%s3838_s22] sm:$0xff] (%p3815_p3), %v332_v1  ;;  %v338_v4 = vld [vmem:[%s3833_s21 + $0x28] sm:$0xff] (%p3815_p3) }
  0x14   : > { %335 = vst [vmem:[%s3838_s22 + $0x8] sm:$0xff] %v334_v2  ;;  %v340_v5 = vld [vmem:[%s3833_s21 + $0x40] sm:$0xff]  ;;  %v342_v6 = vld [vmem:[%s3833_s21 + $0x48] sm:$0xff] }
  0x15   : > { %337 = vst [vmem:[%s3838_s22 + $0x10] sm:$0xff] %v336_v3  ;;  %v344_v7 = vld [vmem:[%s3833_s21 + $0x60] sm:$0xff]  ;;  %v346_v8 = vld [vmem:[%s3833_s21 + $0x68] sm:$0xff] }
  0x16   : > { %339 = vst [vmem:[%s3838_s22 + $0x18] sm:$0xff] %v338_v4  ;;  %v348_v9 = vld [vmem:[%s3833_s21 + $0x80] sm:$0xff]  ;;  %v350_v10 = vld [vmem:[%s3833_s21 + $0x88] sm:$0xff] }
  0x17   : > { %341 = vst [vmem:[%s3838_s22 + $0x20] sm:$0xff] %v340_v5  ;;  %v352_v11 = vld [vmem:[%s3833_s21 + $0xa0] sm:$0xff]  ;;  %v354_v12 = vld [vmem:[%s3833_s21 + $0xa8] sm:$0xff] }
  0x18   : > { %343 = vst [vmem:[%s3838_s22 + $0x28] sm:$0xff] %v342_v6  ;;  %v356_v13 = vld [vmem:[%s3833_s21 + $0xc0] sm:$0xff]  ;;  %v358_v14 = vld [vmem:[%s3833_s21 + $0xc8] sm:$0xff] }
  0x19   : > { %345 = vst [vmem:[%s3838_s22 + $0x30] sm:$0xff] %v344_v7  ;;  %v360_v15 = vld [vmem:[%s3833_s21 + $0xe0] sm:$0xff]  ;;  %v362_v16 = vld [vmem:[%s3833_s21 + $0xe8] sm:$0xff] }
  0x1a   : > { %347 = vst [vmem:[%s3838_s22 + $0x38] sm:$0xff] %v346_v8  ;;  %v364_v17 = vld [vmem:[%s3833_s21 + $0x100] sm:$0xff]  ;;  %v366_v18 = vld [vmem:[%s3833_s21 + $0x108] sm:$0xff] }
  0x1b   : > { %349 = vst [vmem:[%s3838_s22 + $0x40] sm:$0xff] %v348_v9  ;;  %v368_v19 = vld [vmem:[%s3833_s21 + $0x120] sm:$0xff]  ;;  %v370_v20 = vld [vmem:[%s3833_s21 + $0x128] sm:$0xff] }
  0x1c   : > { %351 = vst [vmem:[%s3838_s22 + $0x48] sm:$0xff] %v350_v10  ;;  %v372_v21 = vld [vmem:[%s3833_s21 + $0x140] sm:$0xff]  ;;  %v374_v22 = vld [vmem:[%s3833_s21 + $0x148] sm:$0xff] }
  0x1d   : > { %353 = vst [vmem:[%s3838_s22 + $0x50] sm:$0xff] %v352_v11  ;;  %v376_v23 = vld [vmem:[%s3833_s21 + $0x160] sm:$0xff]  ;;  %v378_v24 = vld [vmem:[%s3833_s21 + $0x168] sm:$0xff] }
  0x1e   : > { %355 = vst [vmem:[%s3838_s22 + $0x58] sm:$0xff] %v354_v12  ;;  %v380_v25 = vld [vmem:[%s3833_s21 + $0x180] sm:$0xff]  ;;  %v382_v26 = vld [vmem:[%s3833_s21 + $0x188] sm:$0xff] }
  0x1f   : > { %357 = vst [vmem:[%s3838_s22 + $0x60] sm:$0xff] %v356_v13  ;;  %v384_v27 = vld [vmem:[%s3833_s21 + $0x1a0] sm:$0xff]  ;;  %v386_v28 = vld [vmem:[%s3833_s21 + $0x1a8] sm:$0xff] }
  0x20   : > { %359 = vst [vmem:[%s3838_s22 + $0x68] sm:$0xff] %v358_v14  ;;  %v388_v29 = vld [vmem:[%s3833_s21 + $0x1c0] sm:$0xff]  ;;  %v390_v30 = vld [vmem:[%s3833_s21 + $0x1c8] sm:$0xff] }
  0x21   : > { %361 = vst [vmem:[%s3838_s22 + $0x70] sm:$0xff] %v360_v15  ;;  %v392_v31 = vld [vmem:[%s3833_s21 + $0x1e0] sm:$0xff]  ;;  %v394_v32 = vld [vmem:[%s3833_s21 + $0x1e8] sm:$0xff] }
  0x22   : > { %363 = vst [vmem:[%s3838_s22 + $0x78] sm:$0xff] %v362_v16  ;;  %v396_v33 = vld [vmem:[%s3833_s21 + $0x200] sm:$0xff]  ;;  %v398_v34 = vld [vmem:[%s3833_s21 + $0x208] sm:$0xff] }
  0x23   : > { %365 = vst [vmem:[%s3838_s22 + $0x80] sm:$0xff] %v364_v17  ;;  %v400_v35 = vld [vmem:[%s3833_s21 + $0x220] sm:$0xff]  ;;  %v402_v36 = vld [vmem:[%s3833_s21 + $0x228] sm:$0xff] }
  0x24   : > { %367 = vst [vmem:[%s3838_s22 + $0x88] sm:$0xff] %v366_v18  ;;  %v404_v37 = vld [vmem:[%s3833_s21 + $0x240] sm:$0xff]  ;;  %v406_v38 = vld [vmem:[%s3833_s21 + $0x248] sm:$0xff] }
  0x25   : > { %369 = vst [vmem:[%s3838_s22 + $0x90] sm:$0xff] %v368_v19  ;;  %v408_v39 = vld [vmem:[%s3833_s21 + $0x260] sm:$0xff]  ;;  %v410_v40 = vld [vmem:[%s3833_s21 + $0x268] sm:$0xff] }
  0x26   : > { %371 = vst [vmem:[%s3838_s22 + $0x98] sm:$0xff] %v370_v20  ;;  %v412_v41 = vld [vmem:[%s3833_s21 + $0x280] sm:$0xff]  ;;  %v414_v42 = vld [vmem:[%s3833_s21 + $0x288] sm:$0xff] }
  0x27   : > { %373 = vst [vmem:[%s3838_s22 + $0xa0] sm:$0xff] %v372_v21  ;;  %v416_v43 = vld [vmem:[%s3833_s21 + $0x2a0] sm:$0xff]  ;;  %v418_v44 = vld [vmem:[%s3833_s21 + $0x2a8] sm:$0xff] }
  0x28   : > { %375 = vst [vmem:[%s3838_s22 + $0xa8] sm:$0xff] %v374_v22  ;;  %v420_v45 = vld [vmem:[%s3833_s21 + $0x2c0] sm:$0xff]  ;;  %v422_v46 = vld [vmem:[%s3833_s21 + $0x2c8] sm:$0xff] }
  0x29   : > { %377 = vst [vmem:[%s3838_s22 + $0xb0] sm:$0xff] %v376_v23  ;;  %v424_v47 = vld [vmem:[%s3833_s21 + $0x2e0] sm:$0xff]  ;;  %v426_v48 = vld [vmem:[%s3833_s21 + $0x2e8] sm:$0xff] }
  0x2a   : > { %379 = vst [vmem:[%s3838_s22 + $0xb8] sm:$0xff] %v378_v24  ;;  %v428_v49 = vld [vmem:[%s3833_s21 + $0x300] sm:$0xff]  ;;  %v430_v50 = vld [vmem:[%s3833_s21 + $0x308] sm:$0xff] }
  0x2b   : > { %381 = vst [vmem:[%s3838_s22 + $0xc0] sm:$0xff] %v380_v25  ;;  %v432_v51 = vld [vmem:[%s3833_s21 + $0x320] sm:$0xff]  ;;  %v434_v52 = vld [vmem:[%s3833_s21 + $0x328] sm:$0xff] }
  0x2c   : > { %383 = vst [vmem:[%s3838_s22 + $0xc8] sm:$0xff] %v382_v26  ;;  %v436_v53 = vld [vmem:[%s3833_s21 + $0x340] sm:$0xff]  ;;  %v438_v54 = vld [vmem:[%s3833_s21 + $0x348] sm:$0xff] }
  0x2d   : > { %385 = vst [vmem:[%s3838_s22 + $0xd0] sm:$0xff] %v384_v27  ;;  %v440_v55 = vld [vmem:[%s3833_s21 + $0x360] sm:$0xff]  ;;  %v442_v56 = vld [vmem:[%s3833_s21 + $0x368] sm:$0xff] }
  0x2e   : > { %387 = vst [vmem:[%s3838_s22 + $0xd8] sm:$0xff] %v386_v28  ;;  %v444_v57 = vld [vmem:[%s3833_s21 + $0x380] sm:$0xff]  ;;  %v446_v58 = vld [vmem:[%s3833_s21 + $0x388] sm:$0xff] }
  0x2f   : > { %389 = vst [vmem:[%s3838_s22 + $0xe0] sm:$0xff] %v388_v29  ;;  %v448_v59 = vld [vmem:[%s3833_s21 + $0x3a0] sm:$0xff]  ;;  %v450_v60 = vld [vmem:[%s3833_s21 + $0x3a8] sm:$0xff] }
  0x30   : > { %391 = vst [vmem:[%s3838_s22 + $0xe8] sm:$0xff] %v390_v30  ;;  %v452_v61 = vld [vmem:[%s3833_s21 + $0x3c0] sm:$0xff]  ;;  %v454_v62 = vld [vmem:[%s3833_s21 + $0x3c8] sm:$0xff] }
  0x31   : > { %393 = vst [vmem:[%s3838_s22 + $0xf0] sm:$0xff] %v392_v31  ;;  %v456_v63 = vld [vmem:[%s3833_s21 + $0x3e0] sm:$0xff]  ;;  %v458_v0 = vld [vmem:[%s3833_s21 + $0x3e8] sm:$0xff] }
  0x32   : > { %395 = vst [vmem:[%s3838_s22 + $0xf8] sm:$0xff] %v394_v32  ;;  %v460_v1 = vld [vmem:[%s3833_s21 + $0x400] sm:$0xff]  ;;  %v462_v2 = vld [vmem:[%s3833_s21 + $0x408] sm:$0xff] }
  0x33   : > { %397 = vst [vmem:[%s3838_s22 + $0x100] sm:$0xff] %v396_v33  ;;  %v464_v3 = vld [vmem:[%s3833_s21 + $0x420] sm:$0xff]  ;;  %v466_v4 = vld [vmem:[%s3833_s21 + $0x428] sm:$0xff] }
  0x34   : > { %399 = vst [vmem:[%s3838_s22 + $0x108] sm:$0xff] %v398_v34  ;;  %v468_v5 = vld [vmem:[%s3833_s21 + $0x440] sm:$0xff]  ;;  %v470_v6 = vld [vmem:[%s3833_s21 + $0x448] sm:$0xff] }
  0x35   : > { %401 = vst [vmem:[%s3838_s22 + $0x110] sm:$0xff] %v400_v35  ;;  %v472_v7 = vld [vmem:[%s3833_s21 + $0x460] sm:$0xff]  ;;  %v474_v8 = vld [vmem:[%s3833_s21 + $0x468] sm:$0xff] }
  0x36   : > { %403 = vst [vmem:[%s3838_s22 + $0x118] sm:$0xff] %v402_v36  ;;  %v476_v9 = vld [vmem:[%s3833_s21 + $0x480] sm:$0xff]  ;;  %v478_v10 = vld [vmem:[%s3833_s21 + $0x488] sm:$0xff] }
  0x37   : > { %405 = vst [vmem:[%s3838_s22 + $0x120] sm:$0xff] %v404_v37  ;;  %v480_v11 = vld [vmem:[%s3833_s21 + $0x4a0] sm:$0xff]  ;;  %v482_v12 = vld [vmem:[%s3833_s21 + $0x4a8] sm:$0xff] }
  0x38   : > { %407 = vst [vmem:[%s3838_s22 + $0x128] sm:$0xff] %v406_v38  ;;  %v484_v13 = vld [vmem:[%s3833_s21 + $0x4c0] sm:$0xff]  ;;  %v486_v14 = vld [vmem:[%s3833_s21 + $0x4c8] sm:$0xff] }
  0x39   : > { %409 = vst [vmem:[%s3838_s22 + $0x130] sm:$0xff] %v408_v39  ;;  %v488_v15 = vld [vmem:[%s3833_s21 + $0x4e0] sm:$0xff]  ;;  %v490_v16 = vld [vmem:[%s3833_s21 + $0x4e8] sm:$0xff] }
  0x3a   : > { %411 = vst [vmem:[%s3838_s22 + $0x138] sm:$0xff] %v410_v40  ;;  %v492_v17 = vld [vmem:[%s3833_s21 + $0x500] sm:$0xff]  ;;  %v494_v18 = vld [vmem:[%s3833_s21 + $0x508] sm:$0xff] }
  0x3b   : > { %413 = vst [vmem:[%s3838_s22 + $0x140] sm:$0xff] %v412_v41  ;;  %v496_v19 = vld [vmem:[%s3833_s21 + $0x520] sm:$0xff]  ;;  %v498_v20 = vld [vmem:[%s3833_s21 + $0x528] sm:$0xff] }
  0x3c   : > { %415 = vst [vmem:[%s3838_s22 + $0x148] sm:$0xff] %v414_v42  ;;  %v500_v21 = vld [vmem:[%s3833_s21 + $0x540] sm:$0xff]  ;;  %v502_v22 = vld [vmem:[%s3833_s21 + $0x548] sm:$0xff] }
  0x3d   : > { %417 = vst [vmem:[%s3838_s22 + $0x150] sm:$0xff] %v416_v43  ;;  %v504_v23 = vld [vmem:[%s3833_s21 + $0x560] sm:$0xff]  ;;  %v506_v24 = vld [vmem:[%s3833_s21 + $0x568] sm:$0xff] }
  0x3e   : > { %419 = vst [vmem:[%s3838_s22 + $0x158] sm:$0xff] %v418_v44  ;;  %v508_v25 = vld [vmem:[%s3833_s21 + $0x580] sm:$0xff]  ;;  %v510_v26 = vld [vmem:[%s3833_s21 + $0x588] sm:$0xff] }
  0x3f   : > { %421 = vst [vmem:[%s3838_s22 + $0x160] sm:$0xff] %v420_v45  ;;  %v512_v27 = vld [vmem:[%s3833_s21 + $0x5a0] sm:$0xff]  ;;  %v514_v28 = vld [vmem:[%s3833_s21 + $0x5a8] sm:$0xff] }
  0x40   : > { %423 = vst [vmem:[%s3838_s22 + $0x168] sm:$0xff] %v422_v46  ;;  %v516_v29 = vld [vmem:[%s3833_s21 + $0x5c0] sm:$0xff]  ;;  %v518_v30 = vld [vmem:[%s3833_s21 + $0x5c8] sm:$0xff] }
  0x41   : > { %425 = vst [vmem:[%s3838_s22 + $0x170] sm:$0xff] %v424_v47  ;;  %v520_v31 = vld [vmem:[%s3833_s21 + $0x5e0] sm:$0xff]  ;;  %v522_v32 = vld [vmem:[%s3833_s21 + $0x5e8] sm:$0xff] }
  0x42   : > { %427 = vst [vmem:[%s3838_s22 + $0x178] sm:$0xff] %v426_v48  ;;  %v524_v33 = vld [vmem:[%s3833_s21 + $0x600] sm:$0xff]  ;;  %v526_v34 = vld [vmem:[%s3833_s21 + $0x608] sm:$0xff] }
  0x43   : > { %429 = vst [vmem:[%s3838_s22 + $0x180] sm:$0xff] %v428_v49  ;;  %v528_v35 = vld [vmem:[%s3833_s21 + $0x620] sm:$0xff]  ;;  %v530_v36 = vld [vmem:[%s3833_s21 + $0x628] sm:$0xff] }
  0x44   : > { %431 = vst [vmem:[%s3838_s22 + $0x188] sm:$0xff] %v430_v50  ;;  %v532_v37 = vld [vmem:[%s3833_s21 + $0x640] sm:$0xff]  ;;  %v534_v38 = vld [vmem:[%s3833_s21 + $0x648] sm:$0xff] }
  0x45   : > { %433 = vst [vmem:[%s3838_s22 + $0x190] sm:$0xff] %v432_v51  ;;  %v536_v39 = vld [vmem:[%s3833_s21 + $0x660] sm:$0xff]  ;;  %v538_v40 = vld [vmem:[%s3833_s21 + $0x668] sm:$0xff] }
  0x46   : > { %435 = vst [vmem:[%s3838_s22 + $0x198] sm:$0xff] %v434_v52  ;;  %v540_v41 = vld [vmem:[%s3833_s21 + $0x680] sm:$0xff]  ;;  %v542_v42 = vld [vmem:[%s3833_s21 + $0x688] sm:$0xff] }
  0x47   : > { %437 = vst [vmem:[%s3838_s22 + $0x1a0] sm:$0xff] %v436_v53  ;;  %v544_v43 = vld [vmem:[%s3833_s21 + $0x6a0] sm:$0xff]  ;;  %v546_v44 = vld [vmem:[%s3833_s21 + $0x6a8] sm:$0xff] }
  0x48   : > { %439 = vst [vmem:[%s3838_s22 + $0x1a8] sm:$0xff] %v438_v54  ;;  %v548_v45 = vld [vmem:[%s3833_s21 + $0x6c0] sm:$0xff]  ;;  %v550_v46 = vld [vmem:[%s3833_s21 + $0x6c8] sm:$0xff] }
  0x49   : > { %441 = vst [vmem:[%s3838_s22 + $0x1b0] sm:$0xff] %v440_v55  ;;  %v552_v47 = vld [vmem:[%s3833_s21 + $0x6e0] sm:$0xff]  ;;  %v554_v48 = vld [vmem:[%s3833_s21 + $0x6e8] sm:$0xff] }
  0x4a   : > { %443 = vst [vmem:[%s3838_s22 + $0x1b8] sm:$0xff] %v442_v56  ;;  %v556_v49 = vld [vmem:[%s3833_s21 + $0x700] sm:$0xff]  ;;  %v558_v50 = vld [vmem:[%s3833_s21 + $0x708] sm:$0xff] }
  0x4b   : > { %445 = vst [vmem:[%s3838_s22 + $0x1c0] sm:$0xff] %v444_v57  ;;  %v560_v51 = vld [vmem:[%s3833_s21 + $0x720] sm:$0xff]  ;;  %v562_v52 = vld [vmem:[%s3833_s21 + $0x728] sm:$0xff] }
  0x4c   : > { %447 = vst [vmem:[%s3838_s22 + $0x1c8] sm:$0xff] %v446_v58  ;;  %v564_v53 = vld [vmem:[%s3833_s21 + $0x740] sm:$0xff]  ;;  %v566_v54 = vld [vmem:[%s3833_s21 + $0x748] sm:$0xff] }
  0x4d   : > { %449 = vst [vmem:[%s3838_s22 + $0x1d0] sm:$0xff] %v448_v59  ;;  %v568_v55 = vld [vmem:[%s3833_s21 + $0x760] sm:$0xff]  ;;  %v570_v56 = vld [vmem:[%s3833_s21 + $0x768] sm:$0xff] }
  0x4e   : > { %451 = vst [vmem:[%s3838_s22 + $0x1d8] sm:$0xff] %v450_v60  ;;  %v572_v57 = vld [vmem:[%s3833_s21 + $0x780] sm:$0xff]  ;;  %v574_v58 = vld [vmem:[%s3833_s21 + $0x788] sm:$0xff] }
  0x4f   : > { %453 = vst [vmem:[%s3838_s22 + $0x1e0] sm:$0xff] %v452_v61  ;;  %v576_v59 = vld [vmem:[%s3833_s21 + $0x7a0] sm:$0xff]  ;;  %v578_v60 = vld [vmem:[%s3833_s21 + $0x7a8] sm:$0xff] }
  0x50   : > { %455 = vst [vmem:[%s3838_s22 + $0x1e8] sm:$0xff] %v454_v62  ;;  %v580_v61 = vld [vmem:[%s3833_s21 + $0x7c0] sm:$0xff]  ;;  %v582_v62 = vld [vmem:[%s3833_s21 + $0x7c8] sm:$0xff] }
  0x51   : > { %457 = vst [vmem:[%s3838_s22 + $0x1f0] sm:$0xff] %v456_v63  ;;  %v584_v63 = vld [vmem:[%s3833_s21 + $0x7e0] sm:$0xff] }
  0x52   : > { %459 = vst [vmem:[%s3838_s22 + $0x1f8] sm:$0xff] %v458_v0  ;;  %v586_v0 = vld [vmem:[%s3833_s21 + $0x7e8] sm:$0xff] }
  0x53   : > { %461 = vst [vmem:[%s3838_s22 + $0x200] sm:$0xff] %v460_v1  ;;  %v588_v1 = vld [vmem:[%s3833_s21 + $0x800] sm:$0xff] }
  0x54   : > { %463 = vst [vmem:[%s3838_s22 + $0x208] sm:$0xff] %v462_v2  ;;  %v590_v2 = vld [vmem:[%s3833_s21 + $0x808] sm:$0xff] }
  0x55   : > { %465 = vst [vmem:[%s3838_s22 + $0x210] sm:$0xff] %v464_v3  ;;  %v592_v3 = vld [vmem:[%s3833_s21 + $0x820] sm:$0xff] }
  0x56   : > { %467 = vst [vmem:[%s3838_s22 + $0x218] sm:$0xff] %v466_v4  ;;  %v594_v4 = vld [vmem:[%s3833_s21 + $0x828] sm:$0xff] }
  0x57   : > { %469 = vst [vmem:[%s3838_s22 + $0x220] sm:$0xff] %v468_v5  ;;  %v596_v5 = vld [vmem:[%s3833_s21 + $0x840] sm:$0xff] }
  0x58   : > { %471 = vst [vmem:[%s3838_s22 + $0x228] sm:$0xff] %v470_v6  ;;  %v598_v6 = vld [vmem:[%s3833_s21 + $0x848] sm:$0xff] }
  0x59   : > { %473 = vst [vmem:[%s3838_s22 + $0x230] sm:$0xff] %v472_v7  ;;  %v600_v7 = vld [vmem:[%s3833_s21 + $0x860] sm:$0xff] }
  0x5a   : > { %475 = vst [vmem:[%s3838_s22 + $0x238] sm:$0xff] %v474_v8  ;;  %v602_v8 = vld [vmem:[%s3833_s21 + $0x868] sm:$0xff] }
  0x5b   : > { %477 = vst [vmem:[%s3838_s22 + $0x240] sm:$0xff] %v476_v9  ;;  %v604_v9 = vld [vmem:[%s3833_s21 + $0x880] sm:$0xff] }
  0x5c   : > { %479 = vst [vmem:[%s3838_s22 + $0x248] sm:$0xff] %v478_v10  ;;  %v606_v10 = vld [vmem:[%s3833_s21 + $0x888] sm:$0xff] }
  0x5d   : > { %481 = vst [vmem:[%s3838_s22 + $0x250] sm:$0xff] %v480_v11  ;;  %v608_v11 = vld [vmem:[%s3833_s21 + $0x8a0] sm:$0xff] }
  0x5e   : > { %483 = vst [vmem:[%s3838_s22 + $0x258] sm:$0xff] %v482_v12  ;;  %v610_v12 = vld [vmem:[%s3833_s21 + $0x8a8] sm:$0xff] }
  0x5f   : > { %485 = vst [vmem:[%s3838_s22 + $0x260] sm:$0xff] %v484_v13  ;;  %v612_v13 = vld [vmem:[%s3833_s21 + $0x8c0] sm:$0xff] }
  0x60   : > { %487 = vst [vmem:[%s3838_s22 + $0x268] sm:$0xff] %v486_v14  ;;  %v614_v14 = vld [vmem:[%s3833_s21 + $0x8c8] sm:$0xff] }
  0x61   : > { %489 = vst [vmem:[%s3838_s22 + $0x270] sm:$0xff] %v488_v15  ;;  %v616_v15 = vld [vmem:[%s3833_s21 + $0x8e0] sm:$0xff] }
  0x62   : > { %491 = vst [vmem:[%s3838_s22 + $0x278] sm:$0xff] %v490_v16  ;;  %v618_v16 = vld [vmem:[%s3833_s21 + $0x8e8] sm:$0xff] }
  0x63   : > { %493 = vst [vmem:[%s3838_s22 + $0x280] sm:$0xff] %v492_v17 }
  0x64   : > { %495 = vst [vmem:[%s3838_s22 + $0x288] sm:$0xff] %v494_v18 }
  0x65   : > { %497 = vst [vmem:[%s3838_s22 + $0x290] sm:$0xff] %v496_v19 }
  0x66   : > { %499 = vst [vmem:[%s3838_s22 + $0x298] sm:$0xff] %v498_v20 }
  0x67   : > { %501 = vst [vmem:[%s3838_s22 + $0x2a0] sm:$0xff] %v500_v21 }
  0x68   : > { %503 = vst [vmem:[%s3838_s22 + $0x2a8] sm:$0xff] %v502_v22 }
  0x69   : > { %505 = vst [vmem:[%s3838_s22 + $0x2b0] sm:$0xff] %v504_v23 }
  0x6a   : > { %507 = vst [vmem:[%s3838_s22 + $0x2b8] sm:$0xff] %v506_v24 }
  0x6b   : > { %509 = vst [vmem:[%s3838_s22 + $0x2c0] sm:$0xff] %v508_v25 }
  0x6c   : > { %511 = vst [vmem:[%s3838_s22 + $0x2c8] sm:$0xff] %v510_v26 }
  0x6d   : > { %513 = vst [vmem:[%s3838_s22 + $0x2d0] sm:$0xff] %v512_v27 }
  0x6e   : > { %515 = vst [vmem:[%s3838_s22 + $0x2d8] sm:$0xff] %v514_v28 }
  0x6f   : > { %517 = vst [vmem:[%s3838_s22 + $0x2e0] sm:$0xff] %v516_v29 }
  0x70   : > { %519 = vst [vmem:[%s3838_s22 + $0x2e8] sm:$0xff] %v518_v30 }
  0x71   : > { %521 = vst [vmem:[%s3838_s22 + $0x2f0] sm:$0xff] %v520_v31 }
  0x72   : > { %523 = vst [vmem:[%s3838_s22 + $0x2f8] sm:$0xff] %v522_v32 }
  0x73   : > { %525 = vst [vmem:[%s3838_s22 + $0x300] sm:$0xff] %v524_v33 }
  0x74   : > { %527 = vst [vmem:[%s3838_s22 + $0x308] sm:$0xff] %v526_v34 }
  0x75   : > { %529 = vst [vmem:[%s3838_s22 + $0x310] sm:$0xff] %v528_v35 }
  0x76   : > { %531 = vst [vmem:[%s3838_s22 + $0x318] sm:$0xff] %v530_v36 }
  0x77   : > { %533 = vst [vmem:[%s3838_s22 + $0x320] sm:$0xff] %v532_v37 }
  0x78   : > { %535 = vst [vmem:[%s3838_s22 + $0x328] sm:$0xff] %v534_v38 }
  0x79   : > { %537 = vst [vmem:[%s3838_s22 + $0x330] sm:$0xff] %v536_v39 }
  0x7a   : > { %539 = vst [vmem:[%s3838_s22 + $0x338] sm:$0xff] %v538_v40 }
  0x7b   : > { %541 = vst [vmem:[%s3838_s22 + $0x340] sm:$0xff] %v540_v41 }
  0x7c   : > { %543 = vst [vmem:[%s3838_s22 + $0x348] sm:$0xff] %v542_v42 }
  0x7d   : > { %545 = vst [vmem:[%s3838_s22 + $0x350] sm:$0xff] %v544_v43 }
  0x7e   : > { %547 = vst [vmem:[%s3838_s22 + $0x358] sm:$0xff] %v546_v44 }
  0x7f   : > { %549 = vst [vmem:[%s3838_s22 + $0x360] sm:$0xff] %v548_v45 }
  0x80   : > { %551 = vst [vmem:[%s3838_s22 + $0x368] sm:$0xff] %v550_v46 }
  0x81   : > { %553 = vst [vmem:[%s3838_s22 + $0x370] sm:$0xff] %v552_v47 }
  0x82   : > { %555 = vst [vmem:[%s3838_s22 + $0x378] sm:$0xff] %v554_v48 }
  0x83   : > { %557 = vst [vmem:[%s3838_s22 + $0x380] sm:$0xff] %v556_v49 }
  0x84   : > { %559 = vst [vmem:[%s3838_s22 + $0x388] sm:$0xff] %v558_v50 }
  0x85   : > { %561 = vst [vmem:[%s3838_s22 + $0x390] sm:$0xff] %v560_v51 }
  0x86   : > { %563 = vst [vmem:[%s3838_s22 + $0x398] sm:$0xff] %v562_v52 }
  0x87   : > { %565 = vst [vmem:[%s3838_s22 + $0x3a0] sm:$0xff] %v564_v53 }
  0x88   : > { %567 = vst [vmem:[%s3838_s22 + $0x3a8] sm:$0xff] %v566_v54 }
  0x89   : > { %569 = vst [vmem:[%s3838_s22 + $0x3b0] sm:$0xff] %v568_v55 }
  0x8a   : > { %571 = vst [vmem:[%s3838_s22 + $0x3b8] sm:$0xff] %v570_v56 }
  0x8b   : > { %573 = vst [vmem:[%s3838_s22 + $0x3c0] sm:$0xff] %v572_v57 }
  0x8c   : > { %575 = vst [vmem:[%s3838_s22 + $0x3c8] sm:$0xff] %v574_v58 }
  0x8d   : > { %577 = vst [vmem:[%s3838_s22 + $0x3d0] sm:$0xff] %v576_v59 }
  0x8e   : > { %579 = vst [vmem:[%s3838_s22 + $0x3d8] sm:$0xff] %v578_v60 }
  0x8f   : > { %581 = vst [vmem:[%s3838_s22 + $0x3e0] sm:$0xff] %v580_v61 }
  0x90   : > { %583 = vst [vmem:[%s3838_s22 + $0x3e8] sm:$0xff] %v582_v62 }
  0x91   : > { %585 = vst [vmem:[%s3838_s22 + $0x3f0] sm:$0xff] %v584_v63 }
  0x92   : > { %587 = vst [vmem:[%s3838_s22 + $0x3f8] sm:$0xff] %v586_v0 }
  0x93   : > { %589 = vst [vmem:[%s3838_s22 + $0x400] sm:$0xff] %v588_v1 }
  0x94   : > { %591 = vst [vmem:[%s3838_s22 + $0x408] sm:$0xff] %v590_v2 }
  0x95   : > { %593 = vst [vmem:[%s3838_s22 + $0x410] sm:$0xff] %v592_v3 }
  0x96   : > { %595 = vst [vmem:[%s3838_s22 + $0x418] sm:$0xff] %v594_v4 }
  0x97   : > { %597 = vst [vmem:[%s3838_s22 + $0x420] sm:$0xff] %v596_v5 }
  0x98   : > { %599 = vst [vmem:[%s3838_s22 + $0x428] sm:$0xff] %v598_v6 }
  0x99   : > { %601 = vst [vmem:[%s3838_s22 + $0x430] sm:$0xff] %v600_v7 }
  0x9a   : > { %603 = vst [vmem:[%s3838_s22 + $0x438] sm:$0xff] %v602_v8 }
  0x9b   : > { %605 = vst [vmem:[%s3838_s22 + $0x440] sm:$0xff] %v604_v9 }
  0x9c   : > { %607 = vst [vmem:[%s3838_s22 + $0x448] sm:$0xff] %v606_v10 }
  0x9d   : > { %609 = vst [vmem:[%s3838_s22 + $0x450] sm:$0xff] %v608_v11 }
  0x9e   : > { %611 = vst [vmem:[%s3838_s22 + $0x458] sm:$0xff] %v610_v12 }
  0x9f   : > { %613 = vst [vmem:[%s3838_s22 + $0x460] sm:$0xff] %v612_v13 }
  0xa0   : > { %615 = vst [vmem:[%s3838_s22 + $0x468] sm:$0xff] %v614_v14 }
  0xa1   : > { %617 = vst [vmem:[%s3838_s22 + $0x470] sm:$0xff] %v616_v15 }
  0xa2   : > { %619 = vst [vmem:[%s3838_s22 + $0x478] sm:$0xff] %v618_v16 }
  0xa3 PF: > { %625 = sbr.rel (!%p3815_p3) target bundleno = 311 (0x137), region = 51  ;;  %s627_s23 = sand.u32 (%p3815_p3), 1, %s3721_s30  }
  0xa4   : > { %s3530_s24 = sshll.u32 (%p3815_p3), %s3729_s10, 4  ;;  %s3532_s25 = smul.u32 (%p3815_p3), 1152, %s627_s23 }
  0xa5   : > { %s4132_s28 = scalar_lea.vmem (%p3815_p3), %s6417_s3, %s3530_s24 }
  0xa6   : > { %v648_v17 = vld [vmem:[%s4132_s28] sm:$0xff] (%p3815_p3)  ;;  %v650_v18 = vld [vmem:[%s4132_s28 + $0x8] sm:$0xff] (%p3815_p3)  ;;  %s4137_s12 = scalar_lea.vmem (%p3815_p3), [#allocation5], %s3532_s25 }
  0xa7   : > { %v652_v19 = vld [vmem:[%s4132_s28 + $0x20] sm:$0xff] (%p3815_p3)  ;;  %649 = vst [vmem:[%s4137_s12] sm:$0xff] (%p3815_p3), %v648_v17  ;;  %v654_v20 = vld [vmem:[%s4132_s28 + $0x28] sm:$0xff] (%p3815_p3) }
  0xa8   : > { %651 = vst [vmem:[%s4137_s12 + $0x8] sm:$0xff] %v650_v18  ;;  %v656_v21 = vld [vmem:[%s4132_s28 + $0x40] sm:$0xff]  ;;  %v658_v22 = vld [vmem:[%s4132_s28 + $0x48] sm:$0xff] }
  0xa9   : > { %653 = vst [vmem:[%s4137_s12 + $0x10] sm:$0xff] %v652_v19  ;;  %v660_v23 = vld [vmem:[%s4132_s28 + $0x60] sm:$0xff]  ;;  %v662_v24 = vld [vmem:[%s4132_s28 + $0x68] sm:$0xff] }
  0xaa   : > { %655 = vst [vmem:[%s4137_s12 + $0x18] sm:$0xff] %v654_v20  ;;  %v664_v25 = vld [vmem:[%s4132_s28 + $0x80] sm:$0xff]  ;;  %v666_v26 = vld [vmem:[%s4132_s28 + $0x88] sm:$0xff] }
  0xab   : > { %657 = vst [vmem:[%s4137_s12 + $0x20] sm:$0xff] %v656_v21  ;;  %v668_v27 = vld [vmem:[%s4132_s28 + $0xa0] sm:$0xff]  ;;  %v670_v28 = vld [vmem:[%s4132_s28 + $0xa8] sm:$0xff] }
  0xac   : > { %659 = vst [vmem:[%s4137_s12 + $0x28] sm:$0xff] %v658_v22  ;;  %v672_v29 = vld [vmem:[%s4132_s28 + $0xc0] sm:$0xff]  ;;  %v674_v30 = vld [vmem:[%s4132_s28 + $0xc8] sm:$0xff] }
  0xad   : > { %661 = vst [vmem:[%s4137_s12 + $0x30] sm:$0xff] %v660_v23  ;;  %v676_v31 = vld [vmem:[%s4132_s28 + $0xe0] sm:$0xff]  ;;  %v678_v32 = vld [vmem:[%s4132_s28 + $0xe8] sm:$0xff] }
  0xae   : > { %663 = vst [vmem:[%s4137_s12 + $0x38] sm:$0xff] %v662_v24  ;;  %v680_v33 = vld [vmem:[%s4132_s28 + $0x100] sm:$0xff]  ;;  %v682_v34 = vld [vmem:[%s4132_s28 + $0x108] sm:$0xff] }
  0xaf   : > { %665 = vst [vmem:[%s4137_s12 + $0x40] sm:$0xff] %v664_v25  ;;  %v684_v35 = vld [vmem:[%s4132_s28 + $0x120] sm:$0xff]  ;;  %v686_v36 = vld [vmem:[%s4132_s28 + $0x128] sm:$0xff] }
  0xb0   : > { %667 = vst [vmem:[%s4137_s12 + $0x48] sm:$0xff] %v666_v26  ;;  %v688_v37 = vld [vmem:[%s4132_s28 + $0x140] sm:$0xff]  ;;  %v690_v38 = vld [vmem:[%s4132_s28 + $0x148] sm:$0xff] }
  0xb1   : > { %669 = vst [vmem:[%s4137_s12 + $0x50] sm:$0xff] %v668_v27  ;;  %v692_v39 = vld [vmem:[%s4132_s28 + $0x160] sm:$0xff]  ;;  %v694_v40 = vld [vmem:[%s4132_s28 + $0x168] sm:$0xff] }
  0xb2   : > { %671 = vst [vmem:[%s4137_s12 + $0x58] sm:$0xff] %v670_v28  ;;  %v696_v41 = vld [vmem:[%s4132_s28 + $0x180] sm:$0xff]  ;;  %v698_v42 = vld [vmem:[%s4132_s28 + $0x188] sm:$0xff] }
  0xb3   : > { %673 = vst [vmem:[%s4137_s12 + $0x60] sm:$0xff] %v672_v29  ;;  %v700_v43 = vld [vmem:[%s4132_s28 + $0x1a0] sm:$0xff]  ;;  %v702_v44 = vld [vmem:[%s4132_s28 + $0x1a8] sm:$0xff] }
  0xb4   : > { %675 = vst [vmem:[%s4137_s12 + $0x68] sm:$0xff] %v674_v30  ;;  %v704_v45 = vld [vmem:[%s4132_s28 + $0x1c0] sm:$0xff]  ;;  %v706_v46 = vld [vmem:[%s4132_s28 + $0x1c8] sm:$0xff] }
  0xb5   : > { %677 = vst [vmem:[%s4137_s12 + $0x70] sm:$0xff] %v676_v31  ;;  %v708_v47 = vld [vmem:[%s4132_s28 + $0x1e0] sm:$0xff]  ;;  %v710_v48 = vld [vmem:[%s4132_s28 + $0x1e8] sm:$0xff] }
  0xb6   : > { %679 = vst [vmem:[%s4137_s12 + $0x78] sm:$0xff] %v678_v32  ;;  %v712_v49 = vld [vmem:[%s4132_s28 + $0x200] sm:$0xff]  ;;  %v714_v50 = vld [vmem:[%s4132_s28 + $0x208] sm:$0xff] }
  0xb7   : > { %681 = vst [vmem:[%s4137_s12 + $0x80] sm:$0xff] %v680_v33  ;;  %v716_v51 = vld [vmem:[%s4132_s28 + $0x220] sm:$0xff]  ;;  %v718_v52 = vld [vmem:[%s4132_s28 + $0x228] sm:$0xff] }
  0xb8   : > { %683 = vst [vmem:[%s4137_s12 + $0x88] sm:$0xff] %v682_v34  ;;  %v720_v53 = vld [vmem:[%s4132_s28 + $0x240] sm:$0xff]  ;;  %v722_v54 = vld [vmem:[%s4132_s28 + $0x248] sm:$0xff] }
  0xb9   : > { %685 = vst [vmem:[%s4137_s12 + $0x90] sm:$0xff] %v684_v35  ;;  %v724_v55 = vld [vmem:[%s4132_s28 + $0x260] sm:$0xff]  ;;  %v726_v56 = vld [vmem:[%s4132_s28 + $0x268] sm:$0xff] }
  0xba   : > { %687 = vst [vmem:[%s4137_s12 + $0x98] sm:$0xff] %v686_v36  ;;  %v728_v57 = vld [vmem:[%s4132_s28 + $0x280] sm:$0xff]  ;;  %v730_v58 = vld [vmem:[%s4132_s28 + $0x288] sm:$0xff] }
  0xbb   : > { %689 = vst [vmem:[%s4137_s12 + $0xa0] sm:$0xff] %v688_v37  ;;  %v732_v59 = vld [vmem:[%s4132_s28 + $0x2a0] sm:$0xff]  ;;  %v734_v60 = vld [vmem:[%s4132_s28 + $0x2a8] sm:$0xff] }
  0xbc   : > { %691 = vst [vmem:[%s4137_s12 + $0xa8] sm:$0xff] %v690_v38  ;;  %v736_v61 = vld [vmem:[%s4132_s28 + $0x2c0] sm:$0xff]  ;;  %v738_v62 = vld [vmem:[%s4132_s28 + $0x2c8] sm:$0xff] }
  0xbd   : > { %693 = vst [vmem:[%s4137_s12 + $0xb0] sm:$0xff] %v692_v39  ;;  %v740_v63 = vld [vmem:[%s4132_s28 + $0x2e0] sm:$0xff]  ;;  %v742_v0 = vld [vmem:[%s4132_s28 + $0x2e8] sm:$0xff] }
  0xbe   : > { %695 = vst [vmem:[%s4137_s12 + $0xb8] sm:$0xff] %v694_v40  ;;  %v744_v1 = vld [vmem:[%s4132_s28 + $0x300] sm:$0xff]  ;;  %v746_v2 = vld [vmem:[%s4132_s28 + $0x308] sm:$0xff] }
  0xbf   : > { %697 = vst [vmem:[%s4137_s12 + $0xc0] sm:$0xff] %v696_v41  ;;  %v748_v3 = vld [vmem:[%s4132_s28 + $0x320] sm:$0xff]  ;;  %v750_v4 = vld [vmem:[%s4132_s28 + $0x328] sm:$0xff] }
  0xc0   : > { %699 = vst [vmem:[%s4137_s12 + $0xc8] sm:$0xff] %v698_v42  ;;  %v752_v5 = vld [vmem:[%s4132_s28 + $0x340] sm:$0xff]  ;;  %v754_v6 = vld [vmem:[%s4132_s28 + $0x348] sm:$0xff] }
  0xc1   : > { %701 = vst [vmem:[%s4137_s12 + $0xd0] sm:$0xff] %v700_v43  ;;  %v756_v7 = vld [vmem:[%s4132_s28 + $0x360] sm:$0xff]  ;;  %v758_v8 = vld [vmem:[%s4132_s28 + $0x368] sm:$0xff] }
  0xc2   : > { %703 = vst [vmem:[%s4137_s12 + $0xd8] sm:$0xff] %v702_v44  ;;  %v760_v9 = vld [vmem:[%s4132_s28 + $0x380] sm:$0xff]  ;;  %v762_v10 = vld [vmem:[%s4132_s28 + $0x388] sm:$0xff] }
  0xc3   : > { %705 = vst [vmem:[%s4137_s12 + $0xe0] sm:$0xff] %v704_v45  ;;  %v764_v11 = vld [vmem:[%s4132_s28 + $0x3a0] sm:$0xff]  ;;  %v766_v12 = vld [vmem:[%s4132_s28 + $0x3a8] sm:$0xff] }
  0xc4   : > { %707 = vst [vmem:[%s4137_s12 + $0xe8] sm:$0xff] %v706_v46  ;;  %v768_v13 = vld [vmem:[%s4132_s28 + $0x3c0] sm:$0xff]  ;;  %v770_v14 = vld [vmem:[%s4132_s28 + $0x3c8] sm:$0xff] }
  0xc5   : > { %709 = vst [vmem:[%s4137_s12 + $0xf0] sm:$0xff] %v708_v47  ;;  %v772_v15 = vld [vmem:[%s4132_s28 + $0x3e0] sm:$0xff]  ;;  %v774_v16 = vld [vmem:[%s4132_s28 + $0x3e8] sm:$0xff] }
  0xc6   : > { %711 = vst [vmem:[%s4137_s12 + $0xf8] sm:$0xff] %v710_v48  ;;  %v776_v17 = vld [vmem:[%s4132_s28 + $0x400] sm:$0xff]  ;;  %v778_v18 = vld [vmem:[%s4132_s28 + $0x408] sm:$0xff] }
  0xc7   : > { %713 = vst [vmem:[%s4137_s12 + $0x100] sm:$0xff] %v712_v49  ;;  %v780_v19 = vld [vmem:[%s4132_s28 + $0x420] sm:$0xff]  ;;  %v782_v20 = vld [vmem:[%s4132_s28 + $0x428] sm:$0xff] }
  0xc8   : > { %715 = vst [vmem:[%s4137_s12 + $0x108] sm:$0xff] %v714_v50  ;;  %v784_v21 = vld [vmem:[%s4132_s28 + $0x440] sm:$0xff]  ;;  %v786_v22 = vld [vmem:[%s4132_s28 + $0x448] sm:$0xff] }
  0xc9   : > { %717 = vst [vmem:[%s4137_s12 + $0x110] sm:$0xff] %v716_v51  ;;  %v788_v23 = vld [vmem:[%s4132_s28 + $0x460] sm:$0xff]  ;;  %v790_v24 = vld [vmem:[%s4132_s28 + $0x468] sm:$0xff] }
  0xca   : > { %719 = vst [vmem:[%s4137_s12 + $0x118] sm:$0xff] %v718_v52  ;;  %v792_v25 = vld [vmem:[%s4132_s28 + $0x480] sm:$0xff]  ;;  %v794_v26 = vld [vmem:[%s4132_s28 + $0x488] sm:$0xff] }
  0xcb   : > { %721 = vst [vmem:[%s4137_s12 + $0x120] sm:$0xff] %v720_v53  ;;  %v796_v27 = vld [vmem:[%s4132_s28 + $0x4a0] sm:$0xff]  ;;  %v798_v28 = vld [vmem:[%s4132_s28 + $0x4a8] sm:$0xff] }
  0xcc   : > { %723 = vst [vmem:[%s4137_s12 + $0x128] sm:$0xff] %v722_v54  ;;  %v800_v29 = vld [vmem:[%s4132_s28 + $0x4c0] sm:$0xff]  ;;  %v802_v30 = vld [vmem:[%s4132_s28 + $0x4c8] sm:$0xff] }
  0xcd   : > { %725 = vst [vmem:[%s4137_s12 + $0x130] sm:$0xff] %v724_v55  ;;  %v804_v31 = vld [vmem:[%s4132_s28 + $0x4e0] sm:$0xff]  ;;  %v806_v32 = vld [vmem:[%s4132_s28 + $0x4e8] sm:$0xff] }
  0xce   : > { %727 = vst [vmem:[%s4137_s12 + $0x138] sm:$0xff] %v726_v56  ;;  %v808_v33 = vld [vmem:[%s4132_s28 + $0x500] sm:$0xff]  ;;  %v810_v34 = vld [vmem:[%s4132_s28 + $0x508] sm:$0xff] }
  0xcf   : > { %729 = vst [vmem:[%s4137_s12 + $0x140] sm:$0xff] %v728_v57  ;;  %v812_v35 = vld [vmem:[%s4132_s28 + $0x520] sm:$0xff]  ;;  %v814_v36 = vld [vmem:[%s4132_s28 + $0x528] sm:$0xff] }
  0xd0   : > { %731 = vst [vmem:[%s4137_s12 + $0x148] sm:$0xff] %v730_v58  ;;  %v816_v37 = vld [vmem:[%s4132_s28 + $0x540] sm:$0xff]  ;;  %v818_v38 = vld [vmem:[%s4132_s28 + $0x548] sm:$0xff] }
  0xd1   : > { %733 = vst [vmem:[%s4137_s12 + $0x150] sm:$0xff] %v732_v59  ;;  %v820_v39 = vld [vmem:[%s4132_s28 + $0x560] sm:$0xff]  ;;  %v822_v40 = vld [vmem:[%s4132_s28 + $0x568] sm:$0xff] }
  0xd2   : > { %735 = vst [vmem:[%s4137_s12 + $0x158] sm:$0xff] %v734_v60  ;;  %v824_v41 = vld [vmem:[%s4132_s28 + $0x580] sm:$0xff]  ;;  %v826_v42 = vld [vmem:[%s4132_s28 + $0x588] sm:$0xff] }
  0xd3   : > { %737 = vst [vmem:[%s4137_s12 + $0x160] sm:$0xff] %v736_v61  ;;  %v828_v43 = vld [vmem:[%s4132_s28 + $0x5a0] sm:$0xff]  ;;  %v830_v44 = vld [vmem:[%s4132_s28 + $0x5a8] sm:$0xff] }
  0xd4   : > { %739 = vst [vmem:[%s4137_s12 + $0x168] sm:$0xff] %v738_v62  ;;  %v832_v45 = vld [vmem:[%s4132_s28 + $0x5c0] sm:$0xff]  ;;  %v834_v46 = vld [vmem:[%s4132_s28 + $0x5c8] sm:$0xff] }
  0xd5   : > { %741 = vst [vmem:[%s4137_s12 + $0x170] sm:$0xff] %v740_v63  ;;  %v836_v47 = vld [vmem:[%s4132_s28 + $0x5e0] sm:$0xff]  ;;  %v838_v48 = vld [vmem:[%s4132_s28 + $0x5e8] sm:$0xff] }
  0xd6   : > { %743 = vst [vmem:[%s4137_s12 + $0x178] sm:$0xff] %v742_v0  ;;  %v840_v49 = vld [vmem:[%s4132_s28 + $0x600] sm:$0xff]  ;;  %v842_v50 = vld [vmem:[%s4132_s28 + $0x608] sm:$0xff] }
  0xd7   : > { %745 = vst [vmem:[%s4137_s12 + $0x180] sm:$0xff] %v744_v1  ;;  %v844_v51 = vld [vmem:[%s4132_s28 + $0x620] sm:$0xff]  ;;  %v846_v52 = vld [vmem:[%s4132_s28 + $0x628] sm:$0xff] }
  0xd8   : > { %747 = vst [vmem:[%s4137_s12 + $0x188] sm:$0xff] %v746_v2  ;;  %v848_v53 = vld [vmem:[%s4132_s28 + $0x640] sm:$0xff]  ;;  %v850_v54 = vld [vmem:[%s4132_s28 + $0x648] sm:$0xff] }
  0xd9   : > { %749 = vst [vmem:[%s4137_s12 + $0x190] sm:$0xff] %v748_v3  ;;  %v852_v55 = vld [vmem:[%s4132_s28 + $0x660] sm:$0xff]  ;;  %v854_v56 = vld [vmem:[%s4132_s28 + $0x668] sm:$0xff] }
  0xda   : > { %751 = vst [vmem:[%s4137_s12 + $0x198] sm:$0xff] %v750_v4  ;;  %v856_v57 = vld [vmem:[%s4132_s28 + $0x680] sm:$0xff]  ;;  %v858_v58 = vld [vmem:[%s4132_s28 + $0x688] sm:$0xff] }
  0xdb   : > { %753 = vst [vmem:[%s4137_s12 + $0x1a0] sm:$0xff] %v752_v5  ;;  %v860_v59 = vld [vmem:[%s4132_s28 + $0x6a0] sm:$0xff]  ;;  %v862_v60 = vld [vmem:[%s4132_s28 + $0x6a8] sm:$0xff] }
  0xdc   : > { %755 = vst [vmem:[%s4137_s12 + $0x1a8] sm:$0xff] %v754_v6  ;;  %v864_v61 = vld [vmem:[%s4132_s28 + $0x6c0] sm:$0xff]  ;;  %v866_v62 = vld [vmem:[%s4132_s28 + $0x6c8] sm:$0xff] }
  0xdd   : > { %757 = vst [vmem:[%s4137_s12 + $0x1b0] sm:$0xff] %v756_v7  ;;  %v868_v63 = vld [vmem:[%s4132_s28 + $0x6e0] sm:$0xff]  ;;  %v870_v0 = vld [vmem:[%s4132_s28 + $0x6e8] sm:$0xff] }
  0xde   : > { %759 = vst [vmem:[%s4137_s12 + $0x1b8] sm:$0xff] %v758_v8  ;;  %v872_v1 = vld [vmem:[%s4132_s28 + $0x700] sm:$0xff]  ;;  %v874_v2 = vld [vmem:[%s4132_s28 + $0x708] sm:$0xff] }
  0xdf   : > { %761 = vst [vmem:[%s4137_s12 + $0x1c0] sm:$0xff] %v760_v9  ;;  %v876_v3 = vld [vmem:[%s4132_s28 + $0x720] sm:$0xff]  ;;  %v878_v4 = vld [vmem:[%s4132_s28 + $0x728] sm:$0xff] }
  0xe0   : > { %763 = vst [vmem:[%s4137_s12 + $0x1c8] sm:$0xff] %v762_v10  ;;  %v880_v5 = vld [vmem:[%s4132_s28 + $0x740] sm:$0xff]  ;;  %v882_v6 = vld [vmem:[%s4132_s28 + $0x748] sm:$0xff] }
  0xe1   : > { %765 = vst [vmem:[%s4137_s12 + $0x1d0] sm:$0xff] %v764_v11  ;;  %v884_v7 = vld [vmem:[%s4132_s28 + $0x760] sm:$0xff]  ;;  %v886_v8 = vld [vmem:[%s4132_s28 + $0x768] sm:$0xff] }
  0xe2   : > { %767 = vst [vmem:[%s4137_s12 + $0x1d8] sm:$0xff] %v766_v12  ;;  %v888_v9 = vld [vmem:[%s4132_s28 + $0x780] sm:$0xff]  ;;  %v890_v10 = vld [vmem:[%s4132_s28 + $0x788] sm:$0xff] }
  0xe3   : > { %769 = vst [vmem:[%s4137_s12 + $0x1e0] sm:$0xff] %v768_v13  ;;  %v892_v11 = vld [vmem:[%s4132_s28 + $0x7a0] sm:$0xff]  ;;  %v894_v12 = vld [vmem:[%s4132_s28 + $0x7a8] sm:$0xff] }
  0xe4   : > { %771 = vst [vmem:[%s4137_s12 + $0x1e8] sm:$0xff] %v770_v14  ;;  %v896_v13 = vld [vmem:[%s4132_s28 + $0x7c0] sm:$0xff]  ;;  %v898_v14 = vld [vmem:[%s4132_s28 + $0x7c8] sm:$0xff] }
  0xe5   : > { %773 = vst [vmem:[%s4137_s12 + $0x1f0] sm:$0xff] %v772_v15  ;;  %v900_v15 = vld [vmem:[%s4132_s28 + $0x7e0] sm:$0xff] }
  0xe6   : > { %775 = vst [vmem:[%s4137_s12 + $0x1f8] sm:$0xff] %v774_v16  ;;  %v902_v16 = vld [vmem:[%s4132_s28 + $0x7e8] sm:$0xff] }
  0xe7   : > { %777 = vst [vmem:[%s4137_s12 + $0x200] sm:$0xff] %v776_v17  ;;  %v904_v17 = vld [vmem:[%s4132_s28 + $0x800] sm:$0xff] }
  0xe8   : > { %779 = vst [vmem:[%s4137_s12 + $0x208] sm:$0xff] %v778_v18  ;;  %v906_v18 = vld [vmem:[%s4132_s28 + $0x808] sm:$0xff] }
  0xe9   : > { %781 = vst [vmem:[%s4137_s12 + $0x210] sm:$0xff] %v780_v19  ;;  %v908_v19 = vld [vmem:[%s4132_s28 + $0x820] sm:$0xff] }
  0xea   : > { %783 = vst [vmem:[%s4137_s12 + $0x218] sm:$0xff] %v782_v20  ;;  %v910_v20 = vld [vmem:[%s4132_s28 + $0x828] sm:$0xff] }
  0xeb   : > { %785 = vst [vmem:[%s4137_s12 + $0x220] sm:$0xff] %v784_v21  ;;  %v912_v21 = vld [vmem:[%s4132_s28 + $0x840] sm:$0xff] }
  0xec   : > { %787 = vst [vmem:[%s4137_s12 + $0x228] sm:$0xff] %v786_v22  ;;  %v914_v22 = vld [vmem:[%s4132_s28 + $0x848] sm:$0xff] }
  0xed   : > { %789 = vst [vmem:[%s4137_s12 + $0x230] sm:$0xff] %v788_v23  ;;  %v916_v23 = vld [vmem:[%s4132_s28 + $0x860] sm:$0xff] }
  0xee   : > { %791 = vst [vmem:[%s4137_s12 + $0x238] sm:$0xff] %v790_v24  ;;  %v918_v24 = vld [vmem:[%s4132_s28 + $0x868] sm:$0xff] }
  0xef   : > { %793 = vst [vmem:[%s4137_s12 + $0x240] sm:$0xff] %v792_v25  ;;  %v920_v25 = vld [vmem:[%s4132_s28 + $0x880] sm:$0xff] }
  0xf0   : > { %795 = vst [vmem:[%s4137_s12 + $0x248] sm:$0xff] %v794_v26  ;;  %v922_v26 = vld [vmem:[%s4132_s28 + $0x888] sm:$0xff] }
  0xf1   : > { %797 = vst [vmem:[%s4137_s12 + $0x250] sm:$0xff] %v796_v27  ;;  %v924_v27 = vld [vmem:[%s4132_s28 + $0x8a0] sm:$0xff] }
  0xf2   : > { %799 = vst [vmem:[%s4137_s12 + $0x258] sm:$0xff] %v798_v28  ;;  %v926_v28 = vld [vmem:[%s4132_s28 + $0x8a8] sm:$0xff] }
  0xf3   : > { %801 = vst [vmem:[%s4137_s12 + $0x260] sm:$0xff] %v800_v29  ;;  %v928_v29 = vld [vmem:[%s4132_s28 + $0x8c0] sm:$0xff] }
  0xf4   : > { %803 = vst [vmem:[%s4137_s12 + $0x268] sm:$0xff] %v802_v30  ;;  %v930_v30 = vld [vmem:[%s4132_s28 + $0x8c8] sm:$0xff] }
  0xf5   : > { %805 = vst [vmem:[%s4137_s12 + $0x270] sm:$0xff] %v804_v31  ;;  %v932_v31 = vld [vmem:[%s4132_s28 + $0x8e0] sm:$0xff] }
  0xf6   : > { %807 = vst [vmem:[%s4137_s12 + $0x278] sm:$0xff] %v806_v32  ;;  %v934_v32 = vld [vmem:[%s4132_s28 + $0x8e8] sm:$0xff] }
  0xf7   : > { %809 = vst [vmem:[%s4137_s12 + $0x280] sm:$0xff] %v808_v33 }
  0xf8   : > { %811 = vst [vmem:[%s4137_s12 + $0x288] sm:$0xff] %v810_v34 }
  0xf9   : > { %813 = vst [vmem:[%s4137_s12 + $0x290] sm:$0xff] %v812_v35 }
  0xfa   : > { %815 = vst [vmem:[%s4137_s12 + $0x298] sm:$0xff] %v814_v36 }
  0xfb   : > { %817 = vst [vmem:[%s4137_s12 + $0x2a0] sm:$0xff] %v816_v37 }
  0xfc   : > { %819 = vst [vmem:[%s4137_s12 + $0x2a8] sm:$0xff] %v818_v38 }
  0xfd   : > { %821 = vst [vmem:[%s4137_s12 + $0x2b0] sm:$0xff] %v820_v39 }
  0xfe   : > { %823 = vst [vmem:[%s4137_s12 + $0x2b8] sm:$0xff] %v822_v40 }
  0xff   : > { %825 = vst [vmem:[%s4137_s12 + $0x2c0] sm:$0xff] %v824_v41 }
 0x100   : > { %827 = vst [vmem:[%s4137_s12 + $0x2c8] sm:$0xff] %v826_v42 }
 0x101   : > { %829 = vst [vmem:[%s4137_s12 + $0x2d0] sm:$0xff] %v828_v43 }
 0x102   : > { %831 = vst [vmem:[%s4137_s12 + $0x2d8] sm:$0xff] %v830_v44 }
 0x103   : > { %833 = vst [vmem:[%s4137_s12 + $0x2e0] sm:$0xff] %v832_v45 }
 0x104   : > { %835 = vst [vmem:[%s4137_s12 + $0x2e8] sm:$0xff] %v834_v46 }
 0x105   : > { %837 = vst [vmem:[%s4137_s12 + $0x2f0] sm:$0xff] %v836_v47 }
 0x106   : > { %839 = vst [vmem:[%s4137_s12 + $0x2f8] sm:$0xff] %v838_v48 }
 0x107   : > { %841 = vst [vmem:[%s4137_s12 + $0x300] sm:$0xff] %v840_v49 }
 0x108   : > { %843 = vst [vmem:[%s4137_s12 + $0x308] sm:$0xff] %v842_v50 }
 0x109   : > { %845 = vst [vmem:[%s4137_s12 + $0x310] sm:$0xff] %v844_v51 }
 0x10a   : > { %847 = vst [vmem:[%s4137_s12 + $0x318] sm:$0xff] %v846_v52 }
 0x10b   : > { %849 = vst [vmem:[%s4137_s12 + $0x320] sm:$0xff] %v848_v53 }
 0x10c   : > { %851 = vst [vmem:[%s4137_s12 + $0x328] sm:$0xff] %v850_v54 }
 0x10d   : > { %853 = vst [vmem:[%s4137_s12 + $0x330] sm:$0xff] %v852_v55 }
 0x10e   : > { %855 = vst [vmem:[%s4137_s12 + $0x338] sm:$0xff] %v854_v56 }
 0x10f   : > { %857 = vst [vmem:[%s4137_s12 + $0x340] sm:$0xff] %v856_v57 }
 0x110   : > { %859 = vst [vmem:[%s4137_s12 + $0x348] sm:$0xff] %v858_v58 }
 0x111   : > { %861 = vst [vmem:[%s4137_s12 + $0x350] sm:$0xff] %v860_v59 }
 0x112   : > { %863 = vst [vmem:[%s4137_s12 + $0x358] sm:$0xff] %v862_v60 }
 0x113   : > { %865 = vst [vmem:[%s4137_s12 + $0x360] sm:$0xff] %v864_v61 }
 0x114   : > { %867 = vst [vmem:[%s4137_s12 + $0x368] sm:$0xff] %v866_v62 }
 0x115   : > { %869 = vst [vmem:[%s4137_s12 + $0x370] sm:$0xff] %v868_v63 }
 0x116   : > { %871 = vst [vmem:[%s4137_s12 + $0x378] sm:$0xff] %v870_v0 }
 0x117   : > { %873 = vst [vmem:[%s4137_s12 + $0x380] sm:$0xff] %v872_v1 }
 0x118   : > { %875 = vst [vmem:[%s4137_s12 + $0x388] sm:$0xff] %v874_v2 }
 0x119   : > { %877 = vst [vmem:[%s4137_s12 + $0x390] sm:$0xff] %v876_v3 }
 0x11a   : > { %879 = vst [vmem:[%s4137_s12 + $0x398] sm:$0xff] %v878_v4 }
 0x11b   : > { %881 = vst [vmem:[%s4137_s12 + $0x3a0] sm:$0xff] %v880_v5 }
 0x11c   : > { %883 = vst [vmem:[%s4137_s12 + $0x3a8] sm:$0xff] %v882_v6 }
 0x11d   : > { %885 = vst [vmem:[%s4137_s12 + $0x3b0] sm:$0xff] %v884_v7 }
 0x11e   : > { %887 = vst [vmem:[%s4137_s12 + $0x3b8] sm:$0xff] %v886_v8 }
 0x11f   : > { %889 = vst [vmem:[%s4137_s12 + $0x3c0] sm:$0xff] %v888_v9 }
 0x120   : > { %891 = vst [vmem:[%s4137_s12 + $0x3c8] sm:$0xff] %v890_v10 }
 0x121   : > { %893 = vst [vmem:[%s4137_s12 + $0x3d0] sm:$0xff] %v892_v11 }
 0x122   : > { %895 = vst [vmem:[%s4137_s12 + $0x3d8] sm:$0xff] %v894_v12 }
 0x123   : > { %897 = vst [vmem:[%s4137_s12 + $0x3e0] sm:$0xff] %v896_v13 }
 0x124   : > { %899 = vst [vmem:[%s4137_s12 + $0x3e8] sm:$0xff] %v898_v14 }
 0x125   : > { %901 = vst [vmem:[%s4137_s12 + $0x3f0] sm:$0xff] %v900_v15 }
 0x126   : > { %903 = vst [vmem:[%s4137_s12 + $0x3f8] sm:$0xff] %v902_v16 }
 0x127   : > { %905 = vst [vmem:[%s4137_s12 + $0x400] sm:$0xff] %v904_v17 }
 0x128   : > { %907 = vst [vmem:[%s4137_s12 + $0x408] sm:$0xff] %v906_v18 }
 0x129   : > { %909 = vst [vmem:[%s4137_s12 + $0x410] sm:$0xff] %v908_v19 }
 0x12a   : > { %911 = vst [vmem:[%s4137_s12 + $0x418] sm:$0xff] %v910_v20 }
 0x12b   : > { %913 = vst [vmem:[%s4137_s12 + $0x420] sm:$0xff] %v912_v21 }
 0x12c   : > { %915 = vst [vmem:[%s4137_s12 + $0x428] sm:$0xff] %v914_v22 }
 0x12d   : > { %917 = vst [vmem:[%s4137_s12 + $0x430] sm:$0xff] %v916_v23 }
 0x12e   : > { %919 = vst [vmem:[%s4137_s12 + $0x438] sm:$0xff] %v918_v24 }
 0x12f   : > { %921 = vst [vmem:[%s4137_s12 + $0x440] sm:$0xff] %v920_v25 }
 0x130   : > { %923 = vst [vmem:[%s4137_s12 + $0x448] sm:$0xff] %v922_v26 }
 0x131   : > { %925 = vst [vmem:[%s4137_s12 + $0x450] sm:$0xff] %v924_v27 }
 0x132   : > { %927 = vst [vmem:[%s4137_s12 + $0x458] sm:$0xff] %v926_v28 }
 0x133   : > { %929 = vst [vmem:[%s4137_s12 + $0x460] sm:$0xff] %v928_v29 }
 0x134   : > { %931 = vst [vmem:[%s4137_s12 + $0x468] sm:$0xff] %v930_v30 }
 0x135   : > { %933 = vst [vmem:[%s4137_s12 + $0x470] sm:$0xff] %v932_v31 }
 0x136   : > { %935 = vst [vmem:[%s4137_s12 + $0x478] sm:$0xff] %v934_v32 }
 0x137 PF: > { %p3516_p6 = scmp.ge.s32.totalorder %s3733_s11, 1  ;;  %p972_p7 = scmp.lt.s32.totalorder %s3733_s11, 3 }
 0x139   : > { %p973_p8 = pnand %p3516_p6, %p972_p7 }
 0x13b   : > { %976 = sbr.rel (%p973_p8) target bundleno = 971 (0x3cb), region = 90 }
 0x140   : > { %v3576_v33 = vld [vmem:[#allocation3] ss:$0 sm:$0xff]  ;;  %v3735_v34 = vmov 0   ;;  %s979_s13 = sand.u32 1, %s3717_s29   ;;  %s3517_s29 = sshll.u32 %s3725_s9, 2  ;;  %vm3008_vm0 = vcmask 523264  }
 0x141   : > { %3575 = vset.pattern.permute.xlu0 %v3735_v34  ;;  %v1105_v35 = vld [vmem:[#allocation3] sm:$0x1]  ;;  %s3533_s14 = smul.u32 1152, %s979_s13  ;;  %p4473_p9 = scmp.lt.s32.totalorder %s3517_s29, 7 }
 0x142   : > { %2261 = vperm.xlu0 %3575, %v3576_v33  }
 0x143   : > { %s4427_s16 = scalar_lea.vmem [#allocation4], %s3533_s14  ;;  %s4435_s17 = scalar_lea.vmem [#allocation5], %s3533_s14 }
 0x144   : > { %v4430_v36 = vld [vmem:[%s4427_s16 + $0xe0] sm:$0xff]  ;;  %v4433_v37 = vld [vmem:[%s4427_s16 + $0xf0] sm:$0xff]  ;;  %s6931_s29 = smov (!%p4473_p9, %s3517_s29), 7 }
 0x145   : > { %v1566_v38 = vld [vmem:[%s4435_s17 + $0xe0] sm:$0xff]  ;;  %v6442_v39 = vunpack.c.l.bf16 %v4430_v36  ;;  %v1568_v40 = vld [vmem:[%s4435_s17 + $0xf0] sm:$0xff]  ;;  %v6441_v47 = vunpack.c.l.bf16 %v4433_v37  ;;  %s4568_s20 = scalar_lea.vmem %s6418_s4, %s6931_s29  ;;  %s1074_s23 = scalar_lea.vmem %s6419_s5, %s6931_s29 }
 0x146   : > { %v1738_v41 = vunpack.c.l.bf16 %v1566_v38  ;;  %v4441_v42 = vld [vmem:[%s4427_s16 + $0x1e0] sm:$0xff]  ;;  %v4444_v43 = vld [vmem:[%s4427_s16 + $0x1f0] sm:$0xff]  ;;  %v1742_v48 = vunpack.c.l.bf16 %v1568_v40  ;;  %s1084_s9 = scalar_lea.vmem %s6421_s7, %s6931_s29  ;;  %s3522_s19 = sshll.u32 %s6931_s29, 2 }
 0x147   : > { %v1598_v44 = vld [vmem:[%s4435_s17 + $0x1e0] sm:$0xff]  ;;  %v1600_v45 = vld [vmem:[%s4435_s17 + $0x1f0] sm:$0xff]  ;;  %v6438_v49 = vunpack.c.l.bf16 %v4441_v42  ;;  %v6434_v54 = vunpack.c.l.bf16 %v4444_v43  ;;  %s6395_s22 = scalar_lea.vmem %s6422_s8, %s3522_s19 }
 0x148   : > { %v4450_v46 = vld [vmem:[%s4427_s16 + $0x2e0] sm:$0xff]  ;;  %v4455_v50 = vld [vmem:[%s4427_s16 + $0x2f0] sm:$0xff]  ;;  %v4461_v53 = vsub.f32 %v1738_v41, %v6442_v39  ;;  %v1802_v55 = vunpack.c.l.bf16 %v1598_v44  ;;  %v1806_v56 = vunpack.c.l.bf16 %v1600_v45  ;;  %v4497_v14 = vsub.f32 %v1742_v48, %v6441_v47 }
 0x149   : > { %v1630_v51 = vld [vmem:[%s4435_s17 + $0x2e0] sm:$0xff]  ;;  %v1632_v52 = vld [vmem:[%s4435_s17 + $0x2f0] sm:$0xff]  ;;  %v6433_v60 = vunpack.c.l.bf16 %v4450_v46  ;;  %v6432_v61 = vunpack.c.l.bf16 %v4455_v50 }
 0x14a   : > { %3287 = vperm.xlu0 %3575, %v1105_v35   ;;  %v4465_v57 = vld [vmem:[%s4427_s16 + $0x3e0] sm:$0xff]  ;;  %v4468_v58 = vld [vmem:[%s4427_s16 + $0x3f0] sm:$0xff]  ;;  %v1866_v62 = vunpack.c.l.bf16 %v1630_v51  ;;  %v1870_v2 = vunpack.c.l.bf16 %v1632_v52  ;;  %v4501_v15 = vsub.f32 %v1802_v55, %v6438_v49  ;;  %v4517_v21 = vsub.f32 %v1806_v56, %v6434_v54 }
 0x14b   : > { %v1662_v59 = vld [vmem:[%s4435_s17 + $0x3e0] sm:$0xff]  ;;  %v6426_v63 = vunpack.c.h.bf16 %v4465_v57  ;;  %v1664_v0 = vld [vmem:[%s4435_s17 + $0x3f0] sm:$0xff]  ;;  %v6429_v3 = vunpack.c.l.bf16 %v4465_v57  ;;  %v6425_v4 = vunpack.c.l.bf16 %v4468_v58  ;;  %v6424_v5 = vunpack.c.h.bf16 %v4468_v58 }
 0x14c   : > { %v4482_v1 = vld [vmem:[%s4427_s16 + $0xc0] sm:$0xff]  ;;  %v1930_v7 = vunpack.c.l.bf16 %v1662_v59  ;;  %v1931_v8 = vunpack.c.h.bf16 %v1662_v59  ;;  %v1934_v9 = vunpack.c.l.bf16 %v1664_v0  ;;  %v1935_v10 = vunpack.c.h.bf16 %v1664_v0  ;;  %v4489_v11 = vld [vmem:[%s4427_s16 + $0xd0] sm:$0xff] }
 0x14d   : > { %v1562_v6 = vld [vmem:[%s4435_s17 + $0xc0] sm:$0xff]  ;;  %v1564_v12 = vld [vmem:[%s4435_s17 + $0xd0] sm:$0xff]  ;;  %v6423_v16 = vunpack.c.l.bf16 %v4482_v1  ;;  %v4521_v22 = vsub.f32 %v1866_v62, %v6433_v60  ;;  %v4542_v28 = vsub.f32 %v1870_v2, %v6432_v61  ;;  %v6428_v30 = vunpack.c.l.bf16 %v4489_v11 }
 0x14e   : > { %v4493_v13 = vld [vmem:[%s4427_s16 + $0x1c0] sm:$0xff]  ;;  %v1730_v17 = vunpack.c.l.bf16 %v1562_v6  ;;  %v4511_v18 = vld [vmem:[%s4427_s16 + $0x1d0] sm:$0xff]  ;;  %v4525_v23 = vsub.f32 %v1931_v8, %v6426_v63  ;;  %v4529_v24 = vsub.f32 %v1935_v10, %v6424_v5  ;;  %v4546_v29 = vsub.f32 %v1930_v7, %v6429_v3 }
 0x14f   : > { %v1594_v19 = vld [vmem:[%s4435_s17 + $0x1c0] sm:$0xff]  ;;  %v1596_v20 = vld [vmem:[%s4435_s17 + $0x1d0] sm:$0xff]  ;;  %v1734_v31 = vunpack.c.l.bf16 %v1564_v12  ;;  %v4556_v35 = vsub.f32 %v1934_v9, %v6425_v4  ;;  %v6427_v40 = vunpack.c.l.bf16 %v4493_v13  ;;  %v6431_v45 = vunpack.c.l.bf16 %v4511_v18 }
 0x150   : > { %v4532_v25 = vld [vmem:[%s4427_s16 + $0x2c0] sm:$0xff]  ;;  %v4535_v26 = vld [vmem:[%s4427_s16 + $0x2d0] sm:$0xff]  ;;  %v4560_v38 = vsub.f32 %v1730_v17, %v6423_v16  ;;  %v1794_v41 = vunpack.c.l.bf16 %v1594_v19  ;;  %v1798_v48 = vunpack.c.l.bf16 %v1596_v20 }
 0x151   : > { %v4538_v27 = vld [vmem:[%s4427_s16 + $0x3c0] sm:$0xff]  ;;  %v1628_v33 = vld [vmem:[%s4435_s17 + $0x2d0] sm:$0xff]  ;;  %v6436_v51 = vunpack.c.l.bf16 %v4532_v25  ;;  %v6437_v56 = vunpack.c.l.bf16 %v4535_v26 }
 0x152   : > { %6570 = vst [vmem:[#allocation6_spill] sm:$0xff] %v4538_v27  ;;  %v1626_v32 = vld [vmem:[%s4435_s17 + $0x2c0] sm:$0xff]  ;;  %v4552_v34 = vld [vmem:[%s4427_s16 + $0x3d0] sm:$0xff]  ;;  %v6430_v52 = vunpack.c.h.bf16 %v4538_v27  ;;  %v1862_v62 = vunpack.c.l.bf16 %v1628_v33  ;;  %v6439_v7 = vunpack.c.l.bf16 %v4538_v27  ;;  %v4601_v33 = vsub.f32 %v1794_v41, %v6427_v40 }
 0x153   : > { %6571 = vst [vmem:[#allocation7_spill] sm:$0xff] %v4552_v34  ;;  %v1658_v44 = vld [vmem:[%s4435_s17 + $0x3c0] sm:$0xff]  ;;  %v1660_v55 = vld [vmem:[%s4435_s17 + $0x3d0] sm:$0xff]  ;;  %v1858_v59 = vunpack.c.l.bf16 %v1626_v32  ;;  %v6435_v0 = vunpack.c.h.bf16 %v4552_v34  ;;  %v6440_v8 = vunpack.c.l.bf16 %v4552_v34  ;;  %v4597_v32 = vsub.f32 %v1734_v31, %v6428_v30 }
 0x154   : > { %v4581_v2 = vld [vmem:[%s4427_s16 + $0xa0] sm:$0xff]  ;;  %v4584_v6 = vld [vmem:[%s4427_s16 + $0xb0] sm:$0xff]  ;;  %v1922_v9 = vunpack.c.l.bf16 %v1658_v44  ;;  %v1923_v10 = vunpack.c.h.bf16 %v1658_v44  ;;  %v1926_v16 = vunpack.c.l.bf16 %v1660_v55  ;;  %v1927_v44 = vunpack.c.h.bf16 %v1660_v55 }
 0x155   : > { %6572 = vst [vmem:[#allocation8_spill] sm:$0xff] %v4581_v2  ;;  %v1558_v12 = vld [vmem:[%s4435_s17 + $0xa0] sm:$0xff]  ;;  %v1560_v17 = vld [vmem:[%s4435_s17 + $0xb0] sm:$0xff]  ;;  %v4608_v4 = vsub.f32 %v1798_v48, %v6431_v45  ;;  %v6443_v31 = vunpack.c.l.bf16 %v4581_v2  ;;  %v6445_v41 = vunpack.c.l.bf16 %v4584_v6  ;;  %v4623_v3 = vsub.f32 %v1858_v59, %v6436_v51 }
 0x156   : > { %6573 = vst [vmem:[#allocation9_spill] sm:$0xff] %v4584_v6  ;;  %v4591_v19 = vld [vmem:[%s4568_s20] sm:$0xf]  ;;  %v4612_v63 = vsub.f32 %v1923_v10, %v6430_v52  ;;  %v4617_v40 = vld [vmem:[%s4427_s16 + $0x1b0] sm:$0xff]  ;;  %v4627_v48 = vsub.f32 %v1927_v44, %v6435_v0  ;;  %v1722_v10 = vunpack.c.l.bf16 %v1558_v12  ;;  %v1726_v52 = vunpack.c.l.bf16 %v1560_v17 }
 0x157   : > { %6574 = vst [vmem:[#allocation10_spill] sm:$0xff] %v4591_v19  ;;  %v4593_v20 = vld [vmem:[%s1074_s23] sm:$0xf]  ;;  %v1592_v30 = vld [vmem:[%s4435_s17 + $0x1b0] sm:$0xff]  ;;  %v4640_v59 = vsub.f32 %v1862_v62, %v6437_v56  ;;  %v4644_v44 = vsub.f32 %v1922_v9, %v6439_v7  ;;  %v4648_v12 = vsub.f32 %v1926_v16, %v6440_v8 }
 0x158   : > { %6575 = vst [vmem:[#allocation11_spill] sm:$0xff] %v4593_v20  ;;  %v4604_v5 = vld [vmem:[%s4427_s16 + $0x1a0] sm:$0xff]  ;;  %v4633_v61 = vld [vmem:[%s4427_s16 + $0x2b0] sm:$0xff]  ;;  %v1790_v49 = vunpack.c.l.bf16 %v1592_v30  ;;  %v4662_v7 = vsub.f32 %v1722_v10, %v6443_v31  ;;  %v4666_v16 = vsub.f32 %v1726_v52, %v6445_v41 }
 0x159   : > { %6576 = vst [vmem:[#allocation12_spill] sm:$0xff] %v4604_v5  ;;  %v1590_v55 = vld [vmem:[%s4435_s17 + $0x1a0] sm:$0xff]  ;;  %v1624_v17 = vld [vmem:[%s4435_s17 + $0x2b0] sm:$0xff]  ;;  %v6589_v41 = vunpack.c.l.bf16 %v4604_v5 }
 0x15a   : > { %6577 = vst [vmem:[#allocation13_spill] sm:$0xff] %v4612_v63  ;;  %v4630_v45 = vld [vmem:[%s4427_s16 + $0x2a0] sm:$0xff]  ;;  %v4655_v51 = vld [vmem:[%s4427_s16 + $0x3b0] sm:$0xff]  ;;  %v1786_v56 = vunpack.c.l.bf16 %v1590_v55  ;;  %v1854_v55 = vunpack.c.l.bf16 %v1624_v17 }
 0x15b   : > { %6578 = vst [vmem:[#allocation14_spill] sm:$0xff] %v4617_v40  ;;  %v1622_v60 = vld [vmem:[%s4435_s17 + $0x2a0] sm:$0xff]  ;;  %v1656_v39 = vld [vmem:[%s4435_s17 + $0x3b0] sm:$0xff]  ;;  %v6596_v5 = vunpack.c.l.bf16 %v4630_v45 }
 0x15c   : > { %6579 = vst [vmem:[#allocation15_spill] sm:$0xff] %v4627_v48  ;;  %v4652_v0 = vld [vmem:[%s4427_s16 + $0x3a0] sm:$0xff]  ;;  %v4675_v62 = vld [vmem:[%s4427_s16 + $0x90] sm:$0xff]  ;;  %v1850_v30 = vunpack.c.l.bf16 %v1622_v60  ;;  %v1918_v48 = vunpack.c.l.bf16 %v1656_v39  ;;  %v1919_v63 = vunpack.c.h.bf16 %v1656_v39  ;;  %v4693_v6 = vsub.f32 %v1786_v56, %v6589_v41 }
 0x15d   : > { %6580 = vst [vmem:[#allocation16_spill] sm:$0xff] %v4630_v45  ;;  %v1654_v9 = vld [vmem:[%s4435_s17 + $0x3a0] sm:$0xff]  ;;  %v1556_v52 = vld [vmem:[%s4435_s17 + $0x90] sm:$0xff]  ;;  %v6591_v47 = vunpack.c.h.bf16 %v4652_v0  ;;  %v6598_v41 = vunpack.c.l.bf16 %v4633_v61 }
 0x15e   : > { %6581 = vst [vmem:[#allocation17_spill] sm:$0xff] %v4633_v61  ;;  %v4672_v54 = vld [vmem:[%s4427_s16 + $0x80] sm:$0xff]  ;;  %v1914_v8 = vunpack.c.l.bf16 %v1654_v9  ;;  %v1915_v20 = vunpack.c.h.bf16 %v1654_v9  ;;  %v4689_v10 = vld [vmem:[%s4427_s16 + $0x190] sm:$0xff]  ;;  %v1718_v2 = vunpack.c.l.bf16 %v1556_v52  ;;  %v4710_v56 = vsub.f32 %v1850_v30, %v6596_v5 }
 0x15f   : > { %6582 = vst [vmem:[#allocation18_spill] sm:$0xff] %v4652_v0  ;;  %v1554_v19 = vld [vmem:[%s4435_s17 + $0x80] sm:$0xff]  ;;  %v4721_v52 = vld [vmem:[%s4427_s16 + $0x290] sm:$0xff]  ;;  %v6606_v30 = vunpack.c.l.bf16 %v4655_v51 }
 0x160   : > { %6583 = vst [vmem:[#allocation19_spill] sm:$0xff] %v4655_v51  ;;  %v4686_v31 = vld [vmem:[%s4427_s16 + $0x180] sm:$0xff]  ;;  %v4697_v9 = vsub.f32 %v1915_v20, %v6591_v47  ;;  %v1714_v39 = vunpack.c.l.bf16 %v1554_v19  ;;  %v4714_v47 = vsub.f32 %v1854_v55, %v6598_v41  ;;  %v6600_v19 = vunpack.c.h.bf16 %v4655_v51  ;;  %v1620_v41 = vld [vmem:[%s4435_s17 + $0x290] sm:$0xff] }
 0x161   : > { %6584 = vst [vmem:[#allocation20_spill] sm:$0xff] %v4662_v7  ;;  %v1586_v60 = vld [vmem:[%s4435_s17 + $0x180] sm:$0xff]  ;;  %v6594_v7 = vunpack.c.l.bf16 %v4617_v40  ;;  %v4733_v61 = vsub.f32 %v1918_v48, %v6606_v30  ;;  %v4797_v27 = vld [vmem:[%s4427_s16 + $0x270] sm:$0xff] }
 0x162   : > { %6585 = vst [vmem:[#allocation21_spill] sm:$0xff] %v4666_v16  ;;  %v1588_v16 = vld [vmem:[%s4435_s17 + $0x190] sm:$0xff]  ;;  %v4702_v17 = vld [vmem:[%s4427_s16 + $0x280] sm:$0xff]  ;;  %v4718_v20 = vsub.f32 %v1919_v63, %v6600_v19  ;;  %v1778_v48 = vunpack.c.l.bf16 %v1586_v60  ;;  %v1846_v60 = vunpack.c.l.bf16 %v1620_v41 }
 0x163   : > { %6586 = vst [vmem:[#allocation22_spill] sm:$0xff] %v4672_v54  ;;  %v4706_v34 = vsub.f32 %v1790_v49, %v6594_v7  ;;  %v4725_v49 = vld [vmem:[%s4427_s16 + $0x380] sm:$0xff]  ;;  %v6604_v7 = vunpack.c.l.bf16 %v4652_v0  ;;  %v4739_v19 = vld [vmem:[%s4427_s16 + $0x390] sm:$0xff]  ;;  %v1782_v30 = vunpack.c.l.bf16 %v1588_v16 }
 0x164   : > { %6587 = vst [vmem:[#allocation23_spill] sm:$0xff] %v4675_v62  ;;  %v1650_v51 = vld [vmem:[%s4435_s17 + $0x380] sm:$0xff]  ;;  %v1652_v0 = vld [vmem:[%s4435_s17 + $0x390] sm:$0xff] }
 0x165   : > { %6588 = vst [vmem:[#allocation24_spill] sm:$0xff] %v4689_v10  ;;  %v4729_v5 = vsub.f32 %v1914_v8, %v6604_v7  ;;  %v6611_v8 = vunpack.c.l.bf16 %v4675_v62  ;;  %v4752_v55 = vld [vmem:[%s4427_s16 + $0x60] sm:$0xff]  ;;  %v1906_v63 = vunpack.c.l.bf16 %v1650_v51 }
 0x166   : > { %6590 = vst [vmem:[#allocation25_spill] sm:$0xff] %v4693_v6  ;;  %v1582_v62 = vld [vmem:[%s4435_s17 + $0x160] sm:$0xff] }
 0x167   : > { %6592 = vst [vmem:[#allocation26_spill] sm:$0xff] %v4697_v9  ;;  %v1618_v9 = vld [vmem:[%s4435_s17 + $0x280] sm:$0xff]  ;;  %v4747_v7 = vsub.f32 %v1718_v2, %v6611_v8  ;;  %v1552_v2 = vld [vmem:[%s4435_s17 + $0x70] sm:$0xff] }
 0x168   : > { %6593 = vst [vmem:[#allocation27_spill] sm:$0xff] %v4702_v17  ;;  %v1842_v40 = vunpack.c.l.bf16 %v1618_v9  ;;  %v1910_v9 = vunpack.c.l.bf16 %v1652_v0  ;;  %v1710_v16 = vunpack.c.l.bf16 %v1552_v2  ;;  %v4771_v8 = vld [vmem:[%s4427_s16 + $0x170] sm:$0xff]  ;;  %v4794_v6 = vld [vmem:[%s4427_s16 + $0x260] sm:$0xff] }
 0x169   : > { %6595 = vst [vmem:[#allocation28_spill] sm:$0xff] %v4706_v34  ;;  %v4791_v2 = vld [vmem:[%s4435_s17 + $0x170] sm:$0xff] }
 0x16a   : > { %6597 = vst [vmem:[#allocation29_spill] sm:$0xff] %v4710_v56 }
 0x16b   : > { %6599 = vst [vmem:[#allocation30_spill] sm:$0xff] %v4714_v47  ;;  %v6613_v47 = vunpack.c.l.bf16 %v4686_v31 }
 0x16c   : > { %6601 = vst [vmem:[#allocation31_spill] sm:$0xff] %v4718_v20  ;;  %v6609_v20 = vunpack.c.l.bf16 %v4672_v54  ;;  %v1911_v54 = vunpack.c.h.bf16 %v1652_v0  ;;  %v6614_v0 = vunpack.c.l.bf16 %v4689_v10 }
 0x16d   : > { %6602 = vst [vmem:[#allocation32_spill] sm:$0xff] %v4721_v52 }
 0x16e   : > { %6603 = vst [vmem:[#allocation33_spill] sm:$0xff] %v4725_v49  ;;  %v4743_v45 = vsub.f32 %v1714_v39, %v6609_v20  ;;  %v4758_v39 = vld [vmem:[%s4427_s16 + $0x70] sm:$0xff]  ;;  %v1550_v20 = vld [vmem:[%s4435_s17 + $0x60] sm:$0xff]  ;;  %v4780_v56 = vsub.f32 %v1782_v30, %v6614_v0  ;;  %v6621_v30 = vunpack.c.l.bf16 %v4721_v52 }
 0x16f   : > { %6605 = vst [vmem:[#allocation34_spill] sm:$0xff] %v4729_v5  ;;  %v1706_v41 = vunpack.c.l.bf16 %v1550_v20  ;;  %v6617_v20 = vunpack.c.h.bf16 %v4739_v19 }
 0x170   : > { %6607 = vst [vmem:[#allocation35_spill] sm:$0xff] %v4733_v61  ;;  %v1907_v61 = vunpack.c.h.bf16 %v1650_v51  ;;  %v4776_v51 = vsub.f32 %v1778_v48, %v6613_v47  ;;  %v6620_v47 = vunpack.c.l.bf16 %v4702_v17  ;;  %v4805_v0 = vsub.f32 %v1846_v60, %v6621_v30 }
 0x171   : > { %6608 = vst [vmem:[#allocation36_spill] sm:$0xff] %v4739_v19  ;;  %v4788_v5 = vsub.f32 %v1911_v54, %v6617_v20  ;;  %v4813_v20 = vld [vmem:[%s4435_s17 + $0x260] sm:$0xff]  ;;  %v6625_v17 = vunpack.c.l.bf16 %v4739_v19  ;;  %v6627_v30 = vunpack.c.l.bf16 %v4758_v39 }
 0x172   : > { %6610 = vst [vmem:[#allocation37_spill] sm:$0xff] %v4743_v45  ;;  %v6615_v45 = vunpack.c.h.bf16 %v4725_v49  ;;  %v4801_v48 = vsub.f32 %v1842_v40, %v6620_v47  ;;  %v6626_v47 = vunpack.c.l.bf16 %v4752_v55 }
 0x173   : > { %6612 = vst [vmem:[#allocation38_spill] sm:$0xff] %v4747_v7  ;;  %v4766_v7 = vld [vmem:[%s4427_s16 + $0x160] sm:$0xff]  ;;  %v4823_v40 = vsub.f32 %v1910_v9, %v6625_v17 }
 0x174   : > { %v4784_v34 = vsub.f32 %v1907_v61, %v6615_v45  ;;  %6618 = vst [vmem:[#allocation40_spill] sm:$0xff] %v4788_v5  ;;  %v6622_v61 = vunpack.c.l.bf16 %v4725_v49  ;;  %v4816_v5 = vld [vmem:[%s4435_s17 + $0x270] sm:$0xff]  ;;  %v4827_v60 = vsub.f32 %v1706_v41, %v6626_v47  ;;  %v1774_v49 = vunpack.c.l.bf16 %v4791_v2 }
 0x175   : > { %6619 = vst [vmem:[#allocation41_spill] sm:$0xff] %v4797_v27  ;;  %v6628_v17 = vunpack.c.l.bf16 %v4766_v7 }
 0x176   : > { %6616 = vst [vmem:[#allocation39_spill] sm:$0xff] %v4784_v34  ;;  %v4809_v45 = vsub.f32 %v1906_v63, %v6622_v61  ;;  %v4819_v34 = vld [vmem:[%s4427_s16 + $0x360] sm:$0xff]  ;;  %v4831_v63 = vsub.f32 %v1710_v16, %v6627_v30  ;;  %v1770_v61 = vunpack.c.l.bf16 %v1582_v62 }
 0x177   : > { %6623 = vst [vmem:[#allocation42_spill] sm:$0xff] %v4816_v5 }
 0x178   : > { %6624 = vst [vmem:[#allocation43_spill] sm:$0xff] %v4819_v34  ;;  %v4841_v9 = vsub.f32 %v1770_v61, %v6628_v17 }
 0x1b4   : > { %v4837_v19 = vpop.permute.xlu0 %2261 }
 0x1b5   : > { %v2320_v47 = vmul.f32 %v4837_v19, %v4461_v53  ;;  %v2324_v2 = vmul.f32 %v4837_v19, %v4497_v14  ;;  %v2384_v30 = vmul.f32 %v4837_v19, %v4501_v15  ;;  %v2388_v10 = vmul.f32 %v4837_v19, %v4517_v21 }
 0x1b6   : > { %v2448_v61 = vmul.f32 %v4837_v19, %v4521_v22  ;;  %v2452_v17 = vmul.f32 %v4837_v19, %v4542_v28  ;;  %v2512_v62 = vmul.f32 %v4837_v19, %v4546_v29  ;;  %v2513_v53 = vmul.f32 %v4837_v19, %v4525_v23 }
 0x1b7   : > { %v6629_v14 = vunpack.c.l.bf16 %v4430_v36  ;;  %v6630_v15 = vunpack.c.l.bf16 %v4433_v37  ;;  %v6631_v21 = vunpack.c.l.bf16 %v4441_v42  ;;  %v6632_v22 = vunpack.c.l.bf16 %v4444_v43 }
 0x1b8   : > { %v6633_v28 = vunpack.c.l.bf16 %v4450_v46  ;;  %v6634_v29 = vunpack.c.l.bf16 %v4455_v50  ;;  %v2516_v23 = vmul.f32 %v4837_v19, %v4556_v35  ;;  %v2517_v36 = vmul.f32 %v4837_v19, %v4529_v24 }
 0x1b9   : > { %v2608_v16 = vadd.f32 %v2320_v47, %v6629_v14  ;;  %v2612_v41 = vadd.f32 %v2324_v2, %v6630_v15  ;;  %v2672_v52 = vadd.f32 %v2384_v30, %v6631_v21  ;;  %v2676_v54 = vadd.f32 %v2388_v10, %v6632_v22 }
 0x1ba   : > { %v2736_v5 = vadd.f32 %v2448_v61, %v6633_v28  ;;  %v2740_v27 = vadd.f32 %v2452_v17, %v6634_v29  ;;  %v6635_v42 = vunpack.c.l.bf16 %v4465_v57  ;;  %v6636_v43 = vunpack.c.h.bf16 %v4465_v57  ;;  %v4929_v28 = vld [vmem:[%s4435_s17 + $0x360] sm:$0xff] }
 0x1bb   : > { %v2868_v37 = vpack.c.bf16 %v2612_v41, %v2608_v16  ;;  %v2900_v47 = vpack.c.bf16 %v2676_v54, %v2672_v52  ;;  %v6637_v50 = vunpack.c.l.bf16 %v4468_v58  ;;  %v6638_v61 = vunpack.c.h.bf16 %v4468_v58  ;;  %v4906_v16 = vld [vmem:[%s4427_s16 + $0x370] sm:$0xff] }
 0x1bc   : > { %v2800_v2 = vadd.f32 %v2512_v62, %v6635_v42  ;;  %v4882_v10 = vadd.f32 %v2513_v53, %v6636_v43  ;;  %v2932_v46 = vpack.c.bf16 %v2740_v27, %v2736_v5  ;;  %v2312_v24 = vmul.f32 %v4837_v19, %v4560_v38  ;;  %6640 = vst [vmem:[#allocation44_spill] sm:$0xff] %v4906_v16 }
 0x1bd   : > { %v2804_v30 = vadd.f32 %v2516_v23, %v6637_v50  ;;  %v4888_v35 = vadd.f32 %v2517_v36, %v6638_v61  ;;  %3012 = vmatpush.bf16.msra.mxu0 %v2868_v37  ;;  %3025 = vmatpush.bf16.msra.mxu1 %v2900_v47  ;;  %v2316_v52 = vmul.f32 %v4837_v19, %v4597_v32  ;;  %v6476_v5 = vunpack.c.h.bf16 %v4819_v34  ;;  %v6653_v50 = vld [vmem:[#allocation21_spill] sm:$0xff] }
 0x1be   : > { %v2376_v57 = vmul.f32 %v4837_v19, %v4601_v33  ;;  %v2380_v27 = vmul.f32 %v4837_v19, %v4608_v4  ;;  %3038 = vmatpush.bf16.msra.mxu2 %v2932_v46  ;;  %v6639_v54 = vunpack.c.l.bf16 %v4482_v1  ;;  %v2440_v38 = vmul.f32 %v4837_v19, %v4623_v3  ;;  %v4918_v3 = vpop.permute.xlu0 %3287  ;;  %v6652_v46 = vld [vmem:[#allocation20_spill] sm:$0xff] }
 0x1bf   : > { %v2964_v58 = vpack.c.bf16 %v2804_v30, %v2800_v2  ;;  %v2444_v32 = vmul.f32 %v4837_v19, %v4640_v59  ;;  %v6641_v33 = vunpack.c.l.bf16 %v4489_v11  ;;  %v6642_v4 = vunpack.c.l.bf16 %v4493_v13  ;;  %6645 = vst [vmem:[#allocation45_spill] sm:$0xff] %v4918_v3 }
 0x1c0   : > { %v2600_v41 = vadd.f32 %v2312_v24, %v6639_v54  ;;  %v6643_v53 = vunpack.c.l.bf16 %v4511_v18  ;;  %v6644_v1 = vunpack.c.l.bf16 %v4771_v8  ;;  %v6646_v59 = vunpack.c.l.bf16 %v4532_v25  ;;  %v6648_v25 = vld [vmem:[#allocation6_spill] sm:$0xff]  ;;  %v6656_v54 = vld [vmem:[#allocation25_spill] sm:$0xff] }
 0x1c1   : > { %v2604_v62 = vadd.f32 %v2316_v52, %v6641_v33  ;;  %v2664_v17 = vadd.f32 %v2376_v57, %v6642_v4  ;;  %3051 = vmatpush.bf16.msra.mxu3 %v2964_v58  ;;  %v6647_v22 = vunpack.c.l.bf16 %v4535_v26  ;;  %v2504_v13 = vmul.f32 %v4837_v19, %v4644_v44  ;;  %v6650_v26 = vld [vmem:[#allocation7_spill] sm:$0xff]  ;;  %v6654_v57 = vld [vmem:[#allocation8_spill] sm:$0xff]  ;;  %v6658_v33 = vld [vmem:[#allocation9_spill] sm:$0xff] }
 0x1c2   : > { %v2668_v14 = vadd.f32 %v2380_v27, %v6643_v53  ;;  %v4916_v15 = vsub.f32 %v1774_v49, %v6644_v1  ;;  %v2728_v21 = vadd.f32 %v2440_v38, %v6646_v59  ;;  %v2508_v18 = vmul.f32 %v4837_v19, %v4648_v12  ;;  %v6657_v38 = vld [vmem:[#allocation28_spill] sm:$0xff]  ;;  %v6662_v59 = vld [vmem:[#allocation34_spill] sm:$0xff] }
 0x1c3   : > { %v2732_v11 = vadd.f32 %v2444_v32, %v6647_v22  ;;  %v2864_v29 = vpack.c.bf16 %v2604_v62, %v2600_v41  ;;  %v1470_v23 = vunpack.c.l.bf16 %v4906_v16  ;;  %v6475_v36 = vunpack.c.h.bf16 %v4906_v16  ;;  %v6663_v22 = vld [vmem:[#allocation12_spill] sm:$0xff] }
 0x1c4   : > { %v2896_v49 = vpack.c.bf16 %v2668_v14, %v2664_v17  ;;  %v6649_v47 = vunpack.c.l.bf16 %v6648_v25  ;;  %v6651_v2 = vunpack.c.l.bf16 %v6650_v26  ;;  %v2304_v44 = vmul.f32 %v4837_v19, %v6652_v46  ;;  %v6660_v17 = vld [vmem:[#allocation29_spill] sm:$0xff]  ;;  %v6661_v14 = vld [vmem:[#allocation30_spill] sm:$0xff]  ;;  %v6669_v46 = vld [vmem:[#allocation16_spill] sm:$0xff] }
 0x1c5   : > { %v2928_v37 = vpack.c.bf16 %v2732_v11, %v2728_v21  ;;  %3013 = vmatpush.bf16.msra.mxu0 %v2864_v29  ;;  %v2308_v30 = vmul.f32 %v4837_v19, %v6653_v50  ;;  %v1898_v61 = vunpack.c.l.bf16 %v4929_v28  ;;  %v1899_v24 = vunpack.c.h.bf16 %v4929_v28  ;;  %v1148_v28 = vld [vmem:[%s4427_s16 + $0x150] sm:$0xff] }
 0x1c6   : > { %v2792_v42 = vadd.f32 %v2504_v13, %v6649_v47  ;;  %v2796_v43 = vadd.f32 %v2508_v18, %v6651_v2  ;;  %3026 = vmatpush.bf16.msra.mxu1 %v2896_v49  ;;  %v6655_v27 = vunpack.c.l.bf16 %v6654_v57  ;;  %v2368_v41 = vmul.f32 %v4837_v19, %v6656_v54  ;;  %v6665_v18 = vld [vmem:[#allocation14_spill] sm:$0xff] }
 0x1c7   : > { %3039 = vmatpush.bf16.msra.mxu2 %v2928_v37  ;;  %v2372_v32 = vmul.f32 %v4837_v19, %v6657_v38  ;;  %v6659_v62 = vunpack.c.l.bf16 %v6658_v33  ;;  %v2432_v53 = vmul.f32 %v4837_v19, %v6660_v17  ;;  %v2436_v1 = vmul.f32 %v4837_v19, %v6661_v14  ;;  %v6667_v37 = vld [vmem:[#allocation35_spill] sm:$0xff]  ;;  %v6677_v17 = vld [vmem:[#allocation38_spill] sm:$0xff] }
 0x1c8   : > { %v2960_v52 = vpack.c.bf16 %v2796_v43, %v2792_v42  ;;  %v2592_v58 = vadd.f32 %v2304_v44, %v6655_v27  ;;  %v2496_v21 = vmul.f32 %v4837_v19, %v6662_v59  ;;  %v6664_v11 = vunpack.c.l.bf16 %v6663_v22  ;;  %v6668_v42 = vld [vmem:[#allocation37_spill] sm:$0xff]  ;;  %v6675_v33 = vld [vmem:[#allocation19_spill] sm:$0xff]  ;;  %v6678_v59 = vld [vmem:[#allocation22_spill] sm:$0xff] }
 0x1c9   : > { %v2596_v4 = vadd.f32 %v2308_v30, %v6659_v62  ;;  %v6666_v29 = vunpack.c.l.bf16 %v6665_v18  ;;  %v2500_v47 = vmul.f32 %v4837_v19, %v6667_v37  ;;  %v2296_v2 = vmul.f32 %v4837_v19, %v6668_v42  ;;  %v6671_v30 = vld [vmem:[#allocation17_spill] sm:$0xff] }
 0x1ca   : > { %3052 = vmatpush.bf16.msra.mxu3 %v2960_v52  ;;  %v2656_v13 = vadd.f32 %v2368_v41, %v6664_v11  ;;  %v6670_v44 = vunpack.c.l.bf16 %v6669_v46  ;;  %v6672_v57 = vunpack.c.l.bf16 %v6671_v30  ;;  %v6673_v52 = vld [vmem:[#allocation18_spill] sm:$0xff]  ;;  %v6676_v62 = vunpack.c.l.bf16 %v6675_v33 }
 0x1cb   : > { %v2660_v49 = vadd.f32 %v2372_v32, %v6666_v29  ;;  %v2860_v43 = vpack.c.bf16 %v2596_v4, %v2592_v58  ;;  %v6674_v54 = vunpack.c.l.bf16 %v6673_v52  ;;  %v2300_v14 = vmul.f32 %v4837_v19, %v6677_v17 }
 0x1cc   : > { %v2720_v50 = vadd.f32 %v2432_v53, %v6670_v44  ;;  %v2724_v27 = vadd.f32 %v2436_v1, %v6672_v57  ;;  %v2788_v32 = vadd.f32 %v2500_v47, %v6676_v62  ;;  %v6679_v22 = vunpack.c.l.bf16 %v6678_v59 }
 0x1cd   : > { %v2784_v38 = vadd.f32 %v2496_v21, %v6674_v54  ;;  %v2892_v41 = vpack.c.bf16 %v2660_v49, %v2656_v13  ;;  %3014 = vmatpush.bf16.msra.mxu0 %v2860_v43  ;;  %v2360_v4 = vmul.f32 %v4837_v19, %v4776_v51  ;;  %v2364_v53 = vmul.f32 %v4837_v19, %v4780_v56  ;;  %v6680_v13 = vld [vmem:[#allocation23_spill] sm:$0xff]  ;;  %v6683_v56 = vld [vmem:[#allocation24_spill] sm:$0xff] }
 0x1ce   : > { %v2584_v11 = vadd.f32 %v2296_v2, %v6679_v22  ;;  %v2924_v58 = vpack.c.bf16 %v2724_v27, %v2720_v50  ;;  %v2424_v1 = vmul.f32 %v4837_v19, %v4801_v48  ;;  %v6681_v18 = vunpack.c.l.bf16 %v6680_v13  ;;  %v6685_v48 = vld [vmem:[#allocation27_spill] sm:$0xff]  ;;  %v6689_v27 = vld [vmem:[#allocation33_spill] sm:$0xff] }
 0x1cf   : > { %3027 = vmatpush.bf16.msra.mxu1 %v2892_v41  ;;  %v2956_v21 = vpack.c.bf16 %v2788_v32, %v2784_v38  ;;  %v2428_v49 = vmul.f32 %v4837_v19, %v4805_v0  ;;  %v2488_v37 = vmul.f32 %v4837_v19, %v4809_v45  ;;  %v6682_v51 = vunpack.c.l.bf16 %v4686_v31  ;;  %v6687_v0 = vld [vmem:[#allocation32_spill] sm:$0xff] }
 0x1d0   : > { %v2588_v29 = vadd.f32 %v2300_v14, %v6681_v18  ;;  %3040 = vmatpush.bf16.msra.mxu2 %v2924_v58  ;;  %v6684_v42 = vunpack.c.l.bf16 %v6683_v56  ;;  %v6686_v43 = vunpack.c.l.bf16 %v6685_v48  ;;  %v2492_v44 = vmul.f32 %v4837_v19, %v4823_v40  ;;  %v6691_v41 = vld [vmem:[#allocation36_spill] sm:$0xff]  ;;  %v1114_v56 = vld [vmem:[%s4427_s16 + $0x40] sm:$0xff] }
 0x1d1   : > { %v2648_v47 = vadd.f32 %v2360_v4, %v6682_v51  ;;  %3053 = vmatpush.bf16.msra.mxu3 %v2956_v21  ;;  %v6688_v30 = vunpack.c.l.bf16 %v6687_v0  ;;  %v6690_v45 = vunpack.c.l.bf16 %v6689_v27  ;;  %v2288_v31 = vmul.f32 %v4837_v19, %v4827_v60  ;;  %v1648_v14 = vld [vmem:[%s4435_s17 + $0x370] sm:$0xff] }
 0x1d2   : > { %v2652_v2 = vadd.f32 %v2364_v53, %v6684_v42  ;;  %v2712_v46 = vadd.f32 %v2424_v1, %v6686_v43  ;;  %v2856_v50 = vpack.c.bf16 %v2588_v29, %v2584_v11  ;;  %v6692_v62 = vunpack.c.l.bf16 %v6691_v41  ;;  %v6700_v29 = vld [vmem:[#allocation42_spill] sm:$0xff] }
 0x1d3   : > { %v2716_v57 = vadd.f32 %v2428_v49, %v6688_v30  ;;  %v2776_v54 = vadd.f32 %v2488_v37, %v6690_v45  ;;  %v2292_v17 = vmul.f32 %v4837_v19, %v4831_v63  ;;  %v2352_v40 = vmul.f32 %v4837_v19, %v4841_v9 }
 0x1d4   : > { %v2888_v38 = vpack.c.bf16 %v2652_v2, %v2648_v47  ;;  %v2780_v32 = vadd.f32 %v2492_v44, %v6692_v62  ;;  %3015 = vmatpush.bf16.msra.mxu0 %v2856_v50  ;;  %v6693_v22 = vunpack.c.l.bf16 %v4752_v55  ;;  %v2356_v60 = vmul.f32 %v4837_v19, %v4916_v15  ;;  %v6698_v55 = vld [vmem:[#allocation41_spill] sm:$0xff]  ;;  %v1548_v44 = vld [vmem:[%s4435_s17 + $0x50] sm:$0xff]  ;;  %v1146_v50 = vld [vmem:[%s4427_s16 + $0x140] sm:$0xff] }
 0x1d5   : > { %v2920_v59 = vpack.c.bf16 %v2716_v57, %v2712_v46  ;;  %v6694_v58 = vunpack.c.l.bf16 %v4794_v6  ;;  %v6695_v4 = vunpack.c.l.bf16 %v4813_v20  ;;  %v6696_v9 = vunpack.c.l.bf16 %v4758_v39  ;;  %v1546_v46 = vld [vmem:[%s4435_s17 + $0x40] sm:$0xff] }
 0x1d6   : > { %v2576_v11 = vadd.f32 %v2288_v31, %v6693_v22  ;;  %3028 = vmatpush.bf16.msra.mxu1 %v2888_v38  ;;  %v2952_v63 = vpack.c.bf16 %v2780_v32, %v2776_v54  ;;  %v6697_v21 = vunpack.c.l.bf16 %v4766_v7  ;;  %v6699_v18 = vunpack.c.l.bf16 %v6698_v55  ;;  %v1116_v7 = vld [vmem:[%s4427_s16 + $0x50] sm:$0xff]  ;;  %v5064_v22 = vld [vmem:[%s4427_s16 + $0x240] sm:$0xff] }
 0x1d7   : > { %v2122_v53 = vsub.f32 %v6695_v4, %v6694_v58  ;;  %v2580_v1 = vadd.f32 %v2292_v17, %v6696_v9  ;;  %v6701_v49 = vunpack.c.l.bf16 %v6700_v29  ;;  %3041 = vmatpush.bf16.msra.mxu2 %v2920_v59  ;;  %v6702_v20 = vunpack.c.l.bf16 %v4771_v8  ;;  %v5060_v32 = vld [vmem:[%s4435_s17 + $0x150] sm:$0xff]  ;;  %v5081_v29 = vld [vmem:[%s4427_s16 + $0x340] sm:$0xff] }
 0x1d8   : > { %v2640_v13 = vadd.f32 %v2352_v40, %v6697_v21  ;;  %v1902_v47 = vunpack.c.l.bf16 %v1648_v14  ;;  %v1903_v39 = vunpack.c.h.bf16 %v1648_v14  ;;  %3054 = vmatpush.bf16.msra.mxu3 %v2952_v63  ;;  %v6703_v48 = vunpack.c.l.bf16 %v4819_v34  ;;  %6709 = vst [vmem:[#allocation20_spill] sm:$0xff] %v5081_v29 }
 0x1d9   : > { %v2126_v15 = vsub.f32 %v6701_v49, %v6699_v18  ;;  %v2644_v37 = vadd.f32 %v2356_v60, %v6702_v20  ;;  %v2416_v51 = vmul.f32 %v4837_v19, %v2122_v53  ;;  %v2852_v42 = vpack.c.bf16 %v2580_v1, %v2576_v11  ;;  %v5067_v11 = vld [vmem:[%s4427_s16 + $0x250] sm:$0xff]  ;;  %v5070_v60 = vld [vmem:[%s4435_s17 + $0x240] sm:$0xff] }
 0x1da   : > { %v2186_v43 = vsub.f32 %v1898_v61, %v6703_v48  ;;  %v5041_v8 = vsub.f32 %v1899_v24, %v6476_v5  ;;  %v6705_v30 = vmov %v6694_v58  ;;  %v2190_v45 = vsub.f32 %v1902_v47, %v1470_v23  ;;  %v1578_v24 = vld [vmem:[%s4435_s17 + $0x140] sm:$0xff] }
 0x1db   : > { %v2420_v2 = vmul.f32 %v4837_v19, %v2126_v15  ;;  %v2884_v0 = vpack.c.bf16 %v2644_v37, %v2640_v13  ;;  %v2704_v57 = vadd.f32 %v2416_v51, %v6705_v30  ;;  %v5052_v61 = vsub.f32 %v1903_v39, %v6475_v36  ;;  %3016 = vmatpush.bf16.msra.mxu0 %v2852_v42  ;;  %v1644_v30 = vld [vmem:[%s4435_s17 + $0x350] sm:$0xff]  ;;  %v5185_v36 = vld [vmem:[%s4435_s17] sm:$0xff] }
 0x1dc   : > { %6704 = vst [vmem:[#allocation6_spill] sm:$0xff] %v5041_v8  ;;  %v6707_v54 = vmov %v6699_v18  ;;  %v2480_v38 = vmul.f32 %v4837_v19, %v2186_v43  ;;  %v1266_v6 = vunpack.c.l.bf16 %v1114_v56  ;;  %v1270_v62 = vunpack.c.l.bf16 %v1116_v7  ;;  %v5078_v18 = vld [vmem:[%s4435_s17 + $0x250] sm:$0xff]  ;;  %v1642_v43 = vld [vmem:[%s4435_s17 + $0x340] sm:$0xff] }
 0x1dd   : > { %6706 = vst [vmem:[#allocation7_spill] sm:$0xff] %v5052_v61  ;;  %v2708_v31 = vadd.f32 %v2420_v2, %v6707_v54  ;;  %3029 = vmatpush.bf16.msra.mxu1 %v2884_v0  ;;  %v2484_v17 = vmul.f32 %v4837_v19, %v2190_v45  ;;  %v1698_v40 = vunpack.c.l.bf16 %v1546_v46  ;;  %v1702_v14 = vunpack.c.l.bf16 %v1548_v44  ;;  %v5089_v56 = vld [vmem:[%s4427_s16 + $0x350] sm:$0xff]  ;;  %v5101_v54 = vld [vmem:[%s4427_s16 + $0x20] sm:$0xff] }
 0x1de   : > { %v1330_v59 = vunpack.c.l.bf16 %v1146_v50  ;;  %v6708_v4 = vmov %v6703_v48  ;;  %v1334_v63 = vunpack.c.l.bf16 %v1148_v28  ;;  %v1762_v9 = vunpack.c.l.bf16 %v1578_v24  ;;  %6710 = vst [vmem:[#allocation21_spill] sm:$0xff] %v5089_v56 }
 0x1df   : > { %v2916_v58 = vpack.c.bf16 %v2708_v31, %v2704_v57  ;;  %v2768_v53 = vadd.f32 %v2480_v38, %v6708_v4  ;;  %v2772_v1 = vadd.f32 %v2484_v17, %v1470_v23  ;;  %v1986_v21 = vsub.f32 %v1698_v40, %v1266_v6  ;;  %v5105_v17 = vld [vmem:[%s4427_s16 + $0x30] sm:$0xff]  ;;  %v5109_v4 = vld [vmem:[%s4435_s17 + $0x20] sm:$0xff] }
 0x1e0   : > { %v1990_v13 = vsub.f32 %v1702_v14, %v1270_v62  ;;  %v1766_v55 = vunpack.c.l.bf16 %v5060_v32  ;;  %v2050_v49 = vsub.f32 %v1762_v9, %v1330_v59  ;;  %v1394_v15 = vunpack.c.l.bf16 %v5064_v22 }
 0x1e1   : > { %3042 = vmatpush.bf16.msra.mxu2 %v2916_v58  ;;  %v1398_v20 = vunpack.c.l.bf16 %v5067_v11  ;;  %v1826_v37 = vunpack.c.l.bf16 %v5070_v60  ;;  %v2948_v51 = vpack.c.bf16 %v2772_v1, %v2768_v53  ;;  %v2280_v23 = vmul.f32 %v4837_v19, %v1986_v21  ;;  %v5112_v53 = vld [vmem:[%s4435_s17 + $0x30] sm:$0xff] }
 0x1e2   : > { %v2284_v47 = vmul.f32 %v4837_v19, %v1990_v13  ;;  %v2054_v39 = vsub.f32 %v1766_v55, %v1334_v63  ;;  %v2344_v7 = vmul.f32 %v4837_v19, %v2050_v49  ;;  %v1830_v42 = vunpack.c.l.bf16 %v5078_v18  ;;  %v5116_v13 = vld [vmem:[%s4427_s16 + $0x120] sm:$0xff]  ;;  %v5119_v55 = vld [vmem:[%s4427_s16 + $0x130] sm:$0xff] }
 0x1e3   : > { %v2114_v2 = vsub.f32 %v1826_v37, %v1394_v15  ;;  %v1458_v48 = vunpack.c.l.bf16 %v5081_v29  ;;  %3055 = vmatpush.bf16.msra.mxu3 %v2948_v51  ;;  %v2568_v46 = vadd.f32 %v2280_v23, %v1266_v6  ;;  %v6474_v0 = vunpack.c.h.bf16 %v5081_v29  ;;  %v5127_v23 = vld [vmem:[%s4435_s17 + $0x120] sm:$0xff] }
 0x1e4   : > { %v2572_v44 = vadd.f32 %v2284_v47, %v1270_v62  ;;  %v2348_v50 = vmul.f32 %v4837_v19, %v2054_v39  ;;  %v2632_v57 = vadd.f32 %v2344_v7, %v1330_v59  ;;  %v2118_v45 = vsub.f32 %v1830_v42, %v1398_v20  ;;  %v5137_v42 = vld [vmem:[%s4435_s17 + $0x130] sm:$0xff] }
 0x1e5   : > { %v2408_v28 = vmul.f32 %v4837_v19, %v2114_v2  ;;  %v1462_v24 = vunpack.c.l.bf16 %v5089_v56  ;;  %v6473_v6 = vunpack.c.h.bf16 %v5089_v56  ;;  %v1890_v62 = vunpack.c.l.bf16 %v1642_v43  ;;  %v5140_v2 = vld [vmem:[%s4427_s16 + $0x220] sm:$0xff] }
 0x1e6   : > { %v2848_v31 = vpack.c.bf16 %v2572_v44, %v2568_v46  ;;  %v2636_v38 = vadd.f32 %v2348_v50, %v1334_v63  ;;  %v2412_v40 = vmul.f32 %v4837_v19, %v2118_v45  ;;  %v1891_v59 = vunpack.c.h.bf16 %v1642_v43  ;;  %v5143_v43 = vld [vmem:[%s4427_s16 + $0x230] sm:$0xff]  ;;  %v5234_v56 = vld [vmem:[%s4427_s16 + $0x300] sm:$0xff] }
 0x1e7   : > { %v2696_v14 = vadd.f32 %v2408_v28, %v1394_v15  ;;  %v1894_v58 = vunpack.c.l.bf16 %v1644_v30  ;;  %v1895_v63 = vunpack.c.h.bf16 %v1644_v30  ;;  %v2178_v1 = vsub.f32 %v1890_v62, %v1458_v48  ;;  %v5153_v62 = vld [vmem:[%s4435_s17 + $0x230] sm:$0xff]  ;;  %6722 = vst [vmem:[#allocation16_spill] sm:$0xff] %v5234_v56 }
 0x1e8   : > { %3017 = vmatpush.bf16.msra.mxu0 %v2848_v31  ;;  %v2880_v9 = vpack.c.bf16 %v2636_v38, %v2632_v57  ;;  %v1258_v21 = vunpack.c.l.bf16 %v5101_v54  ;;  %v2700_v49 = vadd.f32 %v2412_v40, %v1398_v20  ;;  %v5123_v15 = vsub.f32 %v1891_v59, %v6474_v0  ;;  %v5149_v57 = vld [vmem:[%s4435_s17 + $0x220] sm:$0xff] }
 0x1e9   : > { %v2182_v37 = vsub.f32 %v1894_v58, %v1462_v24  ;;  %v1262_v51 = vunpack.c.l.bf16 %v5105_v17  ;;  %v5131_v47 = vsub.f32 %v1895_v63, %v6473_v6  ;;  %v2472_v39 = vmul.f32 %v4837_v19, %v2178_v1  ;;  %v5156_v40 = vld [vmem:[%s4427_s16 + $0x320] sm:$0xff] }
 0x1ea   : > { %6711 = vst [vmem:[#allocation8_spill] sm:$0xff] %v5123_v15  ;;  %3030 = vmatpush.bf16.msra.mxu1 %v2880_v9  ;;  %v1690_v20 = vunpack.c.l.bf16 %v5109_v4  ;;  %v1694_v7 = vunpack.c.l.bf16 %v5112_v53  ;;  %v2912_v46 = vpack.c.bf16 %v2700_v49, %v2696_v14  ;;  %v1322_v50 = vunpack.c.l.bf16 %v5116_v13  ;;  %v1638_v6 = vld [vmem:[%s4435_s17 + $0x320] sm:$0xff] }
 0x1eb   : > { %6712 = vst [vmem:[#allocation25_spill] sm:$0xff] %v5131_v47  ;;  %v2476_v44 = vmul.f32 %v4837_v19, %v2182_v37  ;;  %v1326_v30 = vunpack.c.l.bf16 %v5119_v55  ;;  %v2760_v45 = vadd.f32 %v2472_v39, %v1458_v48  ;;  %v1754_v38 = vunpack.c.l.bf16 %v5127_v23  ;;  %v5165_v37 = vld [vmem:[%s4427_s16 + $0x330] sm:$0xff] }
 0x1ec   : > { %v1978_v28 = vsub.f32 %v1690_v20, %v1258_v21  ;;  %v1982_v31 = vsub.f32 %v1694_v7, %v1262_v51  ;;  %6713 = vst [vmem:[#allocation28_spill] sm:$0xff] %v5156_v40  ;;  %3043 = vmatpush.bf16.msra.mxu2 %v2912_v46  ;;  %v1758_v59 = vunpack.c.l.bf16 %v5137_v42  ;;  %v1386_v58 = vunpack.c.l.bf16 %v5140_v2 }
 0x1ed   : > { %v2764_v14 = vadd.f32 %v2476_v44, %v1462_v24  ;;  %v1390_v9 = vunpack.c.l.bf16 %v5143_v43  ;;  %v2042_v1 = vsub.f32 %v1754_v38, %v1322_v50  ;;  %v1818_v49 = vunpack.c.l.bf16 %v5149_v57  ;;  %6714 = vst [vmem:[#allocation9_spill] sm:$0xff] %v5165_v37 }
 0x1ee   : > { %v2272_v63 = vmul.f32 %v4837_v19, %v1978_v28  ;;  %v2276_v48 = vmul.f32 %v4837_v19, %v1982_v31  ;;  %v2046_v24 = vsub.f32 %v1758_v59, %v1326_v30  ;;  %v1822_v20 = vunpack.c.l.bf16 %v5153_v62  ;;  %v5176_v59 = vld [vmem:[%s4427_s16] sm:$0xff] }
 0x1ef   : > { %v2944_v39 = vpack.c.bf16 %v2764_v14, %v2760_v45  ;;  %v1450_v7 = vunpack.c.l.bf16 %v5156_v40  ;;  %v2336_v12 = vmul.f32 %v4837_v19, %v2042_v1  ;;  %v2106_v28 = vsub.f32 %v1818_v49, %v1386_v58  ;;  %v1640_v14 = vld [vmem:[%s4435_s17 + $0x330] sm:$0xff] }
 0x1f0   : > { %v2560_v46 = vadd.f32 %v2272_v63, %v1258_v21  ;;  %v2564_v44 = vadd.f32 %v2276_v48, %v1262_v51  ;;  %v2340_v31 = vmul.f32 %v4837_v19, %v2046_v24  ;;  %v2110_v38 = vsub.f32 %v1822_v20, %v1390_v9  ;;  %v5182_v20 = vld [vmem:[%s4427_s16 + $0x10] sm:$0xff] }
 0x1f1   : > { %3056 = vmatpush.bf16.msra.mxu3 %v2944_v39  ;;  %v6477_v0 = vunpack.c.h.bf16 %v5156_v40  ;;  %v1454_v45 = vunpack.c.l.bf16 %v5165_v37  ;;  %v2624_v51 = vadd.f32 %v2336_v12, %v1322_v50  ;;  %v2400_v63 = vmul.f32 %v4837_v19, %v2106_v28 }
 0x1f2   : > { %v2844_v21 = vpack.c.bf16 %v2564_v44, %v2560_v46  ;;  %v6478_v48 = vunpack.c.h.bf16 %v5165_v37  ;;  %v2628_v1 = vadd.f32 %v2340_v31, %v1326_v30  ;;  %v2404_v49 = vmul.f32 %v4837_v19, %v2110_v38  ;;  %v5189_v44 = vld [vmem:[%s4435_s17 + $0x10] sm:$0xff]  ;;  %v5192_v30 = vld [vmem:[%s4427_s16 + $0x100] sm:$0xff] }
 0x1f3   : > { %v1882_v39 = vunpack.c.l.bf16 %v1638_v6  ;;  %v1883_v24 = vunpack.c.h.bf16 %v1638_v6  ;;  %v2688_v5 = vadd.f32 %v2400_v63, %v1386_v58  ;;  %v1886_v46 = vunpack.c.l.bf16 %v1640_v14  ;;  %v5202_v58 = vld [vmem:[%s4435_s17 + $0x100] sm:$0xff] }
 0x1f4   : > { %3018 = vmatpush.bf16.msra.mxu0 %v2844_v21  ;;  %v1887_v12 = vunpack.c.h.bf16 %v1640_v14  ;;  %v1250_v50 = vunpack.c.l.bf16 %v5176_v59  ;;  %v2876_v28 = vpack.c.bf16 %v2628_v1, %v2624_v51  ;;  %v2692_v31 = vadd.f32 %v2404_v49, %v1390_v9  ;;  %v5199_v21 = vld [vmem:[%s4427_s16 + $0x110] sm:$0xff]  ;;  %v5214_v49 = vld [vmem:[%s4427_s16 + $0x200] sm:$0xff] }
 0x1f5   : > { %v2170_v6 = vsub.f32 %v1882_v39, %v1450_v7  ;;  %v5196_v38 = vsub.f32 %v1883_v24, %v6477_v0  ;;  %v2174_v63 = vsub.f32 %v1886_v46, %v1454_v45  ;;  %v1254_v51 = vunpack.c.l.bf16 %v5182_v20  ;;  %v5211_v1 = vld [vmem:[%s4435_s17 + $0x110] sm:$0xff]  ;;  %6718 = vst [vmem:[#allocation12_spill] sm:$0xff] %v5214_v49 }
 0x1f6   : > { %v5206_v14 = vsub.f32 %v1887_v12, %v6478_v48  ;;  %v1682_v9 = vunpack.c.l.bf16 %v5185_v36  ;;  %6717 = vst [vmem:[#allocation34_spill] sm:$0xff] %v5211_v1  ;;  %3031 = vmatpush.bf16.msra.mxu1 %v2876_v28  ;;  %v2908_v39 = vpack.c.bf16 %v2692_v31, %v2688_v5  ;;  %v1686_v46 = vunpack.c.l.bf16 %v5189_v44  ;;  %v5220_v12 = vld [vmem:[%s4427_s16 + $0x210] sm:$0xff] }
 0x1f7   : > { %6715 = vst [vmem:[#allocation29_spill] sm:$0xff] %v5196_v38  ;;  %v2464_v24 = vmul.f32 %v4837_v19, %v2170_v6  ;;  %v1314_v0 = vunpack.c.l.bf16 %v5192_v30  ;;  %v2468_v48 = vmul.f32 %v4837_v19, %v2174_v63  ;;  %v1318_v37 = vunpack.c.l.bf16 %v5199_v21  ;;  %v5229_v5 = vld [vmem:[%s4435_s17 + $0x210] sm:$0xff] }
 0x1f8   : > { %6716 = vst [vmem:[#allocation30_spill] sm:$0xff] %v5206_v14  ;;  %v1970_v3 = vsub.f32 %v1682_v9, %v1250_v50  ;;  %v1746_v40 = vunpack.c.l.bf16 %v5202_v58  ;;  %v5226_v14 = vld [vmem:[%s4435_s17 + $0x200] sm:$0xff]  ;;  %3044 = vmatpush.bf16.msra.mxu2 %v2908_v39  ;;  %v1974_v31 = vsub.f32 %v1686_v46, %v1254_v51  ;;  %v1750_v6 = vunpack.c.l.bf16 %v5211_v1 }
 0x1f9   : > { %6719 = vst [vmem:[#allocation14_spill] sm:$0xff] %v5220_v12  ;;  %v2752_v28 = vadd.f32 %v2464_v24, %v1450_v7  ;;  %v1378_v38 = vunpack.c.l.bf16 %v5214_v49  ;;  %v2756_v63 = vadd.f32 %v2468_v48, %v1454_v45  ;;  %v1382_v47 = vunpack.c.l.bf16 %v5220_v12  ;;  %v5242_v24 = vld [vmem:[%s4427_s16 + $0x310] sm:$0xff]  ;;  %v1678_v49 = vld [vmem:[%s4435_s17 + $0x460] sm:$0xff] }
 0x1fa   : > { %6720 = vst [vmem:[#allocation35_spill] sm:$0xff] %v5226_v14  ;;  %v2264_v9 = vmul.f32 %v4837_v19, %v1970_v3  ;;  %v2034_v29 = vsub.f32 %v1746_v40, %v1314_v0  ;;  %v2268_v15 = vmul.f32 %v4837_v19, %v1974_v31  ;;  %v2038_v16 = vsub.f32 %v1750_v6, %v1318_v37  ;;  %v1634_v31 = vld [vmem:[%s4435_s17 + $0x300] sm:$0xff]  ;;  %v1636_v6 = vld [vmem:[%s4435_s17 + $0x310] sm:$0xff] }
 0x1fb   : > { %6721 = vst [vmem:[#allocation37_spill] sm:$0xff] %v5229_v5  ;;  %v1810_v7 = vunpack.c.l.bf16 %v5226_v14  ;;  %v1814_v39 = vunpack.c.l.bf16 %v5229_v5  ;;  %v2940_v46 = vpack.c.bf16 %v2756_v63, %v2752_v28  ;;  %v1442_v3 = vunpack.c.l.bf16 %v5234_v56 }
 0x1fc   : > { %6723 = vst [vmem:[#allocation17_spill] sm:$0xff] %v5242_v24  ;;  %v2552_v34 = vadd.f32 %v2264_v9, %v1250_v50  ;;  %v2328_v45 = vmul.f32 %v4837_v19, %v2034_v29  ;;  %v2556_v40 = vadd.f32 %v2268_v15, %v1254_v51  ;;  %v2332_v48 = vmul.f32 %v4837_v19, %v2038_v16  ;;  %v5253_v29 = vld [vmem:[%s4427_s16 + $0x460] sm:$0xff] }
 0x1fd   : > { %v2098_v61 = vsub.f32 %v1810_v7, %v1378_v38  ;;  %v2102_v8 = vsub.f32 %v1814_v39, %v1382_v47  ;;  %3057 = vmatpush.bf16.msra.mxu3 %v2940_v46  ;;  %v1446_v12 = vunpack.c.l.bf16 %v5242_v24  ;;  %6724 = vst [vmem:[#allocation18_spill] sm:$0xff] %v5253_v29  ;;  %v1874_v63 = vunpack.c.l.bf16 %v1634_v31  ;;  %v5258_v39 = vld [vmem:[%s4427_s16 + $0x470] sm:$0xff] }
 0x1fe   : > { %v2616_v14 = vadd.f32 %v2328_v45, %v1314_v0  ;;  %v2840_v28 = vpack.c.bf16 %v2556_v40, %v2552_v34  ;;  %v2620_v15 = vadd.f32 %v2332_v48, %v1318_v37  ;;  %v1875_v9 = vunpack.c.h.bf16 %v1634_v31  ;;  %6725 = vst [vmem:[#allocation19_spill] sm:$0xff] %v5258_v39  ;;  %v1680_v31 = vld [vmem:[%s4435_s17 + $0x470] sm:$0xff] }
 0x1ff   : > { %v2392_v16 = vmul.f32 %v4837_v19, %v2098_v61  ;;  %v2396_v51 = vmul.f32 %v4837_v19, %v2102_v8  ;;  %v1878_v7 = vunpack.c.l.bf16 %v1636_v6  ;;  %v1879_v0 = vunpack.c.h.bf16 %v1636_v6 }
 0x200   : > { %3019 = vmatpush.bf16.msra.mxu0 %v2840_v28  ;;  %v2872_v46 = vpack.c.bf16 %v2620_v15, %v2616_v14  ;;  %v1530_v5 = vunpack.c.l.bf16 %v5253_v29  ;;  %v2162_v34 = vsub.f32 %v1874_v63, %v1442_v3  ;;  %v6726_v37 = vunpack.c.h.bf16 %v5234_v56 }
 0x201   : > { %v2680_v45 = vadd.f32 %v2392_v16, %v1378_v38  ;;  %v2684_v50 = vadd.f32 %v2396_v51, %v1382_v47  ;;  %v2166_v8 = vsub.f32 %v1878_v7, %v1446_v12  ;;  %v6728_v40 = vunpack.c.h.bf16 %v5242_v24  ;;  %v3577_v7 = vld [vmem:[%s4427_s16 + $0xe0] sm:$0xff]  ;;  %v3580_v24 = vld [vmem:[%s4435_s17 + $0xf0] sm:$0xff] }
 0x202   : > { %v5264_v61 = vsub.f32 %v1875_v9, %v6726_v37  ;;  %3032 = vmatpush.bf16.msra.mxu1 %v2872_v46  ;;  %v6494_v47 = vunpack.c.h.bf16 %v5253_v29  ;;  %v1534_v38 = vunpack.c.l.bf16 %v5258_v39  ;;  %v6493_v6 = vunpack.c.h.bf16 %v5258_v39  ;;  %v5307_v39 = vld [vmem:[%s4427_s16 + $0x440] sm:$0xff] }
 0x203   : > { %v5268_v48 = vsub.f32 %v1879_v0, %v6728_v40  ;;  %v2904_v14 = vpack.c.bf16 %v2684_v50, %v2680_v45  ;;  %v2456_v28 = vmul.f32 %v4837_v19, %v2162_v34  ;;  %v2460_v15 = vmul.f32 %v4837_v19, %v2166_v8  ;;  %v3578_v0 = vld [vmem:[%s4427_s16 + $0xf0] sm:$0xff]  ;;  %6732 = vst [vmem:[#allocation27_spill] sm:$0xff] %v5307_v39 }
 0x204   : > { %6727 = vst [vmem:[#allocation38_spill] sm:$0xff] %v5264_v61  ;;  %v1962_v16 = vunpack.c.l.bf16 %v1678_v49  ;;  %v1963_v51 = vunpack.c.h.bf16 %v1678_v49  ;;  %v1966_v63 = vunpack.c.l.bf16 %v1680_v31  ;;  %v1967_v9 = vunpack.c.h.bf16 %v1680_v31  ;;  %v3579_v31 = vld [vmem:[%s4435_s17 + $0xe0] sm:$0xff] }
 0x205   : > { %6729 = vst [vmem:[#allocation22_spill] sm:$0xff] %v5268_v48  ;;  %3045 = vmatpush.bf16.msra.mxu2 %v2904_v14  ;;  %v1307_v50 = vunpack.c.h.bf16 %v3577_v7  ;;  %v1311_v46 = vunpack.c.h.bf16 %v3578_v0  ;;  %v2744_v45 = vadd.f32 %v2456_v28, %v1442_v3  ;;  %v2748_v37 = vadd.f32 %v2460_v15, %v1446_v12  ;;  %v3581_v3 = vld [vmem:[%s4427_s16 + $0x1e0] sm:$0xff]  ;;  %v3582_v15 = vld [vmem:[%s4427_s16 + $0x1f0] sm:$0xff] }
 0x206   : > { %v2250_v40 = vsub.f32 %v1962_v16, %v1530_v5  ;;  %v5280_v34 = vsub.f32 %v1963_v51, %v6494_v47  ;;  %v2254_v8 = vsub.f32 %v1966_v63, %v1534_v38  ;;  %v5284_v49 = vsub.f32 %v1967_v9, %v6493_v6  ;;  %v3583_v9 = vld [vmem:[%s4435_s17 + $0x1e0] sm:$0xff] }
 0x207   : > { %v1739_v14 = vunpack.c.h.bf16 %v3579_v31  ;;  %v1743_v7 = vunpack.c.h.bf16 %v3580_v24  ;;  %v2936_v56 = vpack.c.bf16 %v2748_v37, %v2744_v45  ;;  %v1371_v28 = vunpack.c.h.bf16 %v3581_v3  ;;  %v5296_v24 = vld [vmem:[%s6415_s1] sm:$0xff]  ;;  %v3584_v37 = vld [vmem:[%s4435_s17 + $0x1f0] sm:$0xff] }
 0x208   : > { %6730 = vst [vmem:[#allocation23_spill] sm:$0xff] %v5280_v34  ;;  %v2544_v12 = vmul.f32 %v4837_v19, %v2250_v40  ;;  %v1375_v16 = vunpack.c.h.bf16 %v3582_v15  ;;  %v2548_v51 = vmul.f32 %v4837_v19, %v2254_v8  ;;  %v1803_v6 = vunpack.c.h.bf16 %v3583_v9  ;;  %v3585_v31 = vld [vmem:[%s4427_s16 + $0x2e0] sm:$0xff]  ;;  %v3586_v15 = vld [vmem:[%s4427_s16 + $0x2f0] sm:$0xff] }
 0x209   : > { %6731 = vst [vmem:[#allocation24_spill] sm:$0xff] %v5284_v49  ;;  %v2027_v63 = vsub.f32 %v1739_v14, %v1307_v50  ;;  %v2031_v0 = vsub.f32 %v1743_v7, %v1311_v46  ;;  %3058 = vmatpush.bf16.msra.mxu3 %v2936_v56  ;;  %v1807_v40 = vunpack.c.h.bf16 %v3584_v37  ;;  %v1435_v3 = vunpack.c.h.bf16 %v3585_v31  ;;  %v3587_v61 = vld [vmem:[%s4435_s17 + $0x2e0] sm:$0xff]  ;;  %v1676_v49 = vld [vmem:[%s4435_s17 + $0x450] sm:$0xff] }
 0x20a   : > { %v2832_v45 = vadd.f32 %v2544_v12, %v1530_v5  ;;  %v1439_v8 = vunpack.c.h.bf16 %v3586_v15  ;;  %v2836_v14 = vadd.f32 %v2548_v51, %v1534_v38  ;;  %v2091_v47 = vsub.f32 %v1803_v6, %v1371_v28  ;;  %v3588_v5 = vld [vmem:[%s4435_s17 + $0x2f0] sm:$0xff] }
 0x20b   : > { %v2321_v7 = vmul.f32 %v4837_v19, %v2027_v63  ;;  %v2325_v9 = vmul.f32 %v4837_v19, %v2031_v0  ;;  %v2095_v48 = vsub.f32 %v1807_v40, %v1375_v16  ;;  %v1867_v56 = vunpack.c.h.bf16 %v3587_v61  ;;  %v5311_v51 = vld [vmem:[%s4427_s16 + $0x450] sm:$0xff]  ;;  %v1674_v61 = vld [vmem:[%s4435_s17 + $0x440] sm:$0xff] }
 0x20c   : > { %v1871_v12 = vunpack.c.h.bf16 %v3588_v5  ;;  %v2994_v37 = vunpack.c.l.b16 %v5296_v24  ;;  %v2980_v31 = vpack.c.bf16 %v2836_v14, %v2832_v45  ;;  %v2385_v38 = vmul.f32 %v4837_v19, %v2091_v47  ;;  %6733 = vst [vmem:[#allocation32_spill] sm:$0xff] %v5311_v51 }
 0x20d   : > { %v2609_v15 = vadd.f32 %v2321_v7, %v1307_v50  ;;  %v2613_v29 = vadd.f32 %v2325_v9, %v1311_v46  ;;  %v2389_v6 = vmul.f32 %v4837_v19, %v2095_v48  ;;  %v2155_v63 = vsub.f32 %v1867_v56, %v1435_v3 }
 0x20e   : > { %v2159_v0 = vsub.f32 %v1871_v12, %v1439_v8  ;;  %v5314_v40 = vpack.c.b16 %v2994_v37, %v2994_v37  ;;  %3068 = vmatpush.bf16.msrb.mxu0 %v2980_v31  ;;  %v2673_v34 = vadd.f32 %v2385_v38, %v1371_v28  ;;  %v1522_v1 = vunpack.c.l.bf16 %v5307_v39  ;;  %v3589_v38 = vld [vmem:[%s4427_s16 + $0xc0] sm:$0xff] }
 0x20f   : > { %v2869_v5 = vpack.c.bf16 %v2613_v29, %v2609_v15  ;;  %v6499_v50 = vunpack.c.h.bf16 %v5307_v39  ;;  %v2677_v46 = vadd.f32 %v2389_v6, %v1375_v16  ;;  %v2449_v47 = vmul.f32 %v4837_v19, %v2155_v63  ;;  %v1670_v39 = vld [vmem:[%s4435_s17 + $0x420] sm:$0xff] }
 0x210   : > { %v2453_v45 = vmul.f32 %v4837_v19, %v2159_v0  ;;  %3020 = vmatmul.bf16.vlgmr.msra.gmra.mxu0 %v5314_v40  ;;  %v1526_v48 = vunpack.c.l.bf16 %v5311_v51  ;;  %v6498_v14 = vunpack.c.h.bf16 %v5311_v51  ;;  %v1954_v29 = vunpack.c.l.bf16 %v1674_v61 }
 0x211   : > { %3077 = vmatpush.bf16.msrb.mxu1 %v2869_v5  ;;  %v1955_v28 = vunpack.c.h.bf16 %v1674_v61  ;;  %v1958_v7 = vunpack.c.l.bf16 %v1676_v49  ;;  %v2901_v9 = vpack.c.bf16 %v2677_v46, %v2673_v34  ;;  %v2737_v56 = vadd.f32 %v2449_v47, %v1435_v3  ;;  %v3590_v3 = vld [vmem:[%s4427_s16 + $0xd0] sm:$0xff] }
 0x212   : > { %v2741_v16 = vadd.f32 %v2453_v45, %v1439_v8  ;;  %v1959_v12 = vunpack.c.h.bf16 %v1676_v49  ;;  %v2242_v37 = vsub.f32 %v1954_v29, %v1522_v1  ;;  %v1299_v6 = vunpack.c.h.bf16 %v3589_v38  ;;  %v3591_v8 = vld [vmem:[%s4435_s17 + $0xc0] sm:$0xff]  ;;  %v3592_v46 = vld [vmem:[%s4435_s17 + $0xd0] sm:$0xff] }
 0x213   : > { %v5327_v31 = vsub.f32 %v1955_v28, %v6499_v50  ;;  %v2246_v15 = vsub.f32 %v1958_v7, %v1526_v48  ;;  %3090 = vmatpush.bf16.msrb.mxu2 %v2901_v9  ;;  %v1303_v49 = vunpack.c.h.bf16 %v3590_v3  ;;  %v1731_v0 = vunpack.c.h.bf16 %v3591_v8  ;;  %v3593_v45 = vld [vmem:[%s4427_s16 + $0x1c0] sm:$0xff]  ;;  %v3594_v7 = vld [vmem:[%s4427_s16 + $0x1d0] sm:$0xff] }
 0x214   : > { %v2933_v63 = vpack.c.bf16 %v2741_v16, %v2737_v56  ;;  %v5332_v34 = vsub.f32 %v1959_v12, %v6498_v14  ;;  %v2536_v61 = vmul.f32 %v4837_v19, %v2242_v37  ;;  %v1735_v47 = vunpack.c.h.bf16 %v3592_v46  ;;  %v3595_v56 = vld [vmem:[%s4435_s17 + $0x1c0] sm:$0xff]  ;;  %v3596_v12 = vld [vmem:[%s4435_s17 + $0x1d0] sm:$0xff] }
 0x215   : > { %6734 = vst [vmem:[#allocation33_spill] sm:$0xff] %v5327_v31  ;;  %v2540_v5 = vmul.f32 %v4837_v19, %v2246_v15  ;;  %v1363_v29 = vunpack.c.h.bf16 %v3593_v45  ;;  %v2019_v28 = vsub.f32 %v1731_v0, %v1299_v6  ;;  %v1367_v9 = vunpack.c.h.bf16 %v3594_v7  ;;  %v3597_v8 = vld [vmem:[%s4427_s16 + $0x2c0] sm:$0xff]  ;;  %v3598_v7 = vld [vmem:[%s4427_s16 + $0x2d0] sm:$0xff] }
 0x216   : > { %6735 = vst [vmem:[#allocation36_spill] sm:$0xff] %v5332_v34  ;;  %3103 = vmatpush.bf16.msrb.mxu3 %v2933_v63  ;;  %v1795_v16 = vunpack.c.h.bf16 %v3595_v56  ;;  %v1799_v38 = vunpack.c.h.bf16 %v3596_v12  ;;  %v2824_v3 = vadd.f32 %v2536_v61, %v1522_v1  ;;  %v2023_v15 = vsub.f32 %v1735_v47, %v1303_v49  ;;  %v5347_v63 = vld [vmem:[%s6415_s1 + $0x8] sm:$0xff]  ;;  %v3600_v47 = vld [vmem:[%s4435_s17 + $0x2d0] sm:$0xff] }
 0x217   : > { %v2828_v37 = vadd.f32 %v2540_v5, %v1526_v48  ;;  %v1427_v14 = vunpack.c.h.bf16 %v3597_v8  ;;  %v2313_v0 = vmul.f32 %v4837_v19, %v2019_v28  ;;  %v1431_v56 = vunpack.c.h.bf16 %v3598_v7  ;;  %v5352_v50 = vld [vmem:[%s4427_s16 + $0x420] sm:$0xff] }
 0x218   : > { %v2083_v46 = vsub.f32 %v1795_v16, %v1363_v29  ;;  %v2087_v45 = vsub.f32 %v1799_v38, %v1367_v9  ;;  %6736 = vst [vmem:[#allocation41_spill] sm:$0xff] %v5352_v50  ;;  %v2317_v48 = vmul.f32 %v4837_v19, %v2023_v15  ;;  %v3599_v61 = vld [vmem:[%s4435_s17 + $0x2c0] sm:$0xff]  ;;  %v1863_v12 = vunpack.c.h.bf16 %v3600_v47  ;;  %v5361_v38 = vld [vmem:[%s4427_s16 + $0x430] sm:$0xff] }
 0x219   : > { %v2976_v1 = vpack.c.bf16 %v2828_v37, %v2824_v3  ;;  %v1859_v5 = vunpack.c.h.bf16 %v3599_v61  ;;  %v2601_v8 = vadd.f32 %v2313_v0, %v1299_v6  ;;  %v2996_v16 = vunpack.c.l.b16 %v5347_v63  ;;  %6737 = vst [vmem:[#allocation42_spill] sm:$0xff] %v5361_v38  ;;  %v1672_v0 = vld [vmem:[%s4435_s17 + $0x430] sm:$0xff] }
 0x21a   : > { %v2377_v51 = vmul.f32 %v4837_v19, %v2083_v46  ;;  %v2381_v28 = vmul.f32 %v4837_v19, %v2087_v45  ;;  %v2605_v7 = vadd.f32 %v2317_v48, %v1303_v49  ;;  %v2151_v37 = vsub.f32 %v1863_v12, %v1431_v56 }
 0x21b   : > { %3069 = vmatpush.bf16.msrb.mxu0 %v2976_v1  ;;  %v2147_v3 = vsub.f32 %v1859_v5, %v1427_v14  ;;  %v1514_v15 = vunpack.c.l.bf16 %v5352_v50  ;;  %v5365_v47 = vpack.c.b16 %v2996_v16, %v2996_v16  ;;  %v6503_v6 = vunpack.c.h.bf16 %v5352_v50  ;;  %v3601_v16 = vld [vmem:[%s4427_s16 + $0xa0] sm:$0xff] }
 0x21c   : > { %v2665_v61 = vadd.f32 %v2377_v51, %v1363_v29  ;;  %v2669_v34 = vadd.f32 %v2381_v28, %v1367_v9  ;;  %v2865_v46 = vpack.c.bf16 %v2605_v7, %v2601_v8  ;;  %v2445_v31 = vmul.f32 %v4837_v19, %v2151_v37 }
 0x21d   : > { %6738 = vst [vmem:[#allocation46_spill] sm:$0xff] %v5365_v47  ;;  %v2441_v45 = vmul.f32 %v4837_v19, %v2147_v3  ;;  %v1518_v49 = vunpack.c.l.bf16 %v5361_v38  ;;  %3046 = vmatmul.bf16.vlgmr.msra.gmra.mxu2 %v5365_v47  ;;  %v6502_v51 = vunpack.c.h.bf16 %v5361_v38  ;;  %v1946_v29 = vunpack.c.l.bf16 %v1670_v39  ;;  %v3602_v3 = vld [vmem:[%s4427_s16 + $0xb0] sm:$0xff] }
 0x21e   : > { %v2897_v1 = vpack.c.bf16 %v2669_v34, %v2665_v61  ;;  %v1947_v9 = vunpack.c.h.bf16 %v1670_v39  ;;  %3078 = vmatpush.bf16.msrb.mxu1 %v2865_v46  ;;  %v2733_v5 = vadd.f32 %v2445_v31, %v1431_v56  ;;  %v1950_v12 = vunpack.c.l.bf16 %v1672_v0  ;;  %v3603_v31 = vld [vmem:[%s4435_s17 + $0xa0] sm:$0xff]  ;;  %v3604_v46 = vld [vmem:[%s4435_s17 + $0xb0] sm:$0xff] }
 0x21f   : > { %v2729_v48 = vadd.f32 %v2441_v45, %v1427_v14  ;;  %v1951_v8 = vunpack.c.h.bf16 %v1672_v0  ;;  %v2234_v28 = vsub.f32 %v1946_v29, %v1514_v15  ;;  %v1291_v7 = vunpack.c.h.bf16 %v3601_v16  ;;  %v3610_v38 = vld [vmem:[%s4427_s16 + $0x2b0] sm:$0xff] }
 0x220   : > { %3091 = vmatpush.bf16.msrb.mxu2 %v2897_v1  ;;  %v5376_v34 = vsub.f32 %v1947_v9, %v6503_v6  ;;  %v1295_v37 = vunpack.c.h.bf16 %v3602_v3  ;;  %v2238_v61 = vsub.f32 %v1950_v12, %v1518_v49  ;;  %v1723_v56 = vunpack.c.h.bf16 %v3603_v31  ;;  %v3605_v1 = vld [vmem:[%s4427_s16 + $0x1a0] sm:$0xff]  ;;  %v3606_v9 = vld [vmem:[%s4427_s16 + $0x1b0] sm:$0xff] }
 0x221   : > { %v2929_v39 = vpack.c.bf16 %v2733_v5, %v2729_v48  ;;  %v5382_v14 = vsub.f32 %v1951_v8, %v6502_v51  ;;  %v2528_v0 = vmul.f32 %v4837_v19, %v2234_v28  ;;  %v1727_v45 = vunpack.c.h.bf16 %v3604_v46  ;;  %v3607_v12 = vld [vmem:[%s4435_s17 + $0x1a0] sm:$0xff]  ;;  %v3608_v3 = vld [vmem:[%s4435_s17 + $0x1b0] sm:$0xff] }
 0x222   : > { %6739 = vst [vmem:[#allocation47_spill] sm:$0xff] %v5376_v34  ;;  %v1355_v29 = vunpack.c.h.bf16 %v3605_v1  ;;  %v1359_v16 = vunpack.c.h.bf16 %v3606_v9  ;;  %v2532_v48 = vmul.f32 %v4837_v19, %v2238_v61  ;;  %v2011_v5 = vsub.f32 %v1723_v56, %v1291_v7  ;;  %v3609_v6 = vld [vmem:[%s4427_s16 + $0x2a0] sm:$0xff]  ;;  %v3612_v34 = vld [vmem:[%s4435_s17 + $0x2b0] sm:$0xff] }
 0x223   : > { %6740 = vst [vmem:[#allocation48_spill] sm:$0xff] %v5382_v14  ;;  %3104 = vmatpush.bf16.msrb.mxu3 %v2929_v39  ;;  %v1787_v8 = vunpack.c.h.bf16 %v3607_v12  ;;  %v1791_v31 = vunpack.c.h.bf16 %v3608_v3  ;;  %v2816_v51 = vadd.f32 %v2528_v0, %v1514_v15  ;;  %v2015_v28 = vsub.f32 %v1727_v45, %v1295_v37  ;;  %v3611_v56 = vld [vmem:[%s4435_s17 + $0x2a0] sm:$0xff] }
 0x224   : > { %v1419_v46 = vunpack.c.h.bf16 %v3609_v6  ;;  %v1423_v50 = vunpack.c.h.bf16 %v3610_v38  ;;  %v2820_v1 = vadd.f32 %v2532_v48, %v1518_v49  ;;  %v2305_v9 = vmul.f32 %v4837_v19, %v2011_v5  ;;  %v5400_v0 = vld [vmem:[%s4427_s16 + $0x400] sm:$0xff] }
 0x225   : > { %v2075_v39 = vsub.f32 %v1787_v8, %v1355_v29  ;;  %v2079_v14 = vsub.f32 %v1791_v31, %v1359_v16  ;;  %v2309_v61 = vmul.f32 %v4837_v19, %v2015_v28  ;;  %v1851_v12 = vunpack.c.h.bf16 %v3611_v56  ;;  %6741 = vst [vmem:[#allocation49_spill] sm:$0xff] %v5400_v0  ;;  %v5407_v31 = vld [vmem:[%s4427_s16 + $0x410] sm:$0xff] }
 0x226   : > { %v1855_v47 = vunpack.c.h.bf16 %v3612_v34  ;;  %v2997_v15 = vunpack.c.h.b16 %v5347_v63  ;;  %v2972_v6 = vpack.c.bf16 %v2820_v1, %v2816_v51  ;;  %v2593_v45 = vadd.f32 %v2305_v9, %v1291_v7  ;;  %6743 = vst [vmem:[#allocation51_spill] sm:$0xff] %v5407_v31  ;;  %v1666_v7 = vld [vmem:[%s4435_s17 + $0x400] sm:$0xff] }
 0x227   : > { %v2369_v38 = vmul.f32 %v4837_v19, %v2075_v39  ;;  %v2373_v49 = vmul.f32 %v4837_v19, %v2079_v14  ;;  %v2597_v48 = vadd.f32 %v2309_v61, %v1295_v37  ;;  %v2139_v5 = vsub.f32 %v1851_v12, %v1419_v46  ;;  %v1668_v14 = vld [vmem:[%s4435_s17 + $0x410] sm:$0xff] }
 0x228   : > { %v2143_v8 = vsub.f32 %v1855_v47, %v1423_v50  ;;  %v5404_v3 = vpack.c.b16 %v2997_v15, %v2997_v15  ;;  %3070 = vmatpush.bf16.msrb.mxu0 %v2972_v6  ;;  %v2995_v28 = vunpack.c.h.b16 %v5296_v24  ;;  %v1506_v51 = vunpack.c.l.bf16 %v5400_v0 }
 0x229   : > { %v2657_v34 = vadd.f32 %v2369_v38, %v1355_v29  ;;  %v2661_v63 = vadd.f32 %v2373_v49, %v1359_v16  ;;  %v2861_v1 = vpack.c.bf16 %v2597_v48, %v2593_v45  ;;  %v2433_v9 = vmul.f32 %v4837_v19, %v2139_v5  ;;  %v3613_v38 = vld [vmem:[%s4427_s16 + $0x80] sm:$0xff]  ;;  %v3614_v48 = vld [vmem:[%s4427_s16 + $0x90] sm:$0xff] }
 0x22a   : > { %6742 = vst [vmem:[#allocation50_spill] sm:$0xff] %v5404_v3  ;;  %v2437_v37 = vmul.f32 %v4837_v19, %v2143_v8  ;;  %3059 = vmatmul.bf16.vlgmr.msra.gmra.mxu3 %v5404_v3  ;;  %v6509_v47 = vunpack.c.h.bf16 %v5400_v0  ;;  %v5417_v29 = vpack.c.b16 %v2995_v28, %v2995_v28  ;;  %v1510_v24 = vunpack.c.l.bf16 %v5407_v31  ;;  %v3622_v3 = vld [vmem:[%s4427_s16 + $0x290] sm:$0xff] }
 0x22b   : > { %v2893_v39 = vpack.c.bf16 %v2661_v63, %v2657_v34  ;;  %v6508_v16 = vunpack.c.h.bf16 %v5407_v31  ;;  %3079 = vmatpush.bf16.msrb.mxu1 %v2861_v1  ;;  %v2721_v61 = vadd.f32 %v2433_v9, %v1419_v46  ;;  %v1938_v12 = vunpack.c.l.bf16 %v1666_v7  ;;  %v3615_v46 = vld [vmem:[%s4435_s17 + $0x80] sm:$0xff]  ;;  %v3616_v1 = vld [vmem:[%s4435_s17 + $0x90] sm:$0xff] }
 0x22c   : > { %6744 = vst [vmem:[#allocation52_spill] sm:$0xff] %v5417_v29  ;;  %v2725_v56 = vadd.f32 %v2437_v37, %v1423_v50  ;;  %v1939_v15 = vunpack.c.h.bf16 %v1666_v7  ;;  %3033 = vmatmul.bf16.vlgmr.msra.gmra.mxu1 %v5417_v29  ;;  %v1942_v6 = vunpack.c.l.bf16 %v1668_v14  ;;  %v1943_v45 = vunpack.c.h.bf16 %v1668_v14  ;;  %v3617_v37 = vld [vmem:[%s4427_s16 + $0x180] sm:$0xff] }
 0x22d   : > { %3092 = vmatpush.bf16.msrb.mxu2 %v2893_v39  ;;  %v1283_v49 = vunpack.c.h.bf16 %v3613_v38  ;;  %v1287_v5 = vunpack.c.h.bf16 %v3614_v48  ;;  %v2226_v34 = vsub.f32 %v1938_v12, %v1506_v51  ;;  %v1715_v63 = vunpack.c.h.bf16 %v3615_v46 }
 0x22e   : > { %v2925_v8 = vpack.c.bf16 %v2725_v56, %v2721_v61  ;;  %v5426_v50 = vsub.f32 %v1939_v15, %v6509_v47  ;;  %v2230_v28 = vsub.f32 %v1942_v6, %v1510_v24  ;;  %v5431_v7 = vsub.f32 %v1943_v45, %v6508_v16  ;;  %v3618_v56 = vld [vmem:[%s4427_s16 + $0x190] sm:$0xff]  ;;  %v3619_v15 = vld [vmem:[%s4435_s17 + $0x180] sm:$0xff] }
 0x22f   : > { %v1719_v9 = vunpack.c.h.bf16 %v3616_v1  ;;  %v1347_v14 = vunpack.c.h.bf16 %v3617_v37  ;;  %v2520_v39 = vmul.f32 %v4837_v19, %v2226_v34  ;;  %v2003_v61 = vsub.f32 %v1715_v63, %v1283_v49  ;;  %v3620_v45 = vld [vmem:[%s4435_s17 + $0x190] sm:$0xff]  ;;  %v3621_v16 = vld [vmem:[%s4427_s16 + $0x280] sm:$0xff] }
 0x230   : > { %6745 = vst [vmem:[#allocation53_spill] sm:$0xff] %v5431_v7  ;;  %3105 = vmatpush.bf16.msrb.mxu3 %v2925_v8  ;;  %v1351_v12 = vunpack.c.h.bf16 %v3618_v56  ;;  %v1779_v38 = vunpack.c.h.bf16 %v3619_v15  ;;  %v2524_v6 = vmul.f32 %v4837_v19, %v2230_v28  ;;  %v1783_v46 = vunpack.c.h.bf16 %v3620_v45  ;;  %v3623_v15 = vld [vmem:[%s4435_s17 + $0x280] sm:$0xff]  ;;  %v3624_v45 = vld [vmem:[%s4435_s17 + $0x290] sm:$0xff] }
 0x231   : > { %v2007_v48 = vsub.f32 %v1719_v9, %v1287_v5  ;;  %v1411_v1 = vunpack.c.h.bf16 %v3621_v16  ;;  %v2808_v47 = vadd.f32 %v2520_v39, %v1506_v51  ;;  %v2297_v8 = vmul.f32 %v4837_v19, %v2003_v61 }
 0x232   : > { %v2067_v37 = vsub.f32 %v1779_v38, %v1347_v14  ;;  %v1415_v34 = vunpack.c.h.bf16 %v3622_v3  ;;  %v2812_v63 = vadd.f32 %v2524_v6, %v1510_v24  ;;  %v2071_v31 = vsub.f32 %v1783_v46, %v1351_v12  ;;  %v3625_v6 = vld [vmem:[%s4427_s16 + $0x60] sm:$0xff] }
 0x233   : > { %v2301_v56 = vmul.f32 %v4837_v19, %v2007_v48  ;;  %v1843_v28 = vunpack.c.h.bf16 %v3623_v15  ;;  %v2585_v9 = vadd.f32 %v2297_v8, %v1283_v49  ;;  %v1847_v7 = vunpack.c.h.bf16 %v3624_v45  ;;  %v3626_v48 = vld [vmem:[%s4427_s16 + $0x70] sm:$0xff] }
 0x234   : > { %v2361_v0 = vmul.f32 %v4837_v19, %v2067_v37  ;;  %v2965_v51 = vpack.c.bf16 %v4888_v35, %v4882_v10  ;;  %v2968_v16 = vpack.c.bf16 %v2812_v63, %v2808_v47  ;;  %v2365_v3 = vmul.f32 %v4837_v19, %v2071_v31  ;;  %v3627_v35 = vld [vmem:[%s4435_s17 + $0x60] sm:$0xff]  ;;  %v3630_v63 = vld [vmem:[%s4427_s16 + $0x170] sm:$0xff] }
 0x235   : > { %v2589_v39 = vadd.f32 %v2301_v56, %v1287_v5  ;;  %v2131_v24 = vsub.f32 %v1843_v28, %v1411_v1  ;;  %v2135_v38 = vsub.f32 %v1847_v7, %v1415_v34  ;;  %v1275_v49 = vunpack.c.h.bf16 %v3625_v6  ;;  %v3629_v7 = vld [vmem:[%s4427_s16 + $0x160] sm:$0xff] }
 0x236   : > { %v2649_v61 = vadd.f32 %v2361_v0, %v1347_v14  ;;  %v1279_v46 = vunpack.c.h.bf16 %v3626_v48  ;;  %3071 = vmatpush.bf16.msrb.mxu0 %v2968_v16  ;;  %v2653_v37 = vadd.f32 %v2365_v3, %v1351_v12  ;;  %v1707_v47 = vunpack.c.h.bf16 %v3627_v35  ;;  %v3628_v0 = vld [vmem:[%s4435_s17 + $0x70] sm:$0xff] }
 0x237   : > { %v2857_v8 = vpack.c.bf16 %v2589_v39, %v2585_v9  ;;  %v2425_v10 = vmul.f32 %v4837_v19, %v2131_v24  ;;  %v2429_v31 = vmul.f32 %v4837_v19, %v2135_v38  ;;  %v1711_v5 = vunpack.c.h.bf16 %v3628_v0  ;;  %v3631_v9 = vld [vmem:[%s4435_s17 + $0x160] sm:$0xff]  ;;  %v3632_v3 = vld [vmem:[%s4435_s17 + $0x170] sm:$0xff] }
 0x238   : > { %v1339_v14 = vunpack.c.h.bf16 %v3629_v7  ;;  %v1343_v56 = vunpack.c.h.bf16 %v3630_v63  ;;  %v2889_v15 = vpack.c.bf16 %v2653_v37, %v2649_v61  ;;  %v1995_v28 = vsub.f32 %v1707_v47, %v1275_v49  ;;  %v3633_v24 = vld [vmem:[%s4427_s16 + $0x260] sm:$0xff]  ;;  %v3634_v35 = vld [vmem:[%s4427_s16 + $0x270] sm:$0xff] }
 0x239   : > { %3080 = vmatpush.bf16.msrb.mxu1 %v2857_v8  ;;  %v2713_v12 = vadd.f32 %v2425_v10, %v1411_v1  ;;  %v1771_v45 = vunpack.c.h.bf16 %v3631_v9  ;;  %v2717_v16 = vadd.f32 %v2429_v31, %v1415_v34  ;;  %v1999_v39 = vsub.f32 %v1711_v5, %v1279_v46  ;;  %v3635_v8 = vld [vmem:[%s4435_s17 + $0x260] sm:$0xff]  ;;  %v3636_v47 = vld [vmem:[%s4435_s17 + $0x270] sm:$0xff] }
 0x23a   : > { %3116 = vmatpush.bf16.msra.mxu0 %v2965_v51  ;;  %v1775_v51 = vunpack.c.h.bf16 %v3632_v3  ;;  %v1403_v38 = vunpack.c.h.bf16 %v3633_v24  ;;  %3093 = vmatpush.bf16.msrb.mxu2 %v2889_v15  ;;  %v2289_v6 = vmul.f32 %v4837_v19, %v1995_v28  ;;  %v1407_v0 = vunpack.c.h.bf16 %v3634_v35  ;;  %v2990_v31 = vld [vmem:[%s6415_s1 + $0x10] sm:$0xf]  ;;  %v6746_v15 = vld [vmem:[#allocation13_spill] sm:$0xff] }
 0x23b   : > { %v2059_v48 = vsub.f32 %v1771_v45, %v1339_v14  ;;  %v1835_v61 = vunpack.c.h.bf16 %v3635_v8  ;;  %v2921_v37 = vpack.c.bf16 %v2717_v16, %v2713_v12  ;;  %v2293_v1 = vmul.f32 %v4837_v19, %v1999_v39  ;;  %v6747_v16 = vld [vmem:[#allocation15_spill] sm:$0xff] }
 0x23c   : > { %v2063_v10 = vsub.f32 %v1775_v51, %v1343_v56  ;;  %v1839_v34 = vunpack.c.h.bf16 %v3636_v47  ;;  %v2577_v5 = vadd.f32 %v2289_v6, %v1275_v49  ;;  %v2505_v28 = vmul.f32 %v4837_v19, %v6746_v15 }
 0x23d   : > { %v2353_v7 = vmul.f32 %v4837_v19, %v2059_v48  ;;  %v2123_v63 = vsub.f32 %v1835_v61, %v1403_v38  ;;  %3106 = vmatpush.bf16.msrb.mxu3 %v2921_v37  ;;  %v2581_v9 = vadd.f32 %v2293_v1, %v1279_v46  ;;  %v2509_v39 = vmul.f32 %v4837_v19, %v6747_v16 }
 0x23e   : > { %v2357_v12 = vmul.f32 %v4837_v19, %v2063_v10  ;;  %v2127_v45 = vsub.f32 %v1839_v34, %v1407_v0  ;;  %v6748_v49 = vunpack.c.h.bf16 %v6648_v25  ;;  %v2998_v6 = vunpack.c.l.b16 %v2990_v31 }
 0x23f   : > { %v2641_v3 = vadd.f32 %v2353_v7, %v1339_v14  ;;  %v2417_v51 = vmul.f32 %v4837_v19, %v2123_v63  ;;  %v2853_v48 = vpack.c.bf16 %v2581_v9, %v2577_v5  ;;  %v6749_v46 = vunpack.c.h.bf16 %v6650_v26  ;;  %v3637_v14 = vld [vmem:[%s4427_s16 + $0x40] sm:$0xff] }
 0x240   : > { %v2793_v24 = vadd.f32 %v2505_v28, %v6748_v49  ;;  %v2645_v35 = vadd.f32 %v2357_v12, %v1343_v56  ;;  %v2421_v8 = vmul.f32 %v4837_v19, %v2127_v45  ;;  %v5481_v1 = vpack.c.b16 %v2998_v6, %v2998_v6  ;;  %v3638_v56 = vld [vmem:[%s4427_s16 + $0x50] sm:$0xff]  ;;  %v3639_v26 = vld [vmem:[%s4435_s17 + $0x40] sm:$0xff] }
 0x241   : > { %v2797_v61 = vadd.f32 %v2509_v39, %v6749_v46  ;;  %v2705_v37 = vadd.f32 %v2417_v51, %v1403_v38  ;;  %v1267_v25 = vunpack.c.h.bf16 %v3637_v14  ;;  %3081 = vmatpush.bf16.msrb.mxu1 %v2853_v48  ;;  %v1271_v31 = vunpack.c.h.bf16 %v3638_v56  ;;  %v3640_v38 = vld [vmem:[%s4435_s17 + $0x50] sm:$0xff]  ;;  %v3641_v63 = vld [vmem:[%s4427_s16 + $0x140] sm:$0xff] }
 0x242   : > { %v2885_v10 = vpack.c.bf16 %v2645_v35, %v2641_v3  ;;  %v2709_v47 = vadd.f32 %v2421_v8, %v1407_v0  ;;  %3523 = vmatmul.msk.bf16.vlgmr.msrb.gmra.mxu0 %vm3008_vm0, %v5481_v1  ;;  %v1699_v5 = vunpack.c.h.bf16 %v3639_v26  ;;  %v1703_v7 = vunpack.c.h.bf16 %v3640_v38  ;;  %v3642_v28 = vld [vmem:[%s4427_s16 + $0x150] sm:$0xff]  ;;  %v3643_v45 = vld [vmem:[%s4435_s17 + $0x140] sm:$0xff] }
 0x243   : > { %v2961_v34 = vpack.c.bf16 %v2797_v61, %v2793_v24  ;;  %v1331_v15 = vunpack.c.h.bf16 %v3641_v63  ;;  %v1335_v9 = vunpack.c.h.bf16 %v3642_v28  ;;  %v1763_v0 = vunpack.c.h.bf16 %v3643_v45  ;;  %v6750_v8 = vld [vmem:[#allocation26_spill] sm:$0xff] }
 0x244   : > { %3094 = vmatpush.bf16.msrb.mxu2 %v2885_v10  ;;  %v2917_v12 = vpack.c.bf16 %v2709_v47, %v2705_v37  ;;  %v1767_v16 = vunpack.c.h.bf16 %v5060_v32  ;;  %v1395_v39 = vunpack.c.h.bf16 %v5064_v22  ;;  %v1987_v3 = vsub.f32 %v1699_v5, %v1267_v25  ;;  %v6751_v22 = vld [vmem:[#allocation31_spill] sm:$0xff] }
 0x245   : > { %3117 = vmatpush.bf16.msra.mxu0 %v2961_v34  ;;  %v1991_v51 = vsub.f32 %v1703_v7, %v1271_v31  ;;  %v1399_v49 = vunpack.c.h.bf16 %v5067_v11  ;;  %v1827_v24 = vunpack.c.h.bf16 %v5070_v60  ;;  %v2051_v6 = vsub.f32 %v1763_v0, %v1331_v15 }
 0x246   : > { %3107 = vmatpush.bf16.msrb.mxu3 %v2917_v12  ;;  %v2055_v48 = vsub.f32 %v1767_v16, %v1335_v9  ;;  %v1831_v35 = vunpack.c.h.bf16 %v5078_v18  ;;  %v2497_v46 = vmul.f32 %v4837_v19, %v6750_v8  ;;  %v2281_v61 = vmul.f32 %v4837_v19, %v1987_v3 }
 0x247   : > { %v2285_v32 = vmul.f32 %v4837_v19, %v1991_v51  ;;  %v2115_v37 = vsub.f32 %v1827_v24, %v1395_v39  ;;  %v2501_v14 = vmul.f32 %v4837_v19, %v6751_v22  ;;  %v2345_v11 = vmul.f32 %v4837_v19, %v2051_v6 }
 0x248   : > { %v2349_v60 = vmul.f32 %v4837_v19, %v2055_v48  ;;  %v2119_v10 = vsub.f32 %v1831_v35, %v1399_v49  ;;  %v6752_v47 = vunpack.c.h.bf16 %v6673_v52  ;;  %v2569_v18 = vadd.f32 %v2281_v61, %v1267_v25  ;;  %v6755_v61 = vld [vmem:[#allocation40_spill] sm:$0xff] }
 0x249   : > { %v2573_v56 = vadd.f32 %v2285_v32, %v1271_v31  ;;  %v2409_v26 = vmul.f32 %v4837_v19, %v2115_v37  ;;  %v6753_v5 = vunpack.c.h.bf16 %v6675_v33  ;;  %v2633_v7 = vadd.f32 %v2345_v11, %v1331_v15 }
 0x24a   : > { %v2785_v34 = vadd.f32 %v2497_v46, %v6752_v47  ;;  %v2637_v63 = vadd.f32 %v2349_v60, %v1335_v9  ;;  %v2413_v28 = vmul.f32 %v4837_v19, %v2119_v10  ;;  %v1259_v12 = vunpack.c.h.bf16 %v5101_v54 }
 0x24b   : > { %v2789_v38 = vadd.f32 %v2501_v14, %v6753_v5  ;;  %v2849_v45 = vpack.c.bf16 %v2573_v56, %v2569_v18  ;;  %v2697_v0 = vadd.f32 %v2409_v26, %v1395_v39  ;;  %v1263_v3 = vunpack.c.h.bf16 %v5105_v17 }
 0x24c   : > { %v2881_v52 = vpack.c.bf16 %v2637_v63, %v2633_v7  ;;  %v2701_v51 = vadd.f32 %v2413_v28, %v1399_v49  ;;  %v1691_v25 = vunpack.c.h.bf16 %v5109_v4  ;;  %v1695_v31 = vunpack.c.h.bf16 %v5112_v53 }
 0x24d   : > { %v2957_v16 = vpack.c.bf16 %v2789_v38, %v2785_v34  ;;  %3082 = vmatpush.bf16.msrb.mxu1 %v2849_v45  ;;  %v1323_v33 = vunpack.c.h.bf16 %v5116_v13  ;;  %v1327_v15 = vunpack.c.h.bf16 %v5119_v55  ;;  %v1755_v9 = vunpack.c.h.bf16 %v5127_v23 }
 0x24e   : > { %v1759_v54 = vunpack.c.h.bf16 %v5137_v42  ;;  %3095 = vmatpush.bf16.msrb.mxu2 %v2881_v52  ;;  %v2913_v39 = vpack.c.bf16 %v2701_v51, %v2697_v0  ;;  %v1979_v24 = vsub.f32 %v1691_v25, %v1259_v12  ;;  %v1983_v17 = vsub.f32 %v1695_v31, %v1263_v3  ;;  %v6754_v42 = vld [vmem:[#allocation39_spill] sm:$0xff]  ;;  %v6758_v0 = vld [vmem:[#allocation34_spill] sm:$0xff] }
 0x24f   : > { %3118 = vmatpush.bf16.msra.mxu0 %v2957_v16  ;;  %v1387_v49 = vunpack.c.h.bf16 %v5140_v2  ;;  %v2043_v6 = vsub.f32 %v1755_v9, %v1323_v33  ;;  %v1391_v53 = vunpack.c.h.bf16 %v5143_v43  ;;  %v1819_v48 = vunpack.c.h.bf16 %v5149_v57  ;;  %v6759_v16 = vld [vmem:[#allocation12_spill] sm:$0xff]  ;;  %v6761_v31 = vld [vmem:[#allocation35_spill] sm:$0xff] }
 0x250   : > { %v2047_v4 = vsub.f32 %v1759_v54, %v1327_v15  ;;  %3108 = vmatpush.bf16.msrb.mxu3 %v2913_v39  ;;  %v2273_v13 = vmul.f32 %v4837_v19, %v1979_v24  ;;  %v2277_v55 = vmul.f32 %v4837_v19, %v1983_v17  ;;  %v1823_v23 = vunpack.c.h.bf16 %v5153_v62  ;;  %v6763_v39 = vld [vmem:[#allocation6_spill] sm:$0xff]  ;;  %v6764_v17 = vld [vmem:[#allocation7_spill] sm:$0xff] }
 0x251   : > { %v2489_v35 = vmul.f32 %v4837_v19, %v6754_v42  ;;  %v2337_v8 = vmul.f32 %v4837_v19, %v2043_v6  ;;  %v2107_v46 = vsub.f32 %v1819_v48, %v1387_v49  ;;  %v2493_v43 = vmul.f32 %v4837_v19, %v6755_v61  ;;  %v5563_v61 = vld [vmem:[%s4427_s16 + $0xe8] sm:$0xff] }
 0x252   : > { %v2341_v2 = vmul.f32 %v4837_v19, %v2047_v4  ;;  %v2561_v32 = vadd.f32 %v2273_v13, %v1259_v12  ;;  %v2565_v57 = vadd.f32 %v2277_v55, %v1263_v3  ;;  %v2111_v37 = vsub.f32 %v1823_v23, %v1391_v53  ;;  %v6765_v23 = vld [vmem:[#allocation43_spill] sm:$0xff] }
 0x253   : > { %v6756_v22 = vunpack.c.h.bf16 %v6689_v27  ;;  %v2625_v11 = vadd.f32 %v2337_v8, %v1323_v33  ;;  %v2401_v62 = vmul.f32 %v4837_v19, %v2107_v46  ;;  %v6757_v10 = vunpack.c.h.bf16 %v6691_v41  ;;  %v6767_v8 = vld [vmem:[#allocation44_spill] sm:$0xff] }
 0x254   : > { %v2629_v60 = vadd.f32 %v2341_v2, %v1327_v15  ;;  %v2845_v34 = vpack.c.bf16 %v2565_v57, %v2561_v32  ;;  %v2405_v18 = vmul.f32 %v4837_v19, %v2111_v37  ;;  %v1251_v56 = vunpack.c.h.bf16 %v5176_v59  ;;  %v6762_v15 = vld [vmem:[#allocation37_spill] sm:$0xff]  ;;  %v6769_v37 = vld [vmem:[#allocation23_spill] sm:$0xff] }
 0x255   : > { %v2777_v14 = vadd.f32 %v2489_v35, %v6756_v22  ;;  %v2781_v47 = vadd.f32 %v2493_v43, %v6757_v10  ;;  %v1255_v26 = vunpack.c.h.bf16 %v5182_v20  ;;  %v2689_v38 = vadd.f32 %v2401_v62, %v1387_v49 }
 0x256   : > { %v2877_v5 = vpack.c.bf16 %v2629_v60, %v2625_v11  ;;  %v1683_v27 = vunpack.c.h.bf16 %v5185_v36  ;;  %3083 = vmatpush.bf16.msrb.mxu1 %v2845_v34  ;;  %v2693_v63 = vadd.f32 %v2405_v18, %v1391_v53  ;;  %v1687_v28 = vunpack.c.h.bf16 %v5189_v44  ;;  %v6760_v36 = vld [vmem:[#allocation14_spill] sm:$0xff]  ;;  %v5572_v11 = vld [vmem:[%s4435_s17 + $0xe8] sm:$0xff]  ;;  %v5575_v60 = vld [vmem:[%s4435_s17 + $0xf8] sm:$0xff] }
 0x257   : > { %v2953_v7 = vpack.c.bf16 %v2781_v47, %v2777_v14  ;;  %v1315_v12 = vunpack.c.h.bf16 %v5192_v30  ;;  %v1319_v41 = vunpack.c.h.bf16 %v5199_v21  ;;  %v1747_v59 = vunpack.c.h.bf16 %v5202_v58  ;;  %v5569_v14 = vld [vmem:[%s4427_s16 + $0xf8] sm:$0xff]  ;;  %v6770_v34 = vld [vmem:[#allocation24_spill] sm:$0xff] }
 0x258   : > { %3096 = vmatpush.bf16.msrb.mxu2 %v2877_v5  ;;  %v1971_v45 = vsub.f32 %v1683_v27, %v1251_v56  ;;  %v1751_v20 = vunpack.c.h.bf16 %v6758_v0  ;;  %v1379_v3 = vunpack.c.h.bf16 %v6759_v16  ;;  %v2909_v52 = vpack.c.bf16 %v2693_v63, %v2689_v38  ;;  %v1599_v5 = vld [vmem:[%s4435_s17 + $0x1e8] sm:$0xff]  ;;  %v6771_v27 = vld [vmem:[#allocation18_spill] sm:$0xff] }
 0x259   : > { %3119 = vmatpush.bf16.msra.mxu0 %v2953_v7  ;;  %v1975_v51 = vsub.f32 %v1687_v28, %v1255_v26  ;;  %v1383_v25 = vunpack.c.h.bf16 %v6760_v36  ;;  %v1811_v33 = vunpack.c.h.bf16 %v6761_v31  ;;  %v2035_v30 = vsub.f32 %v1747_v59, %v1315_v12 }
 0x25a   : > { %v2265_v44 = vmul.f32 %v4837_v19, %v1971_v45  ;;  %v2039_v21 = vsub.f32 %v1751_v20, %v1319_v41  ;;  %v1815_v9 = vunpack.c.h.bf16 %v6762_v15  ;;  %3109 = vmatpush.bf16.msrb.mxu3 %v2909_v52  ;;  %v2481_v24 = vmul.f32 %v4837_v19, %v6763_v39  ;;  %v6773_v45 = vld [vmem:[#allocation19_spill] sm:$0xff] }
 0x25b   : > { %v2269_v58 = vmul.f32 %v4837_v19, %v1975_v51  ;;  %v2099_v54 = vsub.f32 %v1811_v33, %v1379_v3  ;;  %v2485_v49 = vmul.f32 %v4837_v19, %v6764_v17  ;;  %v2329_v4 = vmul.f32 %v4837_v19, %v2035_v30  ;;  %v5592_v52 = vld [vmem:[%s4427_s16 + $0xc8] sm:$0xff] }
 0x25c   : > { %v2553_v6 = vadd.f32 %v2265_v44, %v1251_v56  ;;  %v2333_v53 = vmul.f32 %v4837_v19, %v2039_v21  ;;  %v2103_v48 = vsub.f32 %v1815_v9, %v1383_v25  ;;  %v6766_v42 = vunpack.c.h.bf16 %v6765_v23  ;;  %v1167_v56 = vld [vmem:[%s4427_s16 + $0x1e8] sm:$0xff]  ;;  %v6775_v9 = vld [vmem:[#allocation8_spill] sm:$0xff] }
 0x25d   : > { %v2557_v13 = vadd.f32 %v2269_v58, %v1255_v26  ;;  %v2393_v55 = vmul.f32 %v4837_v19, %v2099_v54  ;;  %v6768_v2 = vunpack.c.h.bf16 %v6767_v8  ;;  %v2617_v43 = vadd.f32 %v2329_v4, %v1315_v12  ;;  %v1169_v26 = vld [vmem:[%s4427_s16 + $0x1f8] sm:$0xff] }
 0x25e   : > { %v2769_v35 = vadd.f32 %v2481_v24, %v6766_v42  ;;  %v2621_v32 = vadd.f32 %v2333_v53, %v1319_v41  ;;  %v2397_v57 = vmul.f32 %v4837_v19, %v2103_v48  ;;  %v2545_v22 = vmul.f32 %v4837_v19, %v6769_v37  ;;  %v1601_v41 = vld [vmem:[%s4435_s17 + $0x1f8] sm:$0xff] }
 0x25f   : > { %v2773_v46 = vadd.f32 %v2485_v49, %v6768_v2  ;;  %v2841_v62 = vpack.c.bf16 %v2557_v13, %v2553_v6  ;;  %v2681_v10 = vadd.f32 %v2393_v55, %v1379_v3  ;;  %v2549_v18 = vmul.f32 %v4837_v19, %v6770_v34  ;;  %v6776_v54 = vld [vmem:[#allocation25_spill] sm:$0xff]  ;;  %v6778_v55 = vld [vmem:[#allocation20_spill] sm:$0xff] }
 0x260   : > { %v2873_v38 = vpack.c.bf16 %v2621_v32, %v2617_v43  ;;  %v2685_v7 = vadd.f32 %v2397_v57, %v1383_v25  ;;  %v6772_v63 = vunpack.c.h.bf16 %v6771_v27  ;;  %v1308_v12 = vunpack.c.l.bf16 %v5563_v61  ;;  %v6777_v4 = vld [vmem:[#allocation33_spill] sm:$0xff]  ;;  %v5615_v32 = vld [vmem:[%s4435_s17 + $0xc8] sm:$0xff]  ;;  %v6786_v27 = vld [vmem:[#allocation32_spill] sm:$0xff] }
 0x261   : > { %v2949_v47 = vpack.c.bf16 %v2773_v46, %v2769_v35  ;;  %3084 = vmatpush.bf16.msrb.mxu1 %v2841_v62  ;;  %v6774_v59 = vunpack.c.h.bf16 %v6773_v45  ;;  %v1312_v20 = vunpack.c.l.bf16 %v5569_v14  ;;  %v1740_v16 = vunpack.c.l.bf16 %v5572_v11  ;;  %v5605_v48 = vld [vmem:[%s4427_s16 + $0xd8] sm:$0xff]  ;;  %v6782_v46 = vld [vmem:[#allocation36_spill] sm:$0xff] }
 0x262   : > { %v2833_v28 = vadd.f32 %v2545_v22, %v6772_v63  ;;  %v1744_v3 = vunpack.c.l.bf16 %v5575_v60  ;;  %3097 = vmatpush.bf16.msrb.mxu2 %v2873_v38  ;;  %v2905_v51 = vpack.c.bf16 %v2685_v7, %v2681_v10  ;;  %v1372_v36 = vunpack.c.l.bf16 %v1167_v56  ;;  %v6780_v35 = vld [vmem:[#allocation21_spill] sm:$0xff]  ;;  %v6783_v10 = vld [vmem:[#allocation27_spill] sm:$0xff] }
 0x263   : > { %3120 = vmatpush.bf16.msra.mxu0 %v2949_v47  ;;  %v2837_v0 = vadd.f32 %v2549_v18, %v6774_v59  ;;  %v1376_v25 = vunpack.c.l.bf16 %v1169_v26  ;;  %v1804_v31 = vunpack.c.l.bf16 %v1599_v5  ;;  %v2028_v44 = vsub.f32 %v1740_v16, %v1308_v12  ;;  %v5618_v57 = vld [vmem:[%s4435_s17 + $0xd8] sm:$0xff]  ;;  %v1163_v18 = vld [vmem:[%s4427_s16 + $0x1c8] sm:$0xff]  ;;  %v6785_v5 = vld [vmem:[#allocation46_spill] sm:$0xff] }
 0x264   : > { %v2032_v30 = vsub.f32 %v1744_v3, %v1312_v20  ;;  %v1808_v21 = vunpack.c.l.bf16 %v1601_v41  ;;  %3110 = vmatpush.bf16.msrb.mxu3 %v2905_v51  ;;  %3085 = vmatmul.bf16.vlgmr.msrb.gmra.mxu1 %v5314_v40  ;;  %v2473_v58 = vmul.f32 %v4837_v19, %v6775_v9  ;;  %v2477_v39 = vmul.f32 %v4837_v19, %v6776_v54  ;;  %v1165_v56 = vld [vmem:[%s4427_s16 + $0x1d8] sm:$0xff]  ;;  %v1595_v26 = vld [vmem:[%s4435_s17 + $0x1c8] sm:$0xff] }
 0x265   : > { %v2981_v33 = vpack.c.bf16 %v2837_v0, %v2833_v28  ;;  %v2092_v15 = vsub.f32 %v1804_v31, %v1372_v36  ;;  %v1300_v24 = vunpack.c.l.bf16 %v5592_v52  ;;  %v2322_v17 = vmul.f32 %v4837_v19, %v2028_v44  ;;  %3098 = vmatmul.bf16.vlgmr.msrb.gmra.mxu2 %v5417_v29  ;;  %v1597_v45 = vld [vmem:[%s4435_s17 + $0x1d8] sm:$0xff] }
 0x266   : > { %v2326_v49 = vmul.f32 %v4837_v19, %v2032_v30  ;;  %v2096_v6 = vsub.f32 %v1808_v21, %v1376_v25  ;;  %v2537_v53 = vmul.f32 %v4837_v19, %v6777_v4  ;;  %v6779_v23 = vunpack.c.h.bf16 %v6778_v55 }
 0x267   : > { %3133 = vmatpush.bf16.msra.mxu1 %v2981_v33  ;;  %v2386_v13 = vmul.f32 %v4837_v19, %v2092_v15  ;;  %v6781_v8 = vunpack.c.h.bf16 %v6780_v35  ;;  %v2541_v43 = vmul.f32 %v4837_v19, %v6782_v46  ;;  %v2610_v37 = vadd.f32 %v2322_v17, %v1308_v12  ;;  %3111 = vmatmul.bf16.vlgmr.msrb.gmra.mxu3 %v6785_v5  ;;  %v6789_v15 = vld [vmem:[#allocation30_spill] sm:$0xff] }
 0x268   : > { %v2761_v42 = vadd.f32 %v2473_v58, %v6779_v23  ;;  %v2614_v22 = vadd.f32 %v2326_v49, %v1312_v20  ;;  %v2390_v62 = vmul.f32 %v4837_v19, %v2096_v6  ;;  %v6784_v47 = vunpack.c.h.bf16 %v6783_v10  ;;  %v6790_v58 = vld [vmem:[#allocation47_spill] sm:$0xff]  ;;  %v6791_v6 = vld [vmem:[#allocation48_spill] sm:$0xff]  ;;  %v1561_v10 = vld [vmem:[%s4435_s17 + $0xb8] sm:$0xff] }
 0x269   : > { %v2765_v2 = vadd.f32 %v2477_v39, %v6781_v8  ;;  %v2674_v38 = vadd.f32 %v2386_v13, %v1372_v36  ;;  %v6787_v63 = vunpack.c.h.bf16 %v6786_v27  ;;  %v1304_v41 = vunpack.c.l.bf16 %v5605_v48  ;;  %v1129_v13 = vld [vmem:[%s4427_s16 + $0xb8] sm:$0xff]  ;;  %v6792_v23 = vld [vmem:[#allocation28_spill] sm:$0xff] }
 0x26a   : > { %v2825_v34 = vadd.f32 %v2537_v53, %v6784_v47  ;;  %v2870_v12 = vpack.c.bf16 %v2614_v22, %v2610_v37  ;;  %v2678_v59 = vadd.f32 %v2390_v62, %v1376_v25  ;;  %v1732_v0 = vunpack.c.l.bf16 %v5615_v32  ;;  %v6788_v25 = vld [vmem:[#allocation29_spill] sm:$0xff]  ;;  %v5645_v53 = vld [vmem:[%s4427_s16 + $0xa8] sm:$0xff] }
 0x26b   : > { %v2945_v7 = vpack.c.bf16 %v2765_v2, %v2761_v42  ;;  %v2829_v28 = vadd.f32 %v2541_v43, %v6787_v63  ;;  %v1736_v20 = vunpack.c.l.bf16 %v5618_v57  ;;  %v1364_v3 = vunpack.c.l.bf16 %v1163_v18  ;;  %v6794_v8 = vld [vmem:[#allocation9_spill] sm:$0xff]  ;;  %v5656_v62 = vld [vmem:[%s4435_s17 + $0xa8] sm:$0xff] }
 0x26c   : > { %v1368_v52 = vunpack.c.l.bf16 %v1165_v56  ;;  %v1796_v51 = vunpack.c.l.bf16 %v1595_v26  ;;  %3142 = vmatpush.bf16.msra.mxu2 %v2870_v12  ;;  %v2902_v36 = vpack.c.bf16 %v2678_v59, %v2674_v38  ;;  %v2020_v31 = vsub.f32 %v1732_v0, %v1300_v24  ;;  %v6796_v43 = vld [vmem:[#allocation41_spill] sm:$0xff]  ;;  %v6798_v56 = vld [vmem:[#allocation42_spill] sm:$0xff]  ;;  %v1591_v63 = vld [vmem:[%s4435_s17 + $0x1a8] sm:$0xff] }
 0x26d   : > { %3121 = vmatpush.bf16.msra.mxu0 %v2945_v7  ;;  %v2977_v16 = vpack.c.bf16 %v2829_v28, %v2825_v34  ;;  %v2024_v33 = vsub.f32 %v1736_v20, %v1304_v41  ;;  %v1800_v44 = vunpack.c.l.bf16 %v1597_v45  ;;  %v2465_v21 = vmul.f32 %v4837_v19, %v6788_v25  ;;  %v1159_v7 = vld [vmem:[%s4427_s16 + $0x1a8] sm:$0xff]  ;;  %v1161_v27 = vld [vmem:[%s4427_s16 + $0x1b8] sm:$0xff]  ;;  %v6800_v25 = vld [vmem:[#allocation38_spill] sm:$0xff] }
 0x26e   : > { %v2084_v30 = vsub.f32 %v1796_v51, %v1364_v3  ;;  %v2469_v9 = vmul.f32 %v4837_v19, %v6789_v15  ;;  %v2529_v54 = vmul.f32 %v4837_v19, %v6790_v58  ;;  %3155 = vmatpush.bf16.msra.mxu3 %v2902_v36  ;;  %v2314_v39 = vmul.f32 %v4837_v19, %v2020_v31  ;;  %v1593_v0 = vld [vmem:[%s4435_s17 + $0x1b8] sm:$0xff] }
 0x26f   : > { %3134 = vmatpush.bf16.msra.mxu1 %v2977_v16  ;;  %v2318_v17 = vmul.f32 %v4837_v19, %v2024_v33  ;;  %v2088_v49 = vsub.f32 %v1800_v44, %v1368_v52  ;;  %v2533_v4 = vmul.f32 %v4837_v19, %v6791_v6  ;;  %v6793_v42 = vunpack.c.h.bf16 %v6792_v23  ;;  %v6802_v6 = vld [vmem:[#allocation16_spill] sm:$0xff] }
 0x270   : > { %v2378_v55 = vmul.f32 %v4837_v19, %v2084_v30  ;;  %v6795_v2 = vunpack.c.h.bf16 %v6794_v8  ;;  %v6797_v37 = vunpack.c.h.bf16 %v6796_v43  ;;  %v2602_v47 = vadd.f32 %v2314_v39, %v1300_v24  ;;  %v5675_v39 = vld [vmem:[%s4427_s16 + $0x88] sm:$0xff]  ;;  %v6805_v8 = vld [vmem:[#allocation17_spill] sm:$0xff] }
 0x271   : > { %v2753_v35 = vadd.f32 %v2465_v21, %v6793_v42  ;;  %v2606_v34 = vadd.f32 %v2318_v17, %v1304_v41  ;;  %v2382_v18 = vmul.f32 %v4837_v19, %v2088_v49  ;;  %v6799_v26 = vunpack.c.h.bf16 %v6798_v56  ;;  %v1125_v42 = vld [vmem:[%s4427_s16 + $0x98] sm:$0xff]  ;;  %v6809_v56 = vld [vmem:[#allocation51_spill] sm:$0xff] }
 0x272   : > { %v2757_v46 = vadd.f32 %v2469_v9, %v6795_v2  ;;  %v2817_v22 = vadd.f32 %v2529_v54, %v6797_v37  ;;  %v2666_v28 = vadd.f32 %v2378_v55, %v1364_v3  ;;  %v1292_v12 = vunpack.c.l.bf16 %v5645_v53  ;;  %v6801_v9 = vld [vmem:[#allocation22_spill] sm:$0xff]  ;;  %v6804_v55 = vld [vmem:[#allocation53_spill] sm:$0xff] }
 0x273   : > { %v2821_v38 = vadd.f32 %v2533_v4, %v6799_v26  ;;  %v1296_v59 = vunpack.c.l.bf16 %v1129_v13  ;;  %v2866_v20 = vpack.c.bf16 %v2606_v34, %v2602_v47  ;;  %v2670_v16 = vadd.f32 %v2382_v18, %v1368_v52  ;;  %v6807_v43 = vld [vmem:[#allocation49_spill] sm:$0xff] }
 0x274   : > { %v2941_v45 = vpack.c.bf16 %v2757_v46, %v2753_v35  ;;  %v1724_v24 = vunpack.c.l.bf16 %v5656_v62  ;;  %v1728_v41 = vunpack.c.l.bf16 %v1561_v10  ;;  %v1356_v36 = vunpack.c.l.bf16 %v1159_v7  ;;  %v1555_v10 = vld [vmem:[%s4435_s17 + $0x88] sm:$0xff]  ;;  %v1557_v47 = vld [vmem:[%s4435_s17 + $0x98] sm:$0xff] }
 0x275   : > { %v2973_v51 = vpack.c.bf16 %v2821_v38, %v2817_v22  ;;  %v1360_v31 = vunpack.c.l.bf16 %v1161_v27  ;;  %v1788_v33 = vunpack.c.l.bf16 %v1591_v63  ;;  %3143 = vmatpush.bf16.msra.mxu2 %v2866_v20  ;;  %v2898_v44 = vpack.c.bf16 %v2670_v16, %v2666_v28  ;;  %v1155_v27 = vld [vmem:[%s4427_s16 + $0x188] sm:$0xff]  ;;  %v1157_v63 = vld [vmem:[%s4427_s16 + $0x198] sm:$0xff] }
 0x276   : > { %3122 = vmatpush.bf16.msra.mxu0 %v2941_v45  ;;  %v2012_v3 = vsub.f32 %v1724_v24, %v1292_v12  ;;  %v1792_v30 = vunpack.c.l.bf16 %v1593_v0  ;;  %v2457_v21 = vmul.f32 %v4837_v19, %v6800_v25  ;;  %v2016_v52 = vsub.f32 %v1728_v41, %v1296_v59  ;;  %v1587_v28 = vld [vmem:[%s4435_s17 + $0x188] sm:$0xff] }
 0x277   : > { %3135 = vmatpush.bf16.msra.mxu1 %v2973_v51  ;;  %v2076_v15 = vsub.f32 %v1788_v33, %v1356_v36  ;;  %v2461_v58 = vmul.f32 %v4837_v19, %v6801_v9  ;;  %v2521_v54 = vmul.f32 %v4837_v19, %v5426_v50  ;;  %3156 = vmatpush.bf16.msra.mxu3 %v2898_v44  ;;  %v6803_v4 = vunpack.c.h.bf16 %v6802_v6  ;;  %v1589_v51 = vld [vmem:[%s4435_s17 + $0x198] sm:$0xff]  ;;  %v1199_v44 = vld [vmem:[%s4427_s16 + $0x2e8] sm:$0xff] }
 0x278   : > { %v2306_v17 = vmul.f32 %v4837_v19, %v2012_v3  ;;  %v2080_v49 = vsub.f32 %v1792_v30, %v1360_v31  ;;  %v2525_v23 = vmul.f32 %v4837_v19, %v6804_v55  ;;  %v2310_v35 = vmul.f32 %v4837_v19, %v2016_v52  ;;  %v1201_v3 = vld [vmem:[%s4427_s16 + $0x2f8] sm:$0xff]  ;;  %v1631_v30 = vld [vmem:[%s4435_s17 + $0x2e8] sm:$0xff] }
 0x279   : > { %v2745_v13 = vadd.f32 %v2457_v21, %v6803_v4  ;;  %v2370_v50 = vmul.f32 %v4837_v19, %v2076_v15  ;;  %v6806_v2 = vunpack.c.h.bf16 %v6805_v8  ;;  %v6808_v37 = vunpack.c.h.bf16 %v6807_v43  ;;  %v6811_v8 = vld [vmem:[#allocation50_spill] sm:$0xff] }
 0x27a   : > { %v2594_v34 = vadd.f32 %v2306_v17, %v1292_v12  ;;  %v2374_v18 = vmul.f32 %v4837_v19, %v2080_v49  ;;  %v6810_v26 = vunpack.c.h.bf16 %v6809_v56  ;;  %v1284_v7 = vunpack.c.l.bf16 %v5675_v39  ;;  %v5707_v39 = vld [vmem:[%s4427_s16 + $0x3f8] sm:$0xff] }
 0x27b   : > { %v2749_v46 = vadd.f32 %v2461_v58, %v6806_v2  ;;  %v2809_v22 = vadd.f32 %v2521_v54, %v6808_v37  ;;  %v2598_v45 = vadd.f32 %v2310_v35, %v1296_v59  ;;  %v2658_v0 = vadd.f32 %v2370_v50, %v1356_v36  ;;  %v1633_v59 = vld [vmem:[%s4435_s17 + $0x2f8] sm:$0xff]  ;;  %v5704_v54 = vld [vmem:[%s4427_s16 + $0x3e8] sm:$0xff] }
 0x27c   : > { %v2813_v38 = vadd.f32 %v2525_v23, %v6810_v26  ;;  %v1288_v16 = vunpack.c.l.bf16 %v1125_v42  ;;  %v2662_v12 = vadd.f32 %v2374_v18, %v1360_v31  ;;  %v1716_v41 = vunpack.c.l.bf16 %v1555_v10  ;;  %v1663_v35 = vld [vmem:[%s4435_s17 + $0x3e8] sm:$0xff]  ;;  %v1665_v50 = vld [vmem:[%s4435_s17 + $0x3f8] sm:$0xff] }
 0x27d   : > { %v2937_v20 = vpack.c.bf16 %v2749_v46, %v2745_v13  ;;  %v1720_v33 = vunpack.c.l.bf16 %v1557_v47  ;;  %v2862_v25 = vpack.c.bf16 %v2598_v45, %v2594_v34  ;;  %v1348_v21 = vunpack.c.l.bf16 %v1155_v27  ;;  %v1121_v56 = vld [vmem:[%s4427_s16 + $0x78] sm:$0xff] }
 0x27e   : > { %v2969_v24 = vpack.c.bf16 %v2813_v38, %v2809_v22  ;;  %v1352_v52 = vunpack.c.l.bf16 %v1157_v63  ;;  %v1780_v15 = vunpack.c.l.bf16 %v1587_v28  ;;  %v2894_v36 = vpack.c.bf16 %v2662_v12, %v2658_v0  ;;  %v1119_v22 = vld [vmem:[%s4427_s16 + $0x68] sm:$0xff]  ;;  %v1553_v45 = vld [vmem:[%s4435_s17 + $0x78] sm:$0xff] }
 0x27f   : > { %3123 = vmatpush.bf16.msra.mxu0 %v2937_v20  ;;  %v2004_v9 = vsub.f32 %v1716_v41, %v1284_v7  ;;  %v2008_v31 = vsub.f32 %v1720_v33, %v1288_v16  ;;  %v1784_v58 = vunpack.c.l.bf16 %v1589_v51  ;;  %3144 = vmatpush.bf16.msra.mxu2 %v2862_v25  ;;  %v1436_v49 = vunpack.c.l.bf16 %v1199_v44  ;;  %v5724_v28 = vld [vmem:[%s4435_s17 + $0x68] sm:$0xff]  ;;  %v1153_v12 = vld [vmem:[%s4427_s16 + $0x178] sm:$0xff] }
 0x280   : > { %3136 = vmatpush.bf16.msra.mxu1 %v2969_v24  ;;  %v2068_v17 = vsub.f32 %v1780_v15, %v1348_v21  ;;  %v1440_v6 = vunpack.c.l.bf16 %v1201_v3  ;;  %v1868_v4 = vunpack.c.l.bf16 %v1631_v30  ;;  %3157 = vmatpush.bf16.msra.mxu3 %v2894_v36  ;;  %v1872_v42 = vunpack.c.l.bf16 %v1633_v59  ;;  %v1151_v51 = vld [vmem:[%s4427_s16 + $0x168] sm:$0xff]  ;;  %v1585_v15 = vld [vmem:[%s4435_s17 + $0x178] sm:$0xff] }
 0x281   : > { %v2298_v13 = vmul.f32 %v4837_v19, %v2004_v9  ;;  %v2302_v55 = vmul.f32 %v4837_v19, %v2008_v31  ;;  %v2072_v23 = vsub.f32 %v1784_v58, %v1352_v52  ;;  %v1500_v43 = vunpack.c.l.bf16 %v5704_v54  ;;  %v1583_v3 = vld [vmem:[%s4435_s17 + $0x168] sm:$0xff]  ;;  %v5739_v54 = vld [vmem:[%s4427_s16 + $0x2d8] sm:$0xff] }
 0x282   : > { %3124 = vmatmul.bf16.vlgmr.msra.gmra.mxu0 %v6811_v8  ;;  %v2362_v2 = vmul.f32 %v4837_v19, %v2068_v17  ;;  %v2156_v46 = vsub.f32 %v1868_v4, %v1436_v49  ;;  %v1504_v37 = vunpack.c.l.bf16 %v5707_v39  ;;  %v2160_v18 = vsub.f32 %v1872_v42, %v1440_v6  ;;  %v5734_v59 = vld [vmem:[%s4427_s16 + $0x2c8] sm:$0xff] }
 0x283   : > { %3524 = vmatmul.msk.bf16.vlgmr.msra.gmra.mxu1 %vm3008_vm0, %v5481_v1  ;;  %v2586_v10 = vadd.f32 %v2298_v13, %v1284_v7  ;;  %v2590_v47 = vadd.f32 %v2302_v55, %v1288_v16  ;;  %v2366_v34 = vmul.f32 %v4837_v19, %v2072_v23  ;;  %v1932_v27 = vunpack.c.l.bf16 %v1663_v35  ;;  %v5742_v4 = vld [vmem:[%s4435_s17 + $0x2c8] sm:$0xff]  ;;  %v5745_v13 = vld [vmem:[%s4435_s17 + $0x2d8] sm:$0xff] }
 0x284   : > { %v2650_v26 = vadd.f32 %v2362_v2, %v1348_v21  ;;  %v2450_v38 = vmul.f32 %v4837_v19, %v2156_v46  ;;  %v1936_v63 = vunpack.c.l.bf16 %v1665_v50  ;;  %v2454_v7 = vmul.f32 %v4837_v19, %v2160_v18  ;;  %v5749_v50 = vld [vmem:[%s4427_s16 + $0x3c8] sm:$0xff] }
 0x285   : > { %v2858_v0 = vpack.c.bf16 %v2590_v47, %v2586_v10  ;;  %v2654_v20 = vadd.f32 %v2366_v34, %v1352_v52  ;;  %v1276_v16 = vunpack.c.l.bf16 %v1119_v22  ;;  %v2220_v41 = vsub.f32 %v1932_v27, %v1500_v43  ;;  %v5755_v47 = vld [vmem:[%s4427_s16 + $0x3d8] sm:$0xff] }
 0x286   : > { %v2738_v24 = vadd.f32 %v2450_v38, %v1436_v49  ;;  %v2224_v33 = vsub.f32 %v1936_v63, %v1504_v37  ;;  %v1280_v44 = vunpack.c.l.bf16 %v1121_v56  ;;  %v2742_v25 = vadd.f32 %v2454_v7, %v1440_v6  ;;  %v5760_v56 = vld [vmem:[%s4435_s17 + $0x3c8] sm:$0xff] }
 0x287   : > { %3145 = vmatpush.bf16.msra.mxu2 %v2858_v0  ;;  %v2890_v30 = vpack.c.bf16 %v2654_v20, %v2650_v26  ;;  %v1708_v21 = vunpack.c.l.bf16 %v5724_v28  ;;  %v1712_v52 = vunpack.c.l.bf16 %v1553_v45  ;;  %v2514_v36 = vmul.f32 %v4837_v19, %v2220_v41  ;;  %v5763_v26 = vld [vmem:[%s4435_s17 + $0x3d8] sm:$0xff]  ;;  %v5768_v0 = vld [vmem:[%s4427_s16 + $0x48] sm:$0xff] }
 0x288   : > { %v2518_v9 = vmul.f32 %v4837_v19, %v2224_v33  ;;  %v1340_v31 = vunpack.c.l.bf16 %v1151_v51  ;;  %v1344_v58 = vunpack.c.l.bf16 %v1153_v12  ;;  %v2934_v39 = vpack.c.bf16 %v2742_v25, %v2738_v24  ;;  %v5773_v24 = vld [vmem:[%s4427_s16 + $0x58] sm:$0xff]  ;;  %v5776_v41 = vld [vmem:[%s4435_s17 + $0x48] sm:$0xff] }
 0x289   : > { %3158 = vmatpush.bf16.msra.mxu3 %v2890_v30  ;;  %v1996_v17 = vsub.f32 %v1708_v21, %v1276_v16  ;;  %v2000_v49 = vsub.f32 %v1712_v52, %v1280_v44  ;;  %v1772_v6 = vunpack.c.l.bf16 %v1583_v3  ;;  %v2802_v55 = vadd.f32 %v2514_v36, %v1500_v43  ;;  %v5781_v30 = vld [vmem:[%s4435_s17 + $0x58] sm:$0xff]  ;;  %v1147_v36 = vld [vmem:[%s4427_s16 + $0x148] sm:$0xff] }
 0x28a   : > { %v2806_v23 = vadd.f32 %v2518_v9, %v1504_v37  ;;  %v1776_v42 = vunpack.c.l.bf16 %v1585_v15  ;;  %v1428_v35 = vunpack.c.l.bf16 %v5734_v59  ;;  %3168 = vmatpush.bf16.msrb.mxu0 %v2934_v39  ;;  %v1432_v10 = vunpack.c.l.bf16 %v5739_v54 }
 0x28b   : > { %v2290_v2 = vmul.f32 %v4837_v19, %v1996_v17  ;;  %v2294_v46 = vmul.f32 %v4837_v19, %v2000_v49  ;;  %v2060_v22 = vsub.f32 %v1772_v6, %v1340_v31  ;;  %v1860_v37 = vunpack.c.l.bf16 %v5742_v4  ;;  %v1149_v49 = vld [vmem:[%s4427_s16 + $0x158] sm:$0xff]  ;;  %v1579_v6 = vld [vmem:[%s4435_s17 + $0x148] sm:$0xff] }
 0x28c   : > { %v2966_v34 = vpack.c.bf16 %v2806_v23, %v2802_v55  ;;  %v2064_v43 = vsub.f32 %v1776_v42, %v1344_v58  ;;  %v1864_v18 = vunpack.c.l.bf16 %v5745_v13  ;;  %v1492_v45 = vunpack.c.l.bf16 %v5749_v50 }
 0x28d   : > { %v2578_v38 = vadd.f32 %v2290_v2, %v1276_v16  ;;  %v2582_v27 = vadd.f32 %v2294_v46, %v1280_v44  ;;  %v2354_v63 = vmul.f32 %v4837_v19, %v2060_v22  ;;  %v2148_v7 = vsub.f32 %v1860_v37, %v1428_v35  ;;  %v1581_v2 = vld [vmem:[%s4435_s17 + $0x158] sm:$0xff]  ;;  %v5796_v37 = vld [vmem:[%s4427_s16 + $0x2a8] sm:$0xff] }
 0x28e   : > { %3181 = vmatpush.bf16.msrb.mxu1 %v2966_v34  ;;  %v2358_v20 = vmul.f32 %v4837_v19, %v2064_v43  ;;  %v2152_v51 = vsub.f32 %v1864_v18, %v1432_v10  ;;  %v1496_v12 = vunpack.c.l.bf16 %v5755_v47  ;;  %v1924_v44 = vunpack.c.l.bf16 %v5760_v56  ;;  %v5799_v18 = vld [vmem:[%s4427_s16 + $0x2b8] sm:$0xff] }
 0x28f   : > { %v2854_v16 = vpack.c.bf16 %v2582_v27, %v2578_v38  ;;  %v2642_v33 = vadd.f32 %v2354_v63, %v1340_v31  ;;  %v1928_v3 = vunpack.c.l.bf16 %v5763_v26  ;;  %v2442_v21 = vmul.f32 %v4837_v19, %v2148_v7  ;;  %v5802_v63 = vld [vmem:[%s4435_s17 + $0x2a8] sm:$0xff] }
 0x290   : > { %v2646_v25 = vadd.f32 %v2358_v20, %v1344_v58  ;;  %v2446_v52 = vmul.f32 %v4837_v19, %v2152_v51  ;;  %v1268_v15 = vunpack.c.l.bf16 %v5768_v0  ;;  %v2212_v9 = vsub.f32 %v1924_v44, %v1492_v45  ;;  %v5809_v44 = vld [vmem:[%s4427_s16 + $0x3a8] sm:$0xff] }
 0x291   : > { %3146 = vmatpush.bf16.msra.mxu2 %v2854_v16  ;;  %v2216_v31 = vsub.f32 %v1928_v3, %v1496_v12  ;;  %v1272_v39 = vunpack.c.l.bf16 %v5773_v24  ;;  %v1700_v17 = vunpack.c.l.bf16 %v5776_v41  ;;  %v2730_v55 = vadd.f32 %v2442_v21, %v1428_v35 }
 0x292   : > { %v2886_v58 = vpack.c.bf16 %v2646_v25, %v2642_v33  ;;  %v2734_v23 = vadd.f32 %v2446_v52, %v1432_v10  ;;  %v1704_v42 = vunpack.c.l.bf16 %v5781_v30  ;;  %v2506_v46 = vmul.f32 %v4837_v19, %v2212_v9  ;;  %v5806_v33 = vld [vmem:[%s4435_s17 + $0x2b8] sm:$0xff] }
 0x293   : > { %v2510_v22 = vmul.f32 %v4837_v19, %v2216_v31  ;;  %v1988_v34 = vsub.f32 %v1700_v17, %v1268_v15  ;;  %v1332_v43 = vunpack.c.l.bf16 %v1147_v36  ;;  %v1336_v10 = vunpack.c.l.bf16 %v1149_v49  ;;  %v5815_v36 = vld [vmem:[%s4427_s16 + $0x3b8] sm:$0xff] }
 0x294   : > { %3159 = vmatpush.bf16.msra.mxu3 %v2886_v58  ;;  %v2930_v38 = vpack.c.bf16 %v2734_v23, %v2730_v55  ;;  %v1992_v35 = vsub.f32 %v1704_v42, %v1272_v39  ;;  %v1764_v27 = vunpack.c.l.bf16 %v1579_v6  ;;  %v2794_v20 = vadd.f32 %v2506_v46, %v1492_v45  ;;  %v5818_v45 = vld [vmem:[%s4435_s17 + $0x3a8] sm:$0xff]  ;;  %v5822_v49 = vld [vmem:[%s4435_s17 + $0x3b8] sm:$0xff] }
 0x295   : > { %v2798_v7 = vadd.f32 %v2510_v22, %v1496_v12  ;;  %v2282_v51 = vmul.f32 %v4837_v19, %v1988_v34  ;;  %v1768_v16 = vunpack.c.l.bf16 %v1581_v2  ;;  %v1420_v21 = vunpack.c.l.bf16 %v5796_v37  ;;  %v5828_v42 = vld [vmem:[%s4427_s16 + $0x28] sm:$0xff]  ;;  %v5834_v34 = vld [vmem:[%s4427_s16 + $0x38] sm:$0xff] }
 0x296   : > { %3169 = vmatpush.bf16.msrb.mxu0 %v2930_v38  ;;  %v2286_v3 = vmul.f32 %v4837_v19, %v1992_v35  ;;  %v2052_v25 = vsub.f32 %v1764_v27, %v1332_v43  ;;  %v1424_v52 = vunpack.c.l.bf16 %v5799_v18  ;;  %v1852_v17 = vunpack.c.l.bf16 %v5802_v63  ;;  %6812 = vst [vmem:[#allocation13_spill] sm:$0xff] %v5828_v42 }
 0x297   : > { %v2962_v12 = vpack.c.bf16 %v2798_v7, %v2794_v20  ;;  %v2570_v9 = vadd.f32 %v2282_v51, %v1268_v15  ;;  %v2056_v31 = vsub.f32 %v1768_v16, %v1336_v10  ;;  %v1856_v55 = vunpack.c.l.bf16 %v5806_v33  ;;  %6813 = vst [vmem:[#allocation15_spill] sm:$0xff] %v5834_v34  ;;  %v5841_v7 = vld [vmem:[%s4435_s17 + $0x38] sm:$0xff] }
 0x298   : > { %v2574_v6 = vadd.f32 %v2286_v3, %v1272_v39  ;;  %v2346_v58 = vmul.f32 %v4837_v19, %v2052_v25  ;;  %v1484_v23 = vunpack.c.l.bf16 %v5809_v44  ;;  %v2140_v15 = vsub.f32 %v1852_v17, %v1420_v21  ;;  %v5837_v39 = vld [vmem:[%s4435_s17 + $0x28] sm:$0xff]  ;;  %6815 = vst [vmem:[#allocation31_spill] sm:$0xff] %v5841_v7 }
 0x299   : > { %3182 = vmatpush.bf16.msrb.mxu1 %v2962_v12  ;;  %v2350_v2 = vmul.f32 %v4837_v19, %v2056_v31  ;;  %v1488_v46 = vunpack.c.l.bf16 %v5815_v36  ;;  %v1916_v22 = vunpack.c.l.bf16 %v5818_v45  ;;  %6814 = vst [vmem:[#allocation26_spill] sm:$0xff] %v5837_v39  ;;  %v2144_v27 = vsub.f32 %v1856_v55, %v1424_v52  ;;  %v1143_v12 = vld [vmem:[%s4427_s16 + $0x128] sm:$0xff] }
 0x29a   : > { %v2850_v38 = vpack.c.bf16 %v2574_v6, %v2570_v9  ;;  %v2634_v35 = vadd.f32 %v2346_v58, %v1332_v43  ;;  %v1920_v20 = vunpack.c.l.bf16 %v5822_v49  ;;  %v2434_v16 = vmul.f32 %v4837_v19, %v2140_v15  ;;  %v1145_v6 = vld [vmem:[%s4427_s16 + $0x138] sm:$0xff]  ;;  %v1575_v58 = vld [vmem:[%s4435_s17 + $0x128] sm:$0xff] }
 0x29b   : > { %v2638_v51 = vadd.f32 %v2350_v2, %v1336_v10  ;;  %v2204_v3 = vsub.f32 %v1916_v22, %v1484_v23  ;;  %v1260_v25 = vunpack.c.l.bf16 %v5828_v42  ;;  %v2438_v31 = vmul.f32 %v4837_v19, %v2144_v27  ;;  %v1577_v22 = vld [vmem:[%s4435_s17 + $0x138] sm:$0xff] }
 0x29c   : > { %3147 = vmatpush.bf16.msra.mxu2 %v2850_v38  ;;  %v2208_v9 = vsub.f32 %v1920_v20, %v1488_v46  ;;  %v1264_v43 = vunpack.c.l.bf16 %v5834_v34  ;;  %v1692_v17 = vunpack.c.l.bf16 %v5837_v39  ;;  %v2722_v55 = vadd.f32 %v2434_v16, %v1420_v21  ;;  %v5856_v34 = vld [vmem:[%s4427_s16 + $0x288] sm:$0xff]  ;;  %v5859_v39 = vld [vmem:[%s4427_s16 + $0x298] sm:$0xff] }
 0x29d   : > { %v2882_v10 = vpack.c.bf16 %v2638_v51, %v2634_v35  ;;  %v2498_v2 = vmul.f32 %v4837_v19, %v2204_v3  ;;  %v1696_v15 = vunpack.c.l.bf16 %v5841_v7  ;;  %v2726_v38 = vadd.f32 %v2438_v31, %v1424_v52  ;;  %6816 = vst [vmem:[#allocation39_spill] sm:$0xff] %v5856_v34  ;;  %v5862_v3 = vld [vmem:[%s4435_s17 + $0x288] sm:$0xff] }
 0x29e   : > { %v2502_v27 = vmul.f32 %v4837_v19, %v2208_v9  ;;  %v1980_v20 = vsub.f32 %v1692_v17, %v1260_v25  ;;  %v1324_v42 = vunpack.c.l.bf16 %v1143_v12  ;;  %6817 = vst [vmem:[#allocation40_spill] sm:$0xff] %v5859_v39  ;;  %v1328_v51 = vunpack.c.l.bf16 %v1145_v6  ;;  %v5866_v12 = vld [vmem:[%s4435_s17 + $0x298] sm:$0xff]  ;;  %v5869_v7 = vld [vmem:[%s4427_s16 + $0x388] sm:$0xff] }
 0x29f   : > { %3160 = vmatpush.bf16.msra.mxu3 %v2882_v10  ;;  %v2786_v35 = vadd.f32 %v2498_v2, %v1484_v23  ;;  %v1984_v21 = vsub.f32 %v1696_v15, %v1264_v43  ;;  %v1756_v16 = vunpack.c.l.bf16 %v1575_v58  ;;  %6818 = vst [vmem:[#allocation34_spill] sm:$0xff] %v5862_v3  ;;  %v2926_v52 = vpack.c.bf16 %v2726_v38, %v2722_v55  ;;  %v5875_v58 = vld [vmem:[%s4427_s16 + $0x398] sm:$0xff]  ;;  %v5878_v55 = vld [vmem:[%s4435_s17 + $0x388] sm:$0xff] }
 0x2a0   : > { %v2790_v31 = vadd.f32 %v2502_v27, %v1488_v46  ;;  %v2274_v9 = vmul.f32 %v4837_v19, %v1980_v20  ;;  %v1760_v17 = vunpack.c.l.bf16 %v1577_v22  ;;  %6819 = vst [vmem:[#allocation12_spill] sm:$0xff] %v5866_v12  ;;  %v1412_v2 = vunpack.c.l.bf16 %v5856_v34  ;;  %v5882_v27 = vld [vmem:[%s4435_s17 + $0x398] sm:$0xff]  ;;  %v5888_v34 = vld [vmem:[%s4427_s16 + $0x8] sm:$0xff] }
 0x2a1   : > { %6820 = vst [vmem:[#allocation14_spill] sm:$0xff] %v5869_v7  ;;  %v2278_v10 = vmul.f32 %v4837_v19, %v1984_v21  ;;  %v2044_v23 = vsub.f32 %v1756_v16, %v1324_v42  ;;  %v1416_v6 = vunpack.c.l.bf16 %v5859_v39  ;;  %3170 = vmatpush.bf16.msrb.mxu0 %v2926_v52  ;;  %v1844_v38 = vunpack.c.l.bf16 %v5862_v3 }
 0x2a2   : > { %6821 = vst [vmem:[#allocation35_spill] sm:$0xff] %v5875_v58  ;;  %v2958_v46 = vpack.c.bf16 %v2790_v31, %v2786_v35  ;;  %v2562_v15 = vadd.f32 %v2274_v9, %v1260_v25  ;;  %v2048_v22 = vsub.f32 %v1760_v17, %v1328_v51  ;;  %v1848_v16 = vunpack.c.l.bf16 %v5866_v12  ;;  %v5894_v9 = vld [vmem:[%s4427_s16 + $0x18] sm:$0xff] }
 0x2a3   : > { %6822 = vst [vmem:[#allocation37_spill] sm:$0xff] %v5878_v55  ;;  %v2566_v20 = vadd.f32 %v2278_v10, %v1264_v43  ;;  %v2338_v21 = vmul.f32 %v4837_v19, %v2044_v23  ;;  %v1476_v39 = vunpack.c.l.bf16 %v5869_v7  ;;  %v2132_v25 = vsub.f32 %v1844_v38, %v1412_v2  ;;  %v5897_v43 = vld [vmem:[%s4435_s17 + $0x8] sm:$0xff] }
 0x2a4   : > { %6823 = vst [vmem:[#allocation6_spill] sm:$0xff] %v5882_v27  ;;  %3183 = vmatpush.bf16.msrb.mxu1 %v2958_v46  ;;  %v2342_v35 = vmul.f32 %v4837_v19, %v2048_v22  ;;  %v1480_v52 = vunpack.c.l.bf16 %v5875_v58  ;;  %v1908_v31 = vunpack.c.l.bf16 %v5878_v55  ;;  %v2136_v23 = vsub.f32 %v1848_v16, %v1416_v6  ;;  %v5901_v46 = vld [vmem:[%s4435_s17 + $0x18] sm:$0xff]  ;;  %v1139_v58 = vld [vmem:[%s4427_s16 + $0x108] sm:$0xff] }
 0x2a5   : > { %6824 = vst [vmem:[#allocation7_spill] sm:$0xff] %v5888_v34  ;;  %v2846_v17 = vpack.c.bf16 %v2566_v20, %v2562_v15  ;;  %v2626_v10 = vadd.f32 %v2338_v21, %v1324_v42  ;;  %v1912_v7 = vunpack.c.l.bf16 %v5882_v27  ;;  %v2426_v22 = vmul.f32 %v4837_v19, %v2132_v25  ;;  %v1141_v21 = vld [vmem:[%s4427_s16 + $0x118] sm:$0xff]  ;;  %v1571_v16 = vld [vmem:[%s4435_s17 + $0x108] sm:$0xff] }
 0x2a6   : > { %6825 = vst [vmem:[#allocation43_spill] sm:$0xff] %v5894_v9  ;;  %v2630_v12 = vadd.f32 %v2342_v35, %v1328_v51  ;;  %v2196_v38 = vsub.f32 %v1908_v31, %v1476_v39  ;;  %v1252_v55 = vunpack.c.l.bf16 %v5888_v34  ;;  %v2430_v3 = vmul.f32 %v4837_v19, %v2136_v23  ;;  %v1573_v34 = vld [vmem:[%s4435_s17 + $0x118] sm:$0xff] }
 0x2a7   : > { %6826 = vst [vmem:[#allocation44_spill] sm:$0xff] %v5897_v43  ;;  %3148 = vmatpush.bf16.msra.mxu2 %v2846_v17  ;;  %v2200_v15 = vsub.f32 %v1912_v7, %v1480_v52  ;;  %v1256_v42 = vunpack.c.l.bf16 %v5894_v9  ;;  %v1684_v20 = vunpack.c.l.bf16 %v5897_v43  ;;  %v2714_v35 = vadd.f32 %v2426_v22, %v1412_v2  ;;  %v5916_v9 = vld [vmem:[%s4427_s16 + $0x268] sm:$0xff]  ;;  %v5919_v43 = vld [vmem:[%s4427_s16 + $0x278] sm:$0xff] }
 0x2a8   : > { %6827 = vst [vmem:[#allocation23_spill] sm:$0xff] %v5901_v46  ;;  %v2878_v51 = vpack.c.bf16 %v2630_v12, %v2626_v10  ;;  %v2490_v25 = vmul.f32 %v4837_v19, %v2196_v38  ;;  %v1688_v31 = vunpack.c.l.bf16 %v5901_v46  ;;  %v2718_v17 = vadd.f32 %v2430_v3, %v1416_v6  ;;  %v5922_v38 = vld [vmem:[%s4435_s17 + $0x268] sm:$0xff] }
 0x2a9   : > { %v2494_v23 = vmul.f32 %v4837_v19, %v2200_v15  ;;  %v1972_v7 = vsub.f32 %v1684_v20, %v1252_v55  ;;  %v1316_v27 = vunpack.c.l.bf16 %v1139_v58  ;;  %6828 = vst [vmem:[#allocation24_spill] sm:$0xff] %v5916_v9  ;;  %v1320_v10 = vunpack.c.l.bf16 %v1141_v21  ;;  %v5926_v58 = vld [vmem:[%s4435_s17 + $0x278] sm:$0xff]  ;;  %v5929_v46 = vld [vmem:[%s4427_s16 + $0x368] sm:$0xff] }
 0x2aa   : > { %6829 = vst [vmem:[#allocation18_spill] sm:$0xff] %v5919_v43  ;;  %3161 = vmatpush.bf16.msra.mxu3 %v2878_v51  ;;  %v2778_v12 = vadd.f32 %v2490_v25, %v1476_v39  ;;  %v1976_v2 = vsub.f32 %v1688_v31, %v1256_v42  ;;  %v1748_v22 = vunpack.c.l.bf16 %v1571_v16  ;;  %v2922_v3 = vpack.c.bf16 %v2718_v17, %v2714_v35  ;;  %v5935_v16 = vld [vmem:[%s4427_s16 + $0x378] sm:$0xff]  ;;  %v5938_v35 = vld [vmem:[%s4435_s17 + $0x368] sm:$0xff] }
 0x2ab   : > { %6830 = vst [vmem:[#allocation19_spill] sm:$0xff] %v5922_v38  ;;  %v2782_v6 = vadd.f32 %v2494_v23, %v1480_v52  ;;  %v2266_v15 = vmul.f32 %v4837_v19, %v1972_v7  ;;  %v1752_v20 = vunpack.c.l.bf16 %v1573_v34  ;;  %v1404_v25 = vunpack.c.l.bf16 %v5916_v9  ;;  %v5942_v23 = vld [vmem:[%s4435_s17 + $0x378] sm:$0xff]  ;;  %v5948_v9 = vld [vmem:[%s4427_s16 + $0x468] sm:$0xff] }
 0x2ac   : > { %6831 = vst [vmem:[#allocation8_spill] sm:$0xff] %v5926_v58  ;;  %v2270_v51 = vmul.f32 %v4837_v19, %v1976_v2  ;;  %v2036_v39 = vsub.f32 %v1748_v22, %v1316_v27  ;;  %v1408_v21 = vunpack.c.l.bf16 %v5919_v43  ;;  %3171 = vmatpush.bf16.msrb.mxu0 %v2922_v3  ;;  %v1836_v17 = vunpack.c.l.bf16 %v5922_v38 }
 0x2ad   : > { %6832 = vst [vmem:[#allocation25_spill] sm:$0xff] %v5929_v46  ;;  %v2954_v52 = vpack.c.bf16 %v2782_v6, %v2778_v12  ;;  %v2554_v34 = vadd.f32 %v2266_v15, %v1252_v55  ;;  %v2040_v31 = vsub.f32 %v1752_v20, %v1320_v10  ;;  %v1840_v22 = vunpack.c.l.bf16 %v5926_v58  ;;  %v5954_v15 = vld [vmem:[%s4427_s16 + $0x478] sm:$0xff] }
 0x2ae   : > { %6833 = vst [vmem:[#allocation33_spill] sm:$0xff] %v5935_v16  ;;  %v2558_v7 = vadd.f32 %v2270_v51, %v1256_v42  ;;  %v2330_v2 = vmul.f32 %v4837_v19, %v2036_v39  ;;  %v1468_v43 = vunpack.c.l.bf16 %v5929_v46  ;;  %v2124_v3 = vsub.f32 %v1836_v17, %v1404_v25  ;;  %v5957_v42 = vld [vmem:[%s4435_s17 + $0x468] sm:$0xff]  ;;  %v5961_v46 = vld [vmem:[%s4435_s17 + $0x478] sm:$0xff] }
 0x2af   : > { %6834 = vst [vmem:[#allocation20_spill] sm:$0xff] %v5938_v35  ;;  %3184 = vmatpush.bf16.msrb.mxu1 %v2954_v52  ;;  %v2334_v12 = vmul.f32 %v4837_v19, %v2040_v31  ;;  %v1472_v55 = vunpack.c.l.bf16 %v5935_v16  ;;  %v1900_v6 = vunpack.c.l.bf16 %v5938_v35  ;;  %v2128_v39 = vsub.f32 %v1840_v22, %v1408_v21 }
 0x2b0   : > { %v2842_v20 = vpack.c.bf16 %v2558_v7, %v2554_v34  ;;  %v2618_v51 = vadd.f32 %v2330_v2, %v1316_v27  ;;  %v1904_v58 = vunpack.c.l.bf16 %v5942_v23  ;;  %v2418_v52 = vmul.f32 %v4837_v19, %v2124_v3 }
 0x2b1   : > { %v2622_v38 = vadd.f32 %v2334_v12, %v1320_v10  ;;  %v2188_v31 = vsub.f32 %v1900_v6, %v1468_v43  ;;  %v1532_v17 = vunpack.c.l.bf16 %v5948_v9  ;;  %v2422_v35 = vmul.f32 %v4837_v19, %v2128_v39  ;;  %v5976_v39 = vld [vmem:[%s4427_s16 + $0x258] sm:$0xff] }
 0x2b2   : > { %3149 = vmatpush.bf16.msra.mxu2 %v2842_v20  ;;  %v2192_v16 = vsub.f32 %v1904_v58, %v1472_v55  ;;  %v1536_v34 = vunpack.c.l.bf16 %v5954_v15  ;;  %v1964_v27 = vunpack.c.l.bf16 %v5957_v42  ;;  %v2706_v2 = vadd.f32 %v2418_v52, %v1404_v25  ;;  %v5973_v58 = vld [vmem:[%s4427_s16 + $0x248] sm:$0xff]  ;;  %6836 = vst [vmem:[#allocation36_spill] sm:$0xff] %v5976_v39 }
 0x2b3   : > { %v2874_v7 = vpack.c.bf16 %v2622_v38, %v2618_v51  ;;  %v2482_v10 = vmul.f32 %v4837_v19, %v2188_v31  ;;  %v1968_v22 = vunpack.c.l.bf16 %v5961_v46  ;;  %v2710_v12 = vadd.f32 %v2422_v35, %v1408_v21  ;;  %6835 = vst [vmem:[#allocation21_spill] sm:$0xff] %v5973_v58 }
 0x2b4   : > { %v2486_v3 = vmul.f32 %v4837_v19, %v2192_v16  ;;  %v2252_v6 = vsub.f32 %v1964_v27, %v1532_v17  ;;  %v1309_v20 = vunpack.c.h.bf16 %v5563_v61  ;;  %v1313_v51 = vunpack.c.h.bf16 %v5569_v14  ;;  %v5982_v16 = vld [vmem:[%s4435_s17 + $0x248] sm:$0xff]  ;;  %v5987_v27 = vld [vmem:[%s4435_s17 + $0x258] sm:$0xff] }
 0x2b5   : > { %3162 = vmatpush.bf16.msra.mxu3 %v2874_v7  ;;  %v2770_v38 = vadd.f32 %v2482_v10, %v1468_v43  ;;  %v2256_v25 = vsub.f32 %v1968_v22, %v1536_v34  ;;  %v1741_v21 = vunpack.c.h.bf16 %v5572_v11  ;;  %3150 = vmatmul.bf16.vlgmr.msra.gmra.mxu2 %v5314_v40  ;;  %6837 = vst [vmem:[#allocation27_spill] sm:$0xff] %v5982_v16  ;;  %v1745_v31 = vunpack.c.h.bf16 %v5575_v60  ;;  %v5990_v43 = vld [vmem:[%s4427_s16 + $0x348] sm:$0xff]  ;;  %v5996_v22 = vld [vmem:[%s4427_s16 + $0x358] sm:$0xff] }
 0x2b6   : > { %v2918_v35 = vpack.c.bf16 %v2710_v12, %v2706_v2  ;;  %v2774_v52 = vadd.f32 %v2486_v3, %v1472_v55  ;;  %v2546_v61 = vmul.f32 %v4837_v19, %v2252_v6  ;;  %6838 = vst [vmem:[#allocation46_spill] sm:$0xff] %v5987_v27  ;;  %v1396_v11 = vunpack.c.l.bf16 %v5973_v58  ;;  %v5999_v55 = vld [vmem:[%s4435_s17 + $0x348] sm:$0xff]  ;;  %v6003_v6 = vld [vmem:[%s4435_s17 + $0x358] sm:$0xff] }
 0x2b7   : > { %6839 = vst [vmem:[#allocation32_spill] sm:$0xff] %v5990_v43  ;;  %v2550_v7 = vmul.f32 %v4837_v19, %v2256_v25  ;;  %v2029_v14 = vsub.f32 %v1741_v21, %v1309_v20  ;;  %v1400_v10 = vunpack.c.l.bf16 %v5976_v39  ;;  %v2033_v12 = vsub.f32 %v1745_v31, %v1313_v51  ;;  %v6016_v31 = vld [vmem:[%s4427_s16 + $0x458] sm:$0xff] }
 0x2b8   : > { %6840 = vst [vmem:[#allocation29_spill] sm:$0xff] %v5996_v22  ;;  %3172 = vmatpush.bf16.msrb.mxu0 %v2918_v35  ;;  %v2950_v2 = vpack.c.bf16 %v2774_v52, %v2770_v38  ;;  %v2834_v60 = vadd.f32 %v2546_v61, %v1532_v17  ;;  %v1828_v3 = vunpack.c.l.bf16 %v5982_v16  ;;  %3163 = vmatmul.bf16.vlgmr.msra.gmra.mxu3 %v5417_v29  ;;  %v1832_v39 = vunpack.c.l.bf16 %v5987_v27  ;;  %v6010_v35 = vld [vmem:[%s4427_s16 + $0x448] sm:$0xff] }
 0x2b9   : > { %6841 = vst [vmem:[#allocation30_spill] sm:$0xff] %v5999_v55  ;;  %v2838_v25 = vadd.f32 %v2550_v7, %v1536_v34  ;;  %v2323_v21 = vmul.f32 %v4837_v19, %v2029_v14  ;;  %v1460_v58 = vunpack.c.l.bf16 %v5990_v43  ;;  %v2327_v17 = vmul.f32 %v4837_v19, %v2033_v12  ;;  %v6019_v34 = vld [vmem:[%s4435_s17 + $0x448] sm:$0xff]  ;;  %v6023_v43 = vld [vmem:[%s4435_s17 + $0x458] sm:$0xff] }
 0x2ba   : > { %3185 = vmatpush.bf16.msrb.mxu1 %v2950_v2  ;;  %v2116_v38 = vsub.f32 %v1828_v3, %v1396_v11  ;;  %v1464_v52 = vunpack.c.l.bf16 %v5996_v22  ;;  %v1892_v61 = vunpack.c.l.bf16 %v5999_v55  ;;  %6842 = vst [vmem:[#allocation47_spill] sm:$0xff] %v6016_v31  ;;  %v2120_v29 = vsub.f32 %v1832_v39, %v1400_v10 }
 0x2bb   : > { %v2982_v7 = vpack.c.bf16 %v2838_v25, %v2834_v60  ;;  %v2611_v14 = vadd.f32 %v2323_v21, %v1309_v20  ;;  %v1896_v27 = vunpack.c.l.bf16 %v6003_v6  ;;  %6843 = vst [vmem:[#allocation48_spill] sm:$0xff] %v6023_v43  ;;  %v2615_v16 = vadd.f32 %v2327_v17, %v1313_v51 }
 0x2bc   : > { %v2410_v2 = vmul.f32 %v4837_v19, %v2116_v38  ;;  %v2180_v12 = vsub.f32 %v1892_v61, %v1460_v58  ;;  %v1524_v3 = vunpack.c.l.bf16 %v6010_v35  ;;  %v2414_v55 = vmul.f32 %v4837_v19, %v2120_v29 }
 0x2bd   : > { %3198 = vmatpush.bf16.msrb.mxu2 %v2982_v7  ;;  %v2184_v22 = vsub.f32 %v1896_v27, %v1464_v52  ;;  %v1528_v20 = vunpack.c.l.bf16 %v6016_v31  ;;  %v1956_v39 = vunpack.c.l.bf16 %v6019_v34  ;;  %v2871_v60 = vpack.c.bf16 %v2615_v16, %v2611_v14  ;;  %v3644_v7 = vld [vmem:[%s4427_s16 + $0xc8] sm:$0xff]  ;;  %v6038_v31 = vld [vmem:[%s4427_s16 + $0x238] sm:$0xff] }
 0x2be   : > { %v2698_v25 = vadd.f32 %v2410_v2, %v1396_v11  ;;  %v2474_v51 = vmul.f32 %v4837_v19, %v2180_v12  ;;  %v1960_v21 = vunpack.c.l.bf16 %v6023_v43  ;;  %v2702_v17 = vadd.f32 %v2414_v55, %v1400_v10  ;;  %v6035_v27 = vld [vmem:[%s4427_s16 + $0x228] sm:$0xff]  ;;  %6845 = vst [vmem:[#allocation9_spill] sm:$0xff] %v6038_v31 }
 0x2bf   : > { %v2478_v38 = vmul.f32 %v4837_v19, %v2184_v22  ;;  %v2244_v61 = vsub.f32 %v1956_v39, %v1524_v3  ;;  %v1301_v29 = vunpack.c.h.bf16 %v3644_v7  ;;  %6844 = vst [vmem:[#allocation28_spill] sm:$0xff] %v6035_v27  ;;  %3207 = vmatpush.bf16.msrb.mxu3 %v2871_v60  ;;  %v1305_v14 = vunpack.c.h.bf16 %v5605_v48  ;;  %v6043_v55 = vld [vmem:[%s4435_s17 + $0x228] sm:$0xff]  ;;  %v6048_v7 = vld [vmem:[%s4435_s17 + $0x238] sm:$0xff] }
 0x2c0   : > { %v2762_v16 = vadd.f32 %v2474_v51, %v1460_v58  ;;  %v2248_v11 = vsub.f32 %v1960_v21, %v1528_v20  ;;  %v1733_v10 = vunpack.c.h.bf16 %v5615_v32  ;;  %6846 = vst [vmem:[#allocation41_spill] sm:$0xff] %v6043_v55  ;;  %v2914_v22 = vpack.c.bf16 %v2702_v17, %v2698_v25  ;;  %v6051_v60 = vld [vmem:[%s4427_s16 + $0x328] sm:$0xff]  ;;  %v6057_v21 = vld [vmem:[%s4427_s16 + $0x338] sm:$0xff] }
 0x2c1   : > { %v2766_v2 = vadd.f32 %v2478_v38, %v1464_v52  ;;  %v2538_v12 = vmul.f32 %v4837_v19, %v2244_v61  ;;  %v1737_v39 = vunpack.c.h.bf16 %v5618_v57  ;;  %6847 = vst [vmem:[#allocation42_spill] sm:$0xff] %v6048_v7  ;;  %v1388_v48 = vunpack.c.l.bf16 %v6035_v27  ;;  %v6060_v52 = vld [vmem:[%s4435_s17 + $0x328] sm:$0xff]  ;;  %v6064_v61 = vld [vmem:[%s4435_s17 + $0x338] sm:$0xff] }
 0x2c2   : > { %6848 = vst [vmem:[#allocation38_spill] sm:$0xff] %v6051_v60  ;;  %v2542_v58 = vmul.f32 %v4837_v19, %v2248_v11  ;;  %v2021_v51 = vsub.f32 %v1733_v10, %v1301_v29  ;;  %v1392_v32 = vunpack.c.l.bf16 %v6038_v31  ;;  %3173 = vmatpush.bf16.msrb.mxu0 %v2914_v22  ;;  %v1820_v38 = vunpack.c.l.bf16 %v6043_v55  ;;  %v6070_v43 = vld [vmem:[%s4427_s16 + $0x428] sm:$0xff] }
 0x2c3   : > { %6849 = vst [vmem:[#allocation22_spill] sm:$0xff] %v6057_v21  ;;  %v2946_v25 = vpack.c.bf16 %v2766_v2, %v2762_v16  ;;  %v2826_v57 = vadd.f32 %v2538_v12, %v1524_v3  ;;  %v2025_v17 = vsub.f32 %v1737_v39, %v1305_v14  ;;  %v1824_v31 = vunpack.c.l.bf16 %v6048_v7  ;;  %v6076_v12 = vld [vmem:[%s4427_s16 + $0x438] sm:$0xff] }
 0x2c4   : > { %6850 = vst [vmem:[#allocation16_spill] sm:$0xff] %v6060_v52  ;;  %v2830_v11 = vadd.f32 %v2542_v58, %v1528_v20  ;;  %v2315_v10 = vmul.f32 %v4837_v19, %v2021_v51  ;;  %v1452_v27 = vunpack.c.l.bf16 %v6051_v60  ;;  %v2108_v22 = vsub.f32 %v1820_v38, %v1388_v48  ;;  %v6079_v20 = vld [vmem:[%s4435_s17 + $0x428] sm:$0xff]  ;;  %v6083_v60 = vld [vmem:[%s4435_s17 + $0x438] sm:$0xff] }
 0x2c5   : > { %3186 = vmatpush.bf16.msrb.mxu1 %v2946_v25  ;;  %v2319_v16 = vmul.f32 %v4837_v19, %v2025_v17  ;;  %v1456_v3 = vunpack.c.l.bf16 %v6057_v21  ;;  %v1884_v2 = vunpack.c.l.bf16 %v6060_v52  ;;  %6851 = vst [vmem:[#allocation53_spill] sm:$0xff] %v6076_v12  ;;  %v2112_v51 = vsub.f32 %v1824_v31, %v1392_v32 }
 0x2c6   : > { %6852 = vst [vmem:[#allocation17_spill] sm:$0xff] %v6079_v20  ;;  %v2978_v39 = vpack.c.bf16 %v2830_v11, %v2826_v57  ;;  %v2603_v58 = vadd.f32 %v2315_v10, %v1301_v29  ;;  %v1888_v7 = vunpack.c.l.bf16 %v6064_v61  ;;  %v2402_v25 = vmul.f32 %v4837_v19, %v2108_v22 }
 0x2c7   : > { %6853 = vst [vmem:[#allocation49_spill] sm:$0xff] %v6083_v60  ;;  %v2607_v55 = vadd.f32 %v2319_v16, %v1305_v14  ;;  %v2172_v17 = vsub.f32 %v1884_v2, %v1452_v27  ;;  %v1516_v38 = vunpack.c.l.bf16 %v6070_v43  ;;  %v2406_v52 = vmul.f32 %v4837_v19, %v2112_v51  ;;  %v6098_v51 = vld [vmem:[%s4427_s16 + $0x218] sm:$0xff] }
 0x2c8   : > { %3199 = vmatpush.bf16.msrb.mxu2 %v2978_v39  ;;  %v2176_v21 = vsub.f32 %v1888_v7, %v1456_v3  ;;  %v1520_v29 = vunpack.c.l.bf16 %v6076_v12  ;;  %v1948_v31 = vunpack.c.l.bf16 %v6079_v20  ;;  %v2690_v11 = vadd.f32 %v2402_v25, %v1388_v48  ;;  %v6095_v39 = vld [vmem:[%s4427_s16 + $0x208] sm:$0xff]  ;;  %6855 = vst [vmem:[#allocation54_spill] sm:$0xff] %v6098_v51  ;;  %v6108_v20 = vld [vmem:[%s4435_s17 + $0x218] sm:$0xff] }
 0x2c9   : > { %v2867_v57 = vpack.c.bf16 %v2607_v55, %v2603_v58  ;;  %v2466_v14 = vmul.f32 %v4837_v19, %v2172_v17  ;;  %v1952_v10 = vunpack.c.l.bf16 %v6083_v60  ;;  %v2694_v16 = vadd.f32 %v2406_v52, %v1392_v32  ;;  %6854 = vst [vmem:[#allocation51_spill] sm:$0xff] %v6095_v39  ;;  %v3645_v58 = vld [vmem:[%s4427_s16 + $0xb8] sm:$0xff]  ;;  %v6103_v52 = vld [vmem:[%s4435_s17 + $0x208] sm:$0xff] }
 0x2ca   : > { %v2470_v22 = vmul.f32 %v4837_v19, %v2176_v21  ;;  %v2236_v2 = vsub.f32 %v1948_v31, %v1516_v38  ;;  %v1293_v7 = vunpack.c.h.bf16 %v5645_v53  ;;  %v1297_v25 = vunpack.c.h.bf16 %v3645_v58  ;;  %6856 = vst [vmem:[#allocation55_spill] sm:$0xff] %v6103_v52  ;;  %v3646_v31 = vld [vmem:[%s4435_s17 + $0xb8] sm:$0xff]  ;;  %v6130_v12 = vld [vmem:[%s4427_s16 + $0x408] sm:$0xff] }
 0x2cb   : > { %3208 = vmatpush.bf16.msrb.mxu3 %v2867_v57  ;;  %v2754_v55 = vadd.f32 %v2466_v14, %v1452_v27  ;;  %v2240_v48 = vsub.f32 %v1952_v10, %v1520_v29  ;;  %v1725_v32 = vunpack.c.h.bf16 %v5656_v62  ;;  %v2910_v21 = vpack.c.bf16 %v2694_v16, %v2690_v11  ;;  %6857 = vst [vmem:[#allocation56_spill] sm:$0xff] %v6108_v20  ;;  %v6111_v57 = vld [vmem:[%s4427_s16 + $0x308] sm:$0xff]  ;;  %v6117_v58 = vld [vmem:[%s4427_s16 + $0x318] sm:$0xff] }
 0x2cc   : > { %v2758_v17 = vadd.f32 %v2470_v22, %v1456_v3  ;;  %v2530_v53 = vmul.f32 %v4837_v19, %v2236_v2  ;;  %v1729_v60 = vunpack.c.h.bf16 %v3646_v31  ;;  %6858 = vst [vmem:[#allocation57_spill] sm:$0xff] %v6111_v57  ;;  %v1380_v10 = vunpack.c.l.bf16 %v6095_v39  ;;  %v6120_v3 = vld [vmem:[%s4435_s17 + $0x308] sm:$0xff]  ;;  %v6124_v31 = vld [vmem:[%s4435_s17 + $0x318] sm:$0xff] }
 0x2cd   : > { %v2534_v27 = vmul.f32 %v4837_v19, %v2240_v48  ;;  %v2013_v14 = vsub.f32 %v1725_v32, %v1293_v7  ;;  %v1384_v62 = vunpack.c.l.bf16 %v6098_v51  ;;  %6859 = vst [vmem:[#allocation58_spill] sm:$0xff] %v6117_v58  ;;  %3174 = vmatpush.bf16.msrb.mxu0 %v2910_v21  ;;  %v1812_v2 = vunpack.c.l.bf16 %v6103_v52 }
 0x2ce   : > { %6860 = vst [vmem:[#allocation59_spill] sm:$0xff] %v6120_v3  ;;  %v2942_v11 = vpack.c.bf16 %v2758_v17, %v2754_v55  ;;  %v2818_v16 = vadd.f32 %v2530_v53, %v1516_v38  ;;  %v2017_v22 = vsub.f32 %v1729_v60, %v1297_v25  ;;  %v1816_v51 = vunpack.c.l.bf16 %v6108_v20  ;;  %v6136_v17 = vld [vmem:[%s4427_s16 + $0x418] sm:$0xff] }
 0x2cf   : > { %v2822_v48 = vadd.f32 %v2534_v27, %v1520_v29  ;;  %v2307_v32 = vmul.f32 %v4837_v19, %v2013_v14  ;;  %v1444_v39 = vunpack.c.l.bf16 %v6111_v57  ;;  %6861 = vst [vmem:[#allocation60_spill] sm:$0xff] %v6130_v12  ;;  %v2100_v21 = vsub.f32 %v1812_v2, %v1380_v10  ;;  %v6139_v29 = vld [vmem:[%s4435_s17 + $0x408] sm:$0xff]  ;;  %v6143_v57 = vld [vmem:[%s4435_s17 + $0x418] sm:$0xff] }
 0x2d0   : > { %3187 = vmatpush.bf16.msrb.mxu1 %v2942_v11  ;;  %v2311_v55 = vmul.f32 %v4837_v19, %v2017_v22  ;;  %v1448_v60 = vunpack.c.l.bf16 %v6117_v58  ;;  %v1876_v38 = vunpack.c.l.bf16 %v6120_v3  ;;  %6862 = vst [vmem:[#allocation61_spill] sm:$0xff] %v6136_v17  ;;  %v2104_v14 = vsub.f32 %v1816_v51, %v1384_v62 }
 0x2d1   : > { %6863 = vst [vmem:[#allocation62_spill] sm:$0xff] %v6139_v29  ;;  %v2974_v53 = vpack.c.bf16 %v2822_v48, %v2818_v16  ;;  %v2595_v27 = vadd.f32 %v2307_v32, %v1293_v7  ;;  %v1880_v20 = vunpack.c.l.bf16 %v6124_v31  ;;  %v2394_v11 = vmul.f32 %v4837_v19, %v2100_v21 }
 0x2d2   : > { %v2599_v52 = vadd.f32 %v2311_v55, %v1297_v25  ;;  %v2164_v22 = vsub.f32 %v1876_v38, %v1444_v39  ;;  %v1508_v2 = vunpack.c.l.bf16 %v6130_v12  ;;  %v2398_v3 = vmul.f32 %v4837_v19, %v2104_v14  ;;  %v3648_v12 = vld [vmem:[%s4427_s16 + $0x98] sm:$0xff] }
 0x2d3   : > { %3200 = vmatpush.bf16.msrb.mxu2 %v2974_v53  ;;  %v2168_v58 = vsub.f32 %v1880_v20, %v1448_v60  ;;  %v1512_v16 = vunpack.c.l.bf16 %v6136_v17  ;;  %v1940_v7 = vunpack.c.l.bf16 %v6139_v29  ;;  %v2682_v48 = vadd.f32 %v2394_v11, %v1380_v10  ;;  %v3647_v53 = vld [vmem:[%s4427_s16 + $0x88] sm:$0xff] }
 0x2d4   : > { %v2863_v51 = vpack.c.bf16 %v2599_v52, %v2595_v27  ;;  %v2458_v25 = vmul.f32 %v4837_v19, %v2164_v22  ;;  %v1944_v32 = vunpack.c.l.bf16 %v6143_v57  ;;  %v2686_v55 = vadd.f32 %v2398_v3, %v1384_v62  ;;  %v3649_v52 = vld [vmem:[%s4435_s17 + $0x88] sm:$0xff]  ;;  %v3650_v62 = vld [vmem:[%s4435_s17 + $0x98] sm:$0xff] }
 0x2d5   : > { %v2462_v21 = vmul.f32 %v4837_v19, %v2168_v58  ;;  %v2228_v38 = vsub.f32 %v1940_v7, %v1508_v2  ;;  %v1285_v14 = vunpack.c.h.bf16 %v3647_v53  ;;  %v1289_v29 = vunpack.c.h.bf16 %v3648_v12 }
 0x2d6   : > { %3209 = vmatpush.bf16.msrb.mxu3 %v2863_v51  ;;  %v2746_v20 = vadd.f32 %v2458_v25, %v1444_v39  ;;  %v2232_v17 = vsub.f32 %v1944_v32, %v1512_v16  ;;  %v1717_v10 = vunpack.c.h.bf16 %v3649_v52  ;;  %v2906_v27 = vpack.c.bf16 %v2686_v55, %v2682_v48  ;;  %v3651_v51 = vld [vmem:[%s4427_s16 + $0x1e8] sm:$0xff]  ;;  %v3652_v39 = vld [vmem:[%s4427_s16 + $0x1f8] sm:$0xff] }
 0x2d7   : > { %v2750_v11 = vadd.f32 %v2462_v21, %v1448_v60  ;;  %v2522_v22 = vmul.f32 %v4837_v19, %v2228_v38  ;;  %v1721_v58 = vunpack.c.h.bf16 %v3650_v62  ;;  %v1373_v53 = vunpack.c.h.bf16 %v3651_v51  ;;  %v3653_v60 = vld [vmem:[%s4435_s17 + $0x1e8] sm:$0xff]  ;;  %v3654_v52 = vld [vmem:[%s4435_s17 + $0x1f8] sm:$0xff] }
 0x2d8   : > { %v2526_v3 = vmul.f32 %v4837_v19, %v2232_v17  ;;  %v2005_v7 = vsub.f32 %v1717_v10, %v1285_v14  ;;  %v1377_v25 = vunpack.c.h.bf16 %v3652_v39  ;;  %3175 = vmatpush.bf16.msrb.mxu0 %v2906_v27  ;;  %v1805_v55 = vunpack.c.h.bf16 %v3653_v60  ;;  %v3655_v62 = vld [vmem:[%s4427_s16 + $0x2e8] sm:$0xff]  ;;  %v3656_v27 = vld [vmem:[%s4427_s16 + $0x2f8] sm:$0xff] }
 0x2d9   : > { %v2938_v12 = vpack.c.bf16 %v2750_v11, %v2746_v20  ;;  %v2810_v32 = vadd.f32 %v2522_v22, %v1508_v2  ;;  %v2009_v48 = vsub.f32 %v1721_v58, %v1289_v29  ;;  %v1809_v17 = vunpack.c.h.bf16 %v3654_v52  ;;  %v3657_v11 = vld [vmem:[%s4435_s17 + $0x2e8] sm:$0xff] }
 0x2da   : > { %v2814_v21 = vadd.f32 %v2526_v3, %v1512_v16  ;;  %v2299_v38 = vmul.f32 %v4837_v19, %v2005_v7  ;;  %v1437_v10 = vunpack.c.h.bf16 %v3655_v62  ;;  %v2093_v39 = vsub.f32 %v1805_v55, %v1373_v53  ;;  %v3658_v3 = vld [vmem:[%s4435_s17 + $0x2f8] sm:$0xff] }
 0x2db   : > { %3188 = vmatpush.bf16.msrb.mxu1 %v2938_v12  ;;  %v2303_v51 = vmul.f32 %v4837_v19, %v2009_v48  ;;  %v1441_v20 = vunpack.c.h.bf16 %v3656_v27  ;;  %v1869_v2 = vunpack.c.h.bf16 %v3657_v11  ;;  %v2097_v58 = vsub.f32 %v1809_v17, %v1377_v25  ;;  %3176 = vmatmul.bf16.vlgmr.msrb.gmra.mxu0 %v6785_v5  ;;  %v3659_v48 = vld [vmem:[%s4427_s16 + $0x3e8] sm:$0xff] }
 0x2dc   : > { %v2970_v22 = vpack.c.bf16 %v2814_v21, %v2810_v32  ;;  %v2587_v16 = vadd.f32 %v2299_v38, %v1285_v14  ;;  %v1873_v7 = vunpack.c.h.bf16 %v3658_v3  ;;  %v2387_v12 = vmul.f32 %v4837_v19, %v2093_v39  ;;  %v3660_v32 = vld [vmem:[%s4427_s16 + $0x3f8] sm:$0xff]  ;;  %v3661_v14 = vld [vmem:[%s4435_s17 + $0x3e8] sm:$0xff] }
 0x2dd   : > { %v2591_v60 = vadd.f32 %v2303_v51, %v1289_v29  ;;  %v2157_v52 = vsub.f32 %v1869_v2, %v1437_v10  ;;  %v1501_v55 = vunpack.c.h.bf16 %v3659_v48  ;;  %v2391_v62 = vmul.f32 %v4837_v19, %v2097_v58  ;;  %v3662_v39 = vld [vmem:[%s4435_s17 + $0x3f8] sm:$0xff]  ;;  %v3663_v58 = vld [vmem:[%s4427_s16 + $0x68] sm:$0xff] }
 0x2de   : > { %3201 = vmatpush.bf16.msrb.mxu2 %v2970_v22  ;;  %v2161_v27 = vsub.f32 %v1873_v7, %v1441_v20  ;;  %v1505_v21 = vunpack.c.h.bf16 %v3660_v32  ;;  %v1933_v38 = vunpack.c.h.bf16 %v3661_v14  ;;  %3189 = vmatmul.bf16.vlgmr.msrb.gmra.mxu1 %v6811_v8  ;;  %v2675_v29 = vadd.f32 %v2387_v12, %v1373_v53  ;;  %v3664_v14 = vld [vmem:[%s4427_s16 + $0x78] sm:$0xff] }
 0x2df   : > { %v2859_v17 = vpack.c.bf16 %v2591_v60, %v2587_v16  ;;  %v2451_v51 = vmul.f32 %v4837_v19, %v2157_v52  ;;  %v1937_v11 = vunpack.c.h.bf16 %v3662_v39  ;;  %v2679_v2 = vadd.f32 %v2391_v62, %v1377_v25  ;;  %v3665_v12 = vld [vmem:[%s4435_s17 + $0x78] sm:$0xff] }
 0x2e0   : > { %v2455_v22 = vmul.f32 %v4837_v19, %v2161_v27  ;;  %v2221_v3 = vsub.f32 %v1933_v38, %v1501_v55  ;;  %v1277_v7 = vunpack.c.h.bf16 %v3663_v58  ;;  %v1281_v8 = vunpack.c.h.bf16 %v3664_v14  ;;  %v3668_v58 = vld [vmem:[%s4435_s17 + $0x1c8] sm:$0xff] }
 0x2e1   : > { %3210 = vmatpush.bf16.msrb.mxu3 %v2859_v17  ;;  %v2739_v48 = vadd.f32 %v2451_v51, %v1437_v10  ;;  %v2225_v32 = vsub.f32 %v1937_v11, %v1505_v21  ;;  %v1709_v53 = vunpack.c.h.bf16 %v5724_v28  ;;  %3525 = vmatmul.msk.bf16.vlgmr.msrb.gmra.mxu2 %vm3008_vm0, %v5481_v1  ;;  %v2903_v16 = vpack.c.bf16 %v2679_v2, %v2675_v29  ;;  %v3666_v10 = vld [vmem:[%s4427_s16 + $0x1c8] sm:$0xff]  ;;  %v3667_v17 = vld [vmem:[%s4427_s16 + $0x1d8] sm:$0xff] }
 0x2e2   : > { %v2743_v25 = vadd.f32 %v2455_v22, %v1441_v20  ;;  %v2515_v60 = vmul.f32 %v4837_v19, %v2221_v3  ;;  %v1713_v52 = vunpack.c.h.bf16 %v3665_v12  ;;  %v1365_v38 = vunpack.c.h.bf16 %v3666_v10  ;;  %v3669_v2 = vld [vmem:[%s4435_s17 + $0x1d8] sm:$0xff] }
 0x2e3   : > { %v2519_v62 = vmul.f32 %v4837_v19, %v2225_v32  ;;  %v1997_v27 = vsub.f32 %v1709_v53, %v1277_v7  ;;  %v1369_v51 = vunpack.c.h.bf16 %v3667_v17  ;;  %3220 = vmatpush.bf16.msra.mxu0 %v2903_v16  ;;  %v1797_v14 = vunpack.c.h.bf16 %v3668_v58 }
 0x2e4   : > { %v2935_v28 = vpack.c.bf16 %v2743_v25, %v2739_v48  ;;  %v2803_v39 = vadd.f32 %v2515_v60, %v1501_v55  ;;  %v2001_v11 = vsub.f32 %v1713_v52, %v1281_v8  ;;  %v1801_v22 = vunpack.c.h.bf16 %v3669_v2 }
 0x2e5   : > { %v2807_v29 = vadd.f32 %v2519_v62, %v1505_v21  ;;  %v2291_v20 = vmul.f32 %v4837_v19, %v1997_v27  ;;  %v1429_v3 = vunpack.c.h.bf16 %v5734_v59  ;;  %v2085_v53 = vsub.f32 %v1797_v14, %v1365_v38 }
 0x2e6   : > { %3233 = vmatpush.bf16.msra.mxu1 %v2935_v28  ;;  %v2295_v32 = vmul.f32 %v4837_v19, %v2001_v11  ;;  %v1433_v12 = vunpack.c.h.bf16 %v5739_v54  ;;  %v1861_v16 = vunpack.c.h.bf16 %v5742_v4  ;;  %v2089_v25 = vsub.f32 %v1801_v22, %v1369_v51  ;;  %v3670_v22 = vld [vmem:[%s4427_s16 + $0x1a8] sm:$0xff] }
 0x2e7   : > { %v2967_v48 = vpack.c.bf16 %v2807_v29, %v2803_v39  ;;  %v2579_v55 = vadd.f32 %v2291_v20, %v1277_v7  ;;  %v1865_v60 = vunpack.c.h.bf16 %v5745_v13  ;;  %v2379_v52 = vmul.f32 %v4837_v19, %v2085_v53 }
 0x2e8   : > { %v2583_v21 = vadd.f32 %v2295_v32, %v1281_v8  ;;  %v2149_v62 = vsub.f32 %v1861_v16, %v1429_v3  ;;  %v1493_v27 = vunpack.c.h.bf16 %v5749_v50  ;;  %v2383_v59 = vmul.f32 %v4837_v19, %v2089_v25  ;;  %v3671_v32 = vld [vmem:[%s4427_s16 + $0x1b8] sm:$0xff] }
 0x2e9   : > { %3246 = vmatpush.bf16.msra.mxu2 %v2967_v48  ;;  %v2153_v10 = vsub.f32 %v1865_v60, %v1433_v12  ;;  %v1497_v17 = vunpack.c.h.bf16 %v5755_v47  ;;  %v1925_v54 = vunpack.c.h.bf16 %v5760_v56  ;;  %v2667_v28 = vadd.f32 %v2379_v52, %v1365_v38  ;;  %v3672_v48 = vld [vmem:[%s4435_s17 + $0x1a8] sm:$0xff]  ;;  %v3673_v25 = vld [vmem:[%s4435_s17 + $0x1b8] sm:$0xff] }
 0x2ea   : > { %v2855_v4 = vpack.c.bf16 %v2583_v21, %v2579_v55  ;;  %v2443_v7 = vmul.f32 %v4837_v19, %v2149_v62  ;;  %v1929_v13 = vunpack.c.h.bf16 %v5763_v26  ;;  %v2671_v8 = vadd.f32 %v2383_v59, %v1369_v51 }
 0x2eb   : > { %v2447_v39 = vmul.f32 %v4837_v19, %v2153_v10  ;;  %v2213_v50 = vsub.f32 %v1925_v54, %v1493_v27  ;;  %v1269_v11 = vunpack.c.h.bf16 %v5768_v0  ;;  %v1273_v47 = vunpack.c.h.bf16 %v5773_v24 }
 0x2ec   : > { %3211 = vmatpush.bf16.msrb.mxu3 %v2855_v4  ;;  %v2731_v58 = vadd.f32 %v2443_v7, %v1429_v3  ;;  %v2217_v14 = vsub.f32 %v1929_v13, %v1497_v17  ;;  %v1701_v56 = vunpack.c.h.bf16 %v5776_v41  ;;  %v2899_v38 = vpack.c.bf16 %v2671_v8, %v2667_v28 }
 0x2ed   : > { %v2735_v29 = vadd.f32 %v2447_v39, %v1433_v12  ;;  %v2507_v26 = vmul.f32 %v4837_v19, %v2213_v50  ;;  %v1705_v51 = vunpack.c.h.bf16 %v5781_v30  ;;  %v1357_v0 = vunpack.c.h.bf16 %v3670_v22  ;;  %v6867_v22 = vld [vmem:[#allocation31_spill] sm:$0xff] }
 0x2ee   : > { %v2511_v20 = vmul.f32 %v4837_v19, %v2217_v14  ;;  %v1989_v2 = vsub.f32 %v1701_v56, %v1269_v11  ;;  %v1361_v3 = vunpack.c.h.bf16 %v3671_v32  ;;  %3221 = vmatpush.bf16.msra.mxu0 %v2899_v38  ;;  %v1789_v41 = vunpack.c.h.bf16 %v3672_v48 }
 0x2ef   : > { %v2931_v53 = vpack.c.bf16 %v2735_v29, %v2731_v58  ;;  %v2795_v24 = vadd.f32 %v2507_v26, %v1493_v27  ;;  %v1993_v16 = vsub.f32 %v1705_v51, %v1273_v47  ;;  %v1793_v60 = vunpack.c.h.bf16 %v3673_v25  ;;  %v3676_v25 = vld [vmem:[%s4435_s17 + $0x188] sm:$0xff] }
 0x2f0   : > { %v2799_v55 = vadd.f32 %v2511_v20, %v1497_v17  ;;  %v2283_v12 = vmul.f32 %v4837_v19, %v1989_v2  ;;  %v1421_v30 = vunpack.c.h.bf16 %v5796_v37  ;;  %v2077_v52 = vsub.f32 %v1789_v41, %v1357_v0 }
 0x2f1   : > { %3234 = vmatpush.bf16.msra.mxu1 %v2931_v53  ;;  %v2287_v21 = vmul.f32 %v4837_v19, %v1993_v16  ;;  %v1425_v62 = vunpack.c.h.bf16 %v5799_v18  ;;  %v1853_v59 = vunpack.c.h.bf16 %v5802_v63  ;;  %v2081_v54 = vsub.f32 %v1793_v60, %v1361_v3  ;;  %v3674_v53 = vld [vmem:[%s4427_s16 + $0x188] sm:$0xff]  ;;  %v3675_v16 = vld [vmem:[%s4427_s16 + $0x198] sm:$0xff] }
 0x2f2   : > { %v2963_v10 = vpack.c.bf16 %v2799_v55, %v2795_v24  ;;  %v2571_v27 = vadd.f32 %v2283_v12, %v1269_v11  ;;  %v1857_v4 = vunpack.c.h.bf16 %v5806_v33  ;;  %v2371_v28 = vmul.f32 %v4837_v19, %v2077_v52  ;;  %v3677_v52 = vld [vmem:[%s4435_s17 + $0x198] sm:$0xff] }
 0x2f3   : > { %v2575_v17 = vadd.f32 %v2287_v21, %v1273_v47  ;;  %v2141_v7 = vsub.f32 %v1853_v59, %v1421_v30  ;;  %v1485_v13 = vunpack.c.h.bf16 %v5809_v44  ;;  %v2375_v37 = vmul.f32 %v4837_v19, %v2081_v54  ;;  %v6864_v47 = vld [vmem:[#allocation13_spill] sm:$0xff]  ;;  %v6868_v59 = vld [vmem:[#allocation39_spill] sm:$0xff] }
 0x2f4   : > { %3247 = vmatpush.bf16.msra.mxu2 %v2963_v10  ;;  %v2145_v8 = vsub.f32 %v1857_v4, %v1425_v62  ;;  %v1489_v39 = vunpack.c.h.bf16 %v5815_v36  ;;  %v1917_v18 = vunpack.c.h.bf16 %v5818_v45  ;;  %v2659_v50 = vadd.f32 %v2371_v28, %v1357_v0  ;;  %v6865_v36 = vld [vmem:[#allocation15_spill] sm:$0xff]  ;;  %v6866_v45 = vld [vmem:[#allocation26_spill] sm:$0xff]  ;;  %v6869_v4 = vld [vmem:[#allocation40_spill] sm:$0xff] }
 0x2f5   : > { %v2851_v63 = vpack.c.bf16 %v2575_v17, %v2571_v27  ;;  %v2435_v11 = vmul.f32 %v4837_v19, %v2141_v7  ;;  %v1921_v33 = vunpack.c.h.bf16 %v5822_v49  ;;  %v2663_v58 = vadd.f32 %v2375_v37, %v1361_v3  ;;  %v6870_v28 = vld [vmem:[#allocation34_spill] sm:$0xff] }
 0x2f6   : > { %v2439_v14 = vmul.f32 %v4837_v19, %v2145_v8  ;;  %v2205_v44 = vsub.f32 %v1917_v18, %v1485_v13  ;;  %v1261_v56 = vunpack.c.h.bf16 %v6864_v47  ;;  %v1265_v26 = vunpack.c.h.bf16 %v6865_v36  ;;  %v6871_v18 = vld [vmem:[#allocation12_spill] sm:$0xff]  ;;  %v6873_v47 = vld [vmem:[#allocation35_spill] sm:$0xff] }
 0x2f7   : > { %3212 = vmatpush.bf16.msrb.mxu3 %v2851_v63  ;;  %v2723_v38 = vadd.f32 %v2435_v11, %v1421_v30  ;;  %v2209_v29 = vsub.f32 %v1921_v33, %v1489_v39  ;;  %v1693_v51 = vunpack.c.h.bf16 %v6866_v45  ;;  %v2895_v20 = vpack.c.bf16 %v2663_v58, %v2659_v50  ;;  %v6872_v33 = vld [vmem:[#allocation14_spill] sm:$0xff] }
 0x2f8   : > { %v2727_v2 = vadd.f32 %v2439_v14, %v1425_v62  ;;  %v2499_v49 = vmul.f32 %v4837_v19, %v2205_v44  ;;  %v1697_v0 = vunpack.c.h.bf16 %v6867_v22  ;;  %v1349_v24 = vunpack.c.h.bf16 %v3674_v53 }
 0x2f9   : > { %v2503_v32 = vmul.f32 %v4837_v19, %v2209_v29  ;;  %v1981_v3 = vsub.f32 %v1693_v51, %v1261_v56  ;;  %v1353_v48 = vunpack.c.h.bf16 %v3675_v16  ;;  %3222 = vmatpush.bf16.msra.mxu0 %v2895_v20  ;;  %v1781_v60 = vunpack.c.h.bf16 %v3676_v25  ;;  %v6874_v29 = vld [vmem:[#allocation37_spill] sm:$0xff]  ;;  %v6875_v20 = vld [vmem:[#allocation6_spill] sm:$0xff]  ;;  %v6877_v16 = vld [vmem:[#allocation43_spill] sm:$0xff] }
 0x2fa   : > { %v2927_v41 = vpack.c.bf16 %v2727_v2, %v2723_v38  ;;  %v2787_v55 = vadd.f32 %v2499_v49, %v1485_v13  ;;  %v1985_v12 = vsub.f32 %v1697_v0, %v1265_v26  ;;  %v1785_v62 = vunpack.c.h.bf16 %v3677_v52  ;;  %v6876_v0 = vld [vmem:[#allocation7_spill] sm:$0xff] }
 0x2fb   : > { %v2791_v30 = vadd.f32 %v2503_v32, %v1489_v39  ;;  %v2275_v21 = vmul.f32 %v4837_v19, %v1981_v3  ;;  %v1413_v10 = vunpack.c.h.bf16 %v6868_v59  ;;  %v2069_v54 = vsub.f32 %v1781_v60, %v1349_v24 }
 0x2fc   : > { %3235 = vmatpush.bf16.msra.mxu1 %v2927_v41  ;;  %v2279_v27 = vmul.f32 %v4837_v19, %v1985_v12  ;;  %v1417_v17 = vunpack.c.h.bf16 %v6869_v4  ;;  %v1845_v7 = vunpack.c.h.bf16 %v6870_v28  ;;  %v2073_v8 = vsub.f32 %v1785_v62, %v1353_v48  ;;  %v3678_v62 = vld [vmem:[%s4427_s16 + $0x168] sm:$0xff] }
 0x2fd   : > { %v2959_v37 = vpack.c.bf16 %v2791_v30, %v2787_v55  ;;  %v2563_v13 = vadd.f32 %v2275_v21, %v1261_v56  ;;  %v1849_v63 = vunpack.c.h.bf16 %v6871_v18  ;;  %v2363_v50 = vmul.f32 %v4837_v19, %v2069_v54  ;;  %v6878_v55 = vld [vmem:[#allocation44_spill] sm:$0xff]  ;;  %v6879_v30 = vld [vmem:[#allocation23_spill] sm:$0xff] }
 0x2fe   : > { %v2567_v39 = vadd.f32 %v2279_v27, %v1265_v26  ;;  %v2133_v11 = vsub.f32 %v1845_v7, %v1413_v10  ;;  %v1477_v58 = vunpack.c.h.bf16 %v6872_v33  ;;  %v2367_v14 = vmul.f32 %v4837_v19, %v2073_v8  ;;  %v3679_v27 = vld [vmem:[%s4427_s16 + $0x178] sm:$0xff]  ;;  %v3680_v7 = vld [vmem:[%s4435_s17 + $0x168] sm:$0xff]  ;;  %v6881_v33 = vld [vmem:[#allocation18_spill] sm:$0xff] }
 0x2ff   : > { %3248 = vmatpush.bf16.msra.mxu2 %v2959_v37  ;;  %v2137_v44 = vsub.f32 %v1849_v63, %v1417_v17  ;;  %v1481_v38 = vunpack.c.h.bf16 %v6873_v47  ;;  %v1909_v36 = vunpack.c.h.bf16 %v6874_v29  ;;  %v2651_v51 = vadd.f32 %v2363_v50, %v1349_v24  ;;  %v3681_v8 = vld [vmem:[%s4435_s17 + $0x178] sm:$0xff]  ;;  %v6880_v63 = vld [vmem:[#allocation24_spill] sm:$0xff] }
 0x300   : > { %v2847_v45 = vpack.c.bf16 %v2567_v39, %v2563_v13  ;;  %v2427_v56 = vmul.f32 %v4837_v19, %v2133_v11  ;;  %v1913_v2 = vunpack.c.h.bf16 %v6875_v20  ;;  %v2655_v26 = vadd.f32 %v2367_v14, %v1353_v48 }
 0x301   : > { %v2431_v49 = vmul.f32 %v4837_v19, %v2137_v44  ;;  %v2197_v22 = vsub.f32 %v1909_v36, %v1477_v58  ;;  %v1253_v32 = vunpack.c.h.bf16 %v6876_v0  ;;  %v1257_v41 = vunpack.c.h.bf16 %v6877_v16  ;;  %v6882_v44 = vld [vmem:[#allocation19_spill] sm:$0xff]  ;;  %v6885_v0 = vld [vmem:[#allocation33_spill] sm:$0xff] }
 0x302   : > { %3213 = vmatpush.bf16.msrb.mxu3 %v2847_v45  ;;  %v2715_v3 = vadd.f32 %v2427_v56, %v1413_v10  ;;  %v2201_v53 = vsub.f32 %v1913_v2, %v1481_v38  ;;  %v1685_v24 = vunpack.c.h.bf16 %v6878_v55  ;;  %v2891_v12 = vpack.c.bf16 %v2655_v26, %v2651_v51  ;;  %v6883_v45 = vld [vmem:[#allocation8_spill] sm:$0xff]  ;;  %v6884_v2 = vld [vmem:[#allocation25_spill] sm:$0xff] }
 0x303   : > { %v2719_v25 = vadd.f32 %v2431_v49, %v1417_v17  ;;  %v2491_v60 = vmul.f32 %v4837_v19, %v2197_v22  ;;  %v1689_v48 = vunpack.c.h.bf16 %v6879_v30  ;;  %v1341_v59 = vunpack.c.h.bf16 %v3678_v62 }
 0x304   : > { %v2495_v21 = vmul.f32 %v4837_v19, %v2201_v53  ;;  %v1973_v52 = vsub.f32 %v1685_v24, %v1253_v32  ;;  %v1345_v10 = vunpack.c.h.bf16 %v3679_v27  ;;  %3223 = vmatpush.bf16.msra.mxu0 %v2891_v12  ;;  %v1773_v37 = vunpack.c.h.bf16 %v3680_v7  ;;  %v6886_v53 = vld [vmem:[#allocation20_spill] sm:$0xff]  ;;  %v3683_v7 = vld [vmem:[%s4427_s16 + $0x158] sm:$0xff] }
 0x305   : > { %v2923_v54 = vpack.c.bf16 %v2719_v25, %v2715_v3  ;;  %v2779_v4 = vadd.f32 %v2491_v60, %v1477_v58  ;;  %v1977_v28 = vsub.f32 %v1689_v48, %v1257_v41  ;;  %v1777_v18 = vunpack.c.h.bf16 %v3681_v8 }
 0x306   : > { %v2783_v13 = vadd.f32 %v2495_v21, %v1481_v38  ;;  %v2267_v17 = vmul.f32 %v4837_v19, %v1973_v52  ;;  %v1405_v39 = vunpack.c.h.bf16 %v6880_v63  ;;  %v2061_v11 = vsub.f32 %v1773_v37, %v1341_v59 }
 0x307   : > { %3236 = vmatpush.bf16.msra.mxu1 %v2923_v54  ;;  %v2271_v50 = vmul.f32 %v4837_v19, %v1977_v28  ;;  %v1409_v14 = vunpack.c.h.bf16 %v6881_v33  ;;  %v1837_v47 = vunpack.c.h.bf16 %v6882_v44  ;;  %v2065_v36 = vsub.f32 %v1777_v18, %v1345_v10  ;;  %v3682_v28 = vld [vmem:[%s4427_s16 + $0x148] sm:$0xff]  ;;  %v6888_v44 = vld [vmem:[#allocation36_spill] sm:$0xff] }
 0x308   : > { %v2955_v29 = vpack.c.bf16 %v2783_v13, %v2779_v4  ;;  %v2555_v58 = vadd.f32 %v2267_v17, %v1253_v32  ;;  %v1841_v51 = vunpack.c.h.bf16 %v6883_v45  ;;  %v2355_v56 = vmul.f32 %v4837_v19, %v2061_v11 }
 0x309   : > { %v2559_v38 = vadd.f32 %v2271_v50, %v1257_v41  ;;  %v2125_v20 = vsub.f32 %v1837_v47, %v1405_v39  ;;  %v1469_v26 = vunpack.c.h.bf16 %v6884_v2  ;;  %v2359_v49 = vmul.f32 %v4837_v19, %v2065_v36  ;;  %v6887_v50 = vld [vmem:[#allocation21_spill] sm:$0xff] }
 0x30a   : > { %3249 = vmatpush.bf16.msra.mxu2 %v2955_v29  ;;  %v2129_v22 = vsub.f32 %v1841_v51, %v1409_v14  ;;  %v1473_v3 = vunpack.c.h.bf16 %v6885_v0  ;;  %v1901_v16 = vunpack.c.h.bf16 %v6886_v53  ;;  %v2643_v24 = vadd.f32 %v2355_v56, %v1341_v59  ;;  %v6889_v29 = vld [vmem:[#allocation27_spill] sm:$0xff]  ;;  %v6890_v51 = vld [vmem:[#allocation46_spill] sm:$0xff] }
 0x30b   : > { %v2843_v55 = vpack.c.bf16 %v2559_v38, %v2555_v58  ;;  %v2419_v32 = vmul.f32 %v4837_v19, %v2125_v20  ;;  %v1905_v12 = vunpack.c.h.bf16 %v5942_v23  ;;  %v2647_v41 = vadd.f32 %v2359_v49, %v1345_v10 }
 0x30c   : > { %v2423_v25 = vmul.f32 %v4837_v19, %v2129_v22  ;;  %v2189_v60 = vsub.f32 %v1901_v16, %v1469_v26  ;;  %v1533_v30 = vunpack.c.h.bf16 %v5948_v9  ;;  %v1537_v52 = vunpack.c.h.bf16 %v5954_v15  ;;  %v6893_v16 = vld [vmem:[#allocation30_spill] sm:$0xff] }
 0x30d   : > { %3214 = vmatpush.bf16.msrb.mxu3 %v2843_v55  ;;  %v2707_v48 = vadd.f32 %v2419_v32, %v1405_v39  ;;  %v2193_v21 = vsub.f32 %v1905_v12, %v1473_v3  ;;  %v1965_v62 = vunpack.c.h.bf16 %v5957_v42  ;;  %v2887_v59 = vpack.c.bf16 %v2647_v41, %v2643_v24  ;;  %v3684_v42 = vld [vmem:[%s4435_s17 + $0x148] sm:$0xff] }
 0x30e   : > { %v2711_v27 = vadd.f32 %v2423_v25, %v1409_v14  ;;  %v2483_v23 = vmul.f32 %v4837_v19, %v2189_v60  ;;  %v1969_v10 = vunpack.c.h.bf16 %v5961_v46  ;;  %v1333_v9 = vunpack.c.h.bf16 %v3682_v28  ;;  %v3685_v46 = vld [vmem:[%s4435_s17 + $0x158] sm:$0xff] }
 0x30f   : > { %v2487_v54 = vmul.f32 %v4837_v19, %v2193_v21  ;;  %v2253_v4 = vsub.f32 %v1965_v62, %v1533_v30  ;;  %v1337_v37 = vunpack.c.h.bf16 %v3683_v7  ;;  %3224 = vmatpush.bf16.msra.mxu0 %v2887_v59  ;;  %v1765_v8 = vunpack.c.h.bf16 %v3684_v42  ;;  %v6894_v62 = vld [vmem:[#allocation47_spill] sm:$0xff] }
 0x310   : > { %v2919_v13 = vpack.c.bf16 %v2711_v27, %v2707_v48  ;;  %v2771_v15 = vadd.f32 %v2483_v23, %v1469_v26  ;;  %v2257_v17 = vsub.f32 %v1969_v10, %v1537_v52  ;;  %3215 = vmatmul.bf16.vlgmr.msrb.gmra.mxu3 %v5314_v40  ;;  %v1769_v39 = vunpack.c.h.bf16 %v3685_v46  ;;  %v6891_v26 = vld [vmem:[#allocation32_spill] sm:$0xff]  ;;  %v3686_v7 = vld [vmem:[%s4427_s16 + $0x128] sm:$0xff]  ;;  %v3689_v46 = vld [vmem:[%s4435_s17 + $0x138] sm:$0xff] }
 0x311   : > { %v2775_v18 = vadd.f32 %v2487_v54, %v1473_v3  ;;  %v2547_v63 = vmul.f32 %v4837_v19, %v2253_v4  ;;  %v1397_v11 = vunpack.c.h.bf16 %v6887_v50  ;;  %v2053_v14 = vsub.f32 %v1765_v8, %v1333_v9  ;;  %v6892_v3 = vld [vmem:[#allocation29_spill] sm:$0xff]  ;;  %v6895_v54 = vld [vmem:[#allocation48_spill] sm:$0xff]  ;;  %v3688_v8 = vld [vmem:[%s4435_s17 + $0x128] sm:$0xff] }
 0x312   : > { %3237 = vmatpush.bf16.msra.mxu1 %v2919_v13  ;;  %v2551_v33 = vmul.f32 %v4837_v19, %v2257_v17  ;;  %v1401_v47 = vunpack.c.h.bf16 %v6888_v44  ;;  %v1829_v58 = vunpack.c.h.bf16 %v6889_v29  ;;  %v2057_v40 = vsub.f32 %v1769_v39, %v1337_v37  ;;  %v6896_v50 = vld [vmem:[#allocation28_spill] sm:$0xff]  ;;  %v6897_v29 = vld [vmem:[#allocation9_spill] sm:$0xff] }
 0x313   : > { %v2951_v36 = vpack.c.bf16 %v2775_v18, %v2771_v15  ;;  %v2835_v45 = vadd.f32 %v2547_v63, %v1533_v30  ;;  %v1833_v38 = vunpack.c.h.bf16 %v6890_v51  ;;  %v2347_v20 = vmul.f32 %v4837_v19, %v2053_v14  ;;  %v6316_v14 = vpop.f32.mrf.mxu1  ;;  %v6323_v51 = vpop.f32.mrf.mxu3 }
 0x314   : > { %v2839_v56 = vadd.f32 %v2551_v33, %v1537_v52  ;;  %v2117_v2 = vsub.f32 %v1829_v58, %v1397_v11  ;;  %v1461_v49 = vunpack.c.h.bf16 %v6891_v26  ;;  %v2351_v22 = vmul.f32 %v4837_v19, %v2057_v40  ;;  %v6314_v33 = vpop.f32.mrf.mxu0  ;;  %v6321_v40 = vpop.f32.mrf.mxu2 }
 0x315   : > { %3250 = vmatpush.bf16.msra.mxu2 %v2951_v36  ;;  %v2121_v0 = vsub.f32 %v1833_v38, %v1401_v47  ;;  %v1465_v53 = vunpack.c.h.bf16 %v6892_v3  ;;  %v1893_v55 = vunpack.c.h.bf16 %v6893_v16  ;;  %v2635_v32 = vadd.f32 %v2347_v20, %v1333_v9  ;;  %v6898_v36 = vld [vmem:[#allocation41_spill] sm:$0xff]  ;;  %v6900_v3 = vld [vmem:[#allocation38_spill] sm:$0xff] }
 0x316   : > { %v2983_v24 = vpack.c.bf16 %v2839_v56, %v2835_v45  ;;  %v2411_v12 = vmul.f32 %v4837_v19, %v2117_v2  ;;  %v1897_v41 = vunpack.c.h.bf16 %v6003_v6  ;;  %v2639_v25 = vadd.f32 %v2351_v22, %v1337_v37  ;;  %v3687_v37 = vld [vmem:[%s4427_s16 + $0x138] sm:$0xff]  ;;  %v6899_v2 = vld [vmem:[#allocation42_spill] sm:$0xff] }
 0x317   : > { %v2415_v60 = vmul.f32 %v4837_v19, %v2121_v0  ;;  %v2181_v30 = vsub.f32 %v1893_v55, %v1461_v49  ;;  %v1525_v48 = vunpack.c.h.bf16 %v6010_v35  ;;  %v1529_v59 = vunpack.c.h.bf16 %v6894_v62 }
 0x318   : > { %3263 = vmatpush.bf16.msra.mxu3 %v2983_v24  ;;  %v2699_v21 = vadd.f32 %v2411_v12, %v1397_v11  ;;  %v2185_v52 = vsub.f32 %v1897_v41, %v1465_v53  ;;  %v1957_v27 = vunpack.c.h.bf16 %v6019_v34  ;;  %v2883_v23 = vpack.c.bf16 %v2639_v25, %v2635_v32  ;;  %v6901_v24 = vld [vmem:[#allocation22_spill] sm:$0xff]  ;;  %v6902_v12 = vld [vmem:[#allocation16_spill] sm:$0xff] }
 0x319   : > { %v2703_v10 = vadd.f32 %v2415_v60, %v1401_v47  ;;  %v2475_v6 = vmul.f32 %v4837_v19, %v2181_v30  ;;  %v1961_v4 = vunpack.c.h.bf16 %v6895_v54  ;;  %v1325_v35 = vunpack.c.h.bf16 %v3686_v7  ;;  %v6904_v54 = vld [vmem:[#allocation17_spill] sm:$0xff] }
 0x31a   : > { %v2479_v28 = vmul.f32 %v4837_v19, %v2185_v52  ;;  %v2245_v9 = vsub.f32 %v1957_v27, %v1525_v48  ;;  %v1329_v13 = vunpack.c.h.bf16 %v3687_v37  ;;  %3225 = vmatpush.bf16.msra.mxu0 %v2883_v23  ;;  %v1757_v34 = vunpack.c.h.bf16 %v3688_v8  ;;  %v3691_v8 = vld [vmem:[%s4427_s16 + $0x118] sm:$0xff] }
 0x31b   : > { %v2915_v15 = vpack.c.bf16 %v2703_v10, %v2699_v21  ;;  %v2763_v17 = vadd.f32 %v2475_v6, %v1461_v49  ;;  %v2249_v42 = vsub.f32 %v1961_v4, %v1529_v59  ;;  %v1761_v39 = vunpack.c.h.bf16 %v3689_v46  ;;  %v6903_v10 = vld [vmem:[#allocation53_spill] sm:$0xff] }
 0x31c   : > { %v2767_v18 = vadd.f32 %v2479_v28, %v1465_v53  ;;  %v2539_v63 = vmul.f32 %v4837_v19, %v2245_v9  ;;  %v1389_v11 = vunpack.c.h.bf16 %v6896_v50  ;;  %v2045_v47 = vsub.f32 %v1757_v34, %v1325_v35  ;;  %v3023_v37 = vpop.f32.mrf.mxu0 }
 0x31d   : > { %3238 = vmatpush.bf16.msra.mxu1 %v2915_v15  ;;  %v2543_v44 = vmul.f32 %v4837_v19, %v2249_v42  ;;  %v1393_v58 = vunpack.c.h.bf16 %v6897_v29  ;;  %v1821_v45 = vunpack.c.h.bf16 %v6898_v36  ;;  %v2049_v20 = vsub.f32 %v1761_v39, %v1329_v13 }
 0x31e   : > { %v2947_v38 = vpack.c.bf16 %v2767_v18, %v2763_v17  ;;  %v2827_v56 = vadd.f32 %v2539_v63, %v1525_v48  ;;  %v1825_v26 = vunpack.c.h.bf16 %v6899_v2  ;;  %v2339_v22 = vmul.f32 %v4837_v19, %v2045_v47  ;;  %v3690_v17 = vld [vmem:[%s4427_s16 + $0x108] sm:$0xff]  ;;  %v3049_v18 = vpop.f32.mrf.mxu2  ;;  %v3062_v63 = vpop.f32.mrf.mxu3  ;;  %v6907_v2 = vld [vmem:[#allocation54_spill] sm:$0xff]  ;;  %s1079_s16 = scalar_lea.vmem %s6420_s6, %s6931_s29 }
 0x31f   : > { %v2831_v49 = vadd.f32 %v2543_v44, %v1529_v59  ;;  %v2109_v0 = vsub.f32 %v1821_v45, %v1389_v11  ;;  %v1453_v53 = vunpack.c.h.bf16 %v6900_v3  ;;  %v2343_v16 = vmul.f32 %v4837_v19, %v2049_v20  ;;  %v6906_v45 = vld [vmem:[#allocation51_spill] sm:$0xff] }
 0x320   : > { %3251 = vmatpush.bf16.msra.mxu2 %v2947_v38  ;;  %v2113_v55 = vsub.f32 %v1825_v26, %v1393_v58  ;;  %v1457_v32 = vunpack.c.h.bf16 %v6901_v24  ;;  %v1885_v41 = vunpack.c.h.bf16 %v6902_v12  ;;  %v2627_v60 = vadd.f32 %v2339_v22, %v1325_v35 }
 0x321   : > { %v2979_v25 = vpack.c.bf16 %v2831_v49, %v2827_v56  ;;  %v2403_v30 = vmul.f32 %v4837_v19, %v2109_v0  ;;  %v1889_v48 = vunpack.c.h.bf16 %v6064_v61  ;;  %v2631_v21 = vadd.f32 %v2343_v16, %v1329_v13  ;;  %v6905_v61 = vld [vmem:[#allocation49_spill] sm:$0xff]  ;;  %v3036_v13 = vpop.f32.mrf.mxu1  ;;  %v6908_v49 = vld [vmem:[#allocation55_spill] sm:$0xff]  ;;  %v6909_v16 = vld [vmem:[#allocation56_spill] sm:$0xff] }
 0x322   : > { %v2407_v52 = vmul.f32 %v4837_v19, %v2113_v55  ;;  %v2173_v62 = vsub.f32 %v1885_v41, %v1453_v53  ;;  %v1517_v59 = vunpack.c.h.bf16 %v6070_v43  ;;  %v1521_v6 = vunpack.c.h.bf16 %v6903_v10  ;;  %v6910_v41 = vld [vmem:[#allocation57_spill] sm:$0xff] }
 0x323   : > { %3264 = vmatpush.bf16.msra.mxu3 %v2979_v25  ;;  %v2691_v27 = vadd.f32 %v2403_v30, %v1389_v11  ;;  %v2177_v23 = vsub.f32 %v1889_v48, %v1457_v32  ;;  %v1949_v4 = vunpack.c.h.bf16 %v6904_v54  ;;  %v2879_v28 = vpack.c.bf16 %v2631_v21, %v2627_v60  ;;  %v3692_v11 = vld [vmem:[%s4435_s17 + $0x108] sm:$0xff]  ;;  %v6911_v48 = vld [vmem:[#allocation58_spill] sm:$0xff] }
 0x324   : > { %v2695_v9 = vadd.f32 %v2407_v52, %v1393_v58  ;;  %v2467_v7 = vmul.f32 %v4837_v19, %v2173_v62  ;;  %v1953_v35 = vunpack.c.h.bf16 %v6905_v61  ;;  %v1317_v42 = vunpack.c.h.bf16 %v3690_v17  ;;  %v3693_v58 = vld [vmem:[%s4435_s17 + $0x118] sm:$0xff]  ;;  %v6912_v52 = vld [vmem:[#allocation59_spill] sm:$0xff]  ;;  %v6915_v17 = vld [vmem:[#allocation62_spill] sm:$0xff] }
 0x325   : > { %v2471_v15 = vmul.f32 %v4837_v19, %v2177_v23  ;;  %v2237_v43 = vsub.f32 %v1949_v4, %v1517_v59  ;;  %v1321_v34 = vunpack.c.h.bf16 %v3691_v8  ;;  %3226 = vmatpush.bf16.msra.mxu0 %v2879_v28  ;;  %v1749_v44 = vunpack.c.h.bf16 %v3692_v11 }
 0x326   : > { %v2911_v46 = vpack.c.bf16 %v2695_v9, %v2691_v27  ;;  %v2755_v39 = vadd.f32 %v2467_v7, %v1453_v53  ;;  %v2241_v50 = vsub.f32 %v1953_v35, %v1521_v6  ;;  %v1753_v36 = vunpack.c.h.bf16 %v3693_v58  ;;  %v6913_v7 = vld [vmem:[#allocation60_spill] sm:$0xff]  ;;  %v3099_v35 = vpop.f32.mrf.mxu2  ;;  %v3112_v37 = vpop.f32.mrf.mxu3 }
 0x327   : > { %v2759_v47 = vadd.f32 %v2471_v15, %v1457_v32  ;;  %v2531_v29 = vmul.f32 %v4837_v19, %v2237_v43  ;;  %v1381_v38 = vunpack.c.h.bf16 %v6906_v45  ;;  %v2037_v20 = vsub.f32 %v1749_v44, %v1317_v42  ;;  %v6914_v15 = vld [vmem:[#allocation61_spill] sm:$0xff] }
 0x328   : > { %3239 = vmatpush.bf16.msra.mxu1 %v2911_v46  ;;  %v2535_v56 = vmul.f32 %v4837_v19, %v2241_v50  ;;  %v1385_v26 = vunpack.c.h.bf16 %v6907_v2  ;;  %v1813_v22 = vunpack.c.h.bf16 %v6908_v49  ;;  %v2041_v53 = vsub.f32 %v1753_v36, %v1321_v34  ;;  %v3293_v46 = vld [vmem:[%s1079_s16] sm:$0xf] }
 0x329   : > { %v2943_v0 = vpack.c.bf16 %v2759_v47, %v2755_v39  ;;  %v2819_v3 = vadd.f32 %v2531_v29, %v1517_v59  ;;  %v1817_v55 = vunpack.c.h.bf16 %v6909_v16  ;;  %v2331_v32 = vmul.f32 %v4837_v19, %v2037_v20  ;;  %v3086_v54 = vpop.f32.mrf.mxu1  ;;  %v3294_v39 = vld [vmem:[%s1084_s9] sm:$0xf] }
 0x32a   : > { %v2823_v24 = vadd.f32 %v2535_v56, %v1521_v6  ;;  %v2101_v12 = vsub.f32 %v1813_v22, %v1381_v38  ;;  %v1445_v25 = vunpack.c.h.bf16 %v6910_v41  ;;  %v2335_v60 = vmul.f32 %v4837_v19, %v2041_v53  ;;  %v3073_v6 = vpop.f32.mrf.mxu0  ;;  %v6916_v56 = vld [vmem:[#allocation11_spill] sm:$0xff]  ;;  %v6917_v20 = vld [vmem:[#allocation10_spill] sm:$0xff]  ;;  %v6919_v2 = vld [vmem:[#allocation45_spill] sm:$0xff] }
 0x32b   : > { %3252 = vmatpush.bf16.msra.mxu2 %v2943_v0  ;;  %v2105_v30 = vsub.f32 %v1817_v55, %v1385_v26  ;;  %v1449_v21 = vunpack.c.h.bf16 %v6911_v48  ;;  %v1877_v62 = vunpack.c.h.bf16 %v6912_v52  ;;  %v2619_v27 = vadd.f32 %v2331_v32, %v1317_v42  ;;  %v3694_v41 = vld [vmem:[%s4568_s20] sm:$0xf] }
 0x32c   : > { %v2975_v59 = vpack.c.bf16 %v2823_v24, %v2819_v3  ;;  %v2395_v23 = vmul.f32 %v4837_v19, %v2101_v12  ;;  %v1881_v10 = vunpack.c.h.bf16 %v6124_v31  ;;  %v2623_v4 = vadd.f32 %v2335_v60, %v1321_v34  ;;  %v6921_v3 = vld [vmem:[#allocation52_spill] sm:$0xff]  ;;  %v6923_v48 = vld [vmem:[#allocation50_spill] sm:$0xff] }
 0x32d   : > { %v2399_v28 = vmul.f32 %v4837_v19, %v2105_v30  ;;  %v2165_v9 = vsub.f32 %v1877_v62, %v1445_v25  ;;  %v1509_v61 = vunpack.c.h.bf16 %v6913_v7  ;;  %v1513_v43 = vunpack.c.h.bf16 %v6914_v15 }
 0x32e   : > { %3265 = vmatpush.bf16.msra.mxu3 %v2975_v59  ;;  %v2683_v31 = vadd.f32 %v2395_v23, %v1381_v38  ;;  %v2169_v13 = vsub.f32 %v1881_v10, %v1449_v21  ;;  %v1941_v42 = vunpack.c.h.bf16 %v6915_v17  ;;  %v2875_v8 = vpack.c.bf16 %v2623_v4, %v2619_v27  ;;  %v3101_v32 = vpop.f32.mrf.mxu2  ;;  %v3114_v12 = vpop.f32.mrf.mxu3 }
 0x32f   : > { %v2687_v18 = vadd.f32 %v2399_v28, %v1385_v26  ;;  %v2459_v63 = vmul.f32 %v4837_v19, %v2165_v9  ;;  %v1945_v34 = vunpack.c.h.bf16 %v6143_v57  ;;  %v3035_v44 = vadd.f32 %v6316_v14, %v6314_v33 }
 0x330   : > { %v2463_v50 = vmul.f32 %v4837_v19, %v2169_v13  ;;  %v2229_v11 = vsub.f32 %v1941_v42, %v1509_v61  ;;  %3227 = vmatpush.bf16.msra.mxu0 %v2875_v8  ;;  %v6918_v57 = vsub.f32 %v6916_v56, %v6917_v20  ;;  %v6920_v26 = vperm.slane %v6919_v2, 0 }
 0x331   : > { %v2907_v47 = vpack.c.bf16 %v2687_v18, %v2683_v31  ;;  %v2747_v29 = vadd.f32 %v2459_v63, %v1445_v25  ;;  %v2233_v58 = vsub.f32 %v1945_v34, %v1513_v43  ;;  %v3048_v38 = vadd.f32 %v6321_v40, %v3035_v44  ;;  %v3088_v16 = vpop.f32.mrf.mxu1 }
 0x332   : > { %v2751_v36 = vadd.f32 %v2463_v50, %v1449_v21  ;;  %v2523_v45 = vmul.f32 %v4837_v19, %v2229_v11  ;;  %v3291_v49 = vmul.f32 %v6920_v26, %v6918_v57  ;;  %v3295_v22 = vsub.f32 %v3294_v39, %v3293_v46  ;;  %v3075_v53 = vpop.f32.mrf.mxu0 }
 0x333   : > { %3240 = vmatpush.bf16.msra.mxu1 %v2907_v47  ;;  %v2527_v33 = vmul.f32 %v4837_v19, %v2233_v58  ;;  %3228 = vmatmul.bf16.vlgmr.msra.gmra.mxu0 %v6921_v3  ;;  %v3061_v40 = vadd.f32 %v6323_v51, %v3048_v38  ;;  %v3100_v24 = vadd.f32 %v3099_v35, %v3086_v54 }
 0x334   : > { %v2939_v14 = vpack.c.bf16 %v2751_v36, %v2747_v29  ;;  %v2811_v0 = vadd.f32 %v2523_v45, %v1509_v61  ;;  %v3292_v25 = vadd.f32 %v3694_v41, %v3291_v49  ;;  %v6922_v60 = vmov %v6920_v26 }
 0x335   : > { %v2815_v55 = vadd.f32 %v2527_v33, %v1513_v43  ;;  %v3296_v19 = vmul.f32 %v3295_v22, %v6922_v60  ;;  %v3074_v21 = vadd.f32 %v3073_v6, %v3061_v40  ;;  %v3113_v52 = vadd.f32 %v3112_v37, %v3100_v24 }
 0x336   : > { %3253 = vmatpush.bf16.msra.mxu2 %v2939_v14  ;;  %3241 = vmatmul.bf16.vlgmr.msra.gmra.mxu1 %v6785_v5  ;;  %v3303_v51 = vperm.slane %v3292_v25, 0  ;;  %v3304_v7 = vperm.slane %v3292_v25, 1  ;;  %v3305_v44 = vperm.slane %v3292_v25, 2  ;;  %v3306_v3 = vperm.slane %v3292_v25, 3 }
 0x337   : > { %v2971_v30 = vpack.c.bf16 %v2815_v55, %v2811_v0  ;;  %v3297_v62 = vadd.f32 %v3296_v19, %v3293_v46 }
 0x338   : > { %v3311_v5 = vmul.f32 %v3303_v51, %v3074_v21  ;;  %v3151_v10 = vpop.f32.mrf.mxu2 }
 0x339   : > { %3266 = vmatpush.bf16.msra.mxu3 %v2971_v30  ;;  %3254 = vmatmul.bf16.vlgmr.msra.gmra.mxu2 %v6923_v48  ;;  %v3138_v27 = vpop.f32.mrf.mxu1  ;;  %v3316_v28 = vperm.slane %v3297_v62, 0  ;;  %v3317_v6 = vperm.slane %v3297_v62, 1  ;;  %v3318_v29 = vperm.slane %v3297_v62, 2  ;;  %v3319_v16 = vperm.slane %v3297_v62, 3 }
 0x33a   : > { %v3125_v59 = vpop.f32.mrf.mxu0 }
 0x33b   : > { %v3126_v23 = vadd.f32 %v3125_v59, %v3113_v52  ;;  %v3164_v54 = vpop.f32.mrf.mxu3  ;;  %v3324_v61 = vadd.f32 %v3316_v28, %v3311_v5 }
 0x33c   : > { %3526 = vmatmul.msk.bf16.vlgmr.msra.gmra.mxu3 %vm3008_vm0, %v5481_v1  ;;  %v3165_v4 = vadd.f32 %v3164_v54, %v3151_v10 }
 0x33d   : > { %v3139_v9 = vadd.f32 %v3138_v27, %v3126_v23  ;;  %v3328_v15 = vmax.f32 %v3324_v61, 0.0 }
 0x33f   : > { %v3312_v35 = vmul.f32 %v3304_v7, %v3139_v9 }
 0x340   : > { %v3153_v1 = vpop.f32.mrf.mxu2 }
 0x341   : > { %v3325_v37 = vadd.f32 %v3317_v6, %v3312_v35  ;;  %v3140_v13 = vpop.f32.mrf.mxu1 }
 0x342   : > { %v3127_v31 = vpop.f32.mrf.mxu0 }
 0x343   : > { %v3329_v43 = vmax.f32 %v3325_v37, 0.0  ;;  %v3166_v17 = vpop.f32.mrf.mxu3 }
 0x345   : > { %v3332_v42 = vpack.c.bf16 %v3329_v43, %v3328_v15 }
 0x347   : > { %3334 = vst [vmem:[%s6395_s22] sm:$0xff] %v3332_v42 }
 0x358   : > { %v3177_v8 = vpop.f32.mrf.mxu0 }
 0x359   : > { %v3178_v18 = vadd.f32 %v3177_v8, %v3165_v4 }
 0x35b   : > { %v3190_v63 = vpop.f32.mrf.mxu1 }
 0x35c   : > { %v3191_v34 = vadd.f32 %v3190_v63, %v3178_v18 }
 0x360   : > { %v3179_v46 = vpop.f32.mrf.mxu0 }
 0x363   : > { %v3192_v39 = vpop.f32.mrf.mxu1 }
 0x364   : > { %v3203_v50 = vpop.f32.mrf.mxu2 }
 0x365   : > { %v3204_v11 = vadd.f32 %v3203_v50, %v3191_v34 }
 0x367   : > { %v3313_v47 = vmul.f32 %v3305_v44, %v3204_v11 }
 0x369   : > { %v3326_v58 = vadd.f32 %v3318_v29, %v3313_v47 }
 0x36b   : > { %v3330_v24 = vmax.f32 %v3326_v58, 0.0 }
 0x36c   : > { %v3205_v36 = vpop.f32.mrf.mxu2 }
 0x393   : > { %v3216_v45 = vpop.f32.mrf.mxu3 }
 0x39b   : > { %v3218_v38 = vpop.f32.mrf.mxu3 }
 0x3b0   : > { %v3229_v56 = vpop.f32.mrf.mxu0 }
 0x3b1   : > { %v3230_v57 = vadd.f32 %v3229_v56, %v3216_v45 }
 0x3b3   : > { %v3242_v20 = vpop.f32.mrf.mxu1 }
 0x3b4   : > { %v3243_v26 = vadd.f32 %v3242_v20, %v3230_v57 }
 0x3b8   : > { %v3231_v2 = vpop.f32.mrf.mxu0 }
 0x3bb   : > { %v3244_v49 = vpop.f32.mrf.mxu1 }
 0x3bc   : > { %v3255_v22 = vpop.f32.mrf.mxu2 }
 0x3bd   : > { %v3256_v33 = vadd.f32 %v3255_v22, %v3243_v26 }
 0x3bf   : > { %v3268_v14 = vpop.f32.mrf.mxu3 }
 0x3c0   : > { %v3269_v0 = vadd.f32 %v3268_v14, %v3256_v33 }
 0x3c2   : > { %v3314_v53 = vmul.f32 %v3306_v3, %v3269_v0 }
 0x3c4   : > { %v3327_v55 = vadd.f32 %v3319_v16, %v3314_v53  ;;  %v3257_v40 = vpop.f32.mrf.mxu2 }
 0x3c6   : > { %v3331_v32 = vmax.f32 %v3327_v55, 0.0 }
 0x3c7   : > { %v3270_v12 = vpop.f32.mrf.mxu3 }
 0x3c8   : > { %v3333_v41 = vpack.c.bf16 %v3331_v32, %v3330_v24 }
 0x3ca   : > { %3335 = vst [vmem:[%s6395_s22 + $0x8] sm:$0xff] %v3333_v41 }
 0x3cb PF: > { %s20_s11 = sadd.s32 1, %s3733_s11   ;;  %s6924_s29 = smov %s3721_s30 }
 0x3cc   : > { %p17_p10 = scmp.ge.s32.totalorder %s20_s11, 4   ;;  %s6925_s30 = smov %s3823_s15 }
 0x3cd   : > { %s6926_s9 = smov %s3729_s10  ;;  %s6927_s10 = smov %s6929_s0 }
 0x3ce   :  { %19 = sbr.rel (!%p17_p10) target bundleno = 6 (0x6), region = 164 }

</bundles_post_ra>
